<compile_context>
chip_gen: v5e
topology: v5e:2x2
jax: 0.10.0
libtpu: 0.0.40
codegen_flags: <defaults>
</compile_context>

<pallas_src>
import numpy as np
import jax
import jax.numpy as jnp
from jax.experimental import pallas as pl
from jax.experimental.pallas import tpu as pltpu

_SQRT_2_OVER_PI = 0.7978845608028654
_GELU_C = 0.044715


def _gelu_f32(x):
    u = _SQRT_2_OVER_PI * (x + _GELU_C * x * x * x)
    return 0.5 * x * (1.0 + jnp.tanh(u))


# ----------------------------- fused Pallas kernel -----------------------------

def _fused_energy_kernel(nf_ref, w1_ref, b1_ref, w2_ref, w1t_ref, scat_ref,
                         moment_ref, gnf_ref):
    """One node tile: a single h1 / tanh evaluation feeds BOTH the forward per-graph
    moment and the analytic d(energy)/d(node_features) (up to the per-node row scale
    g[batch]/count that is applied in the VJP wrapper)."""
    @pl.when(pl.program_id(1) == 0)
    def _():
        moment_ref[...] = jnp.zeros_like(moment_ref)

    x = nf_ref[...].astype(jnp.bfloat16)                        # in-kernel cast (VPU-cheap)
    h1 = jnp.dot(x, w1_ref[...], preferred_element_type=jnp.float32) + b1_ref[...]
    h = h1.astype(jnp.bfloat16)                                 # bf16 activation math

    h2 = h * h
    t = jnp.tanh(_SQRT_2_OVER_PI * (h + _GELU_C * h2 * h))      # EUP (bf16 on v6e/v7x)
    one_pt = 1.0 + t
    a1 = 0.5 * h * one_pt                                       # GELU(h1), bf16

    # forward: per-graph mean moment (scat rows already carry 1/count), f32 accumulation
    moment_ref[...] += jnp.dot(scat_ref[...], a1,
                               preferred_element_type=jnp.float32)

    # backward: GELU'(h1), then (w2 * dact) @ W1.T; row scale applied outside the kernel
    du = _SQRT_2_OVER_PI * (1.0 + (3.0 * _GELU_C) * h2)
    dact = 0.5 * one_pt + 0.5 * h * (1.0 - t * t) * du          # bf16
    g_h1 = w2_ref[...] * dact                                   # bf16 [TN, H]
    gnf_ref[...] = jnp.dot(g_h1, w1t_ref[...],
                           preferred_element_type=jnp.float32).astype(jnp.bfloat16)


# ----------------------------- pallas_call wrapper -----------------------------

def _fused_energy_pallas(nf_p, w1_bf16, b1, w2_bf16, w1t_bf16, scat_p, *, tn, nc):
    n_pad, H = nf_p.shape
    G = scat_p.shape[0]
    tpc = (n_pad // tn) // nc                     # node tiles per partial accumulator
    return pl.pallas_call(
        _fused_energy_kernel,
        out_shape=(jax.ShapeDtypeStruct((nc, G, H), jnp.float32),      # moment partials
                   jax.ShapeDtypeStruct((n_pad, H), jnp.bfloat16)),    # unscaled d e/d nf
        grid_spec=pltpu.PrefetchScalarGridSpec(
            num_scalar_prefetch=0,
            grid=(nc, tpc),
            in_specs=[
                pl.BlockSpec((tn, H), lambda c, t: (c * tpc + t, 0)),  # nf tile (f32, streamed)
                pl.BlockSpec((H, H), lambda c, t: (0, 0)),             # W1   (bf16, invariant)
                pl.BlockSpec((1, H), lambda c, t: (0, 0)),             # b1   (f32)
                pl.BlockSpec((1, H), lambda c, t: (0, 0)),             # W2   (bf16)
                pl.BlockSpec((H, H), lambda c, t: (0, 0)),             # W1.T (bf16, precomputed)
                pl.BlockSpec((G, tn), lambda c, t: (0, c * tpc + t)),  # scat tile (bf16)
            ],
            out_specs=[
                pl.BlockSpec((None, G, H), lambda c, t: (c, 0, 0)),    # resident [G,H] acc
                pl.BlockSpec((tn, H), lambda c, t: (c * tpc + t, 0)),  # gnf tile (bf16)
            ],
        ),
        # Outer axis: one partial accumulator per TensorCore (v7x megacore); inner axis is
        # the node-tile reduction.  VMEM footprint ~1-2 MiB -> scoped defaults are plenty.
        compiler_params=pltpu.CompilerParams(
            dimension_semantics=("parallel", "arbitrary")),
    )(nf_p, w1_bf16, b1, w2_bf16, w1t_bf16, scat_p)


# ----------------------------- generation / tiling heuristics -----------------------------

def _default_num_partials():
    # 2 partial accumulators only on v7x (two TensorCores/chip); 1 on v5e/v6e where a second
    # accumulator is just a serial pass plus extra padding granularity.
    try:
        kind = jax.devices()[0].device_kind.lower()
    except Exception:
        return 1
    return 2 if ("v7" in kind or "7x" in kind) else 1


def _pick_tile(n, nc):
    # Bigger tiles amortize per-grid-step overhead; keep NC*TN padding waste small at small N.
    tn = 1024 if n >= 4096 else (512 if n >= 512 else 256)
    n_pad = nc * tn * pl.cdiv(n, nc * tn)
    return tn, n_pad


# ----------------------------- head (custom_vjp so jax.grad == torch.autograd.grad) ----------

def make_energy_force_head(params, node_batch, num_graphs):
    H = params["w1"].shape[0]
    w1 = params["w1"].astype(jnp.float32)
    b1 = params["b1"].astype(jnp.float32).reshape(1, H)
    w2 = params["w2"].astype(jnp.float32).reshape(1, H)
    b2 = params["b2"].astype(jnp.float32).reshape(())
    w1_bf16 = w1.astype(jnp.bfloat16)
    w1t_bf16 = w1.T.astype(jnp.bfloat16)
    w2_bf16 = w2.astype(jnp.bfloat16)

    node_batch = node_batch.astype(jnp.int32)
    n = node_batch.shape[0]
    onehot = (node_batch[:, None] == jnp.arange(num_graphs)[None, :]).astype(jnp.float32)
    counts = jnp.maximum(onehot.sum(axis=0), 1.0)                # [G]
    scat = (onehot / counts[None, :]).T                          # [G, N] segment-'mean' matrix
    row_sum = scat.sum(axis=1, keepdims=True)                    # == 1 for non-empty graphs

    nc = _default_num_partials()
    tn, n_pad = _pick_tile(n, nc)
    scat_p = jnp.pad(scat, ((0, 0), (0, n_pad - n))).astype(jnp.bfloat16)

    def _run_fused(nf):
        # Single pad of f32 nf (zero rows have zero scat columns -> contribute nothing);
        # the bf16 cast happens inside the kernel, so no extra bf16 copy is materialized.
        nf_p = jnp.pad(nf.astype(jnp.float32), ((0, n_pad - n), (0, 0)))
        moment, gnf_raw = _fused_energy_pallas(nf_p, w1_bf16, b1, w2_bf16, w1t_bf16,
                                               scat_p, tn=tn, nc=nc)
        moment = moment.sum(axis=0)                              # reduce NC partials (tiny)
        # finalize: energy_g = moment_g . w2 + b2 * row_sum_g
        energy = jnp.sum(moment * w2, axis=-1, keepdims=True) + b2 * row_sum
        return energy, gnf_raw[:n]

    @jax.custom_vjp
    def energy_head(nf):
        return _run_fused(nf)[0]

    def fwd(nf):
        energy, gnf_raw = _run_fused(nf)                         # bf16 residual (half memory)
        return energy, gnf_raw

    def bwd(gnf_raw, g):
        # d(sum_g g_g * energy_g)/d(nf_i) = (g[batch_i]/count[batch_i]) * gnf_raw_i
        scale = (g[:, 0] / counts)[node_batch]                   # [N] f32 (exact 1/count)
        return (scale[:, None] * gnf_raw.astype(jnp.float32),)

    energy_head.defvjp(fwd, bwd)
    return energy_head


def grad_energy_force_head_forward(pos, node_batch, num_graphs, params):
    """JAX/Pallas equivalent of EScAIPGradientEnergyForceHead.forward."""
    energy_head = make_energy_force_head(params, node_batch, num_graphs)

    def total_energy(p):
        # TODO(synk): the real pos -> node_features map is the EScAIP backbone (graph
        # attention, not part of this head); a linear embedding stands in so that
        # forces = -dE/dpos are well defined and nonzero.
        nf = p @ params["w_emb"] + params["b_emb"][None, :]
        e_per_graph = energy_head(nf)                            # [G, 1]
        return e_per_graph.sum(), e_per_graph

    (_, energy), grad_pos = jax.value_and_grad(total_energy, has_aux=True)(pos)
    forces = -grad_pos        # == -torch.autograd.grad(energy_output.sum(), data.pos)[0]
    # TODO(synk): unpad_results is the identity here (no padded nodes/graphs in this setup).
    return {"energy": energy, "forces": forces}


# ----------------------------- pure-JAX reference (f32 activations) -----------------------------

def _reference(pos, node_batch, num_graphs, params):
    onehot = (node_batch[:, None] == jnp.arange(num_graphs)[None, :]).astype(jnp.float32)
    counts = jnp.maximum(onehot.sum(axis=0), 1.0)
    scat = (onehot / counts[None, :]).T
    w1_bf16 = params["w1"].astype(jnp.bfloat16)

    def total_energy(p):
        nf = p @ params["w_emb"] + params["b_emb"][None, :]
        h1 = jnp.dot(nf.astype(jnp.bfloat16), w1_bf16,
                     preferred_element_type=jnp.float32) + params["b1"]
        a1 = _gelu_f32(h1)
        e = jnp.sum(a1 * params["w2"], axis=-1, keepdims=True) + params["b2"][0, 0]
        eg = scat @ e
        return eg.sum(), eg

    (_, energy), grad_pos = jax.value_and_grad(total_energy, has_aux=True)(pos)
    return energy, -grad_pos


# ----------------------------- demo -----------------------------

if __name__ == "__main__":
    N, H, G = 1000, 128, 8     # nodes (non-multiple of the tile to exercise padding), hidden, graphs
    key = jax.random.PRNGKey(0)
    k_pos, k_emb, k_w1, k_w2 = jax.random.split(key, 4)

    pos = jax.random.normal(k_pos, (N, 3), jnp.float32)
    node_batch = jnp.repeat(jnp.arange(G, dtype=jnp.int32), N // G)

    gain = 0.01  # EScAIPEnergyHead.post_init(gain=0.01) — xavier-style scaling of head weights
    params = {
        # synthetic backbone stand-in (pos -> node_features)
        "w_emb": 0.5 * jax.random.normal(k_emb, (3, H), jnp.float32),
        "b_emb": jnp.zeros((H,), jnp.float32),
        # TODO(synk): exact OutputLayer depth/multiplier depends on gnn_cfg; 2-layer scalar
        # MLP (Linear(H,H) -> GELU -> Linear(H,1)) stand-in used here.
        "w1": gain * jnp.sqrt(2.0 / (H + H)) * jax.random.normal(k_w1, (H, H), jnp.float32),
        "b1": jnp.zeros((1, H), jnp.float32),
        "w2": gain * jnp.sqrt(2.0 / (H + 1)) * jax.random.normal(k_w2, (1, H), jnp.float32),
        "b2": jnp.zeros((1, 1), jnp.float32),
    }

    out = grad_energy_force_head_forward(pos, node_batch, G, params)
    jax.block_until_ready(out)

    energy_ref, forces_ref = _reference(pos, node_batch, G, params)
    e_ref = np.asarray(energy_ref)
    f_ref = np.asarray(forces_ref)
    # Kernel does activation math in bf16 vs the f32-activation reference; scale absolute
    # tolerances to the reference RMS so near-zero elements don't dominate the check.
    e_atol = 5e-2 * float(np.sqrt(np.mean(e_ref ** 2)) + 1e-30)
    f_atol = 5e-2 * float(np.sqrt(np.mean(f_ref ** 2)) + 1e-30)
    np.testing.assert_allclose(np.asarray(out["energy"]), e_ref, rtol=2e-2, atol=e_atol)
    np.testing.assert_allclose(np.asarray(out["forces"]), f_ref, rtol=2e-2, atol=f_atol)
    print("KERNEL_OK")
</pallas_src>

<mosaic_0001>
module attributes {stable_mosaic.version = 11 : i64} {
  func.func @_fused_energy_kernel(%arg0: i32, %arg1: i32, %arg2: memref<512x128xf32, #tpu.memory_space<vmem>>, %arg3: memref<128x128xbf16, #tpu.memory_space<vmem>>, %arg4: memref<1x128xf32, #tpu.memory_space<vmem>>, %arg5: memref<1x128xbf16, #tpu.memory_space<vmem>>, %arg6: memref<128x128xbf16, #tpu.memory_space<vmem>>, %arg7: memref<8x512xbf16, #tpu.memory_space<vmem>>, %arg8: memref<1x8x128xf32, #tpu.memory_space<vmem>>, %arg9: memref<512x128xbf16, #tpu.memory_space<vmem>>) attributes {dimension_semantics = [#tpu.dimension_semantics<parallel>, #tpu.dimension_semantics<arbitrary>], iteration_bounds = array<i64: 1, 2>, scalar_prefetch = 0 : i64, scratch_operands = 0 : i64, tpu.core_type = #tpu.core_type<tc>, window_params = [{transform_indices = @transform_0, window_bounds = array<i64: 512, 128>}, {pipeline_mode = #tpu.pipeline_mode<synchronous>, transform_indices = @transform_1, window_bounds = array<i64: 128, 128>}, {pipeline_mode = #tpu.pipeline_mode<synchronous>, transform_indices = @transform_2, window_bounds = array<i64: 1, 128>}, {pipeline_mode = #tpu.pipeline_mode<synchronous>, transform_indices = @transform_3, window_bounds = array<i64: 1, 128>}, {pipeline_mode = #tpu.pipeline_mode<synchronous>, transform_indices = @transform_4, window_bounds = array<i64: 128, 128>}, {transform_indices = @transform_5, window_bounds = array<i64: 8, 512>}, {transform_indices = @transform_6, window_bounds = array<i64: 1, 8, 128>}, {transform_indices = @transform_7, window_bounds = array<i64: 512, 128>}]} {
    %c0_i32 = arith.constant 0 : i32
    %0 = arith.cmpi eq, %arg1, %c0_i32 : i32
    %1 = arith.extui %0 : i1 to i32
    %c0_i32_0 = arith.constant 0 : i32
    %2 = arith.cmpi ne, %1, %c0_i32_0 : i32
    scf.if %2 {
      %cst_32 = arith.constant 0.000000e+00 : f32
      %55 = vector.broadcast %cst_32 : f32 to vector<8x128xf32>
      %c0_33 = arith.constant 0 : index
      %c0_34 = arith.constant 0 : index
      %c0_35 = arith.constant 0 : index
      %56 = vector.load %arg8[%c0_33, %c0_34, %c0_35] : memref<1x8x128xf32, #tpu.memory_space<vmem>>, vector<1x8x128xf32>
      %57 = vector.shape_cast %56 : vector<1x8x128xf32> to vector<8x128xf32>
      %58 = vector.shape_cast %55 : vector<8x128xf32> to vector<1x8x128xf32>
      tpu.vector_store %arg8[%c0_33, %c0_34, %c0_35], %58 {strides = array<i32>} : memref<1x8x128xf32, #tpu.memory_space<vmem>>, vector<1x8x128xf32>,
    } else {
    }
    %c0 = arith.constant 0 : index
    %c0_1 = arith.constant 0 : index
    %3 = vector.load %arg2[%c0, %c0_1] : memref<512x128xf32, #tpu.memory_space<vmem>>, vector<512x128xf32>
    %4 = arith.truncf %3 : vector<512x128xf32> to vector<512x128xbf16>
    %c0_2 = arith.constant 0 : index
    %c0_3 = arith.constant 0 : index
    %5 = vector.load %arg3[%c0_2, %c0_3] : memref<128x128xbf16, #tpu.memory_space<vmem>>, vector<128x128xbf16>
    %cst = arith.constant dense<0.000000e+00> : vector<512x128xf32>
    %6 = tpu.matmul %4, %5, %cst {dimension_numbers = #tpu.dot_dimension_numbers<[1], [0], [0], [1], [0, 0, 1, 1], [], []>} : vector<512x128xbf16>, vector<128x128xbf16>, vector<512x128xf32> -> vector<512x128xf32>
    %c0_4 = arith.constant 0 : index
    %c0_5 = arith.constant 0 : index
    %7 = vector.load %arg4[%c0_4, %c0_5] : memref<1x128xf32, #tpu.memory_space<vmem>>, vector<1x128xf32>
    %8 = vector.broadcast %7 : vector<1x128xf32> to vector<512x128xf32>
    %9 = arith.addf %6, %8 : vector<512x128xf32>
    %10 = arith.truncf %9 : vector<512x128xf32> to vector<512x128xbf16>
    %11 = arith.mulf %10, %10 : vector<512x128xbf16>
    %cst_6 = arith.constant 4.467770e-02 : bf16
    %12 = vector.broadcast %cst_6 : bf16 to vector<512x128xbf16>
    %13 = arith.mulf %12, %11 : vector<512x128xbf16>
    %14 = arith.mulf %13, %10 : vector<512x128xbf16>
    %15 = arith.addf %10, %14 : vector<512x128xbf16>
    %cst_7 = arith.constant 7.968750e-01 : bf16
    %16 = vector.broadcast %cst_7 : bf16 to vector<512x128xbf16>
    %17 = arith.mulf %16, %15 : vector<512x128xbf16>
    %18 = math.tanh %17 : vector<512x128xbf16>
    %cst_8 = arith.constant 1.000000e+00 : bf16
    %19 = vector.broadcast %cst_8 : bf16 to vector<512x128xbf16>
    %20 = arith.addf %19, %18 : vector<512x128xbf16>
    %cst_9 = arith.constant 5.000000e-01 : bf16
    %21 = vector.broadcast %cst_9 : bf16 to vector<512x128xbf16>
    %22 = arith.mulf %21, %10 : vector<512x128xbf16>
    %23 = arith.mulf %22, %20 : vector<512x128xbf16>
    %c0_10 = arith.constant 0 : index
    %c0_11 = arith.constant 0 : index
    %c0_12 = arith.constant 0 : index
    %24 = vector.load %arg8[%c0_10, %c0_11, %c0_12] : memref<1x8x128xf32, #tpu.memory_space<vmem>>, vector<1x8x128xf32>
    %25 = vector.shape_cast %24 : vector<1x8x128xf32> to vector<8x128xf32>
    %c0_13 = arith.constant 0 : index
    %c0_14 = arith.constant 0 : index
    %26 = vector.load %arg7[%c0_13, %c0_14] : memref<8x512xbf16, #tpu.memory_space<vmem>>, vector<8x512xbf16>
    %cst_15 = arith.constant dense<0.000000e+00> : vector<8x128xf32>
    %27 = tpu.matmul %26, %23, %cst_15 {dimension_numbers = #tpu.dot_dimension_numbers<[1], [0], [0], [1], [0, 0, 1, 1], [], []>} : vector<8x512xbf16>, vector<512x128xbf16>, vector<8x128xf32> -> vector<8x128xf32>
    %28 = arith.addf %25, %27 : vector<8x128xf32>
    %c0_16 = arith.constant 0 : index
    %c0_17 = arith.constant 0 : index
    %c0_18 = arith.constant 0 : index
    %29 = vector.load %arg8[%c0_16, %c0_17, %c0_18] : memref<1x8x128xf32, #tpu.memory_space<vmem>>, vector<1x8x128xf32>
    %30 = vector.shape_cast %29 : vector<1x8x128xf32> to vector<8x128xf32>
    %31 = vector.shape_cast %28 : vector<8x128xf32> to vector<1x8x128xf32>
    tpu.vector_store %arg8[%c0_16, %c0_17, %c0_18], %31 {strides = array<i32>} : memref<1x8x128xf32, #tpu.memory_space<vmem>>, vector<1x8x128xf32>,
    %cst_19 = arith.constant 1.337890e-01 : bf16
    %32 = vector.broadcast %cst_19 : bf16 to vector<512x128xbf16>
    %33 = arith.mulf %32, %11 : vector<512x128xbf16>
    %cst_20 = arith.constant 1.000000e+00 : bf16
    %34 = vector.broadcast %cst_20 : bf16 to vector<512x128xbf16>
    %35 = arith.addf %34, %33 : vector<512x128xbf16>
    %cst_21 = arith.constant 7.968750e-01 : bf16
    %36 = vector.broadcast %cst_21 : bf16 to vector<512x128xbf16>
    %37 = arith.mulf %36, %35 : vector<512x128xbf16>
    %cst_22 = arith.constant 5.000000e-01 : bf16
    %38 = vector.broadcast %cst_22 : bf16 to vector<512x128xbf16>
    %39 = arith.mulf %38, %20 : vector<512x128xbf16>
    %cst_23 = arith.constant 5.000000e-01 : bf16
    %40 = vector.broadcast %cst_23 : bf16 to vector<512x128xbf16>
    %41 = arith.mulf %40, %10 : vector<512x128xbf16>
    %42 = arith.mulf %18, %18 : vector<512x128xbf16>
    %cst_24 = arith.constant 1.000000e+00 : bf16
    %43 = vector.broadcast %cst_24 : bf16 to vector<512x128xbf16>
    %44 = arith.subf %43, %42 : vector<512x128xbf16>
    %45 = arith.mulf %41, %44 : vector<512x128xbf16>
    %46 = arith.mulf %45, %37 : vector<512x128xbf16>
    %47 = arith.addf %39, %46 : vector<512x128xbf16>
    %c0_25 = arith.constant 0 : index
    %c0_26 = arith.constant 0 : index
    %48 = vector.load %arg5[%c0_25, %c0_26] : memref<1x128xbf16, #tpu.memory_space<vmem>>, vector<1x128xbf16>
    %49 = vector.broadcast %48 : vector<1x128xbf16> to vector<512x128xbf16>
    %50 = arith.mulf %49, %47 : vector<512x128xbf16>
    %c0_27 = arith.constant 0 : index
    %c0_28 = arith.constant 0 : index
    %51 = vector.load %arg6[%c0_27, %c0_28] : memref<128x128xbf16, #tpu.memory_space<vmem>>, vector<128x128xbf16>
    %cst_29 = arith.constant dense<0.000000e+00> : vector<512x128xf32>
    %52 = tpu.matmul %50, %51, %cst_29 {dimension_numbers = #tpu.dot_dimension_numbers<[1], [0], [0], [1], [0, 0, 1, 1], [], []>} : vector<512x128xbf16>, vector<128x128xbf16>, vector<512x128xf32> -> vector<512x128xf32>
    %53 = arith.truncf %52 : vector<512x128xf32> to vector<512x128xbf16>
    %c0_30 = arith.constant 0 : index
    %c0_31 = arith.constant 0 : index
    %54 = vector.load %arg9[%c0_30, %c0_31] : memref<512x128xbf16, #tpu.memory_space<vmem>>, vector<512x128xbf16>
    tpu.vector_store %arg9[%c0_30, %c0_31], %53 {strides = array<i32>} : memref<512x128xbf16, #tpu.memory_space<vmem>>, vector<512x128xbf16>,
    return
  }
  func.func @transform_0(%arg0: i32, %arg1: i32) -> (i32, i32) {
    %c2_i32 = arith.constant 2 : i32
    %0 = arith.muli %arg0, %c2_i32 : i32
    %1 = arith.addi %0, %arg1 : i32
    %c0_i32 = arith.constant 0 : i32
    %c0_i32_0 = arith.constant 0 : i32
    return %1, %c0_i32 : i32, i32
  }
  func.func @transform_1(%arg0: i32, %arg1: i32) -> (i32, i32) {
    %c0_i32 = arith.constant 0 : i32
    %c0_i32_0 = arith.constant 0 : i32
    %c0_i32_1 = arith.constant 0 : i32
    return %c0_i32, %c0_i32_0 : i32, i32
  }
  func.func @transform_2(%arg0: i32, %arg1: i32) -> (i32, i32) {
    %c0_i32 = arith.constant 0 : i32
    %c0_i32_0 = arith.constant 0 : i32
    %c0_i32_1 = arith.constant 0 : i32
    return %c0_i32, %c0_i32_0 : i32, i32
  }
  func.func @transform_3(%arg0: i32, %arg1: i32) -> (i32, i32) {
    %c0_i32 = arith.constant 0 : i32
    %c0_i32_0 = arith.constant 0 : i32
    %c0_i32_1 = arith.constant 0 : i32
    return %c0_i32, %c0_i32_0 : i32, i32
  }
  func.func @transform_4(%arg0: i32, %arg1: i32) -> (i32, i32) {
    %c0_i32 = arith.constant 0 : i32
    %c0_i32_0 = arith.constant 0 : i32
    %c0_i32_1 = arith.constant 0 : i32
    return %c0_i32, %c0_i32_0 : i32, i32
  }
  func.func @transform_5(%arg0: i32, %arg1: i32) -> (i32, i32) {
    %c2_i32 = arith.constant 2 : i32
    %0 = arith.muli %arg0, %c2_i32 : i32
    %1 = arith.addi %0, %arg1 : i32
    %c0_i32 = arith.constant 0 : i32
    %c0_i32_0 = arith.constant 0 : i32
    return %c0_i32, %1 : i32, i32
  }
  func.func @transform_6(%arg0: i32, %arg1: i32) -> (i32, i32, i32) {
    %c0_i32 = arith.constant 0 : i32
    %c0_i32_0 = arith.constant 0 : i32
    %c0_i32_1 = arith.constant 0 : i32
    return %arg0, %c0_i32, %c0_i32_0 : i32, i32, i32
  }
  func.func @transform_7(%arg0: i32, %arg1: i32) -> (i32, i32) {
    %c2_i32 = arith.constant 2 : i32
    %0 = arith.muli %arg0, %c2_i32 : i32
    %1 = arith.addi %0, %arg1 : i32
    %c0_i32 = arith.constant 0 : i32
    %c0_i32_0 = arith.constant 0 : i32
    return %1, %c0_i32 : i32, i32
  }
}

</mosaic_0001>

<bundles_post_ra>
// kernel: tpu_custom_call.1
= control target key start
LH: loop header
LB: loop body
LE: loop exit
PB: predicated region body
PF: predicated region fallthrough
CT: control target
= control target key end

     0   :  { %s8844_s0 = inlined_call_operand.hbm [shape: f32[1024,128], index: 0, kind: input, shape index: {}]   ;;  %s8845_s1 = inlined_call_operand.hbm [shape: bf16[128,128], index: 1, kind: input, shape index: {}]   ;;  %s8846_s2 = inlined_call_operand.vmem [shape: f32[1,128], index: 2, kind: input, shape index: {}]   ;;  %s8847_s3 = inlined_call_operand.vmem [shape: bf16[1,128], index: 3, kind: input, shape index: {}]   ;;  %s8848_s4 = inlined_call_operand.hbm [shape: bf16[128,128], index: 4, kind: input, shape index: {}]   ;;  %s8849_s5 = inlined_call_operand.hbm [shape: bf16[8,1024], index: 5, kind: input, shape index: {}]   ;;  %s8850_s6 = inlined_call_operand.hbm [shape: f32[1,8,128], index: 6, kind: output, shape index: {0}]   ;;  %s8851_s7 = inlined_call_operand.hbm [shape: bf16[1024,128], index: 7, kind: output, shape index: {1}]  }
   0x1   :  { %9033 = sst [smem:[#allocation178_spill]] %s8844_s0 }
   0x2   :  { %9034 = sst [smem:[#allocation179_spill]] %s8845_s1 }
   0x3   :  { %9035 = sst [smem:[#allocation180_spill]] %s8848_s4 }
   0x4   :  { %13 = vsyncpa [#allocation3], 0 }
   0x5   :  { %15 = vsyncpa [#allocation3 + $0x1], 0 }
   0x6   :  { %16 = vsyncpa [#allocation6], 0 }
   0x7   :  { %17 = vsyncpa [#allocation9], 0 }
   0x8   :  { %19 = vsyncpa [#allocation9 + $0x1], 0 }
   0x9   :  { %20 = vsyncpa [#allocation4], 0 }
   0xa   :  { %21 = vsyncpa [#allocation12], 0 }
   0xb   :  { %23 = vsyncpa [#allocation12 + $0x1], 0  ;;  %s5795_s24 = smov 0   ;;  %s5797_s25 = smov 0  }
   0xc   :  { %s5799_s26 = smov 0   ;;  %s5801_s27 = smov 0  }
   0xd   :  { %s5803_s28 = smov 0   ;;  %s5805_s29 = smov 0  }
   0xe LB: > { %9036 = sst [smem:[#allocation18_spill]] %s5731_s26  ;;  %s4950_s30 = sadd.s32 4294967295, %s5743_s29   ;;  %s5743_s29 = sphi %s5805_s29, %s29_s29   ;;  %s5739_s28 = sphi %s5803_s28, %s9619_s28   ;;  %s5735_s27 = sphi %s5801_s27, %s9618_s27   ;;  %s5731_s26 = sphi %s5799_s26, %s9614_s26   ;;  %s5727_s25 = sphi %s5797_s25, %s9617_s25   ;;  %s5723_s24 = sphi %s5795_s24, %s9616_s24  }
   0xf   : > { %9037 = sst [smem:[#allocation19_spill]] %s5743_s29  ;;  %s4951_s8 = sadd.s32 4294967294, %s5743_s29  }
  0x10   : > { %p65_p0 = scmp.ne.s32.totalorder %s5727_s25, %s5723_s24  ;;  %p5829_p1 = scmp.eq.s32.totalorder %s4950_s30, 0 }
  0x11   : > { %p5833_p2 = scmp.eq.s32.totalorder %s4950_s30, 1  ;;  %p239_p3 = scmp.eq.s32.totalorder %s4951_s8, 1 }
  0x12   : > { %p5839_p4 = por %p5829_p1, %p65_p0  ;;  %p4952_p5 = scmp.ge.s32.totalorder %s5743_s29, 1 }
  0x13   : > { %p5844_p6 = por %p239_p3, %p65_p0  ;;  %p246_p7 = scmp.lt.s32.totalorder %s5743_s29, 3 }
  0x14   : > { %s9043_s1 = sld [smem:[#allocation179_spill]]  ;;  %s5745_s17 = smov [#allocation5]  }
  0x15   : > { %s9041_s12 = scalar_select %p5844_p6, 1, 0 }
  0x16   : > { %p5852_p8 = pnand %p4952_p5, %p246_p7  ;;  %s259_s18 = sshll.u32 %s5745_s17, 4  ;;  %s260_s18 = int_to_ptr.vmem [resolvable:$true] %s259_s18 }
  0x17   : > { %9042 = sst [smem:[#allocation20_spill]] %s9041_s12  ;;  %p4955_p11 = scmp.ge.s32.totalorder %s5743_s29, 2 }
  0x18   : > { %p5284_p9 = pneg %p5852_p8  ;;  %s9045_s4 = sld [smem:[#allocation180_spill]] }
  0x19   : > { %s5746_s22 = smov 64   ;;  %s5747_s23 = smov 4  }
  0x1a   : > { %s257_s15 = sshll.u32 %s9043_s1, 4  ;;  %p5285_p10 = pnand %p5284_p9, %p5829_p1  ;;  %s258_s15 = int_to_ptr.hbm [resolvable:$true] %s257_s15 }
  0x1b   : > { %s5748_s30 = smov [#allocation7]   ;;  %s38_s13 = sadd.s32 1, %s5739_s28 }
  0x1c   : > { %5287 = dma.hbm_to_vmem [thread:$0]  (!%p5285_p10), %s258_s15, 1024, %s260_s18, [#allocation6], %s5746_s22, %s5746_s22, %s5747_s23  }
  0x1d   : > { %s279_s8 = sshll.u32 %s5748_s30, 4  ;;  %s52_s14 = sadd.s32 1, %s5731_s26  ;;  %s280_s8 = int_to_ptr.vmem [resolvable:$true] %s279_s8 }
  0x1e   : > { %s277_s21 = sshll.u32 %s9045_s4, 4  ;;  %p39_p12 = scmp.ge.s32.totalorder %s38_s13, 2  ;;  %s278_s21 = int_to_ptr.hbm [resolvable:$true] %s277_s21 }
  0x1f   : > { %5290 = dma.hbm_to_vmem [thread:$0]  (!%p5285_p10), %s278_s21, 1024, %s280_s8, [#allocation6], %s5746_s22, %s5746_s22, %s5747_s23  }
  0x20   : > { %p59_p13 = scmp.ne.s32.totalorder %s5731_s26, %s5727_s25  ;;  %p60_p0 = scmp.eq.s32.totalorder %s5743_s29, 0 }
  0x21   : > { %p5304_p3 = scmp.lt.s32.totalorder %s5743_s29, 2  ;;  %s9621_s13 = smov (%p39_p12, %s38_s13), 0 }
  0x22   : > { %9046 = sst [smem:[#allocation21_spill]] %s9621_s13  ;;  %p5872_p5 = por %p60_p0, %p59_p13 }
  0x23   : > { %p5878_p7 = por %p5833_p2, %p59_p13  ;;  %s49_s18 = ssub.s32 %s5739_s28, %s9621_s13 }
  0x24   : > { %s293_s19 = sand.u32 1, %s5731_s26   ;;  %p50_p9 = scmp.eq.s32.totalorder %s49_s18, 0 }
  0x25   : > { %s4956_s20 = sshll.u32 %s293_s19, 9  ;;  %s5040_s21 = sshll.u32 %s5739_s28, 9 }
  0x26   : > { %s5887_s22 = scalar_select %p50_p9, %s5731_s26, %s52_s14  }
  0x27   : > { %s9050_s0 = sld [smem:[#allocation178_spill]]  ;;  %s297_s4 = scalar_lea.vmem [#allocation2], %s4956_s20 }
  0x28   : > { %9049 = sst [smem:[#allocation22_spill]] %s5887_s22  ;;  %s307_s12 = sshll.u32 %s297_s4, 4  ;;  %s308_s12 = int_to_ptr.vmem [resolvable:$true] %s307_s12 }
  0x29   : > { %p5896_p10 = pnand %p5304_p3, %p5872_p5  ;;  %s4959_s18 = sshll.u32 %s293_s19, 4 }
  0x2a   : > { %s294_s14 = scalar_lea.sflag [#allocation3], %s293_s19  ;;  %s5749_s22 = smov 128  }
  0x2b   : > { %s5750_s26 = smov 8   ;;  %s321_s30 = scalar_lea.vmem [#allocation8], %s4959_s18 }
  0x2c   : > { %s332_s17 = sshll.u32 %s321_s30, 4  ;;  %s333_s17 = int_to_ptr.vmem [resolvable:$true] %s332_s17 }
  0x2d   : > { %s304_s8 = scalar_lea.hbm %s9050_s0, %s5040_s21  ;;  %s5041_s21 = sshll.u32 %s5739_s28, 4 }
  0x2e   : > { %s305_s1 = sshll.u32 %s304_s8, 4  ;;  %s328_s4 = scalar_lea.hbm %s8849_s5, %s5041_s21  ;;  %s306_s1 = int_to_ptr.hbm [resolvable:$true] %s305_s1 }
  0x2f   : > { %5294 = dma.hbm_to_vmem [thread:$0]  (!%p5896_p10), %s306_s1, 8192, %s308_s12, %s294_s14, %s5749_s22, %s5749_s22, %s5750_s26  }
  0x30   : > { %s330_s8 = sshll.u32 %s328_s4, 4  ;;  %s318_s0 = scalar_lea.sflag [#allocation9], %s293_s19  ;;  %s331_s8 = int_to_ptr.hbm [resolvable:$true] %s330_s8 }
  0x31   : > { %5297 = dma.hbm_to_vmem [thread:$0]  (!%p5896_p10), %s331_s8, 256, %s333_s17, %s318_s0  }
  0x32   : > { %341 = sbr.rel (%p5852_p8) target bundleno = 1376 (0x560), region = 44 }
  0x37   : > { %s5911_s29 = sand.u32 1, %s5727_s25  }
  0x38   : > { %s4963_s1 = sshll.u32 %s5911_s29, 9  ;;  %s344_s26 = scalar_lea.sflag [#allocation3], %s5911_s29 }
  0x39   : > { %s5915_s12 = scalar_lea.vmem [#allocation2], %s4963_s1 }
  0x3a   : > { %5702 = dma.done.wait (%p5839_p4), %s344_s26, 8192  }
  0x3b   : > { %5704 = vsyncadd (%p5839_p4), %s344_s26, 4294959104 }
  0x3c   : > { %5706 = dma.done.wait (%p5829_p1), [#allocation6], 2048  }
  0x3d   : > { %5708 = vsyncadd (%p5829_p1), [#allocation6], 4294965248  ;;  %s4966_s0 = sshll.u32 %s5911_s29, 4  ;;  %s364_s16 = scalar_lea.sflag [#allocation9], %s5911_s29 }
  0x3e   : > { %s5927_s13 = scalar_lea.vmem [#allocation8], %s4966_s0 }
  0x3f   : > { %5710 = dma.done.wait (%p5839_p4), %s364_s16, 256  }
  0x40   : > { %5712 = vsyncadd (%p5839_p4), %s364_s16, 4294967040  ;;  %s4967_s19 = sshll.u32 %s5911_s29, 8  ;;  %p4968_p8 = scmp.ne.s32.totalorder %s5735_s27, 0 }
  0x41   : > { %s5934_s22 = scalar_lea.vmem [#allocation11], %s4967_s19 }
  0x42   : > { %416 = sbr.rel (%p4968_p8) target bundleno = 73 (0x49), region = 64 }
  0x47   : > { %v5751_v0 = vmov 0.0  }
  0x48   : > { %417 = vst [vmem:[#allocation10] sm:$0xff] %v5751_v0 }
  0x49 PF: > { %v5049_v1 = vld [vmem:[#allocation5 + $0x38] sm:$0xff]  ;;  %v5048_v2 = vld [vmem:[#allocation5 + $0x30] sm:$0xff]  ;;  %v5047_v3 = vld [vmem:[#allocation5 + $0x28] sm:$0xff]  ;;  %s4788_s0 = sshll.u32 %s8850_s6, 4  ;;  %s5752_s16 = smov [#allocation10]   ;;  %s4789_s0 = int_to_ptr.hbm [resolvable:$true] %s4788_s0 }
  0x4a   : > { %582 = vmatpush.bf16.msra.mxu0 %v5049_v1  ;;  %5250 = vmatpush.bf16.msra.mxu1 %v5049_v1  ;;  %v5046_v4 = vld [vmem:[#allocation5 + $0x20] sm:$0xff]  ;;  %v5045_v5 = vld [vmem:[#allocation5 + $0x18] sm:$0xff]  ;;  %v5044_v6 = vld [vmem:[#allocation5 + $0x10] sm:$0xff]  ;;  %s5058_s19 = sshll.u32 %s5735_s27, 8  ;;  %s4802_s14 = sshll.u32 %s5934_s22, 4  ;;  %s4803_s14 = int_to_ptr.vmem [resolvable:$true] %s4802_s14 }
  0x4b   : > { %v5043_v7 = vld [vmem:[#allocation5 + $0x8] sm:$0xff]  ;;  %v5042_v8 = vld [vmem:[#allocation5] sm:$0xff]  ;;  %v420_v15 = vld [vmem:[%s5915_s12 + $0x10] sm:$0xff]  ;;  %s4801_s18 = scalar_lea.hbm %s8851_s7, %s5058_s19  ;;  %s4774_s23 = scalar_lea.sflag [#allocation12], %s5911_s29 }
  0x4c   : > { %v418_v9 = vld [vmem:[%s5915_s12] sm:$0xff]  ;;  %v419_v10 = vld [vmem:[%s5915_s12 + $0x8] sm:$0xff]  ;;  %v421_v16 = vld [vmem:[%s5915_s12 + $0x18] sm:$0xff]  ;;  %s4804_s21 = sshll.u32 %s4801_s18, 4  ;;  %s5669_s17 = scalar_lea.hbm %s8851_s7, 512  ;;  %s4805_s21 = int_to_ptr.hbm [resolvable:$true] %s4804_s21 }
  0x4d   : > { %v454_v11 = vld [vmem:[%s5915_s12 + $0x120] sm:$0xff]  ;;  %v455_v12 = vld [vmem:[%s5915_s12 + $0x128] sm:$0xff]  ;;  %v482_v13 = vpack.c.bf16 %v419_v10, %v418_v9  ;;  %v456_v17 = vld [vmem:[%s5915_s12 + $0x130] sm:$0xff]  ;;  %v483_v19 = vpack.c.bf16 %v421_v16, %v420_v15  ;;  %s5663_s20 = sshra.s32 %s4805_s21, 4  ;;  %s5664_s20 = int_to_ptr.hbm [resolvable:$true] %s5663_s20 }
  0x4e   : > { %583 = vmatpush.bf16.msra.mxu0 %v5048_v2  ;;  %5251 = vmatpush.bf16.msra.mxu1 %v5048_v2  ;;  %v500_v14 = vpack.c.bf16 %v455_v12, %v454_v11  ;;  %v457_v18 = vld [vmem:[%s5915_s12 + $0x138] sm:$0xff]  ;;  %v422_v21 = vld [vmem:[%s5915_s12 + $0x20] sm:$0xff]  ;;  %v423_v22 = vld [vmem:[%s5915_s12 + $0x28] sm:$0xff]  ;;  %s5665_s4 = scalar_lea.hbm %s5664_s20, 256  ;;  %p5670_p13 = scmp.lt.s32.totalorder %s5664_s20, %s8851_s7 }
  0x4f   : > { %v501_v20 = vpack.c.bf16 %v457_v18, %v456_v17  ;;  %v458_v23 = vld [vmem:[%s5915_s12 + $0x140] sm:$0xff]  ;;  %v459_v24 = vld [vmem:[%s5915_s12 + $0x148] sm:$0xff]  ;;  %v484_v25 = vpack.c.bf16 %v423_v22, %v422_v21  ;;  %v424_v27 = vld [vmem:[%s5915_s12 + $0x30] sm:$0xff]  ;;  %p5666_p1 = scmp.ne.s32.totalorder %s5664_s20, %s5665_s4  ;;  %p5671_p0 = scmp.lt.s32.totalorder %s5669_s17, %s5665_s4 }
  0x50   : > { %v502_v26 = vpack.c.bf16 %v459_v24, %v458_v23  ;;  %v425_v28 = vld [vmem:[%s5915_s12 + $0x38] sm:$0xff]  ;;  %v460_v29 = vld [vmem:[%s5915_s12 + $0x150] sm:$0xff]  ;;  %v426_v33 = vld [vmem:[%s5915_s12 + $0x40] sm:$0xff] }
  0x51   : > { %v461_v30 = vld [vmem:[%s5915_s12 + $0x158] sm:$0xff]  ;;  %v485_v31 = vpack.c.bf16 %v425_v28, %v424_v27  ;;  %v427_v34 = vld [vmem:[%s5915_s12 + $0x48] sm:$0xff]  ;;  %v462_v35 = vld [vmem:[%s5915_s12 + $0x160] sm:$0xff]  ;;  %p5667_p4 = pnand %p5666_p1, %p5878_p7  ;;  %p5672_p3 = por %p5671_p0, %p5670_p13 }
  0x52   : > { %584 = vmatpush.bf16.msra.mxu0 %v5047_v3  ;;  %5252 = vmatpush.bf16.msra.mxu1 %v5047_v3  ;;  %v503_v32 = vpack.c.bf16 %v461_v30, %v460_v29  ;;  %v463_v36 = vld [vmem:[%s5915_s12 + $0x168] sm:$0xff]  ;;  %v486_v37 = vpack.c.bf16 %v427_v34, %v426_v33  ;;  %v428_v39 = vld [vmem:[%s5915_s12 + $0x50] sm:$0xff]  ;;  %v429_v40 = vld [vmem:[%s5915_s12 + $0x58] sm:$0xff] }
  0x53   : > { %v504_v38 = vpack.c.bf16 %v463_v36, %v462_v35  ;;  %v464_v41 = vld [vmem:[%s5915_s12 + $0x170] sm:$0xff]  ;;  %v465_v42 = vld [vmem:[%s5915_s12 + $0x178] sm:$0xff]  ;;  %v487_v43 = vpack.c.bf16 %v429_v40, %v428_v39  ;;  %v430_v45 = vld [vmem:[%s5915_s12 + $0x60] sm:$0xff]  ;;  %p5668_p12 = pneg %p5667_p4 }
  0x54   : > { %v505_v44 = vpack.c.bf16 %v465_v42, %v464_v41  ;;  %v431_v46 = vld [vmem:[%s5915_s12 + $0x68] sm:$0xff]  ;;  %v432_v48 = vld [vmem:[%s5915_s12 + $0x70] sm:$0xff]  ;;  %v433_v49 = vld [vmem:[%s5915_s12 + $0x78] sm:$0xff] }
  0x55   : > { %v488_v47 = vpack.c.bf16 %v431_v46, %v430_v45  ;;  %v489_v50 = vpack.c.bf16 %v433_v49, %v432_v48  ;;  %v434_v51 = vld [vmem:[%s5915_s12 + $0x80] sm:$0xff]  ;;  %v435_v52 = vld [vmem:[%s5915_s12 + $0x88] sm:$0xff]  ;;  %v436_v58 = vld [vmem:[%s5915_s12 + $0x90] sm:$0xff]  ;;  %p5673_p5 = pnand %p5672_p3, %p5668_p12 }
  0x56   : > { %585 = vmatpush.bf16.msra.mxu0 %v5046_v4  ;;  %5253 = vmatpush.bf16.msra.mxu1 %v5046_v4  ;;  %v490_v53 = vpack.c.bf16 %v435_v52, %v434_v51  ;;  %v466_v54 = vld [vmem:[%s5915_s12 + $0x180] sm:$0xff]  ;;  %v467_v55 = vld [vmem:[%s5915_s12 + $0x188] sm:$0xff]  ;;  %v437_v59 = vld [vmem:[%s5915_s12 + $0x98] sm:$0xff] }
  0x57   : > { %v506_v56 = vpack.c.bf16 %v467_v55, %v466_v54  ;;  %v491_v60 = vpack.c.bf16 %v437_v59, %v436_v58  ;;  %v468_v61 = vld [vmem:[%s5915_s12 + $0x190] sm:$0xff]  ;;  %v469_v62 = vld [vmem:[%s5915_s12 + $0x198] sm:$0xff]  ;;  %v438_v3 = vld [vmem:[%s5915_s12 + $0xa0] sm:$0xff] }
  0x58   : > { %v507_v0 = vpack.c.bf16 %v469_v62, %v468_v61  ;;  %v439_v4 = vld [vmem:[%s5915_s12 + $0xa8] sm:$0xff]  ;;  %v5982_v9 = vld [vmem:[%s8846_s2] ss:$0 sm:$0xff]  ;;  %v440_v10 = vld [vmem:[%s5915_s12 + $0xb0] sm:$0xff] }
  0x59   : > { %v441_v11 = vld [vmem:[%s5915_s12 + $0xb8] sm:$0xff]  ;;  %v471_v33 = vld [vmem:[%s5915_s12 + $0x1a8] sm:$0xff]  ;;  %v442_v36 = vld [vmem:[%s5915_s12 + $0xc0] sm:$0xff] }
  0x5a   : > { %586 = vmatpush.bf16.msra.mxu0 %v5045_v5  ;;  %5254 = vmatpush.bf16.msra.mxu1 %v5045_v5  ;;  %v493_v12 = vpack.c.bf16 %v441_v11, %v440_v10 }
  0x5e   : > { %587 = vmatpush.bf16.msra.mxu0 %v5044_v6  ;;  %5255 = vmatpush.bf16.msra.mxu1 %v5044_v6  ;;  %v492_v6 = vpack.c.bf16 %v439_v4, %v438_v3 }
  0x62   : > { %588 = vmatpush.bf16.msra.mxu0 %v5043_v7  ;;  %5256 = vmatpush.bf16.msra.mxu1 %v5043_v7 }
  0x66   : > { %589 = vmatpush.bf16.msra.mxu0 %v5042_v8  ;;  %5257 = vmatpush.bf16.msra.mxu1 %v5042_v8 }
  0x69   : > { %590 = vmatmul.bf16.vlgmr.msra.gmra.mxu0 %v482_v13  ;;  %680 = vmatmul.bf16.vlgmr.msra.gmra.mxu1 %v500_v14 }
  0x79   : > { %595 = vmatmul.bf16.gmra.mxu0 %v483_v19  ;;  %685 = vmatmul.bf16.gmra.mxu1 %v501_v20 }
  0x89   : > { %600 = vmatmul.bf16.gmra.mxu0 %v484_v25  ;;  %690 = vmatmul.bf16.gmra.mxu1 %v502_v26 }
  0x99   : > { %605 = vmatmul.bf16.gmra.mxu0 %v485_v31  ;;  %695 = vmatmul.bf16.gmra.mxu1 %v503_v32  ;;  %v470_v32 = vld [vmem:[%s5915_s12 + $0x1a0] sm:$0xff] }
  0x9a   : > { %v508_v41 = vpack.c.bf16 %v471_v33, %v470_v32 }
  0xa9   : > { %610 = vmatmul.bf16.gmra.mxu0 %v486_v37  ;;  %700 = vmatmul.bf16.gmra.mxu1 %v504_v38  ;;  %v443_v37 = vld [vmem:[%s5915_s12 + $0xc8] sm:$0xff] }
  0xb9   : > { %615 = vmatmul.bf16.gmra.mxu0 %v487_v43  ;;  %705 = vmatmul.bf16.gmra.mxu1 %v505_v44  ;;  %v494_v43 = vpack.c.bf16 %v443_v37, %v442_v36 }
  0xc9   : > { %620 = vmatmul.bf16.gmra.mxu0 %v488_v47  ;;  %710 = vmatmul.bf16.gmra.mxu1 %v506_v56 }
  0xd9   : > { %625 = vmatmul.bf16.gmra.mxu0 %v489_v50  ;;  %715 = vmatmul.bf16.gmra.mxu1 %v507_v0 }
  0xe6   : > { %v681_v57 = vpop.f32.mrf.mxu1  ;;  %v591_v1 = vpop.f32.mrf.mxu0 }
  0xe7   : > { %v592_v14 = vadd.f32 %v5982_v9, %v591_v1  ;;  %v682_v23 = vadd.f32 %v5982_v9, %v681_v57 }
  0xe9   : > { %630 = vmatmul.bf16.gmra.mxu0 %v490_v53  ;;  %v751_v16 = vpack.c.bf16 %v592_v14, %v592_v14  ;;  %v787_v27 = vpack.c.bf16 %v682_v23, %v682_v23  ;;  %720 = vmatmul.bf16.gmra.mxu1 %v508_v41  ;;  %v472_v14 = vld [vmem:[%s5915_s12 + $0x1b0] sm:$0xff] }
  0xeb   : > { %v5989_v17 = vunpack.c.l.bf16 %v751_v16  ;;  %v6008_v34 = vunpack.c.l.bf16 %v787_v27 }
  0xed   : > { %9052 = vst [vmem:[#allocation23_spill] sm:$0xff] %v5989_v17  ;;  %v879_v19 = vmul.f32 %v5989_v17, %v5989_v17  ;;  %v915_v44 = vmul.f32 %v6008_v34, %v6008_v34 }
  0xee   : > { %v683_v63 = vpop.f32.mrf.mxu1  ;;  %v593_v5 = vpop.f32.mrf.mxu0  ;;  %9055 = vst [vmem:[#allocation26_spill] sm:$0xff] %v6008_v34 }
  0xef   : > { %v594_v22 = vadd.f32 %v5982_v9, %v593_v5  ;;  %v943_v24 = vpack.c.bf16 %v879_v19, %v879_v19  ;;  %v684_v40 = vadd.f32 %v5982_v9, %v683_v63  ;;  %v979_v51 = vpack.c.bf16 %v915_v44, %v915_v44  ;;  %v473_v19 = vld [vmem:[%s5915_s12 + $0x1b8] sm:$0xff] }
  0xf0   : > { %v509_v33 = vpack.c.bf16 %v473_v19, %v472_v14 }
  0xf1   : > { %v752_v26 = vpack.c.bf16 %v594_v22, %v594_v22  ;;  %v6000_v29 = vunpack.c.l.bf16 %v943_v24  ;;  %v788_v48 = vpack.c.bf16 %v684_v40, %v684_v40  ;;  %v6031_v58 = vunpack.c.l.bf16 %v979_v51 }
  0xf3   : > { %v6004_v31 = vunpack.c.l.bf16 %v752_v26  ;;  %v1071_v38 = vmul.f32 0.044677734, %v6000_v29  ;;  %v6027_v55 = vunpack.c.l.bf16 %v788_v48  ;;  %v1107_v1 = vmul.f32 0.044677734, %v6031_v58 }
  0xf4   : > { %v2582_v40 = vmul.f32 0.13378906, %v6000_v29 }
  0xf5   : > { %9054 = vst [vmem:[#allocation25_spill] sm:$0xff] %v6004_v31  ;;  %v880_v42 = vmul.f32 %v6004_v31, %v6004_v31  ;;  %v1135_v45 = vpack.c.bf16 %v1071_v38, %v1071_v38  ;;  %v916_v63 = vmul.f32 %v6027_v55, %v6027_v55 }
  0xf6   : > { %v5973_v2 = vpop.f32.mrf.mxu1  ;;  %v596_v8 = vpop.f32.mrf.mxu0  ;;  %9056 = vst [vmem:[#allocation27_spill] sm:$0xff] %v6027_v55  ;;  %v2646_v51 = vpack.c.bf16 %v2582_v40, %v2582_v40 }
  0xf7   : > { %v597_v20 = vadd.f32 %v5982_v9, %v596_v8  ;;  %v944_v50 = vpack.c.bf16 %v880_v42, %v880_v42  ;;  %v1199_v52 = vunpack.c.l.bf16 %v1135_v45  ;;  %v980_v10 = vpack.c.bf16 %v916_v63, %v916_v63 }
  0xf8   : > { %v687_v11 = vadd.f32 %v5982_v9, %v5973_v2 }
  0xf9   : > { %635 = vmatmul.bf16.gmra.mxu0 %v491_v60  ;;  %v753_v25 = vpack.c.bf16 %v597_v20, %v597_v20  ;;  %v1008_v57 = vunpack.c.l.bf16 %v944_v50  ;;  %v1263_v59 = vmul.f32 %v1199_v52, %v5989_v17  ;;  %v444_v20 = vld [vmem:[%s5915_s12 + $0xd0] sm:$0xff]  ;;  %v6055_v26 = vunpack.c.l.bf16 %v980_v10  ;;  %725 = vmatmul.bf16.gmra.mxu1 %v509_v33 }
  0xfa   : > { %v789_v27 = vpack.c.bf16 %v687_v11, %v687_v11 }
  0xfb   : > { %v6002_v30 = vunpack.c.l.bf16 %v753_v25  ;;  %v1072_v0 = vmul.f32 0.044677734, %v1008_v57  ;;  %v1327_v4 = vpack.c.bf16 %v1263_v59, %v1263_v59  ;;  %v1108_v42 = vmul.f32 0.044677734, %v6055_v26 }
  0xfd   : > { %9053 = vst [vmem:[#allocation24_spill] sm:$0xff] %v6002_v30  ;;  %v881_v39 = vmul.f32 %v6002_v30, %v6002_v30  ;;  %v1391_v22 = vunpack.c.l.bf16 %v1327_v4 }
  0xfe   : > { %v5977_v7 = vpop.f32.mrf.mxu1  ;;  %v598_v15 = vpop.f32.mrf.mxu0 }
  0xff   : > { %v599_v46 = vadd.f32 %v5982_v9, %v598_v15  ;;  %v945_v47 = vpack.c.bf16 %v881_v39, %v881_v39  ;;  %v1171_v15 = vpack.c.bf16 %v1107_v1, %v1107_v1  ;;  %v1455_v37 = vadd.f32 %v1391_v22, %v5989_v17 }
 0x100   : > { %v689_v1 = vadd.f32 %v5982_v9, %v5977_v7 }
 0x101   : > { %v754_v53 = vpack.c.bf16 %v599_v46, %v599_v46  ;;  %v6025_v54 = vunpack.c.l.bf16 %v945_v47  ;;  %v1235_v2 = vunpack.c.l.bf16 %v1171_v15  ;;  %v1519_v47 = vpack.c.bf16 %v1455_v37, %v1455_v37 }
 0x102   : > { %v790_v7 = vpack.c.bf16 %v689_v1, %v689_v1 }
 0x103   : > { %v6034_v60 = vunpack.c.l.bf16 %v754_v53  ;;  %v1073_v62 = vmul.f32 0.044677734, %v6025_v54  ;;  %v1299_v46 = vmul.f32 %v1235_v2, %v6008_v34  ;;  %v1172_v53 = vpack.c.bf16 %v1108_v42, %v1108_v42 }
 0x104   : > { %v1583_v4 = vunpack.c.l.bf16 %v1519_v47 }
 0x105   : > { %9057 = vst [vmem:[#allocation28_spill] sm:$0xff] %v6034_v60  ;;  %v882_v5 = vmul.f32 %v6034_v60, %v6034_v60  ;;  %v1137_v8 = vpack.c.bf16 %v1073_v62, %v1073_v62  ;;  %v2583_v62 = vmul.f32 0.13378906, %v1008_v57  ;;  %v1236_v11 = vunpack.c.l.bf16 %v1172_v53 }
 0x106   : > { %v5986_v13 = vpop.f32.mrf.mxu1  ;;  %v601_v21 = vpop.f32.mrf.mxu0 }
 0x107   : > { %v602_v61 = vadd.f32 %v5982_v9, %v601_v21  ;;  %v445_v21 = vld [vmem:[%s5915_s12 + $0xd8] sm:$0xff]  ;;  %v946_v23 = vpack.c.bf16 %v882_v5, %v882_v5  ;;  %v1201_v25 = vunpack.c.l.bf16 %v1137_v8  ;;  %v2710_v8 = vunpack.c.l.bf16 %v2646_v51 }
 0x108   : > { %v495_v36 = vpack.c.bf16 %v445_v21, %v444_v20  ;;  %v2647_v15 = vpack.c.bf16 %v2583_v62, %v2583_v62  ;;  %v474_v20 = vld [vmem:[%s5915_s12 + $0x1c0] sm:$0xff]  ;;  %v2584_v21 = vmul.f32 0.13378906, %v6025_v54  ;;  %v1300_v2 = vmul.f32 %v1236_v11, %v6027_v55 }
 0x109   : > { %640 = vmatmul.bf16.gmra.mxu0 %v492_v6  ;;  %v755_v6 = vpack.c.bf16 %v602_v61, %v602_v61  ;;  %v6058_v38 = vunpack.c.l.bf16 %v946_v23  ;;  %v1265_v41 = vmul.f32 %v1201_v25, %v6002_v30  ;;  %v692_v23 = vadd.f32 %v5982_v9, %v5986_v13 }
 0x10a   : > { %v2648_v51 = vpack.c.bf16 %v2584_v21, %v2584_v21 }
 0x10b   : > { %v6053_v24 = vunpack.c.l.bf16 %v755_v6  ;;  %v1074_v48 = vmul.f32 0.044677734, %v6058_v38  ;;  %v1329_v52 = vpack.c.bf16 %v1265_v41, %v1265_v41 }
 0x10d   : > { %9058 = vst [vmem:[#allocation29_spill] sm:$0xff] %v6053_v24  ;;  %v883_v39 = vmul.f32 %v6053_v24, %v6053_v24  ;;  %v1138_v5 = vpack.c.bf16 %v1074_v48, %v1074_v48  ;;  %v1393_v10 = vunpack.c.l.bf16 %v1329_v52  ;;  %v446_v48 = vld [vmem:[%s5915_s12 + $0xe0] sm:$0xff] }
 0x10e   : > { %v5991_v18 = vpop.f32.mrf.mxu1  ;;  %v6010_v35 = vpop.f32.mrf.mxu0 }
 0x10f   : > { %v947_v50 = vpack.c.bf16 %v883_v39, %v883_v39  ;;  %v604_v63 = vadd.f32 %v5982_v9, %v6010_v35  ;;  %v475_v35 = vld [vmem:[%s5915_s12 + $0x1c8] sm:$0xff]  ;;  %v1202_v33 = vunpack.c.l.bf16 %v1138_v5  ;;  %v6097_v39 = vadd.f32 1.0, %v2710_v8 }
 0x110   : > { %v510_v37 = vpack.c.bf16 %v475_v35, %v474_v20 }
 0x111   : > { %v6080_v6 = vunpack.c.l.bf16 %v947_v50  ;;  %v756_v19 = vpack.c.bf16 %v604_v63, %v604_v63  ;;  %9060 = vst [vmem:[#allocation31_spill] sm:$0xff] %v6097_v39  ;;  %v447_v50 = vld [vmem:[%s5915_s12 + $0xe8] sm:$0xff]  ;;  %v1266_v53 = vmul.f32 %v1202_v33, %v6034_v60  ;;  %v1364_v63 = vpack.c.bf16 %v1300_v2, %v1300_v2 }
 0x112   : > { %730 = vmatmul.bf16.gmra.mxu1 %v510_v37  ;;  %v496_v8 = vpack.c.bf16 %v447_v50, %v446_v48  ;;  %v6131_v33 = vmul.f32 0.13378906, %v6055_v26  ;;  %v6136_v2 = vmul.f32 0.13378906, %v6058_v38 }
 0x113   : > { %v6100_v40 = vunpack.c.l.bf16 %v756_v19  ;;  %v1428_v21 = vunpack.c.l.bf16 %v1364_v63 }
 0x114   : > { %9067 = vst [vmem:[#allocation38_spill] sm:$0xff] %v6131_v33 }
 0x115   : > { %9061 = vst [vmem:[#allocation32_spill] sm:$0xff] %v6100_v40  ;;  %v1492_v50 = vadd.f32 %v1428_v21, %v6027_v55 }
 0x116   : > { %v5998_v28 = vpop.f32.mrf.mxu1  ;;  %v6029_v56 = vpop.f32.mrf.mxu0  ;;  %9068 = vst [vmem:[#allocation39_spill] sm:$0xff] %v6136_v2 }
 0x117   : > { %v607_v57 = vadd.f32 %v5982_v9, %v6029_v56  ;;  %v1457_v56 = vadd.f32 %v1393_v10, %v6002_v30 }
 0x119   : > { %645 = vmatmul.bf16.gmra.mxu0 %v493_v12  ;;  %v1136_v12 = vpack.c.bf16 %v1072_v0, %v1072_v0  ;;  %v1363_v0 = vpack.c.bf16 %v1299_v46, %v1299_v46  ;;  %v757_v41 = vpack.c.bf16 %v607_v57, %v607_v57  ;;  %v791_v46 = vpack.c.bf16 %v692_v23, %v692_v23 }
 0x11a   : > { %v1521_v62 = vpack.c.bf16 %v1457_v56, %v1457_v56  ;;  %v1330_v57 = vpack.c.bf16 %v1266_v53, %v1266_v53 }
 0x11b   : > { %v1200_v32 = vunpack.c.l.bf16 %v1136_v12  ;;  %v1427_v22 = vunpack.c.l.bf16 %v1363_v0  ;;  %v6117_v5 = vunpack.c.l.bf16 %v757_v41 }
 0x11c   : > { %v1585_v35 = vunpack.c.l.bf16 %v1521_v62  ;;  %v1394_v41 = vunpack.c.l.bf16 %v1330_v57 }
 0x11d   : > { %v1264_v45 = vmul.f32 %v1200_v32, %v6004_v31  ;;  %v2618_v32 = vmul.f32 0.13378906, %v6031_v58  ;;  %v6102_v58 = vunpack.c.l.bf16 %v2647_v15  ;;  %v1491_v42 = vadd.f32 %v1427_v22, %v6008_v34  ;;  %9063 = vst [vmem:[#allocation34_spill] sm:$0xff] %v6117_v5 }
 0x11e   : > { %v6023_v49 = vpop.f32.mrf.mxu1  ;;  %v6048_v16 = vpop.f32.mrf.mxu0  ;;  %v6124_v15 = vunpack.c.l.bf16 %v2648_v51  ;;  %v6144_v48 = vmul.f32 0.796875, %v1585_v35 }
 0x11f   : > { %v1328_v61 = vpack.c.bf16 %v1264_v45, %v1264_v45  ;;  %9062 = vst [vmem:[#allocation33_spill] sm:$0xff] %v6102_v58  ;;  %v6105_v45 = vunpack.c.l.bf16 %v790_v7  ;;  %v2682_v52 = vpack.c.bf16 %v2618_v32, %v2618_v32  ;;  %v1555_v10 = vpack.c.bf16 %v1491_v42, %v1491_v42 }
 0x120   : > { %9064 = vst [vmem:[#allocation35_spill] sm:$0xff] %v6124_v15 }
 0x121   : > { %v1392_v14 = vunpack.c.l.bf16 %v1328_v61  ;;  %v918_v11 = vmul.f32 %v6105_v45, %v6105_v45  ;;  %v6126_v19 = vunpack.c.l.bf16 %v2682_v52  ;;  %v1619_v56 = vunpack.c.l.bf16 %v1555_v10  ;;  %9069 = vst [vmem:[#allocation40_spill] sm:$0xff] %v6144_v48  ;;  %v449_v61 = vld [vmem:[%s5915_s12 + $0xf8] sm:$0xff] }
 0x123   : > { %v1456_v13 = vadd.f32 %v1392_v14, %v6004_v31  ;;  %9065 = vst [vmem:[#allocation36_spill] sm:$0xff] %v6126_v19  ;;  %v982_v37 = vpack.c.bf16 %v918_v11, %v918_v11 }
 0x125   : > { %v1520_v1 = vpack.c.bf16 %v1456_v13, %v1456_v13 }
 0x126   : > { %v6041_v3 = vpop.f32.mrf.mxu1  ;;  %v6074_v59 = vpop.f32.mrf.mxu0 }
 0x127   : > { %v6128_v32 = vunpack.c.l.bf16 %v1520_v1  ;;  %v1046_v1 = vunpack.c.l.bf16 %v982_v37 }
 0x129   : > { %650 = vmatmul.bf16.gmra.mxu0 %v494_v43  ;;  %v6065_v43 = vunpack.c.l.bf16 %v789_v27  ;;  %v6089_v27 = vmul.f32 0.796875, %v1583_v4  ;;  %v884_v4 = vmul.f32 %v6100_v40, %v6100_v40  ;;  %9066 = vst [vmem:[#allocation37_spill] sm:$0xff] %v6128_v32 }
 0x12b   : > { %v917_v29 = vmul.f32 %v6065_v43, %v6065_v43  ;;  %9059 = vst [vmem:[#allocation30_spill] sm:$0xff] %v6089_v27 }
 0x12d   : > { %v981_v12 = vpack.c.bf16 %v917_v29, %v917_v29 }
 0x12e   : > { %v6067_v44 = vpop.f32.mrf.mxu1  ;;  %v6107_v47 = vpop.f32.mrf.mxu0 }
 0x12f   : > { %v6095_v54 = vunpack.c.l.bf16 %v981_v12  ;;  %v6121_v12 = vunpack.c.l.bf16 %v791_v46  ;;  %v609_v46 = vadd.f32 %v5982_v9, %v6048_v16  ;;  %v704_v16 = vadd.f32 %v5982_v9, %v6067_v44 }
 0x130   : > { %v6208_v44 = vmul.f32 0.13378906, %v1046_v1 }
 0x131   : > { %v1109_v0 = vmul.f32 0.044677734, %v6095_v54  ;;  %v919_v13 = vmul.f32 %v6121_v12, %v6121_v12  ;;  %v758_v11 = vpack.c.bf16 %v609_v46, %v609_v46 }
 0x132   : > { %9075 = vst [vmem:[#allocation46_spill] sm:$0xff] %v6208_v44  ;;  %v450_v44 = vld [vmem:[%s5915_s12 + $0x100] sm:$0xff] }
 0x133   : > { %v1173_v22 = vpack.c.bf16 %v1109_v0, %v1109_v0  ;;  %v6154_v0 = vmul.f32 0.796875, %v1619_v56  ;;  %v1110_v56 = vmul.f32 0.044677734, %v1046_v1 }
 0x135   : > { %v1237_v51 = vunpack.c.l.bf16 %v1173_v22 }
 0x136   : > { %v706_v25 = vpop.f32.mrf.mxu1  ;;  %v6147_v52 = vpop.f32.mrf.mxu0 }
 0x137   : > { %v707_v14 = vadd.f32 %v5982_v9, %v706_v25  ;;  %v885_v25 = vmul.f32 %v6117_v5, %v6117_v5 }
 0x139   : > { %655 = vmatmul.bf16.gmra.mxu0 %v495_v36  ;;  %v1075_v36 = vmul.f32 0.044677734, %v6080_v6  ;;  %v797_v7 = vpack.c.bf16 %v707_v14, %v707_v14  ;;  %v949_v63 = vpack.c.bf16 %v885_v25, %v885_v25  ;;  %v2620_v25 = vmul.f32 0.13378906, %v6095_v54 }
 0x13b   : > { %v1139_v29 = vpack.c.bf16 %v1075_v36, %v1075_v36  ;;  %v948_v36 = vpack.c.bf16 %v884_v4, %v884_v4  ;;  %v6149_v38 = vunpack.c.l.bf16 %v797_v7  ;;  %v983_v4 = vpack.c.bf16 %v919_v13, %v919_v13 }
 0x13c   : > { %v6164_v7 = vunpack.c.l.bf16 %v949_v63 }
 0x13d   : > { %v1203_v20 = vunpack.c.l.bf16 %v1139_v29  ;;  %v2586_v29 = vmul.f32 0.13378906, %v6080_v6  ;;  %v1012_v62 = vunpack.c.l.bf16 %v948_v36  ;;  %v1301_v6 = vmul.f32 %v1237_v51, %v6065_v43 }
 0x13e   : > { %v708_v23 = vpop.f32.mrf.mxu1  ;;  %v925_v35 = vmul.f32 %v6149_v38, %v6149_v38  ;;  %v6171_v37 = vunpack.c.l.bf16 %v983_v4  ;;  %v702_v51 = vadd.f32 %v5982_v9, %v6041_v3  ;;  %v1077_v4 = vmul.f32 0.044677734, %v6164_v7  ;;  %v6189_v53 = vpop.f32.mrf.mxu0 }
 0x13f   : > { %v1267_v42 = vmul.f32 %v1203_v20, %v6053_v24  ;;  %v709_v26 = vadd.f32 %v5982_v9, %v708_v23  ;;  %v1556_v20 = vpack.c.bf16 %v1492_v50, %v1492_v50  ;;  %v2650_v21 = vpack.c.bf16 %v2586_v29, %v2586_v29 }
 0x140   : > { %v1076_v22 = vmul.f32 0.044677734, %v1012_v62  ;;  %v1365_v50 = vpack.c.bf16 %v1301_v6, %v1301_v6  ;;  %v989_v29 = vpack.c.bf16 %v925_v35, %v925_v35  ;;  %v1111_v6 = vmul.f32 0.044677734, %v6171_v37 }
 0x141   : > { %v1331_v10 = vpack.c.bf16 %v1267_v42, %v1267_v42  ;;  %v798_v14 = vpack.c.bf16 %v709_v26, %v709_v26  ;;  %v6173_v42 = vunpack.c.l.bf16 %v758_v11  ;;  %v6177_v26 = vunpack.c.l.bf16 %v1556_v20  ;;  %v477_v11 = vld [vmem:[%s5915_s12 + $0x1d8] sm:$0xff] }
 0x142   : > { %v6181_v54 = vunpack.c.l.bf16 %v2650_v21  ;;  %v1140_v63 = vpack.c.bf16 %v1076_v22, %v1076_v22  ;;  %v1174_v20 = vpack.c.bf16 %v1110_v56, %v1110_v56  ;;  %v1429_v57 = vunpack.c.l.bf16 %v1365_v50 }
 0x143   : > { %v6166_v23 = vunpack.c.l.bf16 %v798_v14  ;;  %9070 = vst [vmem:[#allocation41_spill] sm:$0xff] %v6173_v42  ;;  %v2684_v14 = vpack.c.bf16 %v2620_v25, %v2620_v25  ;;  %v886_v22 = vmul.f32 %v6173_v42, %v6173_v42  ;;  %v795_v25 = vpack.c.bf16 %v702_v51, %v702_v51 }
 0x144   : > { %9071 = vst [vmem:[#allocation42_spill] sm:$0xff] %v6181_v54  ;;  %v6200_v56 = vunpack.c.l.bf16 %v989_v29  ;;  %v1204_v19 = vunpack.c.l.bf16 %v1140_v63  ;;  %v6202_v33 = vmul.f32 0.13378906, %v1012_v62  ;;  %v1238_v54 = vunpack.c.l.bf16 %v1174_v20 }
 0x145   : > { %v926_v46 = vmul.f32 %v6166_v23, %v6166_v23  ;;  %v6206_v39 = vunpack.c.l.bf16 %v2684_v14  ;;  %v950_v50 = vpack.c.bf16 %v886_v22, %v886_v22  ;;  %v796_v51 = vpack.c.bf16 %v704_v16, %v704_v16 }
 0x146   : > { %9073 = vst [vmem:[#allocation44_spill] sm:$0xff] %v6202_v33  ;;  %v6211_v63 = vunpack.c.l.bf16 %v795_v25  ;;  %v1117_v62 = vmul.f32 0.044677734, %v6200_v56  ;;  %v1302_v16 = vmul.f32 %v1238_v54, %v6105_v45  ;;  %v6233_v54 = vpop.f32.mrf.mxu0 }
 0x147   : > { %v990_v3 = vpack.c.bf16 %v926_v46, %v926_v46  ;;  %9074 = vst [vmem:[#allocation45_spill] sm:$0xff] %v6206_v39  ;;  %v6229_v20 = vunpack.c.l.bf16 %v796_v51  ;;  %v2588_v51 = vmul.f32 0.13378906, %v6164_v7  ;;  %v451_v7 = vld [vmem:[%s5915_s12 + $0x108] sm:$0xff] }
 0x149   : > { %660 = vmatmul.bf16.gmra.mxu0 %v496_v8  ;;  %v1458_v8 = vadd.f32 %v1394_v41, %v6034_v60  ;;  %v1395_v41 = vunpack.c.l.bf16 %v1331_v10  ;;  %v476_v10 = vld [vmem:[%s5915_s12 + $0x1d0] sm:$0xff]  ;;  %v6204_v15 = vunpack.c.l.bf16 %v990_v3  ;;  %v923_v3 = vmul.f32 %v6211_v63, %v6211_v63 }
 0x14a   : > { %v511_v36 = vpack.c.bf16 %v477_v11, %v476_v10  ;;  %v1493_v10 = vadd.f32 %v1429_v57, %v6065_v43  ;;  %v2652_v60 = vpack.c.bf16 %v2588_v51, %v2588_v51 }
 0x14b   : > { %v1522_v13 = vpack.c.bf16 %v1458_v8, %v1458_v8  ;;  %v694_v8 = vadd.f32 %v5982_v9, %v5991_v18  ;;  %v1459_v21 = vadd.f32 %v1395_v41, %v6053_v24  ;;  %v448_v18 = vld [vmem:[%s5915_s12 + $0xf0] sm:$0xff]  ;;  %v1175_v41 = vpack.c.bf16 %v1111_v6, %v1111_v6 }
 0x14c   : > { %735 = vmatmul.bf16.gmra.mxu1 %v511_v36  ;;  %v497_v2 = vpack.c.bf16 %v449_v61, %v448_v18  ;;  %v697_v61 = vadd.f32 %v5982_v9, %v5998_v28  ;;  %v1118_v57 = vmul.f32 0.044677734, %v6204_v15  ;;  %v1557_v28 = vpack.c.bf16 %v1493_v10, %v1493_v10 }
 0x14d   : > { %v6191_v35 = vunpack.c.l.bf16 %v1522_v13  ;;  %v1141_v13 = vpack.c.bf16 %v1077_v4, %v1077_v4  ;;  %v792_v46 = vpack.c.bf16 %v694_v8, %v694_v8  ;;  %v1523_v29 = vpack.c.bf16 %v1459_v21, %v1459_v21 }
 0x14e   : > { %v1268_v4 = vmul.f32 %v1204_v19, %v6100_v40  ;;  %v1239_v36 = vunpack.c.l.bf16 %v1175_v41  ;;  %v612_v19 = vadd.f32 %v5982_v9, %v6074_v59  ;;  %v1181_v21 = vpack.c.bf16 %v1117_v62, %v1117_v62 }
 0x14f   : > { %9072 = vst [vmem:[#allocation43_spill] sm:$0xff] %v6191_v35  ;;  %v1205_v8 = vunpack.c.l.bf16 %v1141_v13  ;;  %v6215_v11 = vunpack.c.l.bf16 %v792_v46  ;;  %v1587_v6 = vunpack.c.l.bf16 %v1523_v29  ;;  %v793_v13 = vpack.c.bf16 %v697_v61, %v697_v61 }
 0x150   : > { %v1332_v22 = vpack.c.bf16 %v1268_v4, %v1268_v4  ;;  %v1366_v59 = vpack.c.bf16 %v1302_v16, %v1302_v16  ;;  %v1303_v46 = vmul.f32 %v1239_v36, %v6121_v12  ;;  %v699_v41 = vadd.f32 %v5982_v9, %v6023_v49  ;;  %v478_v4 = vld [vmem:[%s5915_s12 + $0x1e0] sm:$0xff] }
 0x151   : > { %v1269_v18 = vmul.f32 %v1205_v8, %v6117_v5  ;;  %v920_v25 = vmul.f32 %v6215_v11, %v6215_v11  ;;  %v759_v10 = vpack.c.bf16 %v612_v19, %v612_v19  ;;  %v924_v62 = vmul.f32 %v6229_v20, %v6229_v20  ;;  %v479_v8 = vld [vmem:[%s5915_s12 + $0x1e8] sm:$0xff] }
 0x152   : > { %v6247_v61 = vmul.f32 0.796875, %v1587_v6  ;;  %v1621_v16 = vunpack.c.l.bf16 %v1557_v28  ;;  %v987_v36 = vpack.c.bf16 %v923_v3, %v923_v3  ;;  %v1245_v14 = vunpack.c.l.bf16 %v1181_v21 }
 0x153   : > { %v1396_v1 = vunpack.c.l.bf16 %v1332_v22  ;;  %v1333_v49 = vpack.c.bf16 %v1269_v18, %v1269_v18  ;;  %v984_v39 = vpack.c.bf16 %v920_v25, %v920_v25  ;;  %v1367_v33 = vpack.c.bf16 %v1303_v46, %v1303_v46 }
 0x154   : > { %9076 = vst [vmem:[#allocation47_spill] sm:$0xff] %v6247_v61  ;;  %v794_v58 = vpack.c.bf16 %v699_v41, %v699_v41  ;;  %v512_v31 = vpack.c.bf16 %v479_v8, %v478_v4  ;;  %v1430_v17 = vunpack.c.l.bf16 %v1366_v59  ;;  %v6253_v32 = vunpack.c.l.bf16 %v759_v10 }
 0x155   : > { %v988_v6 = vpack.c.bf16 %v924_v62, %v924_v62  ;;  %v6255_v28 = vunpack.c.l.bf16 %v987_v36  ;;  %v1309_v3 = vmul.f32 %v1245_v14, %v6149_v38  ;;  %v498_v21 = vpack.c.bf16 %v451_v7, %v450_v44 }
 0x156   : > { %v1397_v18 = vunpack.c.l.bf16 %v1333_v49  ;;  %v6260_v25 = vunpack.c.l.bf16 %v984_v39  ;;  %v1460_v59 = vadd.f32 %v1396_v1, %v6100_v40  ;;  %v1431_v46 = vunpack.c.l.bf16 %v1367_v33 }
 0x157   : > { %v6265_v41 = vunpack.c.l.bf16 %v794_v58  ;;  %v6270_v44 = vmul.f32 0.796875, %v1621_v16  ;;  %v887_v39 = vmul.f32 %v6253_v32, %v6253_v32  ;;  %v1494_v10 = vadd.f32 %v1430_v17, %v6105_v45 }
 0x158   : > { %v2622_v1 = vmul.f32 0.13378906, %v6171_v37  ;;  %v1115_v58 = vmul.f32 0.044677734, %v6255_v28  ;;  %v1373_v33 = vpack.c.bf16 %v1309_v3, %v1309_v3  ;;  %v1461_v62 = vadd.f32 %v1397_v18, %v6117_v5 }
 0x159   : > { %665 = vmatmul.bf16.gmra.mxu0 %v497_v2  ;;  %v6225_v2 = vunpack.c.l.bf16 %v950_v50  ;;  %v1182_v50 = vpack.c.bf16 %v1118_v57, %v1118_v57  ;;  %v6249_v57 = vunpack.c.l.bf16 %v793_v13  ;;  %v6280_v4 = vunpack.c.l.bf16 %v2652_v60 }
 0x15a   : > { %v1524_v8 = vpack.c.bf16 %v1460_v59, %v1460_v59  ;;  %v1495_v16 = vadd.f32 %v1431_v46, %v6121_v12  ;;  %v922_v36 = vmul.f32 %v6265_v41, %v6265_v41  ;;  %v951_v49 = vpack.c.bf16 %v887_v39, %v887_v39 }
 0x15b   : > { %v1078_v29 = vmul.f32 0.044677734, %v6225_v2  ;;  %v1246_v19 = vunpack.c.l.bf16 %v1182_v50  ;;  %v921_v13 = vmul.f32 %v6249_v57, %v6249_v57  ;;  %v6267_v50 = vpop.f32.mrf.mxu0  ;;  %9077 = vst [vmem:[#allocation48_spill] sm:$0xff] %v6280_v4  ;;  %v614_v7 = vadd.f32 %v5982_v9, %v6107_v47 }
 0x15c   : > { %740 = vmatmul.bf16.gmra.mxu1 %v512_v31  ;;  %v1112_v31 = vmul.f32 0.044677734, %v6260_v25  ;;  %v1558_v60 = vpack.c.bf16 %v1494_v10, %v1494_v10  ;;  %v1179_v3 = vpack.c.bf16 %v1115_v58, %v1115_v58  ;;  %v986_v39 = vpack.c.bf16 %v922_v36, %v922_v36  ;;  %v480_v58 = vld [vmem:[%s5915_s12 + $0x1f0] sm:$0xff] }
 0x15d   : > { %v1142_v27 = vpack.c.bf16 %v1078_v29, %v1078_v29  ;;  %v1310_v51 = vmul.f32 %v1246_v19, %v6166_v23  ;;  %v6274_v29 = vunpack.c.l.bf16 %v988_v6  ;;  %v2686_v6 = vpack.c.bf16 %v2622_v1, %v2622_v1 }
 0x15e   : > { %v1176_v59 = vpack.c.bf16 %v1112_v31, %v1112_v31  ;;  %v1015_v10 = vunpack.c.l.bf16 %v951_v49  ;;  %v760_v1 = vpack.c.bf16 %v614_v7, %v614_v7  ;;  %v6298_v30 = vunpack.c.l.bf16 %v1558_v60  ;;  %v453_v49 = vld [vmem:[%s5915_s12 + $0x118] sm:$0xff] }
 0x15f   : > { %v1206_v14 = vunpack.c.l.bf16 %v1142_v27  ;;  %v985_v27 = vpack.c.bf16 %v921_v13, %v921_v13  ;;  %v1374_v17 = vpack.c.bf16 %v1310_v51, %v1310_v51  ;;  %v1116_v19 = vmul.f32 0.044677734, %v6274_v29 }
 0x160   : > { %v1525_v13 = vpack.c.bf16 %v1461_v62, %v1461_v62  ;;  %v6294_v51 = vunpack.c.l.bf16 %v1524_v8  ;;  %v6300_v18 = vunpack.c.l.bf16 %v2686_v6  ;;  %v1243_v62 = vunpack.c.l.bf16 %v1179_v3 }
 0x161   : > { %v1270_v37 = vmul.f32 %v1206_v14, %v6173_v42  ;;  %v6292_v46 = vunpack.c.l.bf16 %v985_v27  ;;  %v1559_v14 = vpack.c.bf16 %v1495_v16, %v1495_v16  ;;  %v1438_v47 = vunpack.c.l.bf16 %v1374_v17 }
 0x162   : > { %9078 = vst [vmem:[#allocation49_spill] sm:$0xff] %v6294_v51  ;;  %v1180_v4 = vpack.c.bf16 %v1116_v19, %v1116_v19  ;;  %v1589_v8 = vunpack.c.l.bf16 %v1525_v13  ;;  %v6304_v16 = vmul.f32 0.13378906, %v6225_v2  ;;  %v1240_v36 = vunpack.c.l.bf16 %v1176_v59 }
 0x163   : > { %v1334_v22 = vpack.c.bf16 %v1270_v37, %v1270_v37  ;;  %9079 = vst [vmem:[#allocation50_spill] sm:$0xff] %v6300_v18  ;;  %v626_v27 = vpop.f32.mrf.mxu0  ;;  %v1113_v17 = vmul.f32 0.044677734, %v6292_v46  ;;  %v452_v37 = vld [vmem:[%s5915_s12 + $0x110] sm:$0xff]  ;;  %v1623_v7 = vunpack.c.l.bf16 %v1559_v14  ;;  %v6309_v19 = vunpack.c.l.bf16 %v986_v39 }
 0x164   : > { %9080 = vst [vmem:[#allocation51_spill] sm:$0xff] %v6304_v16  ;;  %v1502_v60 = vadd.f32 %v1438_v47, %v6166_v23  ;;  %v1079_v3 = vmul.f32 0.044677734, %v1015_v10  ;;  %v6312_v48 = vunpack.c.l.bf16 %v760_v1  ;;  %v2590_v13 = vmul.f32 0.13378906, %v1015_v10 }
 0x165   : > { %v1398_v18 = vunpack.c.l.bf16 %v1334_v22  ;;  %v1307_v2 = vmul.f32 %v1243_v62, %v6211_v63  ;;  %v499_v59 = vpack.c.bf16 %v453_v49, %v452_v37  ;;  %v1304_v24 = vmul.f32 %v1240_v36, %v6215_v11 }
 0x166   : > { %v6317_v35 = vmul.f32 0.13378906, %v6260_v25  ;;  %v1177_v14 = vpack.c.bf16 %v1113_v17, %v1113_v17  ;;  %v617_v39 = vadd.f32 %v5982_v9, %v6147_v52  ;;  %v6321_v47 = vmul.f32 0.796875, %v1589_v8 }
 0x167   : > { %v6323_v22 = vmul.f32 0.796875, %v1623_v7  ;;  %v1566_v10 = vpack.c.bf16 %v1502_v60, %v1502_v60  ;;  %v1462_v1 = vadd.f32 %v1398_v18, %v6173_v42  ;;  %v2654_v52 = vpack.c.bf16 %v2590_v13, %v2590_v13 }
 0x168   : > { %9081 = vst [vmem:[#allocation52_spill] sm:$0xff] %v6317_v35  ;;  %v1368_v36 = vpack.c.bf16 %v1304_v24, %v1304_v24  ;;  %v1241_v37 = vunpack.c.l.bf16 %v1177_v14  ;;  %v761_v49 = vpack.c.bf16 %v617_v39, %v617_v39  ;;  %v627_v17 = vadd.f32 %v5982_v9, %v626_v27 }
 0x169   : > { %670 = vmatmul.bf16.gmra.mxu0 %v498_v21  ;;  %v1437_v21 = vunpack.c.l.bf16 %v1373_v33  ;;  %v481_v33 = vld [vmem:[%s5915_s12 + $0x1f8] sm:$0xff]  ;;  %9082 = vst [vmem:[#allocation53_spill] sm:$0xff] %v6321_v47  ;;  %v2629_v27 = vmul.f32 0.13378906, %v6204_v15 }
 0x16a   : > { %v513_v6 = vpack.c.bf16 %v481_v33, %v480_v58  ;;  %v1143_v58 = vpack.c.bf16 %v1079_v3, %v1079_v3  ;;  %v888_v33 = vmul.f32 %v6312_v48, %v6312_v48  ;;  %v1432_v39 = vunpack.c.l.bf16 %v1368_v36 }
 0x16b   : > { %v1501_v31 = vadd.f32 %v1437_v21, %v6149_v38  ;;  %v1244_v21 = vunpack.c.l.bf16 %v1180_v4  ;;  %v1114_v4 = vmul.f32 0.044677734, %v6309_v19  ;;  %v628_v3 = vpop.f32.mrf.mxu0  ;;  %v1305_v62 = vmul.f32 %v1241_v37, %v6249_v57 }
 0x16c   : > { %745 = vmatmul.bf16.gmra.mxu1 %v513_v6  ;;  %v1630_v6 = vunpack.c.l.bf16 %v1566_v10  ;;  %v1207_v13 = vunpack.c.l.bf16 %v1143_v58  ;;  %v6342_v18 = vunpack.c.l.bf16 %v761_v49  ;;  %v629_v7 = vadd.f32 %v5982_v9, %v628_v3 }
 0x16d   : > { %v1565_v40 = vpack.c.bf16 %v1501_v31, %v1501_v31  ;;  %v1308_v25 = vmul.f32 %v1244_v21, %v6229_v20  ;;  %v1371_v31 = vpack.c.bf16 %v1307_v2, %v1307_v2  ;;  %v1178_v60 = vpack.c.bf16 %v1114_v4, %v1114_v4 }
 0x16e   : > { %v1526_v21 = vpack.c.bf16 %v1462_v1, %v1462_v1  ;;  %v952_v2 = vpack.c.bf16 %v888_v33, %v888_v33  ;;  %v2628_v10 = vmul.f32 0.13378906, %v6200_v56  ;;  %v1694_v1 = vmul.f32 0.796875, %v1630_v6 }
 0x16f   : > { %v1629_v8 = vunpack.c.l.bf16 %v1565_v40  ;;  %v1372_v40 = vpack.c.bf16 %v1308_v25, %v1308_v25  ;;  %v1435_v24 = vunpack.c.l.bf16 %v1371_v31  ;;  %v1242_v4 = vunpack.c.l.bf16 %v1178_v60 }
 0x170   : > { %v6347_v33 = vmul.f32 0.13378906, %v6292_v46  ;;  %v6349_v25 = vunpack.c.l.bf16 %v952_v2  ;;  %v6352_v31 = vunpack.c.l.bf16 %v1526_v21  ;;  %v765_v36 = vpack.c.bf16 %v627_v17, %v627_v17 }
 0x171   : > { %v1693_v14 = vmul.f32 0.796875, %v1629_v8  ;;  %v1499_v8 = vadd.f32 %v1435_v24, %v6211_v63  ;;  %v1758_v37 = vpack.c.bf16 %v1694_v1, %v1694_v1  ;;  %v1271_v49 = vmul.f32 %v1207_v13, %v6253_v32 }
 0x172   : > { %9084 = vst [vmem:[#allocation55_spill] sm:$0xff] %v6352_v31  ;;  %v1369_v60 = vpack.c.bf16 %v1305_v62, %v1305_v62  ;;  %v889_v56 = vmul.f32 %v6342_v18, %v6342_v18  ;;  %v766_v6 = vpack.c.bf16 %v629_v7, %v629_v7  ;;  %v1306_v46 = vmul.f32 %v1242_v4, %v6265_v41 }
 0x173   : > { %v1757_v58 = vpack.c.bf16 %v1693_v14, %v1693_v14  ;;  %v2692_v3 = vpack.c.bf16 %v2628_v10, %v2628_v10  ;;  %v6360_v15 = vadd.f32 %v1432_v39, %v6215_v11  ;;  %v622_v17 = vadd.f32 %v5982_v9, %v6233_v54 }
 0x174   : > { %v2693_v24 = vpack.c.bf16 %v2629_v27, %v2629_v27  ;;  %v6366_v62 = vmul.f32 0.044677734, %v6349_v25  ;;  %v1563_v13 = vpack.c.bf16 %v1499_v8, %v1499_v8  ;;  %v6368_v14 = vunpack.c.l.bf16 %v765_v36 }
 0x175   : > { %v1821_v2 = vunpack.c.l.bf16 %v1757_v58  ;;  %v1335_v7 = vpack.c.bf16 %v1271_v49, %v1271_v49  ;;  %v1433_v4 = vunpack.c.l.bf16 %v1369_v60  ;;  %v6370_v10 = vunpack.c.l.bf16 %v766_v6 }
 0x176   : > { %v1370_v1 = vpack.c.bf16 %v1306_v46, %v1306_v46  ;;  %v953_v58 = vpack.c.bf16 %v889_v56, %v889_v56  ;;  %v2757_v8 = vunpack.c.l.bf16 %v2693_v24  ;;  %v1627_v49 = vunpack.c.l.bf16 %v1563_v13 }
 0x177   : > { %5369 = vtanh.f32 %v1821_v2  ;;  %v6380_v60 = vadd.f32 %v5982_v9, %v6189_v53  ;;  %v893_v6 = vmul.f32 %v6368_v14, %v6368_v14  ;;  %v6384_v46 = vunpack.c.l.bf16 %v1335_v7 }
 0x178   : > { %v1497_v56 = vadd.f32 %v1433_v4, %v6249_v57  ;;  %v2205_v2 = vmul.f32 0.5, %v6149_v38  ;;  %v2206_v24 = vmul.f32 0.5, %v6166_v23  ;;  %v2821_v36 = vadd.f32 1.0, %v2757_v8 }
 0x179   : > { %675 = vmatmul.bf16.gmra.mxu0 %v499_v59  ;;  %v6338_v59 = vunpack.c.l.bf16 %v2654_v52  ;;  %v1436_v52 = vunpack.c.l.bf16 %v1372_v40  ;;  %v1822_v40 = vunpack.c.l.bf16 %v1758_v37  ;;  %v763_v37 = vpack.c.bf16 %v622_v17, %v622_v17 }
 0x17a   : > { %v6390_v17 = vunpack.c.l.bf16 %v953_v58  ;;  %v1691_v54 = vmul.f32 0.796875, %v1627_v49  ;;  %v957_v35 = vpack.c.bf16 %v893_v6, %v893_v6  ;;  %v1561_v38 = vpack.c.bf16 %v1497_v56, %v1497_v56 }
 0x17b   : > { %9083 = vst [vmem:[#allocation54_spill] sm:$0xff] %v6338_v59  ;;  %v1500_v21 = vadd.f32 %v1436_v52, %v6229_v20  ;;  %5371 = vtanh.f32 %v1822_v40  ;;  %v2756_v52 = vunpack.c.l.bf16 %v2692_v3  ;;  %v894_v3 = vmul.f32 %v6370_v10, %v6370_v10 }
 0x17c   : > { %v6393_v39 = vunpack.c.l.bf16 %v763_v37  ;;  %v2269_v58 = vpack.c.bf16 %v2205_v2, %v2205_v2  ;;  %v2885_v49 = vpack.c.bf16 %v2821_v36, %v2821_v36  ;;  %v6400_v42 = vunpack.c.l.bf16 %v957_v35  ;;  %v6409_v35 = vld [vmem:[%s8846_s2] ss:$0 sm:$0xff] }
 0x17d   : > { %v1564_v27 = vpack.c.bf16 %v1500_v21, %v1500_v21  ;;  %v5370_v40 = vpop.eup %5369  ;;  %v1434_v21 = vunpack.c.l.bf16 %v1370_v1  ;;  %v2820_v9 = vadd.f32 1.0, %v2756_v52  ;;  %v958_v16 = vpack.c.bf16 %v894_v3, %v894_v3 }
 0x17e   : > { %v1949_v7 = vpack.c.bf16 %v5370_v40, %v5370_v40  ;;  %v2270_v52 = vpack.c.bf16 %v2206_v24, %v2206_v24  ;;  %v891_v37 = vmul.f32 %v6393_v39, %v6393_v39  ;;  %v1755_v40 = vpack.c.bf16 %v1691_v54, %v1691_v54  ;;  %9085 = vst [vmem:[#allocation56_spill] sm:$0xff] %v6400_v42 }
 0x17f   : > { %v1628_v13 = vunpack.c.l.bf16 %v1564_v27  ;;  %v1498_v61 = vadd.f32 %v1434_v21, %v6265_v41  ;;  %v2884_v51 = vpack.c.bf16 %v2820_v9, %v2820_v9  ;;  %v6402_v56 = vunpack.c.l.bf16 %v958_v16 }
 0x180   : > { %v2013_v1 = vunpack.c.l.bf16 %v1949_v7  ;;  %v2333_v2 = vunpack.c.l.bf16 %v2269_v58  ;;  %v2949_v5 = vunpack.c.l.bf16 %v2885_v49  ;;  %v624_v16 = vadd.f32 %v6409_v35, %v6267_v50 }
 0x181   : > { %v5372_v53 = vpop.eup %5371  ;;  %v1692_v27 = vmul.f32 0.796875, %v1628_v13  ;;  %9086 = vst [vmem:[#allocation57_spill] sm:$0xff] %v6402_v56  ;;  %v2948_v24 = vunpack.c.l.bf16 %v2884_v51  ;;  %v1085_v54 = vmul.f32 0.044677734, %v6400_v42  ;;  %v1086_v51 = vmul.f32 0.044677734, %v6402_v56 }
 0x182   : > { %v1950_v59 = vpack.c.bf16 %v5372_v53, %v5372_v53  ;;  %v2077_v8 = vadd.f32 1.0, %v2013_v1  ;;  %v3268_v53 = vmul.f32 %v2013_v1, %v2013_v1  ;;  %v764_v31 = vpack.c.bf16 %v624_v16, %v624_v16 }
 0x183   : > { %v1756_v13 = vpack.c.bf16 %v1692_v27, %v1692_v27  ;;  %v1625_v27 = vunpack.c.l.bf16 %v1561_v38  ;;  %v3012_v49 = vmul.f32 0.796875, %v2948_v24  ;;  %v1149_v55 = vpack.c.bf16 %v1085_v54, %v1085_v54 }
 0x184   : > { %v2014_v23 = vunpack.c.l.bf16 %v1950_v59  ;;  %v2141_v3 = vpack.c.bf16 %v2077_v8, %v2077_v8  ;;  %v2334_v59 = vunpack.c.l.bf16 %v2270_v52  ;;  %v3332_v9 = vpack.c.bf16 %v3268_v53, %v3268_v53 }
 0x185   : > { %v1819_v52 = vunpack.c.l.bf16 %v1755_v40  ;;  %v955_v53 = vpack.c.bf16 %v891_v37, %v891_v37  ;;  %v1820_v50 = vunpack.c.l.bf16 %v1756_v13  ;;  %v1150_v42 = vpack.c.bf16 %v1086_v51, %v1086_v51 }
 0x186   : > { %v2078_v6 = vadd.f32 1.0, %v2014_v23  ;;  %v3269_v7 = vmul.f32 %v2014_v23, %v2014_v23  ;;  %v6404_v4 = vunpack.c.l.bf16 %v2141_v3  ;;  %v3396_v1 = vunpack.c.l.bf16 %v3332_v9 }
 0x187   : > { %v3013_v3 = vmul.f32 0.796875, %v2949_v5  ;;  %v1562_v9 = vpack.c.bf16 %v1498_v61, %v1498_v61  ;;  %5373 = vtanh.f32 %v1819_v52  ;;  %v9088_v40 = vpack.c.bf16 %v6360_v15, %v6360_v15 }
 0x188   : > { %v2142_v21 = vpack.c.bf16 %v2078_v6, %v2078_v6  ;;  %9087 = vst [vmem:[#allocation58_spill] sm:$0xff] %v6404_v4  ;;  %v3333_v47 = vpack.c.bf16 %v3269_v7, %v3269_v7  ;;  %v2461_v58 = vmul.f32 %v6404_v4, %v2333_v2  ;;  %v3460_v6 = vsub.f32 1.0, %v3396_v1 }
 0x189   : > { %v1689_v4 = vmul.f32 0.796875, %v1625_v27  ;;  %5375 = vtanh.f32 %v1820_v50  ;;  %v6422_v37 = vunpack.c.l.bf16 %v9088_v40  ;;  %v6424_v5 = vunpack.c.l.bf16 %v955_v53 }
 0x18a   : > { %v6414_v36 = vunpack.c.l.bf16 %v2142_v21  ;;  %v3397_v23 = vunpack.c.l.bf16 %v3333_v47  ;;  %v3524_v34 = vpack.c.bf16 %v3460_v6, %v3460_v6  ;;  %v3076_v47 = vpack.c.bf16 %v3012_v49, %v3012_v49 }
 0x18b   : > { %v3077_v24 = vpack.c.bf16 %v3013_v3, %v3013_v3  ;;  %v6427_v16 = vmul.f32 0.044677734, %v6390_v17  ;;  %v6429_v61 = vunpack.c.l.bf16 %v764_v31  ;;  %v1213_v54 = vunpack.c.l.bf16 %v1149_v55 }
 0x18c   : > { %v2462_v8 = vmul.f32 %v6414_v36, %v2334_v59  ;;  %v3461_v7 = vsub.f32 1.0, %v3397_v23  ;;  %v3588_v38 = vunpack.c.l.bf16 %v3524_v34  ;;  %v1626_v51 = vunpack.c.l.bf16 %v1562_v9 }
 0x18d   : > { %v9089_v34 = vpack.c.bf16 %v6380_v60, %v6380_v60  ;;  %v1214_v15 = vunpack.c.l.bf16 %v1150_v42  ;;  %v1753_v52 = vpack.c.bf16 %v1689_v4, %v1689_v4  ;;  %v5374_v49 = vpop.eup %5373  ;;  %v6438_v6 = vmul.f32 0.044677734, %v6424_v5 }
 0x18e   : > { %v2502_v21 = vpack.c.bf16 %v2462_v8, %v2461_v58  ;;  %v3525_v56 = vpack.c.bf16 %v3461_v7, %v3461_v7  ;;  %v3652_v1 = vmul.f32 %v3588_v38, %v2333_v2  ;;  %v3844_v8 = vunpack.c.l.bf16 %v3076_v47 }
 0x18f   : > { %v6434_v58 = vunpack.c.l.bf16 %v9089_v34  ;;  %v3845_v55 = vunpack.c.l.bf16 %v3077_v24  ;;  %v2204_v2 = vmul.f32 0.5, %v6229_v20  ;;  %v5376_v53 = vpop.eup %5375  ;;  %v892_v60 = vmul.f32 %v6429_v61, %v6429_v61 }
 0x190   : > { %2554 = vmatpush.bf16.msra.mxu3 %v2502_v21  ;;  %v3589_v13 = vunpack.c.l.bf16 %v3525_v56  ;;  %v3716_v27 = vpack.c.bf16 %v3652_v1, %v3652_v1  ;;  %v2203_v56 = vmul.f32 0.5, %v6211_v63  ;;  %v1277_v42 = vmul.f32 %v1213_v54, %v6368_v14 }
 0x191   : > { %v1947_v4 = vpack.c.bf16 %v5374_v49, %v5374_v49  ;;  %v1278_v3 = vmul.f32 %v1214_v15, %v6370_v10  ;;  %v1948_v63 = vpack.c.bf16 %v5376_v53, %v5376_v53  ;;  %v1690_v50 = vmul.f32 0.796875, %v1626_v51 }
 0x192   : > { %v3653_v23 = vmul.f32 %v3589_v13, %v2334_v59  ;;  %v3780_v59 = vunpack.c.l.bf16 %v3716_v27  ;;  %v2267_v47 = vpack.c.bf16 %v2203_v56, %v2203_v56  ;;  %v1817_v38 = vunpack.c.l.bf16 %v1753_v52 }
 0x193   : > { %v2011_v9 = vunpack.c.l.bf16 %v1947_v4  ;;  %v2012_v20 = vunpack.c.l.bf16 %v1948_v63  ;;  %v2268_v24 = vpack.c.bf16 %v2204_v2, %v2204_v2  ;;  %v1754_v13 = vpack.c.bf16 %v1690_v50, %v1690_v50 }
 0x194   : > { %v3717_v31 = vpack.c.bf16 %v3653_v23, %v3653_v23  ;;  %v6445_v21 = vmul.f32 %v3844_v8, %v3780_v59  ;;  %v956_v1 = vpack.c.bf16 %v892_v60, %v892_v60  ;;  %v1341_v34 = vpack.c.bf16 %v1277_v42, %v1277_v42 }
 0x195   : > { %v2075_v54 = vadd.f32 1.0, %v2011_v9  ;;  %v3266_v23 = vmul.f32 %v2011_v9, %v2011_v9  ;;  %v2076_v27 = vadd.f32 1.0, %v2012_v20  ;;  %v3267_v49 = vmul.f32 %v2012_v20, %v2012_v20 }
 0x196   : > { %v3781_v7 = vunpack.c.l.bf16 %v3717_v31  ;;  %9090 = vst [vmem:[#allocation59_spill] sm:$0xff] %v6445_v21  ;;  %v1818_v15 = vunpack.c.l.bf16 %v1754_v13  ;;  %5377 = vtanh.f32 %v1817_v38  ;;  %v1342_v31 = vpack.c.bf16 %v1278_v3, %v1278_v3 }
 0x197   : > { %v2139_v51 = vpack.c.bf16 %v2075_v54, %v2075_v54  ;;  %v2331_v8 = vunpack.c.l.bf16 %v2267_v47  ;;  %v3330_v53 = vpack.c.bf16 %v3266_v23, %v3266_v23  ;;  %v2140_v59 = vpack.c.bf16 %v2076_v27, %v2076_v27 }
 0x198   : > { %v6447_v40 = vmul.f32 %v3845_v55, %v3781_v7  ;;  %v2332_v56 = vunpack.c.l.bf16 %v2268_v24  ;;  %v3331_v52 = vpack.c.bf16 %v3267_v49, %v3267_v49  ;;  %5379 = vtanh.f32 %v1818_v15 }
 0x199   : > { %v9092_v55 = vpack.c.bf16 %v6366_v62, %v6366_v62  ;;  %v1405_v60 = vunpack.c.l.bf16 %v1341_v34  ;;  %v6452_v42 = vunpack.c.l.bf16 %v2139_v51  ;;  %v3394_v4 = vunpack.c.l.bf16 %v3330_v53 }
 0x19a   : > { %9091 = vst [vmem:[#allocation60_spill] sm:$0xff] %v6447_v40  ;;  %v6456_v7 = vadd.f32 %v6384_v46, %v6253_v32  ;;  %v1145_v3 = vpack.c.bf16 %v6427_v16, %v6427_v16  ;;  %v6460_v63 = vunpack.c.l.bf16 %v2140_v59  ;;  %v3395_v50 = vunpack.c.l.bf16 %v3331_v52 }
 0x19b   : > { %v1208_v2 = vunpack.c.l.bf16 %v9092_v55  ;;  %v6462_v9 = vunpack.c.l.bf16 %v956_v1  ;;  %v1406_v47 = vunpack.c.l.bf16 %v1342_v31  ;;  %v2459_v62 = vmul.f32 %v6452_v42, %v2331_v8 }
 0x19c   : > { %v3458_v38 = vsub.f32 1.0, %v3394_v4  ;;  %v5378_v20 = vpop.eup %5377  ;;  %v890_v24 = vmul.f32 %v6434_v58, %v6434_v58  ;;  %v1147_v46 = vpack.c.bf16 %v6438_v6, %v6438_v6  ;;  %v2460_v13 = vmul.f32 %v6460_v63, %v2332_v56 }
 0x19d   : > { %v3459_v34 = vsub.f32 1.0, %v3395_v50  ;;  %v6471_v16 = vmul.f32 %v1208_v2, %v6312_v48  ;;  %v1469_v1 = vadd.f32 %v1405_v60, %v6368_v14  ;;  %v2201_v23 = vmul.f32 0.5, %v6249_v57 }
 0x19e   : > { %v3522_v54 = vpack.c.bf16 %v3458_v38, %v3458_v38  ;;  %v5380_v27 = vpop.eup %5379  ;;  %v1209_v49 = vunpack.c.l.bf16 %v1145_v3  ;;  %v2501_v15 = vpack.c.bf16 %v2460_v13, %v2459_v62  ;;  %v2202_v51 = vmul.f32 0.5, %v6265_v41 }
 0x19f   : > { %v3523_v31 = vpack.c.bf16 %v3459_v34, %v3459_v34  ;;  %v1084_v53 = vmul.f32 0.044677734, %v6462_v9  ;;  %v1470_v6 = vadd.f32 %v1406_v47, %v6370_v10  ;;  %v1945_v52 = vpack.c.bf16 %v5378_v20, %v5378_v20 }
 0x1a0   : > { %v3586_v59 = vunpack.c.l.bf16 %v3522_v54  ;;  %v954_v55 = vpack.c.bf16 %v890_v24, %v890_v24  ;;  %v1211_v2 = vunpack.c.l.bf16 %v1147_v46  ;;  %2555 = vmatpush.bf16.msra.mxu3 %v2501_v15  ;;  %v1946_v60 = vpack.c.bf16 %v5380_v27, %v5380_v27 }
 0x1a1   : > { %v3587_v4 = vunpack.c.l.bf16 %v3523_v31  ;;  %v1533_v50 = vpack.c.bf16 %v1469_v1, %v1469_v1  ;;  %v2009_v57 = vunpack.c.l.bf16 %v1945_v52  ;;  %v2265_v3 = vpack.c.bf16 %v2201_v23, %v2201_v23 }
 0x1a2   : > { %v6478_v38 = vmul.f32 %v3586_v59, %v2331_v8  ;;  %v1527_v62 = vpack.c.bf16 %v6456_v7, %v6456_v7  ;;  %v2010_v13 = vunpack.c.l.bf16 %v1946_v60  ;;  %v2266_v34 = vpack.c.bf16 %v2202_v51, %v2202_v51 }
 0x1a3   : > { %v6482_v41 = vmul.f32 %v3587_v4, %v2332_v56  ;;  %v1273_v47 = vmul.f32 %v1209_v49, %v6342_v18  ;;  %v1148_v20 = vpack.c.bf16 %v1084_v53, %v1084_v53  ;;  %v1534_v24 = vpack.c.bf16 %v1470_v6, %v1470_v6 }
 0x1a4   : > { %v2073_v46 = vadd.f32 1.0, %v2009_v57  ;;  %v6485_v54 = vunpack.c.l.bf16 %v954_v55  ;;  %v2074_v27 = vadd.f32 1.0, %v2010_v13  ;;  %v3264_v1 = vmul.f32 %v2009_v57, %v2009_v57 }
 0x1a5   : > { %v3265_v8 = vmul.f32 %v2010_v13, %v2010_v13  ;;  %v1275_v15 = vmul.f32 %v1211_v2, %v6393_v39  ;;  %v1597_v23 = vunpack.c.l.bf16 %v1533_v50  ;;  %v2329_v59 = vunpack.c.l.bf16 %v2265_v3 }
 0x1a6   : > { %v2137_v31 = vpack.c.bf16 %v2073_v46, %v2073_v46  ;;  %v2138_v7 = vpack.c.bf16 %v2074_v27, %v2074_v27  ;;  %v2330_v56 = vunpack.c.l.bf16 %v2266_v34  ;;  %v3328_v52 = vpack.c.bf16 %v3264_v1, %v3264_v1 }
 0x1a7   : > { %v3329_v4 = vpack.c.bf16 %v3265_v8, %v3265_v8  ;;  %v1212_v51 = vunpack.c.l.bf16 %v1148_v20  ;;  %v1598_v60 = vunpack.c.l.bf16 %v1534_v24  ;;  %v1688_v53 = vmul.f32 0.796875, %v6422_v37 }
 0x1a8   : > { %v6488_v49 = vunpack.c.l.bf16 %v2137_v31  ;;  %v1082_v6 = vmul.f32 0.044677734, %v6485_v54  ;;  %v6492_v55 = vunpack.c.l.bf16 %v2138_v7  ;;  %v3392_v57 = vunpack.c.l.bf16 %v3328_v52  ;;  %v631_v7 = vpop.f32.mrf.mxu0 }
 0x1a9   : > { %v3393_v13 = vunpack.c.l.bf16 %v3329_v4  ;;  %v1339_v2 = vpack.c.bf16 %v1275_v15, %v1275_v15  ;;  %v1661_v50 = vmul.f32 0.796875, %v1597_v23  ;;  %v9095_v34 = vpack.c.bf16 %v6323_v22, %v6323_v22 }
 0x1aa   : > { %9093 = vst [vmem:[#allocation61_spill] sm:$0xff] %v6488_v49  ;;  %v2457_v3 = vmul.f32 %v6488_v49, %v2329_v59  ;;  %v1336_v20 = vpack.c.bf16 %v6471_v16, %v6471_v16  ;;  %v2458_v24 = vmul.f32 %v6492_v55, %v2330_v56  ;;  %v3456_v37 = vsub.f32 1.0, %v3392_v57 }
 0x1ab   : > { %9094 = vst [vmem:[#allocation62_spill] sm:$0xff] %v6492_v55  ;;  %v1815_v46 = vunpack.c.l.bf16 %v9095_v34  ;;  %v3457_v27 = vsub.f32 1.0, %v3393_v13  ;;  %v1337_v1 = vpack.c.bf16 %v1273_v47, %v1273_v47  ;;  %v1276_v8 = vmul.f32 %v1212_v51, %v6429_v61 }
 0x1ac   : > { %v1662_v31 = vmul.f32 0.796875, %v1598_v60  ;;  %v1752_v15 = vpack.c.bf16 %v1688_v53, %v1688_v53  ;;  %v1146_v23 = vpack.c.bf16 %v1082_v6, %v1082_v6  ;;  %v2500_v52 = vpack.c.bf16 %v2458_v24, %v2457_v3 }
 0x1ad   : > { %v3520_v4 = vpack.c.bf16 %v3456_v37, %v3456_v37  ;;  %v3521_v40 = vpack.c.bf16 %v3457_v27, %v3457_v27  ;;  %v1403_v21 = vunpack.c.l.bf16 %v1339_v2  ;;  %v1725_v22 = vpack.c.bf16 %v1661_v50, %v1661_v50 }
 0x1ae   : > { %v1816_v34 = vunpack.c.l.bf16 %v1752_v15  ;;  %5381 = vtanh.f32 %v1815_v46  ;;  %v1591_v49 = vunpack.c.l.bf16 %v1527_v62  ;;  %v1400_v16 = vunpack.c.l.bf16 %v1336_v20  ;;  %2556 = vmatpush.bf16.msra.mxu3 %v2500_v52 }
 0x1af   : > { %v3584_v55 = vunpack.c.l.bf16 %v3520_v4  ;;  %v3585_v57 = vunpack.c.l.bf16 %v3521_v40  ;;  %v6503_v47 = vmul.f32 0.13378906, %v6349_v25  ;;  %v1340_v51 = vpack.c.bf16 %v1276_v8, %v1276_v8 }
 0x1b0   : > { %v1726_v60 = vpack.c.bf16 %v1662_v31, %v1662_v31  ;;  %5383 = vtanh.f32 %v1816_v34  ;;  %v1401_v53 = vunpack.c.l.bf16 %v1337_v1  ;;  %v1210_v6 = vunpack.c.l.bf16 %v1146_v23  ;;  %v633_v31 = vpop.f32.mrf.mxu0 }
 0x1b1   : > { %9096 = vst [vmem:[#allocation63_spill] sm:$0xff] %v6503_v47  ;;  %v6505_v13 = vmul.f32 %v3584_v55, %v2329_v59  ;;  %v6507_v3 = vmul.f32 %v3585_v57, %v2330_v56  ;;  %v1467_v2 = vadd.f32 %v1403_v21, %v6393_v39  ;;  %v632_v62 = vadd.f32 %v6409_v35, %v631_v7 }
 0x1b2   : > { %v2199_v50 = vmul.f32 0.5, %v6121_v12  ;;  %v1789_v46 = vunpack.c.l.bf16 %v1725_v22  ;;  %v6512_v40 = vmul.f32 0.796875, %v1591_v49  ;;  %v9097_v25 = vpack.c.bf16 %v6347_v33, %v6347_v33 }
 0x1b3   : > { %v6520_v24 = vadd.f32 %v1400_v16, %v6312_v48  ;;  %v6523_v59 = vmul.f32 0.13378906, %v6309_v19  ;;  %v1404_v21 = vunpack.c.l.bf16 %v1340_v51  ;;  %v2200_v55 = vmul.f32 0.5, %v6215_v11 }
 0x1b4   : > { %v6517_v20 = vunpack.c.l.bf16 %v9097_v25  ;;  %v5382_v56 = vpop.eup %5381  ;;  %v1790_v37 = vunpack.c.l.bf16 %v1726_v60  ;;  %5385 = vtanh.f32 %v1789_v46  ;;  %v6529_v49 = vadd.f32 %v1401_v53, %v6342_v18 }
 0x1b5   : > { %9099 = vst [vmem:[#allocation65_spill] sm:$0xff] %v6523_v59  ;;  %v6532_v33 = vmul.f32 %v1210_v6, %v6434_v58  ;;  %v1943_v27 = vpack.c.bf16 %v5382_v56, %v5382_v56  ;;  %v1531_v8 = vpack.c.bf16 %v1467_v2, %v1467_v2  ;;  %v767_v19 = vpack.c.bf16 %v632_v62, %v632_v62 }
 0x1b6   : > { %9098 = vst [vmem:[#allocation64_spill] sm:$0xff] %v6517_v20  ;;  %v5384_v1 = vpop.eup %5383  ;;  %v2263_v7 = vpack.c.bf16 %v2199_v50, %v2199_v50  ;;  %5387 = vtanh.f32 %v1790_v37  ;;  %v6537_v15 = vmul.f32 0.13378906, %v6390_v17  ;;  %v1468_v34 = vadd.f32 %v1404_v21, %v6429_v61 }
 0x1b7   : > { %v1944_v23 = vpack.c.bf16 %v5384_v1, %v5384_v1  ;;  %v2007_v52 = vunpack.c.l.bf16 %v1943_v27  ;;  %v2264_v16 = vpack.c.bf16 %v2200_v55, %v2200_v55  ;;  %v1338_v17 = vpack.c.bf16 %v6532_v33, %v6532_v33 }
 0x1b8   : > { %v1595_v2 = vunpack.c.l.bf16 %v1531_v8  ;;  %v6548_v62 = vunpack.c.l.bf16 %v767_v19  ;;  %v2327_v50 = vunpack.c.l.bf16 %v2263_v7  ;;  %v1532_v55 = vpack.c.bf16 %v1468_v34, %v1468_v34 }
 0x1b9   : > { %v2008_v51 = vunpack.c.l.bf16 %v1944_v23  ;;  %v2071_v60 = vadd.f32 1.0, %v2007_v52  ;;  %v3262_v53 = vmul.f32 %v2007_v52, %v2007_v52  ;;  %v2328_v27 = vunpack.c.l.bf16 %v2264_v16 }
 0x1ba   : > { %v5386_v6 = vpop.eup %5385  ;;  %9100 = vst [vmem:[#allocation66_spill] sm:$0xff] %v6548_v62  ;;  %v2173_v23 = vmul.f32 0.5, %v6368_v14  ;;  %v1659_v33 = vmul.f32 0.796875, %v1595_v2  ;;  %v2174_v7 = vmul.f32 0.5, %v6370_v10  ;;  %v634_v14 = vadd.f32 %v6409_v35, %v633_v31 }
 0x1bb   : > { %v2072_v46 = vadd.f32 1.0, %v2008_v51  ;;  %v2135_v25 = vpack.c.bf16 %v2071_v60, %v2071_v60  ;;  %v3263_v56 = vmul.f32 %v2008_v51, %v2008_v51  ;;  %v3326_v37 = vpack.c.bf16 %v3262_v53, %v3262_v53  ;;  %v636_v53 = vpop.f32.mrf.mxu0 }
 0x1bc   : > { %v5388_v21 = vpop.eup %5387  ;;  %v1917_v1 = vpack.c.bf16 %v5386_v6, %v5386_v6  ;;  %v895_v51 = vmul.f32 %v6548_v62, %v6548_v62  ;;  %v2238_v57 = vpack.c.bf16 %v2174_v7, %v2174_v7 }
 0x1bd   : > { %v2136_v11 = vpack.c.bf16 %v2072_v46, %v2072_v46  ;;  %v6551_v52 = vunpack.c.l.bf16 %v2135_v25  ;;  %v3327_v12 = vpack.c.bf16 %v3263_v56, %v3263_v56  ;;  %v3390_v4 = vunpack.c.l.bf16 %v3326_v37 }
 0x1be   : > { %v1918_v8 = vpack.c.bf16 %v5388_v21, %v5388_v21  ;;  %v1981_v19 = vunpack.c.l.bf16 %v1917_v1  ;;  %v1596_v56 = vunpack.c.l.bf16 %v1532_v55  ;;  %v2237_v21 = vpack.c.bf16 %v2173_v23, %v2173_v23 }
 0x1bf   : > { %9101 = vst [vmem:[#allocation67_spill] sm:$0xff] %v6551_v52  ;;  %v6556_v60 = vunpack.c.l.bf16 %v2136_v11  ;;  %v2455_v34 = vmul.f32 %v6551_v52, %v2327_v50  ;;  %v3391_v16 = vunpack.c.l.bf16 %v3327_v12  ;;  %v3454_v6 = vsub.f32 1.0, %v3390_v4 }
 0x1c0   : > { %v1982_v46 = vunpack.c.l.bf16 %v1918_v8  ;;  %v2045_v25 = vadd.f32 1.0, %v1981_v19  ;;  %v637_v11 = vadd.f32 %v6409_v35, %v636_v53  ;;  %v3236_v12 = vmul.f32 %v1981_v19, %v1981_v19 }
 0x1c1   : > { %9102 = vst [vmem:[#allocation68_spill] sm:$0xff] %v6556_v60  ;;  %v2456_v2 = vmul.f32 %v6556_v60, %v2328_v27  ;;  %v3455_v37 = vsub.f32 1.0, %v3391_v16  ;;  %v3518_v10 = vpack.c.bf16 %v3454_v6, %v3454_v6  ;;  %v1686_v4 = vmul.f32 0.796875, %v6298_v30 }
 0x1c2   : > { %v2046_v1 = vadd.f32 1.0, %v1982_v46  ;;  %v2109_v22 = vpack.c.bf16 %v2045_v25, %v2045_v25  ;;  %v1660_v55 = vmul.f32 0.796875, %v1596_v56  ;;  %v3237_v16 = vmul.f32 %v1982_v46, %v1982_v46 }
 0x1c3   : > { %v2499_v20 = vpack.c.bf16 %v2456_v2, %v2455_v34  ;;  %v3519_v59 = vpack.c.bf16 %v3455_v37, %v3455_v37  ;;  %v3582_v47 = vunpack.c.l.bf16 %v3518_v10  ;;  %v3300_v23 = vpack.c.bf16 %v3236_v12, %v3236_v12 }
 0x1c4   : > { %v2110_v31 = vpack.c.bf16 %v2046_v1, %v2046_v1  ;;  %v6562_v52 = vunpack.c.l.bf16 %v2109_v22  ;;  %v2301_v25 = vunpack.c.l.bf16 %v2237_v21  ;;  %v2302_v7 = vunpack.c.l.bf16 %v2238_v57 }
 0x1c5   : > { %2557 = vmatpush.bf16.msra.mxu3 %v2499_v20  ;;  %v3583_v8 = vunpack.c.l.bf16 %v3519_v59  ;;  %v6565_v6 = vmul.f32 %v3582_v47, %v2327_v50  ;;  %v1723_v34 = vpack.c.bf16 %v1659_v33, %v1659_v33  ;;  %v3301_v19 = vpack.c.bf16 %v3237_v16, %v3237_v16 }
 0x1c6   : > { %v6567_v60 = vunpack.c.l.bf16 %v2110_v31  ;;  %v3364_v2 = vunpack.c.l.bf16 %v3300_v23  ;;  %v2429_v22 = vmul.f32 %v6562_v52, %v2301_v25  ;;  %v1750_v56 = vpack.c.bf16 %v1686_v4, %v1686_v4 }
 0x1c7   : > { %v6569_v53 = vmul.f32 %v3583_v8, %v2328_v27  ;;  %v9103_v20 = vpack.c.bf16 %v6270_v44, %v6270_v44  ;;  %v1402_v47 = vunpack.c.l.bf16 %v1338_v17  ;;  %v959_v50 = vpack.c.bf16 %v895_v51, %v895_v51 }
 0x1c8   : > { %v2430_v30 = vmul.f32 %v6567_v60, %v2302_v7  ;;  %v3365_v46 = vunpack.c.l.bf16 %v3301_v19  ;;  %v3428_v57 = vsub.f32 1.0, %v3364_v2  ;;  %v1724_v37 = vpack.c.bf16 %v1660_v55, %v1660_v55 }
 0x1c9   : > { %v1813_v59 = vunpack.c.l.bf16 %v9103_v20  ;;  %v768_v21 = vpack.c.bf16 %v634_v14, %v634_v14  ;;  %v769_v33 = vpack.c.bf16 %v637_v11, %v637_v11  ;;  %v2626_v10 = vmul.f32 0.13378906, %v6255_v28 }
 0x1ca   : > { %v2486_v27 = vpack.c.bf16 %v2430_v30, %v2429_v22  ;;  %v2627_v1 = vmul.f32 0.13378906, %v6274_v29  ;;  %v3429_v12 = vsub.f32 1.0, %v3365_v46  ;;  %v3492_v31 = vpack.c.bf16 %v3428_v57, %v3428_v57 }
 0x1cb   : > { %v9104_v4 = vpack.c.bf16 %v6529_v49, %v6529_v49  ;;  %v1814_v44 = vunpack.c.l.bf16 %v1750_v56  ;;  %5389 = vtanh.f32 %v1813_v59  ;;  %v1787_v17 = vunpack.c.l.bf16 %v1723_v34 }
 0x1cc   : > { %2528 = vmatpush.bf16.msrb.mxu1 %v2486_v27  ;;  %v1466_v51 = vadd.f32 %v1402_v47, %v6434_v58  ;;  %v6582_v55 = vunpack.c.l.bf16 %v959_v50  ;;  %v3493_v14 = vpack.c.bf16 %v3429_v12, %v3429_v12  ;;  %v3556_v11 = vunpack.c.l.bf16 %v3492_v31  ;;  %v638_v12 = vpop.f32.mrf.mxu0 }
 0x1cd   : > { %v1593_v8 = vunpack.c.l.bf16 %v9104_v4  ;;  %v6584_v16 = vunpack.c.l.bf16 %v768_v21  ;;  %v6586_v28 = vunpack.c.l.bf16 %v769_v33  ;;  %5391 = vtanh.f32 %v1814_v44 }
 0x1ce   : > { %v1788_v29 = vunpack.c.l.bf16 %v1724_v37  ;;  %v2656_v49 = vpack.c.bf16 %v6537_v15, %v6537_v15  ;;  %v2690_v23 = vpack.c.bf16 %v2626_v10, %v2626_v10  ;;  %v3557_v19 = vunpack.c.l.bf16 %v3493_v14 }
 0x1cf   : > { %9105 = vst [vmem:[#allocation69_spill] sm:$0xff] %v6584_v16  ;;  %v6590_v2 = vmul.f32 %v3556_v11, %v2301_v25  ;;  %v6593_v34 = vmul.f32 0.13378906, %v6485_v54  ;;  %v2691_v22 = vpack.c.bf16 %v2627_v1, %v2627_v1  ;;  %v2197_v30 = vmul.f32 0.5, %v6065_v43 }
 0x1d0   : > { %9106 = vst [vmem:[#allocation70_spill] sm:$0xff] %v6586_v28  ;;  %5393 = vtanh.f32 %v1787_v17  ;;  %v6596_v56 = vmul.f32 0.796875, %v1593_v8  ;;  %v1530_v20 = vpack.c.bf16 %v1466_v51, %v1466_v51  ;;  %v6599_v59 = vmul.f32 0.13378906, %v6424_v5 }
 0x1d1   : > { %9107 = vst [vmem:[#allocation71_spill] sm:$0xff] %v6593_v34  ;;  %v6601_v47 = vmul.f32 %v3557_v19, %v2302_v7  ;;  %v5390_v15 = vpop.eup %5389  ;;  %v1087_v50 = vmul.f32 0.044677734, %v6582_v55  ;;  %v896_v25 = vmul.f32 %v6584_v16, %v6584_v16  ;;  %v897_v54 = vmul.f32 %v6586_v28, %v6586_v28 }
 0x1d2   : > { %5395 = vtanh.f32 %v1788_v29  ;;  %v9108_v43 = vpack.c.bf16 %v6520_v24, %v6520_v24  ;;  %v6613_v57 = vunpack.c.l.bf16 %v2656_v49  ;;  %v1941_v5 = vpack.c.bf16 %v5390_v15, %v5390_v15 }
 0x1d3   : > { %v2198_v7 = vmul.f32 0.5, %v6105_v45  ;;  %v5392_v37 = vpop.eup %5391  ;;  %v6616_v21 = vunpack.c.l.bf16 %v2690_v23  ;;  %v6620_v27 = vunpack.c.l.bf16 %v2691_v22  ;;  %v2261_v10 = vpack.c.bf16 %v2197_v30, %v2197_v30 }
 0x1d4   : > { %v6611_v46 = vunpack.c.l.bf16 %v9108_v43  ;;  %9109 = vst [vmem:[#allocation72_spill] sm:$0xff] %v6613_v57  ;;  %v1721_v1 = vpack.c.bf16 %v6596_v56, %v6596_v56  ;;  %v1942_v31 = vpack.c.bf16 %v5392_v37, %v5392_v37  ;;  %v2005_v4 = vunpack.c.l.bf16 %v1941_v5 }
 0x1d5   : > { %9110 = vst [vmem:[#allocation73_spill] sm:$0xff] %v6616_v21  ;;  %v1594_v45 = vunpack.c.l.bf16 %v1530_v20  ;;  %v1151_v44 = vpack.c.bf16 %v1087_v50, %v1087_v50  ;;  %v960_v17 = vpack.c.bf16 %v896_v25, %v896_v25  ;;  %v961_v51 = vpack.c.bf16 %v897_v54, %v897_v54 }
 0x1d6   : > { %9111 = vst [vmem:[#allocation74_spill] sm:$0xff] %v6620_v27  ;;  %v5394_v8 = vpop.eup %5393  ;;  %v2006_v14 = vunpack.c.l.bf16 %v1942_v31  ;;  %v2069_v11 = vadd.f32 1.0, %v2005_v4  ;;  %v2262_v29 = vpack.c.bf16 %v2198_v7, %v2198_v7  ;;  %v3260_v49 = vmul.f32 %v2005_v4, %v2005_v4 }
 0x1d7   : > { %v6627_v19 = vadd.f32 %v6409_v35, %v638_v12  ;;  %v2325_v22 = vunpack.c.l.bf16 %v2261_v10  ;;  %v1915_v30 = vpack.c.bf16 %v5394_v8, %v5394_v8  ;;  %v2171_v56 = vmul.f32 0.5, %v6393_v39 }
 0x1d8   : > { %v5396_v23 = vpop.eup %5395  ;;  %v2070_v15 = vadd.f32 1.0, %v2006_v14  ;;  %v2133_v43 = vpack.c.bf16 %v2069_v11, %v2069_v11  ;;  %v3261_v5 = vmul.f32 %v2006_v14, %v2006_v14  ;;  %v2172_v20 = vmul.f32 0.5, %v6429_v61 }
 0x1d9   : > { %v1215_v50 = vunpack.c.l.bf16 %v1151_v44  ;;  %v3324_v25 = vpack.c.bf16 %v3260_v49, %v3260_v49  ;;  %v1916_v54 = vpack.c.bf16 %v5396_v23, %v5396_v23  ;;  %v1979_v37 = vunpack.c.l.bf16 %v1915_v30 }
 0x1da   : > { %v2134_v31 = vpack.c.bf16 %v2070_v15, %v2070_v15  ;;  %v2326_v7 = vunpack.c.l.bf16 %v2262_v29  ;;  %v6631_v4 = vunpack.c.l.bf16 %v2133_v43  ;;  %v3325_v33 = vpack.c.bf16 %v3261_v5, %v3261_v5 }
 0x1db   : > { %v6633_v12 = vunpack.c.l.bf16 %v960_v17  ;;  %v3388_v10 = vunpack.c.l.bf16 %v3324_v25  ;;  %v1980_v8 = vunpack.c.l.bf16 %v1916_v54  ;;  %v2043_v24 = vadd.f32 1.0, %v1979_v37 }
 0x1dc   : > { %v6635_v39 = vunpack.c.l.bf16 %v2134_v31  ;;  %v2453_v14 = vmul.f32 %v6631_v4, %v2325_v22  ;;  %v2235_v11 = vpack.c.bf16 %v2171_v56, %v2171_v56  ;;  %v2236_v61 = vpack.c.bf16 %v2172_v20, %v2172_v20 }
 0x1dd   : > { %v3389_v44 = vunpack.c.l.bf16 %v3325_v33  ;;  %v3452_v49 = vsub.f32 1.0, %v3388_v10  ;;  %v2044_v23 = vadd.f32 1.0, %v1980_v8  ;;  %v2107_v30 = vpack.c.bf16 %v2043_v24, %v2043_v24 }
 0x1de   : > { %v6638_v15 = vunpack.c.l.bf16 %v961_v51  ;;  %v2454_v29 = vmul.f32 %v6635_v39, %v2326_v7  ;;  %v3234_v43 = vmul.f32 %v1979_v37, %v1979_v37  ;;  %v1658_v17 = vmul.f32 0.796875, %v1594_v45 }
 0x1df   : > { %v3453_v5 = vsub.f32 1.0, %v3389_v44  ;;  %v3516_v25 = vpack.c.bf16 %v3452_v49, %v3452_v49  ;;  %v2108_v54 = vpack.c.bf16 %v2044_v23, %v2044_v23  ;;  %v6641_v27 = vunpack.c.l.bf16 %v2107_v30  ;;  %v711_v30 = vpop.f32.mrf.mxu1 }
 0x1e0   : > { %v2498_v31 = vpack.c.bf16 %v2454_v29, %v2453_v14  ;;  %v2299_v21 = vunpack.c.l.bf16 %v2235_v11  ;;  %v3235_v57 = vmul.f32 %v1980_v8, %v1980_v8  ;;  %v1785_v56 = vunpack.c.l.bf16 %v1721_v1 }
 0x1e1   : > { %v3517_v20 = vpack.c.bf16 %v3453_v5, %v3453_v5  ;;  %v3580_v33 = vunpack.c.l.bf16 %v3516_v25  ;;  %v2300_v10 = vunpack.c.l.bf16 %v2236_v61  ;;  %v6643_v34 = vunpack.c.l.bf16 %v2108_v54 }
 0x1e2   : > { %v770_v24 = vpack.c.bf16 %v6627_v19, %v6627_v19  ;;  %2558 = vmatpush.bf16.msra.mxu3 %v2498_v31  ;;  %v3298_v51 = vpack.c.bf16 %v3234_v43, %v3234_v43  ;;  %v3299_v45 = vpack.c.bf16 %v3235_v57, %v3235_v57  ;;  %v1722_v37 = vpack.c.bf16 %v1658_v17, %v1658_v17 }
 0x1e3   : > { %9112 = vst [vmem:[#allocation75_spill] sm:$0xff] %v6643_v34  ;;  %v3581_v44 = vunpack.c.l.bf16 %v3517_v20  ;;  %v6647_v49 = vmul.f32 %v3580_v33, %v2325_v22  ;;  %v2427_v14 = vmul.f32 %v6641_v27, %v2299_v21  ;;  %v2428_v8 = vmul.f32 %v6643_v34, %v2300_v10 }
 0x1e4   : > { %v1279_v1 = vmul.f32 %v1215_v50, %v6548_v62  ;;  %v3362_v11 = vunpack.c.l.bf16 %v3298_v51  ;;  %v3363_v61 = vunpack.c.l.bf16 %v3299_v45  ;;  %5397 = vtanh.f32 %v1785_v56  ;;  %v9119_v51 = vld [vmem:[#allocation56_spill] sm:$0xff] }
 0x1e5   : > { %9113 = vst [vmem:[#allocation76_spill] sm:$0xff] %v6647_v49  ;;  %v9114_v23 = vpack.c.bf16 %v6599_v59, %v6599_v59  ;;  %v1088_v57 = vmul.f32 0.044677734, %v6633_v12  ;;  %v6658_v29 = vmul.f32 %v3581_v44, %v2326_v7  ;;  %v2485_v22 = vpack.c.bf16 %v2428_v8, %v2427_v14 }
 0x1e6   : > { %v6661_v43 = vmul.f32 0.13378906, %v6462_v9  ;;  %v712_v17 = vadd.f32 %v6409_v35, %v711_v30  ;;  %v3426_v50 = vsub.f32 1.0, %v3362_v11  ;;  %v3427_v5 = vsub.f32 1.0, %v3363_v61  ;;  %v9120_v11 = vld [vmem:[#allocation57_spill] sm:$0xff] }
 0x1e7   : > { %v6655_v19 = vunpack.c.l.bf16 %v9114_v23  ;;  %9116 = vst [vmem:[#allocation78_spill] sm:$0xff] %v6658_v29  ;;  %v1089_v25 = vmul.f32 0.044677734, %v6638_v15  ;;  %2529 = vmatpush.bf16.msrb.mxu1 %v2485_v22  ;;  %v1684_v59 = vmul.f32 0.796875, %v6177_v26  ;;  %v9117_v54 = vpack.c.bf16 %v6154_v0, %v6154_v0 }
 0x1e8   : > { %v1786_v56 = vunpack.c.l.bf16 %v1722_v37  ;;  %v1343_v7 = vpack.c.bf16 %v1279_v1, %v1279_v1  ;;  %v6669_v20 = vunpack.c.l.bf16 %v770_v24  ;;  %v3490_v33 = vpack.c.bf16 %v3426_v50, %v3426_v50 }
 0x1e9   : > { %9115 = vst [vmem:[#allocation77_spill] sm:$0xff] %v6655_v19  ;;  %v1811_v31 = vunpack.c.l.bf16 %v9117_v54  ;;  %v3491_v9 = vpack.c.bf16 %v3427_v5, %v3427_v5  ;;  %v6672_v45 = vmul.f32 0.13378906, %v9119_v51  ;;  %v1152_v44 = vpack.c.bf16 %v1088_v57, %v1088_v57 }
 0x1ea   : > { %9118 = vst [vmem:[#allocation79_spill] sm:$0xff] %v6669_v20  ;;  %v1748_v14 = vpack.c.bf16 %v1684_v59, %v1684_v59  ;;  %v5398_v8 = vpop.eup %5397  ;;  %v6675_v61 = vmul.f32 0.13378906, %v9120_v11  ;;  %v799_v26 = vpack.c.bf16 %v712_v17, %v712_v17  ;;  %v3554_v23 = vunpack.c.l.bf16 %v3490_v33  ;;  %v9124_v33 = vld [vmem:[#allocation26_spill] sm:$0xff]  ;;  %v9125_v11 = vld [vmem:[#allocation27_spill] sm:$0xff] }
 0x1eb   : > { %5399 = vtanh.f32 %v1811_v31  ;;  %v3555_v0 = vunpack.c.l.bf16 %v3491_v9  ;;  %v1153_v24 = vpack.c.bf16 %v1089_v25, %v1089_v25  ;;  %v1407_v30 = vunpack.c.l.bf16 %v1343_v7 }
 0x1ec   : > { %v1812_v1 = vunpack.c.l.bf16 %v1748_v14  ;;  %5401 = vtanh.f32 %v1786_v56  ;;  %v898_v22 = vmul.f32 %v6669_v20, %v6669_v20  ;;  %v6681_v57 = vmul.f32 %v3554_v23, %v2299_v21 }
 0x1ed   : > { %v6683_v50 = vmul.f32 %v3555_v0, %v2300_v10  ;;  %v1216_v17 = vunpack.c.l.bf16 %v1152_v44  ;;  %v1913_v59 = vpack.c.bf16 %v5398_v8, %v5398_v8  ;;  %v6690_v25 = vmul.f32 0.13378906, %v6582_v55  ;;  %v641_v8 = vpop.f32.mrf.mxu0 }
 0x1ee   : > { %9121 = vst [vmem:[#allocation56_spill] sm:$0xff] %v6681_v57  ;;  %5403 = vtanh.f32 %v1812_v1  ;;  %v6693_v31 = vmul.f32 0.13378906, %v6633_v12  ;;  %v6695_v56 = vunpack.c.l.bf16 %v799_v26  ;;  %v1217_v10 = vunpack.c.l.bf16 %v1153_v24 }
 0x1ef   : > { %9122 = vst [vmem:[#allocation57_spill] sm:$0xff] %v6683_v50  ;;  %v6698_v7 = vmul.f32 0.13378906, %v6638_v15  ;;  %v2195_v9 = vmul.f32 0.5, %v9124_v33  ;;  %v1977_v51 = vunpack.c.l.bf16 %v1913_v59  ;;  %v6702_v44 = vadd.f32 %v1407_v30, %v6548_v62 }
 0x1f0   : > { %9123 = vst [vmem:[#allocation80_spill] sm:$0xff] %v6695_v56  ;;  %v962_v14 = vpack.c.bf16 %v898_v22, %v898_v22  ;;  %v2196_v23 = vmul.f32 0.5, %v9125_v11  ;;  %v6706_v26 = vmul.f32 %v1216_v17, %v6584_v16  ;;  %v2169_v24 = vmul.f32 0.5, %v6342_v18 }
 0x1f1   : > { %v5400_v21 = vpop.eup %5399  ;;  %v2041_v0 = vadd.f32 1.0, %v1977_v51  ;;  %v3232_v15 = vmul.f32 %v1977_v51, %v1977_v51  ;;  %v6711_v1 = vmul.f32 %v6695_v56, %v6695_v56  ;;  %v2170_v22 = vmul.f32 0.5, %v6434_v58 }
 0x1f2   : > { %v1939_v55 = vpack.c.bf16 %v5400_v21, %v5400_v21  ;;  %v5402_v12 = vpop.eup %5401  ;;  %v6715_v21 = vmul.f32 %v1217_v10, %v6586_v28  ;;  %v6718_v11 = vadd.f32 %v6409_v35, %v641_v8  ;;  %v2259_v17 = vpack.c.bf16 %v2195_v9, %v2195_v9 }
 0x1f3   : > { %v1914_v30 = vpack.c.bf16 %v5402_v12, %v5402_v12  ;;  %v3296_v54 = vpack.c.bf16 %v3232_v15, %v3232_v15  ;;  %v2260_v51 = vpack.c.bf16 %v2196_v23, %v2196_v23  ;;  %v6720_v19 = vunpack.c.l.bf16 %v962_v14 }
 0x1f4   : > { %v2003_v59 = vunpack.c.l.bf16 %v1939_v55  ;;  %v5404_v33 = vpop.eup %5403  ;;  %v2105_v55 = vpack.c.bf16 %v2041_v0, %v2041_v0  ;;  %v2233_v12 = vpack.c.bf16 %v2169_v24, %v2169_v24  ;;  %v2234_v29 = vpack.c.bf16 %v2170_v22, %v2170_v22 }
 0x1f5   : > { %v1940_v5 = vpack.c.bf16 %v5404_v33, %v5404_v33  ;;  %v1978_v62 = vunpack.c.l.bf16 %v1914_v30  ;;  %v2323_v10 = vunpack.c.l.bf16 %v2259_v17  ;;  %v3360_v35 = vunpack.c.l.bf16 %v3296_v54 }
 0x1f6   : > { %v2067_v18 = vadd.f32 1.0, %v2003_v59  ;;  %v3258_v37 = vmul.f32 %v2003_v59, %v2003_v59  ;;  %v2324_v9 = vunpack.c.l.bf16 %v2260_v51  ;;  %v6724_v14 = vunpack.c.l.bf16 %v2105_v55 }
 0x1f7   : > { %v2004_v50 = vunpack.c.l.bf16 %v1940_v5  ;;  %v2042_v34 = vadd.f32 1.0, %v1978_v62  ;;  %v3233_v49 = vmul.f32 %v1978_v62, %v1978_v62  ;;  %v2297_v5 = vunpack.c.l.bf16 %v2233_v12  ;;  %v713_v12 = vpop.f32.mrf.mxu1 }
 0x1f8   : > { %v2131_v58 = vpack.c.bf16 %v2067_v18, %v2067_v18  ;;  %v3322_v57 = vpack.c.bf16 %v3258_v37, %v3258_v37  ;;  %9127 = vst [vmem:[#allocation27_spill] sm:$0xff] %v6724_v14  ;;  %v2298_v18 = vunpack.c.l.bf16 %v2234_v29  ;;  %v3424_v62 = vsub.f32 1.0, %v3360_v35 }
 0x1f9   : > { %v2068_v8 = vadd.f32 1.0, %v2004_v50  ;;  %v3259_v33 = vmul.f32 %v2004_v50, %v2004_v50  ;;  %v2106_v59 = vpack.c.bf16 %v2042_v34, %v2042_v34  ;;  %v3297_v30 = vpack.c.bf16 %v3233_v49, %v3233_v49 }
 0x1fa   : > { %v6722_v15 = vunpack.c.l.bf16 %v2131_v58  ;;  %v3386_v23 = vunpack.c.l.bf16 %v3322_v57  ;;  %v1656_v57 = vmul.f32 0.796875, %v6611_v46  ;;  %v2425_v50 = vmul.f32 %v6724_v14, %v2297_v5 }
 0x1fb   : > { %v2132_v0 = vpack.c.bf16 %v2068_v8, %v2068_v8  ;;  %v3323_v24 = vpack.c.bf16 %v3259_v33, %v3259_v33  ;;  %v6726_v22 = vunpack.c.l.bf16 %v2106_v59  ;;  %v3361_v17 = vunpack.c.l.bf16 %v3297_v30 }
 0x1fc   : > { %9126 = vst [vmem:[#allocation26_spill] sm:$0xff] %v6722_v15  ;;  %v3450_v37 = vsub.f32 1.0, %v3386_v23  ;;  %v2451_v51 = vmul.f32 %v6722_v15, %v2323_v10  ;;  %v991_v29 = vpack.c.bf16 %v6711_v1, %v6711_v1  ;;  %v3488_v33 = vpack.c.bf16 %v3424_v62, %v3424_v62  ;;  %v6740_v23 = vld [vmem:[%s8846_s2] ss:$0 sm:$0xff] }
 0x1fd   : > { %9128 = vst [vmem:[#allocation81_spill] sm:$0xff] %v6726_v22  ;;  %v6728_v54 = vunpack.c.l.bf16 %v2132_v0  ;;  %v3387_v58 = vunpack.c.l.bf16 %v3323_v24  ;;  %v2426_v49 = vmul.f32 %v6726_v22, %v2298_v18  ;;  %v3425_v55 = vsub.f32 1.0, %v3361_v17 }
 0x1fe   : > { %v3514_v34 = vpack.c.bf16 %v3450_v37, %v3450_v37  ;;  %v714_v46 = vadd.f32 %v6740_v23, %v713_v12  ;;  %v771_v24 = vpack.c.bf16 %v6718_v11, %v6718_v11  ;;  %v3552_v17 = vunpack.c.l.bf16 %v3488_v33 }
 0x1ff   : > { %9129 = vst [vmem:[#allocation82_spill] sm:$0xff] %v6728_v54  ;;  %v2452_v8 = vmul.f32 %v6728_v54, %v2324_v9  ;;  %v3451_v35 = vsub.f32 1.0, %v3387_v58  ;;  %v2484_v30 = vpack.c.bf16 %v2426_v49, %v2425_v50  ;;  %v3489_v0 = vpack.c.bf16 %v3425_v55, %v3425_v55 }
 0x200   : > { %v3578_v59 = vunpack.c.l.bf16 %v3514_v34  ;;  %v1090_v54 = vmul.f32 0.044677734, %v6720_v19  ;;  %v1720_v22 = vpack.c.bf16 %v1656_v57, %v1656_v57  ;;  %v1055_v15 = vunpack.c.l.bf16 %v991_v29 }
 0x201   : > { %v2497_v37 = vpack.c.bf16 %v2452_v8, %v2451_v51  ;;  %v3515_v1 = vpack.c.bf16 %v3451_v35, %v3451_v35  ;;  %2530 = vmatpush.bf16.msrb.mxu1 %v2484_v30  ;;  %v3553_v62 = vunpack.c.l.bf16 %v3489_v0  ;;  %v6748_v12 = vmul.f32 %v3552_v17, %v2297_v5 }
 0x202   : > { %v6746_v58 = vmul.f32 %v3578_v59, %v2323_v10  ;;  %v9130_v34 = vpack.c.bf16 %v6512_v40, %v6512_v40  ;;  %v2662_v11 = vpack.c.bf16 %v6690_v25, %v6690_v25  ;;  %v1344_v51 = vpack.c.bf16 %v6706_v26, %v6706_v26 }
 0x203   : > { %2559 = vmatpush.bf16.msra.mxu3 %v2497_v37  ;;  %v3579_v14 = vunpack.c.l.bf16 %v3515_v1  ;;  %v6757_v10 = vmul.f32 %v3553_v62, %v2298_v18  ;;  %v1784_v49 = vunpack.c.l.bf16 %v1720_v22  ;;  %v1345_v57 = vpack.c.bf16 %v6715_v21, %v6715_v21 }
 0x204   : > { %v1783_v50 = vunpack.c.l.bf16 %v9130_v34  ;;  %v6761_v55 = vunpack.c.l.bf16 %v771_v24  ;;  %v9132_v40 = vpack.c.bf16 %v6661_v43, %v6661_v43  ;;  %v1535_v25 = vpack.c.bf16 %v6702_v44, %v6702_v44 }
 0x205   : > { %v6763_v5 = vmul.f32 %v3579_v14, %v2324_v9  ;;  %v2663_v26 = vpack.c.bf16 %v6693_v31, %v6693_v31  ;;  %v2664_v18 = vpack.c.bf16 %v6698_v7, %v6698_v7  ;;  %v1154_v21 = vpack.c.bf16 %v1090_v54, %v1090_v54 }
 0x206   : > { %9131 = vst [vmem:[#allocation83_spill] sm:$0xff] %v6761_v55  ;;  %5405 = vtanh.f32 %v1783_v50  ;;  %v6768_v29 = vunpack.c.l.bf16 %v9132_v40  ;;  %v1119_v22 = vmul.f32 0.044677734, %v1055_v15  ;;  %v800_v8 = vpack.c.bf16 %v714_v46, %v714_v46  ;;  %v9139_v46 = vld [vmem:[#allocation55_spill] sm:$0xff] }
 0x207   : > { %5407 = vtanh.f32 %v1784_v49  ;;  %v9134_v9 = vpack.c.bf16 %v6672_v45, %v6672_v45  ;;  %v9136_v43 = vpack.c.bf16 %v6675_v61, %v6675_v61  ;;  %v1408_v44 = vunpack.c.l.bf16 %v1344_v51  ;;  %v9142_v61 = vld [vmem:[#allocation53_spill] sm:$0xff] }
 0x208   : > { %9133 = vst [vmem:[#allocation84_spill] sm:$0xff] %v6768_v29  ;;  %v6787_v31 = vmul.f32 0.13378906, %v6720_v19  ;;  %v6789_v33 = vunpack.c.l.bf16 %v2662_v11  ;;  %v1409_v7 = vunpack.c.l.bf16 %v1345_v57  ;;  %v899_v54 = vmul.f32 %v6761_v55, %v6761_v55 }
 0x209   : > { %v6779_v14 = vunpack.c.l.bf16 %v9134_v9  ;;  %v6784_v35 = vunpack.c.l.bf16 %v9136_v43  ;;  %v1654_v59 = vmul.f32 0.796875, %v9139_v46  ;;  %v1599_v45 = vunpack.c.l.bf16 %v1535_v25 }
 0x20a   : > { %9138 = vst [vmem:[#allocation87_spill] sm:$0xff] %v6789_v33  ;;  %v6794_v30 = vunpack.c.l.bf16 %v2663_v26  ;;  %v6796_v0 = vunpack.c.l.bf16 %v2664_v18  ;;  %v9143_v24 = vpack.c.bf16 %v9142_v61, %v9142_v61  ;;  %v1218_v19 = vunpack.c.l.bf16 %v1154_v21  ;;  %v716_v33 = vpop.f32.mrf.mxu1 }
 0x20b   : > { %9135 = vst [vmem:[#allocation85_spill] sm:$0xff] %v6779_v14  ;;  %v1183_v17 = vpack.c.bf16 %v1119_v22, %v1119_v22  ;;  %v6801_v62 = vunpack.c.l.bf16 %v800_v8  ;;  %v1718_v34 = vpack.c.bf16 %v1654_v59, %v1654_v59  ;;  %v1472_v50 = vadd.f32 %v1408_v44, %v6584_v16 }
 0x20c   : > { %9137 = vst [vmem:[#allocation86_spill] sm:$0xff] %v6784_v35  ;;  %v1781_v37 = vunpack.c.l.bf16 %v9143_v24  ;;  %v5406_v1 = vpop.eup %5405  ;;  %v1473_v57 = vadd.f32 %v1409_v7, %v6586_v28  ;;  %v963_v40 = vpack.c.bf16 %v899_v54, %v899_v54  ;;  %v2167_v25 = vmul.f32 0.5, %v6253_v32 }
 0x20d   : > { %9140 = vst [vmem:[#allocation55_spill] sm:$0xff] %v6794_v30  ;;  %v1911_v51 = vpack.c.bf16 %v5406_v1, %v5406_v1  ;;  %v5408_v49 = vpop.eup %5407  ;;  %v1782_v26 = vunpack.c.l.bf16 %v1718_v34  ;;  %v6808_v18 = vmul.f32 0.796875, %v1599_v45  ;;  %v2168_v8 = vmul.f32 0.5, %v6312_v48 }
 0x20e   : > { %9141 = vst [vmem:[#allocation88_spill] sm:$0xff] %v6796_v0  ;;  %5409 = vtanh.f32 %v1781_v37  ;;  %v1912_v21 = vpack.c.bf16 %v5408_v49, %v5408_v49  ;;  %v1282_v9 = vmul.f32 %v1218_v19, %v6669_v20  ;;  %v1247_v43 = vunpack.c.l.bf16 %v1183_v17  ;;  %v9148_v0 = vld [vmem:[#allocation34_spill] sm:$0xff] }
 0x20f   : > { %9144 = vst [vmem:[#allocation53_spill] sm:$0xff] %v6801_v62  ;;  %v1975_v22 = vunpack.c.l.bf16 %v1911_v51  ;;  %v6812_v44 = vmul.f32 0.13378906, %v1055_v15  ;;  %v928_v46 = vmul.f32 %v6801_v62, %v6801_v62  ;;  %v1536_v59 = vpack.c.bf16 %v1472_v50, %v1472_v50 }
 0x210   : > { %9145 = vst [vmem:[#allocation89_spill] sm:$0xff] %v6808_v18  ;;  %v1976_v7 = vunpack.c.l.bf16 %v1912_v21  ;;  %v1537_v32 = vpack.c.bf16 %v1473_v57, %v1473_v57  ;;  %v6816_v24 = vunpack.c.l.bf16 %v963_v40  ;;  %v2231_v45 = vpack.c.bf16 %v2167_v25, %v2167_v25 }
 0x211   : > { %v2039_v54 = vadd.f32 1.0, %v1975_v22  ;;  %v3230_v61 = vmul.f32 %v1975_v22, %v1975_v22  ;;  %5411 = vtanh.f32 %v1782_v26  ;;  %v2232_v34 = vpack.c.bf16 %v2168_v8, %v2168_v8 }
 0x212   : > { %v2040_v1 = vadd.f32 1.0, %v1976_v7  ;;  %v3231_v19 = vmul.f32 %v1976_v7, %v1976_v7  ;;  %v1346_v17 = vpack.c.bf16 %v1282_v9, %v1282_v9  ;;  %v1311_v15 = vmul.f32 %v1247_v43, %v6695_v56 }
 0x213   : > { %v2103_v48 = vpack.c.bf16 %v2039_v54, %v2039_v54  ;;  %v992_v51 = vpack.c.bf16 %v928_v46, %v928_v46  ;;  %v3294_v49 = vpack.c.bf16 %v3230_v61, %v3230_v61  ;;  %v1600_v57 = vunpack.c.l.bf16 %v1536_v59 }
 0x214   : > { %v5410_v37 = vpop.eup %5409  ;;  %v2104_v11 = vpack.c.bf16 %v2040_v1, %v2040_v1  ;;  %v3295_v21 = vpack.c.bf16 %v3231_v19, %v3231_v19  ;;  %v6821_v40 = vunpack.c.l.bf16 %v1537_v32  ;;  %v1091_v8 = vmul.f32 0.044677734, %v6816_v24 }
 0x215   : > { %v6819_v50 = vunpack.c.l.bf16 %v2103_v48  ;;  %v1909_v22 = vpack.c.bf16 %v5410_v37, %v5410_v37  ;;  %v3358_v26 = vunpack.c.l.bf16 %v3294_v49  ;;  %v2295_v7 = vunpack.c.l.bf16 %v2231_v45  ;;  %v9149_v45 = vld [vmem:[#allocation41_spill] sm:$0xff] }
 0x216   : > { %v2296_v9 = vunpack.c.l.bf16 %v2232_v34  ;;  %v6826_v54 = vunpack.c.l.bf16 %v2104_v11  ;;  %v1410_v46 = vunpack.c.l.bf16 %v1346_v17  ;;  %v1375_v61 = vpack.c.bf16 %v1311_v15, %v1311_v15  ;;  %v9150_v15 = vld [vmem:[#allocation49_spill] sm:$0xff] }
 0x217   : > { %9146 = vst [vmem:[#allocation90_spill] sm:$0xff] %v6819_v50  ;;  %v5412_v43 = vpop.eup %5411  ;;  %v3359_v1 = vunpack.c.l.bf16 %v3295_v21  ;;  %v3422_v48 = vsub.f32 1.0, %v3358_v26  ;;  %v6828_v19 = vunpack.c.l.bf16 %v992_v51  ;;  %v2423_v59 = vmul.f32 %v6819_v50, %v2295_v7 }
 0x218   : > { %9147 = vst [vmem:[#allocation91_spill] sm:$0xff] %v6826_v54  ;;  %v2424_v32 = vmul.f32 %v6826_v54, %v2296_v9  ;;  %v1973_v37 = vunpack.c.l.bf16 %v1909_v22  ;;  %v2165_v30 = vmul.f32 0.5, %v9148_v0  ;;  %v2166_v34 = vmul.f32 0.5, %v9149_v45  ;;  %v643_v22 = vpop.f32.mrf.mxu0 }
 0x219   : > { %v3423_v25 = vsub.f32 1.0, %v3359_v1  ;;  %v3486_v49 = vpack.c.bf16 %v3422_v48, %v3422_v48  ;;  %v1155_v11 = vpack.c.bf16 %v1091_v8, %v1091_v8  ;;  %v1910_v17 = vpack.c.bf16 %v5412_v43, %v5412_v43 }
 0x21a   : > { %v2483_v35 = vpack.c.bf16 %v2424_v32, %v2423_v59  ;;  %v1652_v21 = vmul.f32 0.796875, %v9150_v15  ;;  %v1439_v26 = vunpack.c.l.bf16 %v1375_v61  ;;  %v717_v51 = vadd.f32 %v6740_v23, %v716_v33 }
 0x21b   : > { %v3487_v14 = vpack.c.bf16 %v3423_v25, %v3423_v25  ;;  %v3550_v29 = vunpack.c.l.bf16 %v3486_v49  ;;  %v1120_v16 = vmul.f32 0.044677734, %v6828_v19  ;;  %v1974_v1 = vunpack.c.l.bf16 %v1910_v17 }
 0x21c   : > { %2531 = vmatpush.bf16.msrb.mxu1 %v2483_v35  ;;  %v2037_v48 = vadd.f32 1.0, %v1973_v37  ;;  %v3228_v0 = vmul.f32 %v1973_v37, %v1973_v37  ;;  %v2229_v8 = vpack.c.bf16 %v2165_v30, %v2165_v30  ;;  %v2230_v59 = vpack.c.bf16 %v2166_v34, %v2166_v34  ;;  %v9152_v30 = vld [vmem:[#allocation47_spill] sm:$0xff] }
 0x21d   : > { %v3551_v28 = vunpack.c.l.bf16 %v3487_v14  ;;  %v6837_v45 = vmul.f32 %v3550_v29, %v2295_v7  ;;  %v2038_v43 = vadd.f32 1.0, %v1974_v1  ;;  %v3229_v15 = vmul.f32 %v1974_v1, %v1974_v1 }
 0x21e   : > { %v2101_v32 = vpack.c.bf16 %v2037_v48, %v2037_v48  ;;  %v1716_v61 = vpack.c.bf16 %v1652_v21, %v1652_v21  ;;  %v644_v33 = vadd.f32 %v6740_v23, %v643_v22  ;;  %v801_v25 = vpack.c.bf16 %v717_v51, %v717_v51 }
 0x21f   : > { %v6840_v49 = vmul.f32 %v3551_v28, %v2296_v9  ;;  %v3292_v54 = vpack.c.bf16 %v3228_v0, %v3228_v0  ;;  %v1219_v50 = vunpack.c.l.bf16 %v1155_v11  ;;  %v2102_v35 = vpack.c.bf16 %v2038_v43, %v2038_v43 }
 0x220   : > { %v6842_v17 = vunpack.c.l.bf16 %v2101_v32  ;;  %v3293_v37 = vpack.c.bf16 %v3229_v15, %v3229_v15  ;;  %v1184_v14 = vpack.c.bf16 %v1120_v16, %v1120_v16  ;;  %v2293_v29 = vunpack.c.l.bf16 %v2229_v8 }
 0x221   : > { %v3356_v7 = vunpack.c.l.bf16 %v3292_v54  ;;  %v9153_v34 = vpack.c.bf16 %v9152_v30, %v9152_v30  ;;  %v2294_v1 = vunpack.c.l.bf16 %v2230_v59  ;;  %v6847_v21 = vunpack.c.l.bf16 %v2102_v35 }
 0x222   : > { %9151 = vst [vmem:[#allocation34_spill] sm:$0xff] %v6842_v17  ;;  %v3357_v22 = vunpack.c.l.bf16 %v3293_v37  ;;  %v1780_v51 = vunpack.c.l.bf16 %v1716_v61  ;;  %v6849_v28 = vmul.f32 0.796875, %v1600_v57  ;;  %v772_v9 = vpack.c.bf16 %v644_v33, %v644_v33 }
 0x223   : > { %v1779_v48 = vunpack.c.l.bf16 %v9153_v34  ;;  %9154 = vst [vmem:[#allocation41_spill] sm:$0xff] %v6847_v21  ;;  %v6851_v11 = vunpack.c.l.bf16 %v801_v25  ;;  %v3420_v0 = vsub.f32 1.0, %v3356_v7  ;;  %v1474_v43 = vadd.f32 %v1410_v46, %v6669_v20 }
 0x224   : > { %9155 = vst [vmem:[#allocation49_spill] sm:$0xff] %v6849_v28  ;;  %v2421_v16 = vmul.f32 %v6842_v17, %v2293_v29  ;;  %v2422_v54 = vmul.f32 %v6847_v21, %v2294_v1  ;;  %v3421_v8 = vsub.f32 1.0, %v3357_v22  ;;  %v1503_v32 = vadd.f32 %v1439_v26, %v6695_v56 }
 0x225   : > { %9156 = vst [vmem:[#allocation47_spill] sm:$0xff] %v6851_v11  ;;  %v1283_v59 = vmul.f32 %v1219_v50, %v6761_v55  ;;  %v3484_v15 = vpack.c.bf16 %v3420_v0, %v3420_v0  ;;  %5413 = vtanh.f32 %v1779_v48  ;;  %v1248_v61 = vunpack.c.l.bf16 %v1184_v14 }
 0x226   : > { %v2482_v57 = vpack.c.bf16 %v2422_v54, %v2421_v16  ;;  %v3485_v35 = vpack.c.bf16 %v3421_v8, %v3421_v8  ;;  %5415 = vtanh.f32 %v1780_v51  ;;  %v6859_v33 = vmul.f32 0.13378906, %v6816_v24 }
 0x227   : > { %v6861_v25 = vunpack.c.l.bf16 %v772_v9  ;;  %v929_v46 = vmul.f32 %v6851_v11, %v6851_v11  ;;  %v3548_v37 = vunpack.c.l.bf16 %v3484_v15  ;;  %v1538_v7 = vpack.c.bf16 %v1474_v43, %v1474_v43 }
 0x228   : > { %v9158_v50 = vpack.c.bf16 %v6787_v31, %v6787_v31  ;;  %2532 = vmatpush.bf16.msrb.mxu1 %v2482_v57  ;;  %v3549_v30 = vunpack.c.l.bf16 %v3485_v35  ;;  %v1567_v34 = vpack.c.bf16 %v1503_v32, %v1503_v32  ;;  %v9160_v24 = vpack.c.bf16 %v6812_v44, %v6812_v44 }
 0x229   : > { %9157 = vst [vmem:[#allocation92_spill] sm:$0xff] %v6861_v25  ;;  %v1347_v22 = vpack.c.bf16 %v1283_v59, %v1283_v59  ;;  %v6877_v51 = vmul.f32 %v3548_v37, %v2293_v29  ;;  %v6882_v0 = vmul.f32 0.796875, %v6821_v40  ;;  %v1312_v31 = vmul.f32 %v1248_v61, %v6801_v62  ;;  %v9165_v29 = vld [vmem:[#allocation43_spill] sm:$0xff]  ;;  %v646_v40 = vpop.f32.mrf.mxu0  ;;  %v9166_v61 = vld [vmem:[#allocation29_spill] sm:$0xff] }
 0x22a   : > { %v6870_v14 = vunpack.c.l.bf16 %v9158_v50  ;;  %v6875_v48 = vunpack.c.l.bf16 %v9160_v24  ;;  %v6885_v43 = vmul.f32 %v3549_v30, %v2294_v1  ;;  %v900_v44 = vmul.f32 %v6861_v25, %v6861_v25  ;;  %v9167_v24 = vld [vmem:[#allocation32_spill] sm:$0xff] }
 0x22b   : > { %9162 = vst [vmem:[#allocation95_spill] sm:$0xff] %v6877_v51  ;;  %v5414_v16 = vpop.eup %5413  ;;  %v993_v8 = vpack.c.bf16 %v929_v46, %v929_v46  ;;  %v1650_v32 = vmul.f32 0.796875, %v9165_v29  ;;  %v1602_v15 = vunpack.c.l.bf16 %v1538_v7  ;;  %v6893_v57 = vmul.f32 0.13378906, %v6828_v19  ;;  %v9168_v46 = vld [vmem:[#allocation40_spill] sm:$0xff] }
 0x22c   : > { %9159 = vst [vmem:[#allocation93_spill] sm:$0xff] %v6870_v14  ;;  %v5416_v59 = vpop.eup %5415  ;;  %v1907_v35 = vpack.c.bf16 %v5414_v16, %v5414_v16  ;;  %v2163_v1 = vmul.f32 0.5, %v9166_v61  ;;  %v1631_v37 = vunpack.c.l.bf16 %v1567_v34  ;;  %v1411_v50 = vunpack.c.l.bf16 %v1347_v22 }
 0x22d   : > { %9161 = vst [vmem:[#allocation94_spill] sm:$0xff] %v6875_v48  ;;  %v1908_v30 = vpack.c.bf16 %v5416_v59, %v5416_v59  ;;  %v2164_v9 = vmul.f32 0.5, %v9167_v24  ;;  %v1376_v26 = vpack.c.bf16 %v1312_v31, %v1312_v31  ;;  %v1714_v48 = vpack.c.bf16 %v1650_v32, %v1650_v32 }
 0x22e   : > { %9163 = vst [vmem:[#allocation96_spill] sm:$0xff] %v6882_v0  ;;  %v1971_v54 = vunpack.c.l.bf16 %v1907_v35  ;;  %v9169_v29 = vpack.c.bf16 %v9168_v46, %v9168_v46  ;;  %v964_v7 = vpack.c.bf16 %v900_v44, %v900_v44  ;;  %v6900_v56 = vunpack.c.l.bf16 %v993_v8 }
 0x22f   : > { %9164 = vst [vmem:[#allocation97_spill] sm:$0xff] %v6885_v43  ;;  %v647_v19 = vadd.f32 %v6740_v23, %v646_v40  ;;  %v1972_v16 = vunpack.c.l.bf16 %v1908_v30  ;;  %v2227_v61 = vpack.c.bf16 %v2163_v1, %v2163_v1  ;;  %v1778_v22 = vunpack.c.l.bf16 %v1714_v48  ;;  %v9173_v43 = vld [vmem:[#allocation24_spill] sm:$0xff] }
 0x230   : > { %v1777_v14 = vunpack.c.l.bf16 %v9169_v29  ;;  %v2035_v28 = vadd.f32 1.0, %v1971_v54  ;;  %v3226_v34 = vmul.f32 %v1971_v54, %v1971_v54  ;;  %v2228_v18 = vpack.c.bf16 %v2164_v9, %v2164_v9  ;;  %v718_v54 = vpop.f32.mrf.mxu1 }
 0x231   : > { %v2036_v59 = vadd.f32 1.0, %v1972_v16  ;;  %v3227_v24 = vmul.f32 %v1972_v16, %v1972_v16  ;;  %v6903_v31 = vmul.f32 0.796875, %v1631_v37  ;;  %v1440_v46 = vunpack.c.l.bf16 %v1376_v26 }
 0x232   : > { %5417 = vtanh.f32 %v1777_v14  ;;  %v2099_v32 = vpack.c.bf16 %v2035_v28, %v2035_v28  ;;  %v3290_v35 = vpack.c.bf16 %v3226_v34, %v3226_v34  ;;  %v6905_v44 = vunpack.c.l.bf16 %v964_v7 }
 0x233   : > { %5419 = vtanh.f32 %v1778_v22  ;;  %v2100_v8 = vpack.c.bf16 %v2036_v59, %v2036_v59  ;;  %v3291_v29 = vpack.c.bf16 %v3227_v24, %v3227_v24  ;;  %v1121_v40 = vmul.f32 0.044677734, %v6900_v56 }
 0x234   : > { %v773_v30 = vpack.c.bf16 %v647_v19, %v647_v19  ;;  %v6908_v1 = vunpack.c.l.bf16 %v2099_v32  ;;  %v3354_v48 = vunpack.c.l.bf16 %v3290_v35  ;;  %v2291_v9 = vunpack.c.l.bf16 %v2227_v61  ;;  %v9174_v32 = vld [vmem:[#allocation28_spill] sm:$0xff] }
 0x235   : > { %v2292_v16 = vunpack.c.l.bf16 %v2228_v18  ;;  %v6910_v14 = vunpack.c.l.bf16 %v2100_v8  ;;  %v3355_v37 = vunpack.c.l.bf16 %v3291_v29  ;;  %v6912_v28 = vmul.f32 0.796875, %v1602_v15 }
 0x236   : > { %9170 = vst [vmem:[#allocation43_spill] sm:$0xff] %v6908_v1  ;;  %v1475_v26 = vadd.f32 %v1411_v50, %v6761_v55  ;;  %v719_v7 = vadd.f32 %v6740_v23, %v718_v54  ;;  %v3418_v34 = vsub.f32 1.0, %v3354_v48  ;;  %v2419_v59 = vmul.f32 %v6908_v1, %v2291_v9 }
 0x237   : > { %9171 = vst [vmem:[#allocation29_spill] sm:$0xff] %v6910_v14  ;;  %v2420_v24 = vmul.f32 %v6910_v14, %v2292_v16  ;;  %v3419_v61 = vsub.f32 1.0, %v3355_v37  ;;  %v1504_v15 = vadd.f32 %v1440_v46, %v6801_v62  ;;  %v1092_v50 = vmul.f32 0.044677734, %v6905_v44 }
 0x238   : > { %9172 = vst [vmem:[#allocation32_spill] sm:$0xff] %v6912_v28  ;;  %v5418_v22 = vpop.eup %5417  ;;  %v3482_v35 = vpack.c.bf16 %v3418_v34, %v3418_v34  ;;  %v1185_v8 = vpack.c.bf16 %v1121_v40, %v1121_v40  ;;  %v6924_v29 = vunpack.c.l.bf16 %v773_v30  ;;  %v1539_v19 = vpack.c.bf16 %v1475_v26, %v1475_v26 }
 0x239   : > { %v5420_v18 = vpop.eup %5419  ;;  %v2481_v48 = vpack.c.bf16 %v2420_v24, %v2419_v59  ;;  %v3483_v54 = vpack.c.bf16 %v3419_v61, %v3419_v61  ;;  %v802_v20 = vpack.c.bf16 %v719_v7, %v719_v7  ;;  %v1905_v1 = vpack.c.bf16 %v5418_v22, %v5418_v22 }
 0x23a   : > { %v3546_v55 = vunpack.c.l.bf16 %v3482_v35  ;;  %v1906_v14 = vpack.c.bf16 %v5420_v18, %v5420_v18  ;;  %v2161_v51 = vmul.f32 0.5, %v9173_v43  ;;  %v2162_v21 = vmul.f32 0.5, %v9174_v32 }
 0x23b   : > { %2533 = vmatpush.bf16.msrb.mxu1 %v2481_v48  ;;  %v3547_v37 = vunpack.c.l.bf16 %v3483_v54  ;;  %v1568_v46 = vpack.c.bf16 %v1504_v15, %v1504_v15  ;;  %v1156_v62 = vpack.c.bf16 %v1092_v50, %v1092_v50  ;;  %v1969_v40 = vunpack.c.l.bf16 %v1905_v1  ;;  %v9179_v54 = vld [vmem:[#allocation37_spill] sm:$0xff] }
 0x23c   : > { %v6928_v17 = vmul.f32 %v3546_v55, %v2291_v9  ;;  %v1249_v30 = vunpack.c.l.bf16 %v1185_v8  ;;  %v901_v34 = vmul.f32 %v6924_v29, %v6924_v29  ;;  %v1970_v7 = vunpack.c.l.bf16 %v1906_v14 }
 0x23d   : > { %v6932_v26 = vmul.f32 %v3547_v37, %v2292_v16  ;;  %v1603_v22 = vunpack.c.l.bf16 %v1539_v19  ;;  %v6934_v59 = vunpack.c.l.bf16 %v802_v20  ;;  %v2033_v24 = vadd.f32 1.0, %v1969_v40 }
 0x23e   : > { %9175 = vst [vmem:[#allocation40_spill] sm:$0xff] %v6928_v17  ;;  %v3224_v61 = vmul.f32 %v1969_v40, %v1969_v40  ;;  %v2034_v43 = vadd.f32 1.0, %v1970_v7  ;;  %v2225_v18 = vpack.c.bf16 %v2161_v51, %v2161_v51  ;;  %v2226_v32 = vpack.c.bf16 %v2162_v21, %v2162_v21 }
 0x23f   : > { %9176 = vst [vmem:[#allocation24_spill] sm:$0xff] %v6932_v26  ;;  %v3225_v15 = vmul.f32 %v1970_v7, %v1970_v7  ;;  %v1632_v50 = vunpack.c.l.bf16 %v1568_v46  ;;  %v1220_v55 = vunpack.c.l.bf16 %v1156_v62  ;;  %v2097_v9 = vpack.c.bf16 %v2033_v24, %v2033_v24  ;;  %v9181_v46 = vld [vmem:[#allocation58_spill] sm:$0xff] }
 0x240   : > { %9177 = vst [vmem:[#allocation28_spill] sm:$0xff] %v6934_v59  ;;  %v3288_v1 = vpack.c.bf16 %v3224_v61, %v3224_v61  ;;  %v1313_v35 = vmul.f32 %v1249_v30, %v6851_v11  ;;  %v965_v8 = vpack.c.bf16 %v901_v34, %v901_v34  ;;  %v2098_v48 = vpack.c.bf16 %v2034_v43, %v2034_v43  ;;  %v9182_v24 = vld [vmem:[#allocation30_spill] sm:$0xff] }
 0x241   : > { %v3289_v16 = vpack.c.bf16 %v3225_v15, %v3225_v15  ;;  %v930_v14 = vmul.f32 %v6934_v59, %v6934_v59  ;;  %v6939_v20 = vunpack.c.l.bf16 %v2097_v9  ;;  %v1648_v37 = vmul.f32 0.796875, %v9179_v54  ;;  %v648_v9 = vpop.f32.mrf.mxu0 }
 0x242   : > { %v3352_v19 = vunpack.c.l.bf16 %v3288_v1  ;;  %v2289_v51 = vunpack.c.l.bf16 %v2225_v18  ;;  %v2290_v21 = vunpack.c.l.bf16 %v2226_v32  ;;  %v6942_v40 = vunpack.c.l.bf16 %v2098_v48 }
 0x243   : > { %9178 = vst [vmem:[#allocation98_spill] sm:$0xff] %v6939_v20  ;;  %v3353_v62 = vunpack.c.l.bf16 %v3289_v16  ;;  %v3140_v7 = vmul.f32 0.5, %v9181_v46  ;;  %v3141_v30 = vmul.f32 0.5, %v6414_v36  ;;  %v9183_v61 = vpack.c.bf16 %v9182_v24, %v9182_v24 }
 0x244   : > { %9180 = vst [vmem:[#allocation37_spill] sm:$0xff] %v6942_v40  ;;  %v3416_v34 = vsub.f32 1.0, %v3352_v19  ;;  %v1696_v15 = vmul.f32 0.796875, %v1632_v50  ;;  %v2417_v1 = vmul.f32 %v6939_v20, %v2289_v51  ;;  %v2418_v54 = vmul.f32 %v6942_v40, %v2290_v21 }
 0x245   : > { %v1775_v43 = vunpack.c.l.bf16 %v9183_v61  ;;  %v3417_v18 = vsub.f32 1.0, %v3353_v62  ;;  %v1284_v32 = vmul.f32 %v1220_v55, %v6861_v25  ;;  %v6952_v48 = vunpack.c.l.bf16 %v965_v8 }
 0x246   : > { %v3480_v16 = vpack.c.bf16 %v3416_v34, %v3416_v34  ;;  %v1712_v46 = vpack.c.bf16 %v1648_v37, %v1648_v37  ;;  %v1377_v26 = vpack.c.bf16 %v1313_v35, %v1313_v35  ;;  %v994_v36 = vpack.c.bf16 %v930_v14, %v930_v14 }
 0x247   : > { %v2480_v19 = vpack.c.bf16 %v2418_v54, %v2417_v1  ;;  %v3481_v17 = vpack.c.bf16 %v3417_v18, %v3417_v18  ;;  %v649_v24 = vadd.f32 %v6740_v23, %v648_v9  ;;  %5421 = vtanh.f32 %v1775_v43 }
 0x248   : > { %v3544_v61 = vunpack.c.l.bf16 %v3480_v16  ;;  %v1776_v50 = vunpack.c.l.bf16 %v1712_v46  ;;  %v9184_v20 = vpack.c.bf16 %v6903_v31, %v6903_v31  ;;  %v6958_v62 = vmul.f32 0.796875, %v1603_v22  ;;  %v721_v16 = vpop.f32.mrf.mxu1 }
 0x249   : > { %v1760_v55 = vpack.c.bf16 %v1696_v15, %v1696_v15  ;;  %2534 = vmatpush.bf16.msrb.mxu1 %v2480_v19  ;;  %v3545_v8 = vunpack.c.l.bf16 %v3481_v17  ;;  %v1348_v34 = vpack.c.bf16 %v1284_v32, %v1284_v32  ;;  %v1093_v35 = vmul.f32 0.044677734, %v6952_v48 }
 0x24a   : > { %v1823_v40 = vunpack.c.l.bf16 %v9184_v20  ;;  %9185 = vst [vmem:[#allocation58_spill] sm:$0xff] %v6958_v62  ;;  %v6961_v14 = vmul.f32 %v3544_v61, %v2289_v51  ;;  %5423 = vtanh.f32 %v1776_v50  ;;  %v3204_v9 = vpack.c.bf16 %v3140_v7, %v3140_v7 }
 0x24b   : > { %v6965_v43 = vunpack.c.l.bf16 %v994_v36  ;;  %v6967_v1 = vmul.f32 %v3545_v8, %v2290_v21  ;;  %v3205_v31 = vpack.c.bf16 %v3141_v30, %v3141_v30  ;;  %v6970_v22 = vmul.f32 0.13378906, %v6905_v44 }
 0x24c   : > { %9186 = vst [vmem:[#allocation30_spill] sm:$0xff] %v6961_v14  ;;  %v1441_v20 = vunpack.c.l.bf16 %v1377_v26  ;;  %v774_v17 = vpack.c.bf16 %v649_v24, %v649_v24  ;;  %5425 = vtanh.f32 %v1823_v40  ;;  %v9188_v51 = vpack.c.bf16 %v6859_v33, %v6859_v33 }
 0x24d   : > { %9187 = vst [vmem:[#allocation99_spill] sm:$0xff] %v6967_v1  ;;  %v9190_v7 = vpack.c.bf16 %v6893_v57, %v6893_v57  ;;  %v5422_v30 = vpop.eup %5421  ;;  %v1824_v26 = vunpack.c.l.bf16 %v1760_v55  ;;  %v1412_v18 = vunpack.c.l.bf16 %v1348_v34  ;;  %v1157_v32 = vpack.c.bf16 %v1093_v35, %v1093_v35  ;;  %v9195_v34 = vld [vmem:[#allocation23_spill] sm:$0xff] }
 0x24e   : > { %v6977_v54 = vunpack.c.l.bf16 %v9188_v51  ;;  %v6986_v46 = vunpack.c.l.bf16 %v3204_v9  ;;  %v1122_v40 = vmul.f32 0.044677734, %v6965_v43  ;;  %v722_v33 = vadd.f32 %v6740_v23, %v721_v16  ;;  %v9196_v9 = vld [vmem:[#allocation25_spill] sm:$0xff] }
 0x24f   : > { %v6982_v21 = vunpack.c.l.bf16 %v9190_v7  ;;  %v1903_v36 = vpack.c.bf16 %v5422_v30, %v5422_v30  ;;  %v6990_v24 = vunpack.c.l.bf16 %v3205_v31  ;;  %v1505_v61 = vadd.f32 %v1441_v20, %v6851_v11  ;;  %v9197_v31 = vld [vmem:[#allocation33_spill] sm:$0xff] }
 0x250   : > { %9189 = vst [vmem:[#allocation100_spill] sm:$0xff] %v6977_v54  ;;  %v5424_v19 = vpop.eup %5423  ;;  %v6995_v50 = vunpack.c.l.bf16 %v774_v17  ;;  %v2159_v35 = vmul.f32 0.5, %v9195_v34  ;;  %v2160_v51 = vmul.f32 0.5, %v9196_v9  ;;  %5427 = vtanh.f32 %v1824_v26 }
 0x251   : > { %9191 = vst [vmem:[#allocation101_spill] sm:$0xff] %v6982_v21  ;;  %v1904_v55 = vpack.c.bf16 %v5424_v19, %v5424_v19  ;;  %v1967_v8 = vunpack.c.l.bf16 %v1903_v36  ;;  %v7000_v7 = vadd.f32 %v1412_v18, %v6861_v25  ;;  %v1221_v30 = vunpack.c.l.bf16 %v1157_v32  ;;  %v9199_v19 = vld [vmem:[#allocation31_spill] sm:$0xff] }
 0x252   : > { %9192 = vst [vmem:[#allocation102_spill] sm:$0xff] %v6986_v46  ;;  %v2775_v16 = vadd.f32 1.0, %v9197_v31  ;;  %v7003_v15 = vpop.eup %5425  ;;  %v1186_v37 = vpack.c.bf16 %v1122_v40, %v1122_v40  ;;  %v803_v44 = vpack.c.bf16 %v722_v33, %v722_v33  ;;  %v1569_v57 = vpack.c.bf16 %v1505_v61, %v1505_v61  ;;  %v651_v61 = vpop.f32.mrf.mxu0 }
 0x253   : > { %9193 = vst [vmem:[#allocation103_spill] sm:$0xff] %v6990_v24  ;;  %v1968_v20 = vunpack.c.l.bf16 %v1904_v55  ;;  %v2031_v17 = vadd.f32 1.0, %v1967_v8  ;;  %v902_v36 = vmul.f32 %v6995_v50, %v6995_v50  ;;  %v2838_v34 = vpack.c.bf16 %v9199_v19, %v9199_v19 }
 0x254   : > { %9194 = vst [vmem:[#allocation104_spill] sm:$0xff] %v6995_v50  ;;  %v3222_v26 = vmul.f32 %v1967_v8, %v1967_v8  ;;  %v2223_v54 = vpack.c.bf16 %v2159_v35, %v2159_v35  ;;  %v2224_v32 = vpack.c.bf16 %v2160_v51, %v2160_v51  ;;  %v1285_v31 = vmul.f32 %v1221_v30, %v6924_v29  ;;  %v723_v8 = vpop.f32.mrf.mxu1 }
 0x255   : > { %9198 = vst [vmem:[#allocation23_spill] sm:$0xff] %v7003_v15  ;;  %v2032_v9 = vadd.f32 1.0, %v1968_v20  ;;  %v2095_v18 = vpack.c.bf16 %v2031_v17, %v2031_v17  ;;  %v2839_v21 = vpack.c.bf16 %v2775_v16, %v2775_v16  ;;  %v3223_v24 = vmul.f32 %v1968_v20, %v1968_v20 }
 0x256   : > { %v3286_v40 = vpack.c.bf16 %v3222_v26, %v3222_v26  ;;  %v1250_v33 = vunpack.c.l.bf16 %v1186_v37  ;;  %v7010_v55 = vunpack.c.l.bf16 %v803_v44  ;;  %v7014_v11 = vpop.eup %5427  ;;  %v966_v19 = vpack.c.bf16 %v902_v36, %v902_v36 }
 0x257   : > { %v2096_v46 = vpack.c.bf16 %v2032_v9, %v2032_v9  ;;  %v7012_v15 = vunpack.c.l.bf16 %v2095_v18  ;;  %9201 = vst [vmem:[#allocation33_spill] sm:$0xff] %v7014_v11  ;;  %v2902_v28 = vunpack.c.l.bf16 %v2838_v34  ;;  %v3287_v17 = vpack.c.bf16 %v3223_v24, %v3223_v24 }
 0x258   : > { %9200 = vst [vmem:[#allocation25_spill] sm:$0xff] %v7010_v55  ;;  %v3350_v35 = vunpack.c.l.bf16 %v3286_v40  ;;  %v724_v51 = vadd.f32 %v6740_v23, %v723_v8  ;;  %v2287_v30 = vunpack.c.l.bf16 %v2223_v54  ;;  %v2288_v16 = vunpack.c.l.bf16 %v2224_v32 }
 0x259   : > { %v7017_v20 = vunpack.c.l.bf16 %v2096_v46  ;;  %v652_v37 = vadd.f32 %v6740_v23, %v651_v61  ;;  %v2903_v44 = vunpack.c.l.bf16 %v2839_v21  ;;  %v3351_v26 = vunpack.c.l.bf16 %v3287_v17 }
 0x25a   : > { %v3414_v9 = vsub.f32 1.0, %v3350_v35  ;;  %v1314_v18 = vmul.f32 %v1250_v33, %v6934_v59  ;;  %v931_v36 = vmul.f32 %v7010_v55, %v7010_v55  ;;  %v2415_v34 = vmul.f32 %v7012_v15, %v2287_v30 }
 0x25b   : > { %9202 = vst [vmem:[#allocation31_spill] sm:$0xff] %v7017_v20  ;;  %v2416_v24 = vmul.f32 %v7017_v20, %v2288_v16  ;;  %v7025_v40 = vunpack.c.l.bf16 %v966_v19  ;;  %v2966_v54 = vmul.f32 0.796875, %v2902_v28  ;;  %v3415_v32 = vsub.f32 1.0, %v3351_v26 }
 0x25c   : > { %v3478_v46 = vpack.c.bf16 %v3414_v9, %v3414_v9  ;;  %v1540_v61 = vpack.c.bf16 %v7000_v7, %v7000_v7  ;;  %v1349_v21 = vpack.c.bf16 %v1285_v31, %v1285_v31  ;;  %v804_v8 = vpack.c.bf16 %v724_v51, %v724_v51 }
 0x25d   : > { %v2479_v17 = vpack.c.bf16 %v2416_v24, %v2415_v34  ;;  %v775_v35 = vpack.c.bf16 %v652_v37, %v652_v37  ;;  %v2967_v33 = vmul.f32 0.796875, %v2903_v44  ;;  %v3479_v11 = vpack.c.bf16 %v3415_v32, %v3415_v32 }
 0x25e   : > { %v3542_v0 = vunpack.c.l.bf16 %v3478_v46  ;;  %v1633_v25 = vunpack.c.l.bf16 %v1569_v57  ;;  %v2632_v62 = vmul.f32 0.13378906, %v6900_v56  ;;  %v1378_v1 = vpack.c.bf16 %v1314_v18, %v1314_v18 }
 0x25f   : > { %v995_v20 = vpack.c.bf16 %v931_v36, %v931_v36  ;;  %2535 = vmatpush.bf16.msrb.mxu1 %v2479_v17  ;;  %v1094_v28 = vmul.f32 0.044677734, %v7025_v40  ;;  %v3030_v19 = vpack.c.bf16 %v2966_v54, %v2966_v54  ;;  %v3543_v26 = vunpack.c.l.bf16 %v3479_v11 }
 0x260   : > { %v3606_v9 = vmul.f32 %v3542_v0, %v2287_v30  ;;  %v1604_v14 = vunpack.c.l.bf16 %v1540_v61  ;;  %v7032_v7 = vmul.f32 0.5, %v6452_v42  ;;  %v1413_v31 = vunpack.c.l.bf16 %v1349_v21 }
 0x261   : > { %v7034_v51 = vunpack.c.l.bf16 %v804_v8  ;;  %v7036_v37 = vunpack.c.l.bf16 %v775_v35  ;;  %v3031_v57 = vpack.c.bf16 %v2967_v33, %v2967_v33  ;;  %v3607_v44 = vmul.f32 %v3543_v26, %v2288_v16 }
 0x262   : > { %9203 = vst [vmem:[#allocation105_spill] sm:$0xff] %v7032_v7  ;;  %v3670_v56 = vpack.c.bf16 %v3606_v9, %v3606_v9  ;;  %v7039_v18 = vmul.f32 0.5, %v6460_v63  ;;  %v1697_v36 = vmul.f32 0.796875, %v1633_v25  ;;  %v1442_v34 = vunpack.c.l.bf16 %v1378_v1  ;;  %v653_v1 = vpop.f32.mrf.mxu0 }
 0x263   : > { %9204 = vst [vmem:[#allocation106_spill] sm:$0xff] %v7034_v51  ;;  %v7041_v24 = vunpack.c.l.bf16 %v995_v20  ;;  %v1158_v11 = vpack.c.bf16 %v1094_v28, %v1094_v28  ;;  %v3671_v0 = vpack.c.bf16 %v3607_v44, %v3607_v44  ;;  %v3798_v42 = vunpack.c.l.bf16 %v3030_v19 }
 0x264   : > { %9205 = vst [vmem:[#allocation107_spill] sm:$0xff] %v7039_v18  ;;  %v3734_v30 = vunpack.c.l.bf16 %v3670_v56  ;;  %v9206_v54 = vpack.c.bf16 %v6970_v22, %v6970_v22  ;;  %v2696_v46 = vpack.c.bf16 %v2632_v62, %v2632_v62  ;;  %v1477_v16 = vadd.f32 %v1413_v31, %v6924_v29  ;;  %v9221_v22 = vld [vmem:[#allocation68_spill] sm:$0xff] }
 0x265   : > { %v932_v63 = vmul.f32 %v7034_v51, %v7034_v51  ;;  %v903_v25 = vmul.f32 %v7036_v37, %v7036_v37  ;;  %v3735_v20 = vunpack.c.l.bf16 %v3671_v0  ;;  %v3799_v61 = vunpack.c.l.bf16 %v3031_v57 }
 0x266   : > { %v7046_v32 = vunpack.c.l.bf16 %v9206_v54  ;;  %v7053_v21 = vmul.f32 %v3798_v42, %v3734_v30  ;;  %v7055_v8 = vmul.f32 0.796875, %v1604_v14  ;;  %v1123_v17 = vmul.f32 0.044677734, %v7041_v24  ;;  %v9214_v30 = vld [vmem:[#allocation62_spill] sm:$0xff]  ;;  %v726_v42 = vpop.f32.mrf.mxu1 }
 0x267   : > { %v1761_v35 = vpack.c.bf16 %v1697_v36, %v1697_v36  ;;  %v1506_v33 = vadd.f32 %v1442_v34, %v6934_v59  ;;  %v1222_v28 = vunpack.c.l.bf16 %v1158_v11  ;;  %v7063_v19 = vmul.f32 %v3799_v61, %v3735_v20  ;;  %v9212_v11 = vld [vmem:[#allocation61_spill] sm:$0xff] }
 0x268   : > { %9207 = vst [vmem:[#allocation108_spill] sm:$0xff] %v7046_v32  ;;  %v3714_v26 = vpack.c.bf16 %v6478_v38, %v6478_v38  ;;  %v2604_v14 = vmul.f32 0.13378906, %v6952_v48  ;;  %v996_v9 = vpack.c.bf16 %v932_v63, %v932_v63  ;;  %v654_v31 = vadd.f32 %v6740_v23, %v653_v1 }
 0x269   : > { %9208 = vst [vmem:[#allocation109_spill] sm:$0xff] %v7053_v21  ;;  %v3715_v57 = vpack.c.bf16 %v6482_v41, %v6482_v41  ;;  %v7071_v44 = vunpack.c.l.bf16 %v2696_v46  ;;  %v1541_v56 = vpack.c.bf16 %v1477_v16, %v1477_v16  ;;  %v967_v36 = vpack.c.bf16 %v903_v25, %v903_v25 }
 0x26a   : > { %9209 = vst [vmem:[#allocation110_spill] sm:$0xff] %v7055_v8  ;;  %v7076_v0 = vmul.f32 0.5, %v9212_v11  ;;  %v7079_v38 = vmul.f32 0.5, %v9214_v30  ;;  %v1187_v48 = vpack.c.bf16 %v1123_v17, %v1123_v17  ;;  %v1825_v54 = vunpack.c.l.bf16 %v1761_v35 }
 0x26b   : > { %9210 = vst [vmem:[#allocation111_spill] sm:$0xff] %v7063_v19  ;;  %v1570_v63 = vpack.c.bf16 %v1506_v33, %v1506_v33  ;;  %v1286_v1 = vmul.f32 %v1222_v28, %v6995_v50  ;;  %v727_v41 = vadd.f32 %v6740_v23, %v726_v42  ;;  %v7083_v46 = vunpack.c.l.bf16 %v3714_v26 }
 0x26c   : > { %9211 = vst [vmem:[#allocation112_spill] sm:$0xff] %v7071_v44  ;;  %v2668_v16 = vpack.c.bf16 %v2604_v14, %v2604_v14  ;;  %v7085_v25 = vunpack.c.l.bf16 %v996_v9  ;;  %v776_v20 = vpack.c.bf16 %v654_v31, %v654_v31  ;;  %v7087_v61 = vunpack.c.l.bf16 %v3715_v57  ;;  %v9218_v57 = vld [vmem:[#allocation67_spill] sm:$0xff] }
 0x26d   : > { %9213 = vst [vmem:[#allocation61_spill] sm:$0xff] %v7076_v0  ;;  %v3712_v11 = vpack.c.bf16 %v6505_v13, %v6505_v13  ;;  %v1605_v30 = vunpack.c.l.bf16 %v1541_v56  ;;  %v7091_v17 = vunpack.c.l.bf16 %v967_v36  ;;  %v3713_v33 = vpack.c.bf16 %v6507_v3, %v6507_v3 }
 0x26e   : > { %9215 = vst [vmem:[#allocation62_spill] sm:$0xff] %v7079_v38  ;;  %v1251_v28 = vunpack.c.l.bf16 %v1187_v48  ;;  %5429 = vtanh.f32 %v1825_v54  ;;  %v1634_v26 = vunpack.c.l.bf16 %v1570_v63  ;;  %v1350_v14 = vpack.c.bf16 %v1286_v1, %v1286_v1 }
 0x26f   : > { %9216 = vst [vmem:[#allocation113_spill] sm:$0xff] %v7083_v46  ;;  %v805_v9 = vpack.c.bf16 %v727_v41, %v727_v41  ;;  %v2732_v31 = vunpack.c.l.bf16 %v2668_v16  ;;  %v7100_v13 = vmul.f32 0.5, %v9218_v57  ;;  %v1124_v56 = vmul.f32 0.044677734, %v7085_v25  ;;  %v728_v57 = vpop.f32.mrf.mxu1 }
 0x270   : > { %9217 = vst [vmem:[#allocation114_spill] sm:$0xff] %v7087_v61  ;;  %v7103_v36 = vunpack.c.l.bf16 %v776_v20  ;;  %v7105_v42 = vunpack.c.l.bf16 %v3712_v11  ;;  %v7107_v62 = vmul.f32 0.796875, %v1605_v30  ;;  %v7110_v23 = vmul.f32 0.5, %v9221_v22 }
 0x271   : > { %9219 = vst [vmem:[#allocation67_spill] sm:$0xff] %v7100_v13  ;;  %v1095_v3 = vmul.f32 0.044677734, %v7091_v17  ;;  %v7113_v48 = vunpack.c.l.bf16 %v3713_v33  ;;  %v7116_v54 = vmul.f32 0.5, %v6562_v52  ;;  %v2633_v63 = vmul.f32 0.13378906, %v6965_v43 }
 0x272   : > { %9220 = vst [vmem:[#allocation115_spill] sm:$0xff] %v7105_v42  ;;  %v1315_v1 = vmul.f32 %v1251_v28, %v7010_v55  ;;  %v3710_v41 = vpack.c.bf16 %v6565_v6, %v6565_v6  ;;  %v1698_v16 = vmul.f32 0.796875, %v1634_v26  ;;  %v1414_v20 = vunpack.c.l.bf16 %v1350_v14 }
 0x273   : > { %9222 = vst [vmem:[#allocation68_spill] sm:$0xff] %v7110_v23  ;;  %v7122_v11 = vunpack.c.l.bf16 %v805_v9  ;;  %v7124_v22 = vadd.f32 1.0, %v2732_v31  ;;  %v1188_v33 = vpack.c.bf16 %v1124_v56, %v1124_v56  ;;  %v904_v52 = vmul.f32 %v7103_v36, %v7103_v36  ;;  %v656_v9 = vpop.f32.mrf.mxu0 }
 0x274   : > { %9223 = vst [vmem:[#allocation116_spill] sm:$0xff] %v7113_v48  ;;  %v7130_v43 = vpop.eup %5429  ;;  %v7137_v26 = vmul.f32 0.5, %v6567_v60  ;;  %v1159_v14 = vpack.c.bf16 %v1095_v3, %v1095_v3  ;;  %v3711_v31 = vpack.c.bf16 %v6569_v53, %v6569_v53  ;;  %v2697_v35 = vpack.c.bf16 %v2633_v63, %v2633_v63  ;;  %v7153_v53 = vld [vmem:[%s8846_s2] ss:$0 sm:$0xff] }
 0x275   : > { %9224 = vst [vmem:[#allocation117_spill] sm:$0xff] %v7116_v54  ;;  %v1379_v30 = vpack.c.bf16 %v1315_v1, %v1315_v1  ;;  %v7143_v34 = vunpack.c.l.bf16 %v3710_v41  ;;  %v1762_v44 = vpack.c.bf16 %v1698_v16, %v1698_v16  ;;  %v1478_v28 = vadd.f32 %v1414_v20, %v6995_v50 }
 0x276   : > { %9225 = vst [vmem:[#allocation118_spill] sm:$0xff] %v7122_v11  ;;  %v933_v6 = vmul.f32 %v7122_v11, %v7122_v11  ;;  %v3684_v60 = vpack.c.bf16 %v6590_v2, %v6590_v2  ;;  %v1252_v3 = vunpack.c.l.bf16 %v1188_v33  ;;  %v968_v32 = vpack.c.bf16 %v904_v52, %v904_v52 }
 0x277   : > { %9226 = vst [vmem:[#allocation119_spill] sm:$0xff] %v7124_v22  ;;  %v657_v63 = vadd.f32 %v7153_v53, %v656_v9  ;;  %v3685_v41 = vpack.c.bf16 %v6601_v47, %v6601_v47  ;;  %v2605_v16 = vmul.f32 0.13378906, %v7025_v40  ;;  %v1223_v20 = vunpack.c.l.bf16 %v1159_v14 }
 0x278   : > { %9227 = vst [vmem:[#allocation120_spill] sm:$0xff] %v7130_v43  ;;  %v7161_v56 = vunpack.c.l.bf16 %v3711_v31  ;;  %v7163_v2 = vunpack.c.l.bf16 %v2697_v35  ;;  %v7166_v33 = vmul.f32 0.5, %v6631_v4  ;;  %v1443_v52 = vunpack.c.l.bf16 %v1379_v30  ;;  %v9237_v30 = vld [vmem:[#allocation76_spill] sm:$0xff] }
 0x279   : > { %9228 = vst [vmem:[#allocation121_spill] sm:$0xff] %v7137_v26  ;;  %v1826_v54 = vunpack.c.l.bf16 %v1762_v44  ;;  %v7169_v9 = vmul.f32 0.5, %v6635_v39  ;;  %v1542_v18 = vpack.c.bf16 %v1478_v28, %v1478_v28  ;;  %v997_v1 = vpack.c.bf16 %v933_v6, %v933_v6  ;;  %v9238_v6 = vld [vmem:[#allocation75_spill] sm:$0xff] }
 0x27a   : > { %9229 = vst [vmem:[#allocation122_spill] sm:$0xff] %v7143_v34  ;;  %v7171_v26 = vunpack.c.l.bf16 %v3684_v60  ;;  %v1316_v47 = vmul.f32 %v1252_v3, %v7034_v51  ;;  %v7174_v40 = vunpack.c.l.bf16 %v968_v32  ;;  %v777_v14 = vpack.c.bf16 %v657_v63, %v657_v63  ;;  %v7190_v3 = vpop.f32.mrf.mxu1 }
 0x27b   : > { %9230 = vst [vmem:[#allocation123_spill] sm:$0xff] %v7161_v56  ;;  %v7176_v31 = vunpack.c.l.bf16 %v3685_v41  ;;  %v7179_v35 = vmul.f32 0.5, %v6641_v27  ;;  %v2669_v4 = vpack.c.bf16 %v2605_v16, %v2605_v16  ;;  %v1287_v44 = vmul.f32 %v1223_v20, %v7036_v37  ;;  %v9240_v16 = vld [vmem:[#allocation78_spill] sm:$0xff] }
 0x27c   : > { %9231 = vst [vmem:[#allocation124_spill] sm:$0xff] %v7163_v2  ;;  %v3708_v28 = vpack.c.bf16 %v9237_v30, %v9237_v30  ;;  %v7187_v60 = vmul.f32 0.5, %v9238_v6  ;;  %v1507_v32 = vadd.f32 %v1443_v52, %v7010_v55  ;;  %5431 = vtanh.f32 %v1826_v54 }
 0x27d   : > { %9232 = vst [vmem:[#allocation125_spill] sm:$0xff] %v7166_v33  ;;  %v1606_v63 = vunpack.c.l.bf16 %v1542_v18  ;;  %v7194_v41 = vunpack.c.l.bf16 %v997_v1  ;;  %v3709_v20 = vpack.c.bf16 %v9240_v16, %v9240_v16  ;;  %v1380_v39 = vpack.c.bf16 %v1316_v47, %v1316_v47  ;;  %v9242_v16 = vld [vmem:[#allocation56_spill] sm:$0xff] }
 0x27e   : > { %9233 = vst [vmem:[#allocation126_spill] sm:$0xff] %v7169_v9  ;;  %v1096_v30 = vmul.f32 0.044677734, %v7174_v40  ;;  %v7199_v2 = vunpack.c.l.bf16 %v777_v14  ;;  %v2733_v6 = vunpack.c.l.bf16 %v2669_v4  ;;  %v729_v54 = vadd.f32 %v7153_v53, %v728_v57  ;;  %v9243_v14 = vld [vmem:[#allocation57_spill] sm:$0xff]  ;;  %v9245_v4 = vld [vmem:[#allocation27_spill] sm:$0xff] }
 0x27f   : > { %9234 = vst [vmem:[#allocation127_spill] sm:$0xff] %v7171_v26  ;;  %v7204_v26 = vpop.f32.mrf.mxu0  ;;  %v7206_v18 = vunpack.c.l.bf16 %v3708_v28  ;;  %v3682_v47 = vpack.c.bf16 %v9242_v16, %v9242_v16  ;;  %v1571_v27 = vpack.c.bf16 %v1507_v32, %v1507_v32  ;;  %v3683_v61 = vpack.c.bf16 %v9243_v14, %v9243_v14  ;;  %v9250_v16 = vld [vmem:[#allocation26_spill] sm:$0xff] }
 0x280   : > { %9235 = vst [vmem:[#allocation128_spill] sm:$0xff] %v7176_v31  ;;  %v1351_v31 = vpack.c.bf16 %v1287_v44, %v1287_v44  ;;  %v7214_v46 = vmul.f32 0.796875, %v1606_v63  ;;  %v7217_v44 = vmul.f32 0.5, %v9245_v4  ;;  %v1125_v57 = vmul.f32 0.044677734, %v7194_v41 }
 0x281   : > { %9236 = vst [vmem:[#allocation129_spill] sm:$0xff] %v7179_v35  ;;  %v7220_v52 = vunpack.c.l.bf16 %v3709_v20  ;;  %v1444_v28 = vunpack.c.l.bf16 %v1380_v39  ;;  %v1160_v7 = vpack.c.bf16 %v1096_v30, %v1096_v30  ;;  %v905_v1 = vmul.f32 %v7199_v2, %v7199_v2 }
 0x282   : > { %9239 = vst [vmem:[#allocation76_spill] sm:$0xff] %v7187_v60  ;;  %v7224_v48 = vpop.eup %5431  ;;  %v7226_v32 = vadd.f32 1.0, %v2733_v6  ;;  %v7229_v14 = vmul.f32 0.5, %v9250_v16  ;;  %v1415_v63 = vunpack.c.l.bf16 %v1351_v31  ;;  %v806_v42 = vpack.c.bf16 %v729_v54, %v729_v54  ;;  %v9253_v60 = vld [vmem:[#allocation81_spill] sm:$0xff] }
 0x283   : > { %9241 = vst [vmem:[#allocation75_spill] sm:$0xff] %v7206_v18  ;;  %v7231_v4 = vunpack.c.l.bf16 %v3682_v47  ;;  %v7234_v35 = vmul.f32 0.5, %v9253_v60  ;;  %v1635_v20 = vunpack.c.l.bf16 %v1571_v27  ;;  %v2606_v39 = vmul.f32 0.13378906, %v7091_v17  ;;  %v7245_v60 = vpop.f32.mrf.mxu1  ;;  %v9256_v27 = vld [vmem:[#allocation82_spill] sm:$0xff] }
 0x284   : > { %9244 = vst [vmem:[#allocation78_spill] sm:$0xff] %v7214_v46  ;;  %v7237_v30 = vunpack.c.l.bf16 %v3683_v61  ;;  %v1189_v16 = vpack.c.bf16 %v1125_v57, %v1125_v57  ;;  %v2634_v31 = vmul.f32 0.13378906, %v7041_v24  ;;  %v1508_v54 = vadd.f32 %v1444_v28, %v7034_v51  ;;  %v9261_v24 = vld [vmem:[#allocation91_spill] sm:$0xff] }
 0x285   : > { %9246 = vst [vmem:[#allocation56_spill] sm:$0xff] %v7217_v44  ;;  %v1224_v47 = vunpack.c.l.bf16 %v1160_v7  ;;  %v7248_v0 = vmul.f32 0.5, %v9256_v27  ;;  %v1479_v17 = vadd.f32 %v1415_v63, %v7036_v37  ;;  %v7253_v38 = vunpack.c.l.bf16 %v806_v42 }
 0x286   : > { %9247 = vst [vmem:[#allocation57_spill] sm:$0xff] %v7220_v52  ;;  %v3706_v57 = vpack.c.bf16 %v6746_v58, %v6746_v58  ;;  %v1699_v7 = vmul.f32 0.796875, %v1635_v20  ;;  %v3707_v28 = vpack.c.bf16 %v6763_v5, %v6763_v5  ;;  %v3680_v27 = vpack.c.bf16 %v6748_v12, %v6748_v12  ;;  %v9259_v20 = vld [vmem:[#allocation90_spill] sm:$0xff] }
 0x287   : > { %9248 = vst [vmem:[#allocation27_spill] sm:$0xff] %v7224_v48  ;;  %v3681_v6 = vpack.c.bf16 %v6757_v10, %v6757_v10  ;;  %v1253_v63 = vunpack.c.l.bf16 %v1189_v16  ;;  %v7265_v42 = vpop.f32.mrf.mxu0  ;;  %v2698_v61 = vpack.c.bf16 %v2634_v31, %v2634_v31  ;;  %v1288_v58 = vmul.f32 %v1224_v47, %v7103_v36 }
 0x288   : > { %9249 = vst [vmem:[#allocation130_spill] sm:$0xff] %v7226_v32  ;;  %v7274_v5 = vmul.f32 0.5, %v9261_v24  ;;  %v934_v12 = vmul.f32 %v7253_v38, %v7253_v38  ;;  %v7280_v16 = vunpack.c.l.bf16 %v3706_v57  ;;  %v1763_v31 = vpack.c.bf16 %v1699_v7, %v1699_v7 }
 0x289   : > { %9251 = vst [vmem:[#allocation26_spill] sm:$0xff] %v7229_v14  ;;  %v7282_v47 = vunpack.c.l.bf16 %v3707_v28  ;;  %v1317_v24 = vmul.f32 %v1253_v63, %v7122_v11  ;;  %v7289_v56 = vunpack.c.l.bf16 %v2698_v61  ;;  %v1352_v34 = vpack.c.bf16 %v1288_v58, %v1288_v58  ;;  %v9268_v58 = vld [vmem:[#allocation34_spill] sm:$0xff] }
 0x28a   : > { %9252 = vst [vmem:[#allocation131_spill] sm:$0xff] %v7231_v4  ;;  %v969_v4 = vpack.c.bf16 %v905_v1, %v905_v1  ;;  %v2670_v1 = vpack.c.bf16 %v2606_v39, %v2606_v39  ;;  %v7271_v39 = vmul.f32 0.5, %v9259_v20  ;;  %v7286_v20 = vunpack.c.l.bf16 %v3681_v6 }
 0x28b   : > { %9254 = vst [vmem:[#allocation81_spill] sm:$0xff] %v7234_v35  ;;  %v1543_v35 = vpack.c.bf16 %v1479_v17, %v1479_v17  ;;  %v998_v28 = vpack.c.bf16 %v934_v12, %v934_v12  ;;  %v3678_v6 = vpack.c.bf16 %v6837_v45, %v6837_v45  ;;  %v7302_v61 = vpop.f32.mrf.mxu1  ;;  %v3679_v63 = vpack.c.bf16 %v6840_v49, %v6840_v49 }
 0x28c   : > { %9255 = vst [vmem:[#allocation132_spill] sm:$0xff] %v7237_v30  ;;  %v1572_v30 = vpack.c.bf16 %v1508_v54, %v1508_v54  ;;  %v7268_v44 = vunpack.c.l.bf16 %v969_v4  ;;  %v2734_v54 = vunpack.c.l.bf16 %v2670_v1  ;;  %v7284_v4 = vunpack.c.l.bf16 %v3680_v27 }
 0x28d   : > { %9257 = vst [vmem:[#allocation82_spill] sm:$0xff] %v7248_v0  ;;  %v1607_v1 = vunpack.c.l.bf16 %v1543_v35  ;;  %v1827_v27 = vunpack.c.l.bf16 %v1763_v31  ;;  %v7307_v57 = vmul.f32 0.5, %v9268_v58  ;;  %v2635_v35 = vmul.f32 0.13378906, %v7085_v25  ;;  %v9295_v0 = vld [vmem:[#allocation31_spill] sm:$0xff] }
 0x28e   : > { %9258 = vst [vmem:[#allocation133_spill] sm:$0xff] %v7253_v38  ;;  %v1636_v17 = vunpack.c.l.bf16 %v1572_v30  ;;  %v1097_v23 = vmul.f32 0.044677734, %v7268_v44  ;;  %v7298_v10 = vadd.f32 1.0, %v2734_v54  ;;  %v659_v30 = vadd.f32 %v7153_v53, %v7204_v26 }
 0x28f   : > { %9260 = vst [vmem:[#allocation90_spill] sm:$0xff] %v7271_v39  ;;  %v1381_v12 = vpack.c.bf16 %v1317_v24, %v1317_v24  ;;  %v1416_v7 = vunpack.c.l.bf16 %v1352_v34  ;;  %v2607_v45 = vmul.f32 0.13378906, %v7174_v40  ;;  %v7317_v13 = vunpack.c.l.bf16 %v998_v28  ;;  %v7319_v49 = vpop.f32.mrf.mxu0 }
 0x290   : > { %9262 = vst [vmem:[#allocation91_spill] sm:$0xff] %v7274_v5  ;;  %v1700_v31 = vmul.f32 0.796875, %v1636_v17  ;;  %v1161_v54 = vpack.c.bf16 %v1097_v23, %v1097_v23  ;;  %5433 = vtanh.f32 %v1827_v27  ;;  %v7321_v58 = vunpack.c.l.bf16 %v3678_v6  ;;  %v9275_v23 = vld [vmem:[#allocation97_spill] sm:$0xff] }
 0x291   : > { %9263 = vst [vmem:[#allocation134_spill] sm:$0xff] %v7280_v16  ;;  %v778_v25 = vpack.c.bf16 %v659_v30, %v659_v30  ;;  %v732_v34 = vadd.f32 %v7153_v53, %v7190_v3  ;;  %v7325_v40 = vunpack.c.l.bf16 %v3679_v63  ;;  %v1445_v24 = vunpack.c.l.bf16 %v1381_v12  ;;  %v9274_v63 = vld [vmem:[#allocation95_spill] sm:$0xff]  ;;  %v9279_v27 = vld [vmem:[#allocation29_spill] sm:$0xff] }
 0x292   : > { %9264 = vst [vmem:[#allocation135_spill] sm:$0xff] %v7282_v47  ;;  %v1764_v17 = vpack.c.bf16 %v1700_v31, %v1700_v31  ;;  %v1225_v28 = vunpack.c.l.bf16 %v1161_v54  ;;  %v1126_v3 = vmul.f32 0.044677734, %v7317_v13  ;;  %v734_v47 = vadd.f32 %v7153_v53, %v7245_v60 }
 0x293   : > { %9265 = vst [vmem:[#allocation136_spill] sm:$0xff] %v7284_v4  ;;  %v2636_v4 = vmul.f32 0.13378906, %v7194_v41  ;;  %v1480_v41 = vadd.f32 %v1416_v7, %v7103_v36  ;;  %v7339_v12 = vunpack.c.l.bf16 %v778_v25  ;;  %v807_v7 = vpack.c.bf16 %v732_v34, %v732_v34  ;;  %v7353_v25 = vpop.f32.mrf.mxu1  ;;  %v9282_v34 = vld [vmem:[#allocation40_spill] sm:$0xff] }
 0x294   : > { %9266 = vst [vmem:[#allocation137_spill] sm:$0xff] %v7286_v20  ;;  %v9270_v20 = vld [vmem:[#allocation41_spill] sm:$0xff]  ;;  %v1828_v52 = vunpack.c.l.bf16 %v1764_v17 }
 0x295   : > { %9267 = vst [vmem:[#allocation138_spill] sm:$0xff] %v7289_v56  ;;  %v7311_v56 = vmul.f32 0.796875, %v1607_v1  ;;  %v7314_v26 = vmul.f32 0.5, %v9270_v20  ;;  %v2699_v20 = vpack.c.bf16 %v2635_v35, %v2635_v35  ;;  %v2671_v1 = vpack.c.bf16 %v2607_v45, %v2607_v45  ;;  %v9277_v45 = vld [vmem:[#allocation43_spill] sm:$0xff] }
 0x296   : > { %9269 = vst [vmem:[#allocation34_spill] sm:$0xff] %v7307_v57  ;;  %v2700_v30 = vpack.c.bf16 %v2636_v4, %v2636_v4  ;;  %v3677_v35 = vpack.c.bf16 %v9275_v23, %v9275_v23  ;;  %v7344_v54 = vmul.f32 0.5, %v9277_v45  ;;  %v1509_v4 = vadd.f32 %v1445_v24, %v7122_v11  ;;  %v7350_v6 = vpop.eup %5433 }
 0x297   : > { %9271 = vst [vmem:[#allocation41_spill] sm:$0xff] %v7314_v26  ;;  %v7341_v31 = vunpack.c.l.bf16 %v2699_v20  ;;  %v2735_v18 = vunpack.c.l.bf16 %v2671_v1  ;;  %v1289_v23 = vmul.f32 %v1225_v28, %v7199_v2  ;;  %v3674_v20 = vpack.c.bf16 %v9282_v34, %v9282_v34  ;;  %v9287_v34 = vld [vmem:[#allocation98_spill] sm:$0xff]  ;;  %v9291_v1 = vld [vmem:[#allocation37_spill] sm:$0xff] }
 0x298   : > { %9272 = vst [vmem:[#allocation139_spill] sm:$0xff] %v7321_v58  ;;  %v7347_v58 = vmul.f32 0.5, %v9279_v27  ;;  %v2764_v5 = vunpack.c.l.bf16 %v2700_v30  ;;  %v1190_v27 = vpack.c.bf16 %v1126_v3, %v1126_v3  ;;  %v7361_v24 = vunpack.c.l.bf16 %v3677_v35  ;;  %v666_v3 = vpop.f32.mrf.mxu0 }
 0x299   : > { %9273 = vst [vmem:[#allocation140_spill] sm:$0xff] %v7325_v40  ;;  %v3676_v40 = vpack.c.bf16 %v9274_v63, %v9274_v63  ;;  %v1544_v63 = vpack.c.bf16 %v1480_v41, %v1480_v41  ;;  %v906_v17 = vmul.f32 %v7339_v12, %v7339_v12  ;;  %v7365_v41 = vunpack.c.l.bf16 %v807_v7 }
 0x29a   : > { %9276 = vst [vmem:[#allocation95_spill] sm:$0xff] %v7341_v31  ;;  %v9283_v31 = vld [vmem:[#allocation24_spill] sm:$0xff]  ;;  %v7372_v9 = vmul.f32 0.5, %v9287_v34  ;;  %v1573_v30 = vpack.c.bf16 %v1509_v4, %v1509_v4  ;;  %5435 = vtanh.f32 %v1828_v52  ;;  %v7374_v35 = vadd.f32 1.0, %v2735_v18 }
 0x29b   : > { %9278 = vst [vmem:[#allocation97_spill] sm:$0xff] %v7344_v54  ;;  %v3675_v45 = vpack.c.bf16 %v9283_v31, %v9283_v31  ;;  %v7359_v39 = vunpack.c.l.bf16 %v3676_v40  ;;  %v1608_v40 = vunpack.c.l.bf16 %v1544_v63  ;;  %v1353_v31 = vpack.c.bf16 %v1289_v23, %v1289_v23 }
 0x29c   : > { %9280 = vst [vmem:[#allocation43_spill] sm:$0xff] %v7347_v58  ;;  %v1254_v33 = vunpack.c.l.bf16 %v1190_v27  ;;  %v7381_v26 = vmul.f32 0.5, %v9291_v1  ;;  %v3094_v28 = vmul.f32 0.5, %v7012_v15  ;;  %v970_v34 = vpack.c.bf16 %v906_v17, %v906_v17  ;;  %v9294_v17 = vld [vmem:[#allocation99_spill] sm:$0xff] }
 0x29d   : > { %9281 = vst [vmem:[#allocation29_spill] sm:$0xff] %v7350_v6  ;;  %v7378_v7 = vunpack.c.l.bf16 %v3675_v45  ;;  %v935_v4 = vmul.f32 %v7365_v41, %v7365_v41  ;;  %v1637_v18 = vunpack.c.l.bf16 %v1573_v30  ;;  %v2608_v63 = vmul.f32 0.13378906, %v7268_v44 }
 0x29e   : > { %9284 = vst [vmem:[#allocation40_spill] sm:$0xff] %v7359_v39  ;;  %v2828_v39 = vadd.f32 1.0, %v2764_v5  ;;  %v662_v23 = vadd.f32 %v7153_v53, %v7265_v42  ;;  %v7391_v5 = vmul.f32 0.796875, %v1608_v40  ;;  %v1417_v27 = vunpack.c.l.bf16 %v1353_v31 }
 0x29f   : > { %9285 = vst [vmem:[#allocation24_spill] sm:$0xff] %v7361_v24  ;;  %v7376_v24 = vunpack.c.l.bf16 %v3674_v20  ;;  %v9293_v20 = vld [vmem:[#allocation30_spill] sm:$0xff]  ;;  %v2637_v15 = vmul.f32 0.13378906, %v7317_v13  ;;  %v3673_v1 = vpack.c.bf16 %v9294_v17, %v9294_v17  ;;  %v3095_v52 = vmul.f32 0.5, %v9295_v0 }
 0x2a0   : > { %9286 = vst [vmem:[#allocation141_spill] sm:$0xff] %v7365_v41  ;;  %v3672_v45 = vpack.c.bf16 %v9293_v20, %v9293_v20  ;;  %v2892_v57 = vpack.c.bf16 %v2828_v39, %v2828_v39  ;;  %v1318_v30 = vmul.f32 %v1254_v33, %v7253_v38  ;;  %v7400_v44 = vpop.eup %5435  ;;  %v3158_v14 = vpack.c.bf16 %v3094_v28, %v3094_v28  ;;  %v741_v20 = vpop.f32.mrf.mxu1 }
 0x2a1   : > { %9288 = vst [vmem:[#allocation98_spill] sm:$0xff] %v7372_v9  ;;  %v1034_v42 = vunpack.c.l.bf16 %v970_v34  ;;  %v999_v40 = vpack.c.bf16 %v935_v4, %v935_v4  ;;  %v1701_v31 = vmul.f32 0.796875, %v1637_v18  ;;  %v2672_v16 = vpack.c.bf16 %v2608_v63, %v2608_v63 }
 0x2a2   : > { %9289 = vst [vmem:[#allocation142_spill] sm:$0xff] %v7376_v24  ;;  %v779_v17 = vpack.c.bf16 %v662_v23, %v662_v23  ;;  %v7408_v39 = vunpack.c.l.bf16 %v3672_v45  ;;  %v1481_v33 = vadd.f32 %v1417_v27, %v7199_v2  ;;  %v2701_v28 = vpack.c.bf16 %v2637_v15, %v2637_v15  ;;  %v668_v24 = vpop.f32.mrf.mxu0 }
 0x2a3   : > { %9290 = vst [vmem:[#allocation143_spill] sm:$0xff] %v7378_v7  ;;  %v7411_v34 = vunpack.c.l.bf16 %v3673_v1  ;;  %v7413_v4 = vunpack.c.l.bf16 %v2892_v57  ;;  %v3159_v60 = vpack.c.bf16 %v3095_v52, %v3095_v52  ;;  %v1382_v7 = vpack.c.bf16 %v1318_v30, %v1318_v30 }
 0x2a4   : > { %9292 = vst [vmem:[#allocation37_spill] sm:$0xff] %v7381_v26  ;;  %v7415_v58 = vunpack.c.l.bf16 %v3158_v14  ;;  %v1098_v18 = vmul.f32 0.044677734, %v1034_v42  ;;  %v1063_v63 = vunpack.c.l.bf16 %v999_v40  ;;  %v808_v23 = vpack.c.bf16 %v734_v47, %v734_v47 }
 0x2a5   : > { %9296 = vst [vmem:[#allocation30_spill] sm:$0xff] %v7400_v44  ;;  %v1765_v13 = vpack.c.bf16 %v1701_v31, %v1701_v31  ;;  %v2736_v54 = vunpack.c.l.bf16 %v2672_v16  ;;  %v7417_v0 = vunpack.c.l.bf16 %v779_v17  ;;  %v664_v45 = vadd.f32 %v7153_v53, %v7319_v49 }
 0x2a6   : > { %9297 = vst [vmem:[#allocation99_spill] sm:$0xff] %v7408_v39  ;;  %v1545_v27 = vpack.c.bf16 %v1481_v33, %v1481_v33  ;;  %v2765_v15 = vunpack.c.l.bf16 %v2701_v28  ;;  %v667_v57 = vadd.f32 %v7153_v53, %v666_v3  ;;  %v669_v52 = vadd.f32 %v7153_v53, %v668_v24 }
 0x2a7   : > { %9298 = vst [vmem:[#allocation31_spill] sm:$0xff] %v7411_v34  ;;  %v1446_v1 = vunpack.c.l.bf16 %v1382_v7  ;;  %v2609_v30 = vmul.f32 0.13378906, %v1034_v42  ;;  %v737_v14 = vadd.f32 %v7153_v53, %v7302_v61  ;;  %v742_v47 = vadd.f32 %v7153_v53, %v741_v20 }
 0x2a8   : > { %9299 = vst [vmem:[#allocation144_spill] sm:$0xff] %v7413_v4  ;;  %v7426_v40 = vunpack.c.l.bf16 %v3159_v60  ;;  %v1162_v16 = vpack.c.bf16 %v1098_v18, %v1098_v18  ;;  %v1127_v31 = vmul.f32 0.044677734, %v1063_v63  ;;  %v7428_v17 = vunpack.c.l.bf16 %v808_v23  ;;  %v743_v34 = vpop.f32.mrf.mxu1 }
 0x2a9   : > { %9300 = vst [vmem:[#allocation145_spill] sm:$0xff] %v7415_v58  ;;  %v1829_v49 = vunpack.c.l.bf16 %v1765_v13  ;;  %v2638_v33 = vmul.f32 0.13378906, %v1063_v63  ;;  %v907_v3 = vmul.f32 %v7417_v0, %v7417_v0  ;;  %v780_v28 = vpack.c.bf16 %v664_v45, %v664_v45 }
 0x2aa   : > { %9301 = vst [vmem:[#allocation146_spill] sm:$0xff] %v7426_v40  ;;  %v1609_v24 = vunpack.c.l.bf16 %v1545_v27  ;;  %v2829_v7 = vadd.f32 1.0, %v2765_v15  ;;  %v781_v42 = vpack.c.bf16 %v667_v57, %v667_v57  ;;  %v782_v4 = vpack.c.bf16 %v669_v52, %v669_v52 }
 0x2ab   : > { %9302 = vst [vmem:[#allocation147_spill] sm:$0xff] %v7428_v17  ;;  %v1510_v61 = vadd.f32 %v1446_v1, %v7253_v38  ;;  %v2673_v20 = vpack.c.bf16 %v2609_v30, %v2609_v30  ;;  %v809_v60 = vpack.c.bf16 %v737_v14, %v737_v14  ;;  %v811_v39 = vpack.c.bf16 %v742_v47, %v742_v47 }
 0x2ac   : > { %v7433_v18 = vadd.f32 1.0, %v2736_v54  ;;  %v1226_v23 = vunpack.c.l.bf16 %v1162_v16  ;;  %v1191_v26 = vpack.c.bf16 %v1127_v31, %v1127_v31  ;;  %v936_v13 = vmul.f32 %v7428_v17, %v7428_v17 }
 0x2ad   : > { %5437 = vtanh.f32 %v1829_v49  ;;  %v2702_v63 = vpack.c.bf16 %v2638_v33, %v2638_v33  ;;  %v971_v45 = vpack.c.bf16 %v907_v3, %v907_v3  ;;  %v7437_v27 = vunpack.c.l.bf16 %v780_v28 }
 0x2ae   : > { %v7439_v15 = vmul.f32 0.796875, %v1609_v24  ;;  %v2893_v57 = vpack.c.bf16 %v2829_v7, %v2829_v7  ;;  %v7441_v52 = vunpack.c.l.bf16 %v781_v42  ;;  %v7443_v1 = vunpack.c.l.bf16 %v782_v4 }
 0x2af   : > { %v1574_v30 = vpack.c.bf16 %v1510_v61, %v1510_v61  ;;  %v2737_v54 = vunpack.c.l.bf16 %v2673_v20  ;;  %v7445_v14 = vunpack.c.l.bf16 %v809_v60  ;;  %v7447_v47 = vunpack.c.l.bf16 %v811_v39 }
 0x2b0   : > { %v1290_v31 = vmul.f32 %v1226_v23, %v7339_v12  ;;  %v1255_v49 = vunpack.c.l.bf16 %v1191_v26  ;;  %v1000_v33 = vpack.c.bf16 %v936_v13, %v936_v13  ;;  %v2766_v28 = vunpack.c.l.bf16 %v2702_v63  ;;  %v671_v63 = vpop.f32.mrf.mxu0  ;;  %v746_v7 = vpop.f32.mrf.mxu1 }
 0x2b1   : > { %9303 = vst [vmem:[#allocation148_spill] sm:$0xff] %v7445_v14  ;;  %v1035_v24 = vunpack.c.l.bf16 %v971_v45  ;;  %v908_v4 = vmul.f32 %v7437_v27, %v7437_v27  ;;  %v7458_v39 = vunpack.c.l.bf16 %v2893_v57  ;;  %v909_v42 = vmul.f32 %v7441_v52, %v7441_v52 }
 0x2b2   : > { %v910_v26 = vmul.f32 %v7443_v1, %v7443_v1  ;;  %v1638_v20 = vunpack.c.l.bf16 %v1574_v30  ;;  %v7466_v60 = vadd.f32 1.0, %v2737_v54  ;;  %v937_v23 = vmul.f32 %v7445_v14, %v7445_v14 }
 0x2b3   : > { %9304 = vst [vmem:[#allocation149_spill] sm:$0xff] %v7458_v39  ;;  %v7464_v61 = vpop.eup %5437  ;;  %v939_v13 = vmul.f32 %v7447_v47, %v7447_v47  ;;  %v1354_v45 = vpack.c.bf16 %v1290_v31, %v1290_v31  ;;  %v1319_v57 = vmul.f32 %v1255_v49, %v7365_v41  ;;  %v1064_v3 = vunpack.c.l.bf16 %v1000_v33 }
 0x2b4   : > { %9305 = vst [vmem:[#allocation150_spill] sm:$0xff] %v7464_v61  ;;  %v744_v16 = vadd.f32 %v7153_v53, %v743_v34  ;;  %v2830_v39 = vadd.f32 1.0, %v2766_v28  ;;  %v1099_v9 = vmul.f32 0.044677734, %v1035_v24  ;;  %v972_v40 = vpack.c.bf16 %v908_v4, %v908_v4 }
 0x2b5   : > { %v747_v30 = vadd.f32 %v7153_v53, %v746_v7  ;;  %v2610_v54 = vmul.f32 0.13378906, %v1035_v24  ;;  %v973_v58 = vpack.c.bf16 %v909_v42, %v909_v42  ;;  %v974_v19 = vpack.c.bf16 %v910_v26, %v910_v26 }
 0x2b6   : > { %v672_v59 = vadd.f32 %v7153_v53, %v671_v63  ;;  %v1702_v48 = vmul.f32 0.796875, %v1638_v20  ;;  %v1001_v43 = vpack.c.bf16 %v937_v23, %v937_v23  ;;  %v739_v31 = vadd.f32 %v7153_v53, %v7353_v25 }
 0x2b7   : > { %v1003_v49 = vpack.c.bf16 %v939_v13, %v939_v13  ;;  %v1418_v33 = vunpack.c.l.bf16 %v1354_v45  ;;  %v1383_v51 = vpack.c.bf16 %v1319_v57, %v1319_v57  ;;  %v1128_v34 = vmul.f32 0.044677734, %v1064_v3 }
 0x2b8   : > { %v812_v55 = vpack.c.bf16 %v744_v16, %v744_v16  ;;  %v2894_v28 = vpack.c.bf16 %v2830_v39, %v2830_v39  ;;  %v1163_v44 = vpack.c.bf16 %v1099_v9, %v1099_v9  ;;  %v7478_v4 = vunpack.c.l.bf16 %v972_v40  ;;  %v748_v61 = vpop.f32.mrf.mxu1 }
 0x2b9   : > { %v813_v7 = vpack.c.bf16 %v747_v30, %v747_v30  ;;  %v2674_v24 = vpack.c.bf16 %v2610_v54, %v2610_v54  ;;  %v7480_v42 = vunpack.c.l.bf16 %v973_v58  ;;  %v7482_v26 = vunpack.c.l.bf16 %v974_v19  ;;  %v673_v30 = vpop.f32.mrf.mxu0 }
 0x2ba   : > { %v783_v20 = vpack.c.bf16 %v672_v59, %v672_v59  ;;  %v1766_v23 = vpack.c.bf16 %v1702_v48, %v1702_v48  ;;  %v7484_v63 = vunpack.c.l.bf16 %v1001_v43  ;;  %v810_v25 = vpack.c.bf16 %v739_v31, %v739_v31 }
 0x2bb   : > { %v7486_v13 = vunpack.c.l.bf16 %v1003_v49  ;;  %v1482_v45 = vadd.f32 %v1418_v33, %v7339_v12  ;;  %v1192_v16 = vpack.c.bf16 %v1128_v34, %v1128_v34  ;;  %v2639_v39 = vmul.f32 0.13378906, %v1064_v3 }
 0x2bc   : > { %v7489_v9 = vunpack.c.l.bf16 %v812_v55  ;;  %v1447_v40 = vunpack.c.l.bf16 %v1383_v51  ;;  %v1227_v57 = vunpack.c.l.bf16 %v1163_v44  ;;  %v1100_v58 = vmul.f32 0.044677734, %v7478_v4 }
 0x2bd   : > { %9306 = vst [vmem:[#allocation151_spill] sm:$0xff] %v7486_v13  ;;  %v7492_v19 = vunpack.c.l.bf16 %v813_v7  ;;  %v7494_v59 = vunpack.c.l.bf16 %v2894_v28  ;;  %v1101_v48 = vmul.f32 0.044677734, %v7480_v42  ;;  %v1102_v43 = vmul.f32 0.044677734, %v7482_v26 }
 0x2be   : > { %v7498_v54 = vunpack.c.l.bf16 %v783_v20  ;;  %v2738_v31 = vunpack.c.l.bf16 %v2674_v24  ;;  %v1129_v3 = vmul.f32 0.044677734, %v7484_v63  ;;  %v7501_v55 = vunpack.c.l.bf16 %v810_v25 }
 0x2bf   : > { %9307 = vst [vmem:[#allocation152_spill] sm:$0xff] %v7494_v59  ;;  %v1131_v51 = vmul.f32 0.044677734, %v7486_v13  ;;  %v7504_v44 = vunpack.c.l.bf16 %v1766_v23  ;;  %v1256_v49 = vunpack.c.l.bf16 %v1192_v16  ;;  %v940_v33 = vmul.f32 %v7489_v9, %v7489_v9 }
 0x2c0   : > { %9308 = vst [vmem:[#allocation153_spill] sm:$0xff] %v7498_v54  ;;  %v674_v34 = vadd.f32 %v7153_v53, %v673_v30  ;;  %v1511_v28 = vadd.f32 %v1447_v40, %v7365_v41  ;;  %v1291_v7 = vmul.f32 %v1227_v57, %v7417_v0  ;;  %v1164_v20 = vpack.c.bf16 %v1100_v58, %v1100_v58 }
 0x2c1   : > { %9309 = vst [vmem:[#allocation154_spill] sm:$0xff] %v7501_v55  ;;  %v941_v24 = vmul.f32 %v7492_v19, %v7492_v19  ;;  %v1546_v25 = vpack.c.bf16 %v1482_v45, %v1482_v45  ;;  %v1165_v59 = vpack.c.bf16 %v1101_v48, %v1101_v48  ;;  %v1166_v6 = vpack.c.bf16 %v1102_v43, %v1102_v43 }
 0x2c2   : > { %9310 = vst [vmem:[#allocation155_spill] sm:$0xff] %v7504_v44  ;;  %v911_v23 = vmul.f32 %v7498_v54, %v7498_v54  ;;  %v2703_v16 = vpack.c.bf16 %v2639_v39, %v2639_v39  ;;  %v1193_v38 = vpack.c.bf16 %v1129_v3, %v1129_v3  ;;  %v938_v11 = vmul.f32 %v7501_v55, %v7501_v55 }
 0x2c3   : > { %v1195_v30 = vpack.c.bf16 %v1131_v51, %v1131_v51  ;;  %v7517_v40 = vadd.f32 1.0, %v2738_v31  ;;  %v1320_v57 = vmul.f32 %v1256_v49, %v7428_v17  ;;  %v1004_v58 = vpack.c.bf16 %v940_v33, %v940_v33 }
 0x2c4   : > { %v784_v41 = vpack.c.bf16 %v674_v34, %v674_v34  ;;  %v1575_v21 = vpack.c.bf16 %v1511_v28, %v1511_v28  ;;  %v1355_v45 = vpack.c.bf16 %v1291_v7, %v1291_v7  ;;  %v1228_v48 = vunpack.c.l.bf16 %v1164_v20 }
 0x2c5   : > { %v1005_v43 = vpack.c.bf16 %v941_v24, %v941_v24  ;;  %v1229_v13 = vunpack.c.l.bf16 %v1165_v59  ;;  %v1230_v44 = vunpack.c.l.bf16 %v1166_v6  ;;  %v975_v32 = vpack.c.bf16 %v911_v23, %v911_v23 }
 0x2c6   : > { %v749_v39 = vadd.f32 %v7153_v53, %v748_v61  ;;  %v1610_v3 = vunpack.c.l.bf16 %v1546_v25  ;;  %v1257_v22 = vunpack.c.l.bf16 %v1193_v38  ;;  %v1002_v8 = vpack.c.bf16 %v938_v11, %v938_v11 }
 0x2c7   : > { %v1259_v51 = vunpack.c.l.bf16 %v1195_v30  ;;  %v1384_v50 = vpack.c.bf16 %v1320_v57, %v1320_v57  ;;  %v2767_v31 = vunpack.c.l.bf16 %v2703_v16  ;;  %v7521_v46 = vunpack.c.l.bf16 %v1004_v58 }
 0x2c8   : > { %v7523_v49 = vunpack.c.l.bf16 %v784_v41  ;;  %v1639_v33 = vunpack.c.l.bf16 %v1575_v21  ;;  %v1419_v34 = vunpack.c.l.bf16 %v1355_v45  ;;  %v1292_v28 = vmul.f32 %v1228_v48, %v7437_v27 }
 0x2c9   : > { %9311 = vst [vmem:[#allocation156_spill] sm:$0xff] %v7521_v46  ;;  %v7526_v7 = vunpack.c.l.bf16 %v1005_v43  ;;  %v1293_v6 = vmul.f32 %v1229_v13, %v7441_v52  ;;  %v1294_v61 = vmul.f32 %v1230_v44, %v7443_v1  ;;  %v7530_v59 = vunpack.c.l.bf16 %v975_v32 }
 0x2ca   : > { %9312 = vst [vmem:[#allocation157_spill] sm:$0xff] %v7523_v49  ;;  %v814_v38 = vpack.c.bf16 %v749_v39, %v749_v39  ;;  %v7532_v11 = vmul.f32 0.796875, %v1610_v3  ;;  %v1321_v20 = vmul.f32 %v1257_v22, %v7445_v14  ;;  %v7535_v24 = vunpack.c.l.bf16 %v1002_v8 }
 0x2cb   : > { %9313 = vst [vmem:[#allocation158_spill] sm:$0xff] %v7526_v7  ;;  %v1323_v21 = vmul.f32 %v1259_v51, %v7447_v47  ;;  %v1448_v41 = vunpack.c.l.bf16 %v1384_v50  ;;  %v7538_v25 = vadd.f32 1.0, %v2767_v31  ;;  %v1132_v23 = vmul.f32 0.044677734, %v7521_v46 }
 0x2cc   : > { %9314 = vst [vmem:[#allocation159_spill] sm:$0xff] %v7530_v59  ;;  %v912_v13 = vmul.f32 %v7523_v49, %v7523_v49  ;;  %v1703_v44 = vmul.f32 0.796875, %v1639_v33  ;;  %v1483_v32 = vadd.f32 %v1419_v34, %v7417_v0  ;;  %v1356_v16 = vpack.c.bf16 %v1292_v28, %v1292_v28 }
 0x2cd   : > { %9315 = vst [vmem:[#allocation160_spill] sm:$0xff] %v7535_v24  ;;  %v1133_v30 = vmul.f32 0.044677734, %v7526_v7  ;;  %v1357_v57 = vpack.c.bf16 %v1293_v6, %v1293_v6  ;;  %v1358_v22 = vpack.c.bf16 %v1294_v61, %v1294_v61  ;;  %v1103_v8 = vmul.f32 0.044677734, %v7530_v59 }
 0x2ce   : > { %9316 = vst [vmem:[#allocation161_spill] sm:$0xff] %v7538_v25  ;;  %v7546_v58 = vunpack.c.l.bf16 %v814_v38  ;;  %v2611_v50 = vmul.f32 0.13378906, %v7478_v4  ;;  %v1385_v45 = vpack.c.bf16 %v1321_v20, %v1321_v20  ;;  %v1130_v48 = vmul.f32 0.044677734, %v7535_v24 }
 0x2cf   : > { %v1387_v43 = vpack.c.bf16 %v1323_v21, %v1323_v21  ;;  %v1512_v3 = vadd.f32 %v1448_v41, %v7428_v17  ;;  %v1196_v51 = vpack.c.bf16 %v1132_v23, %v1132_v23  ;;  %v976_v31 = vpack.c.bf16 %v912_v13, %v912_v13 }
 0x2d0   : > { %v1767_v33 = vpack.c.bf16 %v1703_v44, %v1703_v44  ;;  %v1547_v34 = vpack.c.bf16 %v1483_v32, %v1483_v32  ;;  %v1420_v28 = vunpack.c.l.bf16 %v1356_v16  ;;  %v1197_v6 = vpack.c.bf16 %v1133_v30, %v1133_v30 }
 0x2d1   : > { %v1421_v61 = vunpack.c.l.bf16 %v1357_v57  ;;  %v1422_v38 = vunpack.c.l.bf16 %v1358_v22  ;;  %v1167_v7 = vpack.c.bf16 %v1103_v8, %v1103_v8  ;;  %v942_v4 = vmul.f32 %v7546_v58, %v7546_v58 }
 0x2d2   : > { %v2675_v20 = vpack.c.bf16 %v2611_v50, %v2611_v50  ;;  %v1449_v46 = vunpack.c.l.bf16 %v1385_v45  ;;  %v1194_v21 = vpack.c.bf16 %v1130_v48, %v1130_v48  ;;  %v1451_v59 = vunpack.c.l.bf16 %v1387_v43  ;;  %v676_v50 = vpop.f32.mrf.mxu0 }
 0x2d3   : > { %v1576_v24 = vpack.c.bf16 %v1512_v3, %v1512_v3  ;;  %v1260_v23 = vunpack.c.l.bf16 %v1196_v51  ;;  %v7557_v13 = vunpack.c.l.bf16 %v976_v31  ;;  %v7559_v44 = vunpack.c.l.bf16 %v1767_v33 }
 0x2d4   : > { %v1611_v32 = vunpack.c.l.bf16 %v1547_v34  ;;  %v1484_v16 = vadd.f32 %v1420_v28, %v7437_v27  ;;  %v1261_v30 = vunpack.c.l.bf16 %v1197_v6  ;;  %v1485_v57 = vadd.f32 %v1421_v61, %v7441_v52 }
 0x2d5   : > { %9317 = vst [vmem:[#allocation162_spill] sm:$0xff] %v7559_v44  ;;  %v1486_v22 = vadd.f32 %v1422_v38, %v7443_v1  ;;  %v1231_v8 = vunpack.c.l.bf16 %v1167_v7  ;;  %v1006_v45 = vpack.c.bf16 %v942_v4, %v942_v4  ;;  %v2739_v48 = vunpack.c.l.bf16 %v2675_v20 }
 0x2d6   : > { %v1513_v43 = vadd.f32 %v1449_v46, %v7445_v14  ;;  %v1258_v3 = vunpack.c.l.bf16 %v1194_v21  ;;  %v1515_v51 = vadd.f32 %v1451_v59, %v7447_v47  ;;  %v1640_v31 = vunpack.c.l.bf16 %v1576_v24 }
 0x2d7   : > { %v2640_v33 = vmul.f32 0.13378906, %v7484_v63  ;;  %v1324_v34 = vmul.f32 %v1260_v23, %v7489_v9  ;;  %v1104_v28 = vmul.f32 0.044677734, %v7557_v13  ;;  %v7569_v6 = vmul.f32 0.796875, %v1611_v32 }
 0x2d8   : > { %v1548_v61 = vpack.c.bf16 %v1484_v16, %v1484_v16  ;;  %v1325_v7 = vmul.f32 %v1261_v30, %v7492_v19  ;;  %v677_v38 = vadd.f32 %v7153_v53, %v676_v50  ;;  %v1549_v4 = vpack.c.bf16 %v1485_v57, %v1485_v57 }
 0x2d9   : > { %v1550_v20 = vpack.c.bf16 %v1486_v22, %v1486_v22  ;;  %v1295_v46 = vmul.f32 %v1231_v8, %v7498_v54  ;;  %v7574_v21 = vunpack.c.l.bf16 %v1006_v45  ;;  %v7576_v59 = vadd.f32 1.0, %v2739_v48 }
 0x2da   : > { %v1577_v63 = vpack.c.bf16 %v1513_v43, %v1513_v43  ;;  %v1322_v24 = vmul.f32 %v1258_v3, %v7501_v55  ;;  %v1579_v23 = vpack.c.bf16 %v1515_v51, %v1515_v51  ;;  %v7579_v41 = vmul.f32 0.796875, %v1640_v31 }
 0x2db   : > { %9318 = vst [vmem:[#allocation163_spill] sm:$0xff] %v7574_v21  ;;  %v2704_v32 = vpack.c.bf16 %v2640_v33, %v2640_v33  ;;  %v1388_v16 = vpack.c.bf16 %v1324_v34, %v1324_v34  ;;  %v1168_v39 = vpack.c.bf16 %v1104_v28, %v1104_v28  ;;  %v1739_v53 = vpack.c.bf16 %v7569_v6, %v7569_v6 }
 0x2dc   : > { %v1612_v30 = vunpack.c.l.bf16 %v1548_v61  ;;  %v1389_v57 = vpack.c.bf16 %v1325_v7, %v1325_v7  ;;  %v785_v22 = vpack.c.bf16 %v677_v38, %v677_v38  ;;  %v1613_v8 = vunpack.c.l.bf16 %v1549_v4 }
 0x2dd   : > { %v1614_v50 = vunpack.c.l.bf16 %v1550_v20  ;;  %v1359_v45 = vpack.c.bf16 %v1295_v46, %v1295_v46  ;;  %v1134_v48 = vmul.f32 0.044677734, %v7574_v21  ;;  %v1641_v43 = vunpack.c.l.bf16 %v1577_v63 }
 0x2de   : > { %v2612_v3 = vmul.f32 0.13378906, %v7480_v42  ;;  %v1386_v51 = vpack.c.bf16 %v1322_v24, %v1322_v24  ;;  %v1643_v31 = vunpack.c.l.bf16 %v1579_v23  ;;  %v7587_v34 = vunpack.c.l.bf16 %v2704_v32 }
 0x2df   : > { %v1452_v28 = vunpack.c.l.bf16 %v1388_v16  ;;  %v1232_v6 = vunpack.c.l.bf16 %v1168_v39  ;;  %v1676_v61 = vmul.f32 0.796875, %v1612_v30  ;;  %v2613_v7 = vmul.f32 0.13378906, %v7482_v26 }
 0x2e0   : > { %v1453_v38 = vunpack.c.l.bf16 %v1389_v57  ;;  %v7590_v4 = vunpack.c.l.bf16 %v785_v22  ;;  %v1423_v20 = vunpack.c.l.bf16 %v1359_v45  ;;  %v1198_v46 = vpack.c.bf16 %v1134_v48, %v1134_v48 }
 0x2e1   : > { %v1677_v63 = vmul.f32 0.796875, %v1613_v8  ;;  %v1678_v21 = vmul.f32 0.796875, %v1614_v50  ;;  %v1705_v42 = vmul.f32 0.796875, %v1641_v43  ;;  %v2676_v24 = vpack.c.bf16 %v2612_v3, %v2612_v3 }
 0x2e2   : > { %v1450_v23 = vunpack.c.l.bf16 %v1386_v51  ;;  %v1707_v17 = vmul.f32 0.796875, %v1643_v31  ;;  %v1516_v33 = vadd.f32 %v1452_v28, %v7489_v9  ;;  %v1296_v32 = vmul.f32 %v1232_v6, %v7523_v49 }
 0x2e3   : > { %v1741_v16 = vpack.c.bf16 %v1677_v63, %v1677_v63  ;;  %v1742_v39 = vpack.c.bf16 %v1678_v21, %v1678_v21  ;;  %v1740_v30 = vpack.c.bf16 %v1676_v61, %v1676_v61  ;;  %v2677_v14 = vpack.c.bf16 %v2613_v7, %v2613_v7 }
 0x2e4   : > { %v1517_v26 = vadd.f32 %v1453_v38, %v7492_v19  ;;  %v913_v57 = vmul.f32 %v7590_v4, %v7590_v4  ;;  %v1487_v22 = vadd.f32 %v1423_v20, %v7498_v54  ;;  %v1262_v8 = vunpack.c.l.bf16 %v1198_v46 }
 0x2e5   : > { %v1805_v50 = vunpack.c.l.bf16 %v1741_v16  ;;  %v1806_v45 = vunpack.c.l.bf16 %v1742_v39  ;;  %v1769_v48 = vpack.c.bf16 %v1705_v42, %v1705_v42  ;;  %v7599_v43 = vadd.f32 %v1450_v23, %v7501_v55 }
 0x2e6   : > { %v1771_v3 = vpack.c.bf16 %v1707_v17, %v1707_v17  ;;  %v2221_v51 = vmul.f32 0.5, %v7492_v19  ;;  %v2740_v21 = vunpack.c.l.bf16 %v2676_v24  ;;  %v1580_v31 = vpack.c.bf16 %v1516_v33, %v1516_v33  ;;  %v678_v24 = vpop.f32.mrf.mxu0 }
 0x2e7   : > { %v1360_v28 = vpack.c.bf16 %v1296_v32, %v1296_v32  ;;  %5439 = vtanh.f32 %v1805_v50  ;;  %v2741_v6 = vunpack.c.l.bf16 %v2677_v14  ;;  %v1581_v61 = vpack.c.bf16 %v1517_v26, %v1517_v26 }
 0x2e8   : > { %v977_v7 = vpack.c.bf16 %v913_v57, %v913_v57  ;;  %5441 = vtanh.f32 %v1806_v45  ;;  %v1551_v38 = vpack.c.bf16 %v1487_v22, %v1487_v22  ;;  %v1326_v20 = vmul.f32 %v1262_v8, %v7546_v58  ;;  %v5500_v22 = vld [vmem:[%s8846_s2] ss:$0 sm:$0xff] }
 0x2e9   : > { %v1803_v46 = vunpack.c.l.bf16 %v1739_v53  ;;  %v1804_v63 = vunpack.c.l.bf16 %v1740_v30  ;;  %v7603_v42 = vunpack.c.l.bf16 %v1769_v48  ;;  %v1835_v23 = vunpack.c.l.bf16 %v1771_v3 }
 0x2ea   : > { %v2285_v19 = vpack.c.bf16 %v2221_v51, %v2221_v51  ;;  %v1644_v33 = vunpack.c.l.bf16 %v1580_v31  ;;  %v1424_v32 = vunpack.c.l.bf16 %v1360_v28  ;;  %v2804_v16 = vadd.f32 1.0, %v2740_v21 }
 0x2eb   : > { %5443 = vtanh.f32 %v1803_v46  ;;  %v1645_v14 = vunpack.c.l.bf16 %v1581_v61  ;;  %v7607_v39 = vunpack.c.l.bf16 %v977_v7  ;;  %v2805_v26 = vadd.f32 1.0, %v2741_v6 }
 0x2ec   : > { %5445 = vtanh.f32 %v1804_v63  ;;  %v7609_v53 = vunpack.c.l.bf16 %v1551_v38  ;;  %v1390_v30 = vpack.c.bf16 %v1326_v20, %v1326_v20  ;;  %v679_v8 = vadd.f32 %v5500_v22, %v678_v24 }
 0x2ed   : > { %v5440_v57 = vpop.eup %5439  ;;  %v2189_v50 = vmul.f32 0.5, %v7441_v52  ;;  %5447 = vtanh.f32 %v1835_v23  ;;  %v7615_v48 = vunpack.c.l.bf16 %v2285_v19  ;;  %v2190_v51 = vmul.f32 0.5, %v7443_v1 }
 0x2ee   : > { %v5442_v45 = vpop.eup %5441  ;;  %v1933_v3 = vpack.c.bf16 %v5440_v57, %v5440_v57  ;;  %v7618_v21 = vmul.f32 0.796875, %v1644_v33  ;;  %v7621_v31 = vadd.f32 %v1424_v32, %v7523_v49  ;;  %v2868_v6 = vpack.c.bf16 %v2804_v16, %v2804_v16 }
 0x2ef   : > { %9319 = vst [vmem:[#allocation164_spill] sm:$0xff] %v7615_v48  ;;  %v1934_v28 = vpack.c.bf16 %v5442_v45, %v5442_v45  ;;  %v7623_v61 = vmul.f32 0.796875, %v1645_v14  ;;  %v7626_v7 = vmul.f32 0.044677734, %v7607_v39  ;;  %v2869_v38 = vpack.c.bf16 %v2805_v26, %v2805_v26 }
 0x2f0   : > { %v1997_v52 = vunpack.c.l.bf16 %v1933_v3  ;;  %v1454_v46 = vunpack.c.l.bf16 %v1390_v30  ;;  %v786_v63 = vpack.c.bf16 %v679_v8, %v679_v8  ;;  %v2253_v19 = vpack.c.bf16 %v2189_v50, %v2189_v50 }
 0x2f1   : > { %v5444_v20 = vpop.eup %5443  ;;  %v1998_v23 = vunpack.c.l.bf16 %v1934_v28  ;;  %v2254_v33 = vpack.c.bf16 %v2190_v51, %v2190_v51  ;;  %v2932_v45 = vunpack.c.l.bf16 %v2868_v6  ;;  %v2933_v25 = vunpack.c.l.bf16 %v2869_v38 }
 0x2f2   : > { %v5446_v1 = vpop.eup %5445  ;;  %v2061_v24 = vadd.f32 1.0, %v1997_v52  ;;  %v3252_v57 = vmul.f32 %v1997_v52, %v1997_v52  ;;  %v1931_v32 = vpack.c.bf16 %v5444_v20, %v5444_v20  ;;  %v2187_v50 = vmul.f32 0.5, %v7417_v0 }
 0x2f3   : > { %v2062_v22 = vadd.f32 1.0, %v1998_v23  ;;  %v3253_v16 = vmul.f32 %v1998_v23, %v1998_v23  ;;  %v1932_v14 = vpack.c.bf16 %v5446_v1, %v5446_v1  ;;  %v7628_v17 = vpop.eup %5447  ;;  %v2188_v20 = vmul.f32 0.5, %v7437_v27 }
 0x2f4   : > { %v2125_v55 = vpack.c.bf16 %v2061_v24, %v2061_v24  ;;  %v3316_v3 = vpack.c.bf16 %v3252_v57, %v3252_v57  ;;  %v1995_v26 = vunpack.c.l.bf16 %v1931_v32  ;;  %v2317_v6 = vunpack.c.l.bf16 %v2253_v19 }
 0x2f5   : > { %v2126_v44 = vpack.c.bf16 %v2062_v22, %v2062_v22  ;;  %v3317_v30 = vpack.c.bf16 %v3253_v16, %v3253_v16  ;;  %v1996_v8 = vunpack.c.l.bf16 %v1932_v14  ;;  %v2318_v23 = vunpack.c.l.bf16 %v2254_v33 }
 0x2f6   : > { %v7631_v28 = vunpack.c.l.bf16 %v2125_v55  ;;  %v3380_v51 = vunpack.c.l.bf16 %v3316_v3  ;;  %v2059_v52 = vadd.f32 1.0, %v1995_v26  ;;  %v7636_v24 = vunpack.c.l.bf16 %v786_v63 }
 0x2f7   : > { %v7634_v1 = vunpack.c.l.bf16 %v2126_v44  ;;  %v3381_v49 = vunpack.c.l.bf16 %v3317_v30  ;;  %v2996_v38 = vmul.f32 0.796875, %v2932_v45  ;;  %v2060_v32 = vadd.f32 1.0, %v1996_v8 }
 0x2f8   : > { %9320 = vst [vmem:[#allocation165_spill] sm:$0xff] %v7631_v28  ;;  %v3444_v57 = vsub.f32 1.0, %v3380_v51  ;;  %v2445_v22 = vmul.f32 %v7631_v28, %v2317_v6  ;;  %v2997_v55 = vmul.f32 0.796875, %v2933_v25  ;;  %v2123_v3 = vpack.c.bf16 %v2059_v52, %v2059_v52 }
 0x2f9   : > { %9321 = vst [vmem:[#allocation166_spill] sm:$0xff] %v7634_v1  ;;  %v2446_v0 = vmul.f32 %v7634_v1, %v2318_v23  ;;  %v3445_v16 = vsub.f32 1.0, %v3381_v49  ;;  %v2251_v54 = vpack.c.bf16 %v2187_v50, %v2187_v50  ;;  %v2252_v27 = vpack.c.bf16 %v2188_v20, %v2188_v20 }
 0x2fa   : > { %v3508_v14 = vpack.c.bf16 %v3444_v57, %v3444_v57  ;;  %v1773_v44 = vpack.c.bf16 %v7623_v61, %v7623_v61  ;;  %v1169_v63 = vpack.c.bf16 %v7626_v7, %v7626_v7  ;;  %v1518_v45 = vadd.f32 %v1454_v46, %v7546_v58 }
 0x2fb   : > { %v2494_v19 = vpack.c.bf16 %v2446_v0, %v2445_v22  ;;  %v3509_v33 = vpack.c.bf16 %v3445_v16, %v3445_v16  ;;  %v914_v30 = vmul.f32 %v7636_v24, %v7636_v24  ;;  %v2124_v25 = vpack.c.bf16 %v2060_v32, %v2060_v32 }
 0x2fc   : > { %v3572_v51 = vunpack.c.l.bf16 %v3508_v14  ;;  %v3060_v49 = vpack.c.bf16 %v2996_v38, %v2996_v38  ;;  %v3061_v52 = vpack.c.bf16 %v2997_v55, %v2997_v55  ;;  %v7647_v20 = vunpack.c.l.bf16 %v2123_v3 }
 0x2fd   : > { %2541 = vmatpush.bf16.msra.mxu2 %v2494_v19  ;;  %v3573_v50 = vunpack.c.l.bf16 %v3509_v33  ;;  %v2315_v61 = vunpack.c.l.bf16 %v2251_v54  ;;  %v7649_v1 = vunpack.c.l.bf16 %v2252_v27  ;;  %v7651_v7 = vunpack.c.l.bf16 %v2124_v25 }
 0x2fe   : > { %9322 = vst [vmem:[#allocation167_spill] sm:$0xff] %v7647_v20  ;;  %v3636_v57 = vmul.f32 %v3572_v51, %v2317_v6  ;;  %v1233_v22 = vunpack.c.l.bf16 %v1169_v63  ;;  %v2866_v46 = vpack.c.bf16 %v7517_v40, %v7517_v40  ;;  %v2867_v32 = vpack.c.bf16 %v7576_v59, %v7576_v59 }
 0x2ff   : > { %9323 = vst [vmem:[#allocation168_spill] sm:$0xff] %v7651_v7  ;;  %v3637_v0 = vmul.f32 %v3573_v50, %v2318_v23  ;;  %v1582_v16 = vpack.c.bf16 %v1518_v45, %v1518_v45  ;;  %v2443_v55 = vmul.f32 %v7647_v20, %v2315_v61  ;;  %v2444_v6 = vmul.f32 %v7651_v7, %v7649_v1 }
 0x300   : > { %v3700_v38 = vpack.c.bf16 %v3636_v57, %v3636_v57  ;;  %v978_v54 = vpack.c.bf16 %v914_v30, %v914_v30  ;;  %v3828_v3 = vunpack.c.l.bf16 %v3060_v49  ;;  %v3250_v27 = vmul.f32 %v1995_v26, %v1995_v26 }
 0x301   : > { %v3701_v14 = vpack.c.bf16 %v3637_v0, %v3637_v0  ;;  %v3829_v63 = vunpack.c.l.bf16 %v3061_v52  ;;  %v2493_v23 = vpack.c.bf16 %v2444_v6, %v2443_v55  ;;  %v3251_v33 = vmul.f32 %v1996_v8, %v1996_v8 }
 0x302   : > { %v3764_v19 = vunpack.c.l.bf16 %v3700_v38  ;;  %v2930_v40 = vunpack.c.l.bf16 %v2866_v46  ;;  %v2931_v25 = vunpack.c.l.bf16 %v2867_v32  ;;  %v3314_v50 = vpack.c.bf16 %v3250_v27, %v3250_v27 }
 0x303   : > { %v3765_v51 = vunpack.c.l.bf16 %v3701_v14  ;;  %v1772_v59 = vpack.c.bf16 %v7618_v21, %v7618_v21  ;;  %v1297_v45 = vmul.f32 %v1233_v22, %v7590_v4  ;;  %2542 = vmatpush.bf16.msra.mxu2 %v2493_v23  ;;  %v3315_v30 = vpack.c.bf16 %v3251_v33, %v3251_v33 }
 0x304   : > { %v7663_v57 = vmul.f32 %v3828_v3, %v3764_v19  ;;  %v1646_v0 = vunpack.c.l.bf16 %v1582_v16  ;;  %v3378_v26 = vunpack.c.l.bf16 %v3314_v50  ;;  %v9326_v8 = vpack.c.bf16 %v7439_v15, %v7439_v15 }
 0x305   : > { %v7665_v49 = vmul.f32 %v3829_v63, %v3765_v51  ;;  %v1837_v46 = vunpack.c.l.bf16 %v1773_v44  ;;  %v7670_v32 = vunpack.c.l.bf16 %v978_v54  ;;  %v3379_v38 = vunpack.c.l.bf16 %v3315_v30 }
 0x306   : > { %9324 = vst [vmem:[#allocation169_spill] sm:$0xff] %v7663_v57  ;;  %v1801_v52 = vunpack.c.l.bf16 %v9326_v8  ;;  %v9327_v21 = vpack.c.bf16 %v7532_v11, %v7532_v11  ;;  %v2994_v55 = vmul.f32 0.796875, %v2930_v40  ;;  %v2995_v6 = vmul.f32 0.796875, %v2931_v25 }
 0x307   : > { %9325 = vst [vmem:[#allocation170_spill] sm:$0xff] %v7665_v49  ;;  %v3442_v14 = vsub.f32 1.0, %v3378_v26  ;;  %v1361_v16 = vpack.c.bf16 %v1297_v45, %v1297_v45  ;;  %v3443_v3 = vsub.f32 1.0, %v3379_v38  ;;  %v2185_v27 = vmul.f32 0.5, %v7199_v2 }
 0x308   : > { %v1802_v22 = vunpack.c.l.bf16 %v9327_v21  ;;  %5449 = vtanh.f32 %v1801_v52  ;;  %v7676_v19 = vunpack.c.l.bf16 %v1772_v59  ;;  %v7678_v15 = vmul.f32 0.796875, %v1646_v0 }
 0x309   : > { %v3506_v44 = vpack.c.bf16 %v3442_v14, %v3442_v14  ;;  %v2186_v54 = vmul.f32 0.5, %v7339_v12  ;;  %v1106_v11 = vmul.f32 0.044677734, %v7670_v32  ;;  %v3507_v63 = vpack.c.bf16 %v3443_v3, %v3443_v3 }
 0x30a   : > { %5451 = vtanh.f32 %v1802_v22  ;;  %v9328_v23 = vpack.c.bf16 %v7311_v56, %v7311_v56  ;;  %v3058_v51 = vpack.c.bf16 %v2994_v55, %v2994_v55  ;;  %v3059_v40 = vpack.c.bf16 %v2995_v6, %v2995_v6 }
 0x30b   : > { %5453 = vtanh.f32 %v1837_v46  ;;  %v3570_v25 = vunpack.c.l.bf16 %v3506_v44  ;;  %v9329_v2 = vpack.c.bf16 %v7391_v5, %v7391_v5  ;;  %v7688_v59 = vunpack.c.l.bf16 %v1361_v16 }
 0x30c   : > { %v1799_v33 = vunpack.c.l.bf16 %v9328_v23  ;;  %v3571_v45 = vunpack.c.l.bf16 %v3507_v63  ;;  %v2249_v30 = vpack.c.bf16 %v2185_v27, %v2185_v27  ;;  %v1774_v0 = vpack.c.bf16 %v7678_v15, %v7678_v15 }
 0x30d   : > { %v1800_v50 = vunpack.c.l.bf16 %v9329_v2  ;;  %v3634_v26 = vmul.f32 %v3570_v25, %v2315_v61  ;;  %v2250_v8 = vpack.c.bf16 %v2186_v54, %v2186_v54  ;;  %v1170_v52 = vpack.c.bf16 %v1106_v11, %v1106_v11 }
 0x30e   : > { %5455 = vtanh.f32 %v1799_v33  ;;  %v5450_v12 = vpop.eup %5449  ;;  %v3635_v46 = vmul.f32 %v3571_v45, %v7649_v1  ;;  %v2183_v5 = vmul.f32 0.5, %v7036_v37  ;;  %v3826_v22 = vunpack.c.l.bf16 %v3058_v51 }
 0x30f   : > { %5457 = vtanh.f32 %v1800_v50  ;;  %v1929_v38 = vpack.c.bf16 %v5450_v12, %v5450_v12  ;;  %v3698_v21 = vpack.c.bf16 %v3634_v26, %v3634_v26  ;;  %v3827_v55 = vunpack.c.l.bf16 %v3059_v40 }
 0x310   : > { %v5452_v56 = vpop.eup %5451  ;;  %v3699_v16 = vpack.c.bf16 %v3635_v46, %v3635_v46  ;;  %v2313_v27 = vunpack.c.l.bf16 %v2249_v30  ;;  %v2864_v61 = vpack.c.bf16 %v7433_v18, %v7433_v18  ;;  %v2314_v11 = vunpack.c.l.bf16 %v2250_v8 }
 0x311   : > { %v1930_v6 = vpack.c.bf16 %v5452_v56, %v5452_v56  ;;  %v7694_v14 = vpop.eup %5453  ;;  %v1993_v3 = vunpack.c.l.bf16 %v1929_v38  ;;  %v3762_v44 = vunpack.c.l.bf16 %v3698_v21  ;;  %v2865_v1 = vpack.c.bf16 %v7466_v60, %v7466_v60 }
 0x312   : > { %v3763_v37 = vunpack.c.l.bf16 %v3699_v16  ;;  %v2184_v51 = vmul.f32 0.5, %v7103_v36  ;;  %v2928_v56 = vunpack.c.l.bf16 %v2864_v61 }
 0x313   : > { %v1994_v54 = vunpack.c.l.bf16 %v1930_v6  ;;  %v2057_v23 = vadd.f32 1.0, %v1993_v3  ;;  %v3248_v33 = vmul.f32 %v1993_v3, %v1993_v3  ;;  %v7701_v25 = vmul.f32 %v3826_v22, %v3762_v44 }
 0x314   : > { %v5456_v63 = vpop.eup %5455  ;;  %v7703_v30 = vmul.f32 %v3827_v55, %v3763_v37  ;;  %v2929_v21 = vunpack.c.l.bf16 %v2865_v1  ;;  %v2247_v44 = vpack.c.bf16 %v2183_v5, %v2183_v5  ;;  %v2248_v37 = vpack.c.bf16 %v2184_v51, %v2184_v51 }
 0x315   : > { %v5458_v40 = vpop.eup %5457  ;;  %9330 = vst [vmem:[#allocation171_spill] sm:$0xff] %v7701_v25  ;;  %v2058_v2 = vadd.f32 1.0, %v1994_v54  ;;  %v3249_v50 = vmul.f32 %v1994_v54, %v1994_v54  ;;  %v1927_v45 = vpack.c.bf16 %v5456_v63, %v5456_v63  ;;  %v2121_v18 = vpack.c.bf16 %v2057_v23, %v2057_v23 }
 0x316   : > { %9331 = vst [vmem:[#allocation172_spill] sm:$0xff] %v7703_v30  ;;  %v3312_v12 = vpack.c.bf16 %v3248_v33, %v3248_v33  ;;  %v1928_v26 = vpack.c.bf16 %v5458_v40, %v5458_v40  ;;  %v1234_v54 = vunpack.c.l.bf16 %v1170_v52  ;;  %v7715_v5 = vunpack.c.l.bf16 %v2248_v37  ;;  %v9356_v30 = vld [vmem:[#allocation70_spill] sm:$0xff] }
 0x317   : > { %v2122_v8 = vpack.c.bf16 %v2058_v2, %v2058_v2  ;;  %v3313_v60 = vpack.c.bf16 %v3249_v50, %v3249_v50  ;;  %v1991_v46 = vunpack.c.l.bf16 %v1927_v45  ;;  %v7705_v38 = vunpack.c.l.bf16 %v2121_v18 }
 0x318   : > { %v3376_v6 = vunpack.c.l.bf16 %v3312_v12  ;;  %v1992_v36 = vunpack.c.l.bf16 %v1928_v26  ;;  %v2992_v2 = vmul.f32 0.796875, %v2928_v56  ;;  %v2993_v50 = vmul.f32 0.796875, %v2929_v21 }
 0x319   : > { %9332 = vst [vmem:[#allocation173_spill] sm:$0xff] %v7705_v38  ;;  %v7707_v16 = vunpack.c.l.bf16 %v2122_v8  ;;  %v3377_v22 = vunpack.c.l.bf16 %v3313_v60  ;;  %v2055_v3 = vadd.f32 1.0, %v1991_v46  ;;  %v2441_v23 = vmul.f32 %v7705_v38, %v2313_v27 }
 0x31a   : > { %v3440_v55 = vsub.f32 1.0, %v3376_v6  ;;  %v2056_v63 = vadd.f32 1.0, %v1992_v36  ;;  %v7711_v26 = vunpack.c.l.bf16 %v2247_v44  ;;  %v2862_v60 = vpack.c.bf16 %v7298_v10, %v7298_v10 }
 0x31b   : > { %9333 = vst [vmem:[#allocation174_spill] sm:$0xff] %v7707_v16  ;;  %v2442_v61 = vmul.f32 %v7707_v16, %v2314_v11  ;;  %v3441_v33 = vsub.f32 1.0, %v3377_v22  ;;  %v2119_v40 = vpack.c.bf16 %v2055_v3, %v2055_v3  ;;  %v1489_v56 = vadd.f32 %v7688_v59, %v7590_v4 }
 0x31c   : > { %v3504_v1 = vpack.c.bf16 %v3440_v55, %v3440_v55  ;;  %v2120_v45 = vpack.c.bf16 %v2056_v63, %v2056_v63  ;;  %v1298_v21 = vmul.f32 %v1234_v54, %v7636_v24  ;;  %v2863_v22 = vpack.c.bf16 %v7374_v35, %v7374_v35 }
 0x31d   : > { %v2492_v18 = vpack.c.bf16 %v2442_v61, %v2441_v23  ;;  %v3505_v12 = vpack.c.bf16 %v3441_v33, %v3441_v33  ;;  %v7713_v8 = vunpack.c.l.bf16 %v2119_v40  ;;  %v3056_v3 = vpack.c.bf16 %v2992_v2, %v2992_v2 }
 0x31e   : > { %v3568_v52 = vunpack.c.l.bf16 %v3504_v1  ;;  %v7717_v51 = vunpack.c.l.bf16 %v2120_v45  ;;  %v1838_v10 = vunpack.c.l.bf16 %v1774_v0  ;;  %v3057_v59 = vpack.c.bf16 %v2993_v50, %v2993_v50 }
 0x31f   : > { %9334 = vst [vmem:[#allocation175_spill] sm:$0xff] %v7713_v8  ;;  %2543 = vmatpush.bf16.msra.mxu2 %v2492_v18  ;;  %v3569_v6 = vunpack.c.l.bf16 %v3505_v12  ;;  %v2439_v55 = vmul.f32 %v7713_v8, %v7711_v26  ;;  %v3246_v54 = vmul.f32 %v1991_v46, %v1991_v46  ;;  %v2926_v33 = vunpack.c.l.bf16 %v2862_v60 }
 0x320   : > { %9335 = vst [vmem:[#allocation176_spill] sm:$0xff] %v7717_v51  ;;  %v3632_v44 = vmul.f32 %v3568_v52, %v2313_v27  ;;  %v2440_v63 = vmul.f32 %v7717_v51, %v7715_v5  ;;  %v3247_v40 = vmul.f32 %v1992_v36, %v1992_v36  ;;  %v2927_v2 = vunpack.c.l.bf16 %v2863_v22 }
 0x321   : > { %v3633_v37 = vmul.f32 %v3569_v6, %v2314_v11  ;;  %v3310_v27 = vpack.c.bf16 %v3246_v54, %v3246_v54  ;;  %v2181_v1 = vmul.f32 0.5, %v6924_v29  ;;  %v1362_v45 = vpack.c.bf16 %v1298_v21, %v1298_v21  ;;  %v9338_v6 = vld [vmem:[#allocation78_spill] sm:$0xff] }
 0x322   : > { %v3696_v23 = vpack.c.bf16 %v3632_v44, %v3632_v44  ;;  %v2491_v61 = vpack.c.bf16 %v2440_v63, %v2439_v55  ;;  %v3824_v12 = vunpack.c.l.bf16 %v3056_v3  ;;  %v3311_v52 = vpack.c.bf16 %v3247_v40, %v3247_v40  ;;  %v9342_v40 = vld [vmem:[#allocation58_spill] sm:$0xff] }
 0x323   : > { %v3697_v35 = vpack.c.bf16 %v3633_v37, %v3633_v37  ;;  %v3825_v15 = vunpack.c.l.bf16 %v3057_v59  ;;  %v3374_v0 = vunpack.c.l.bf16 %v3310_v27  ;;  %v9336_v11 = vpack.c.bf16 %v7107_v62, %v7107_v62  ;;  %v9341_v62 = vld [vmem:[#allocation104_spill] sm:$0xff] }
 0x324   : > { %v3760_v18 = vunpack.c.l.bf16 %v3696_v23  ;;  %2544 = vmatpush.bf16.msra.mxu2 %v2491_v61  ;;  %v2990_v36 = vmul.f32 0.796875, %v2926_v33  ;;  %v3375_v60 = vunpack.c.l.bf16 %v3311_v52  ;;  %v9339_v22 = vpack.c.bf16 %v9338_v6, %v9338_v6  ;;  %v9344_v52 = vld [vmem:[#allocation110_spill] sm:$0xff] }
 0x325   : > { %v3761_v49 = vunpack.c.l.bf16 %v3697_v35  ;;  %v1797_v46 = vunpack.c.l.bf16 %v9336_v11  ;;  %v2991_v3 = vmul.f32 0.796875, %v2927_v2  ;;  %v3438_v44 = vsub.f32 1.0, %v3374_v0  ;;  %v9346_v11 = vld [vmem:[#allocation119_spill] sm:$0xff] }
 0x326   : > { %v7737_v50 = vmul.f32 %v3824_v12, %v3760_v18  ;;  %v1798_v29 = vunpack.c.l.bf16 %v9339_v22  ;;  %v3439_v63 = vsub.f32 1.0, %v3375_v60  ;;  %v2182_v59 = vmul.f32 0.5, %v9341_v62  ;;  %v9347_v60 = vld [vmem:[#allocation130_spill] sm:$0xff] }
 0x327   : > { %v7742_v21 = vmul.f32 %v3825_v15, %v3761_v49  ;;  %5459 = vtanh.f32 %v1797_v46  ;;  %v1553_v37 = vpack.c.bf16 %v1489_v56, %v1489_v56  ;;  %v7748_v54 = vmul.f32 0.5, %v7546_v58 }
 0x328   : > { %9337 = vst [vmem:[#allocation177_spill] sm:$0xff] %v7737_v50  ;;  %5461 = vtanh.f32 %v1798_v29  ;;  %v3502_v23 = vpack.c.bf16 %v3438_v44, %v3438_v44  ;;  %v1426_v61 = vunpack.c.l.bf16 %v1362_v45  ;;  %v3054_v33 = vpack.c.bf16 %v2990_v36, %v2990_v36 }
 0x329   : > { %9340 = vst [vmem:[#allocation78_spill] sm:$0xff] %v7742_v21  ;;  %5463 = vtanh.f32 %v1838_v10  ;;  %v3503_v49 = vpack.c.bf16 %v3439_v63, %v3439_v63  ;;  %v9343_v35 = vpack.c.bf16 %v9342_v40, %v9342_v40  ;;  %v3055_v27 = vpack.c.bf16 %v2991_v3, %v2991_v3 }
 0x32a   : > { %v3566_v18 = vunpack.c.l.bf16 %v3502_v23  ;;  %v2245_v12 = vpack.c.bf16 %v2181_v1, %v2181_v1  ;;  %v9345_v15 = vpack.c.bf16 %v9344_v52, %v9344_v52  ;;  %v2246_v10 = vpack.c.bf16 %v2182_v59, %v2182_v59 }
 0x32b   : > { %v1795_v2 = vunpack.c.l.bf16 %v9343_v35  ;;  %v3567_v56 = vunpack.c.l.bf16 %v3503_v49  ;;  %v2860_v58 = vpack.c.bf16 %v9346_v11, %v9346_v11  ;;  %v7758_v46 = vunpack.c.l.bf16 %v1553_v37 }
 0x32c   : > { %v1796_v0 = vunpack.c.l.bf16 %v9345_v15  ;;  %v3630_v36 = vmul.f32 %v3566_v18, %v7711_v26  ;;  %v2861_v6 = vpack.c.bf16 %v9347_v60, %v9347_v60  ;;  %v7764_v22 = vadd.f32 %v1426_v61, %v7636_v24  ;;  %v9348_v15 = vld [vmem:[#allocation83_spill] sm:$0xff] }
 0x32d   : > { %5465 = vtanh.f32 %v1795_v2  ;;  %v5460_v45 = vpop.eup %5459  ;;  %v3631_v29 = vmul.f32 %v3567_v56, %v7715_v5  ;;  %v3822_v3 = vunpack.c.l.bf16 %v3054_v33  ;;  %v3823_v59 = vunpack.c.l.bf16 %v3055_v27  ;;  %v9349_v56 = vld [vmem:[#allocation92_spill] sm:$0xff] }
 0x32e   : > { %5467 = vtanh.f32 %v1796_v0  ;;  %v5462_v1 = vpop.eup %5461  ;;  %v1925_v44 = vpack.c.bf16 %v5460_v45, %v5460_v45  ;;  %v3694_v62 = vpack.c.bf16 %v3630_v36, %v3630_v36  ;;  %v2309_v23 = vunpack.c.l.bf16 %v2245_v12 }
 0x32f   : > { %v7767_v63 = vpop.eup %5463  ;;  %v1926_v37 = vpack.c.bf16 %v5462_v1, %v5462_v1  ;;  %v3695_v49 = vpack.c.bf16 %v3631_v29, %v3631_v29  ;;  %v2310_v40 = vunpack.c.l.bf16 %v2246_v10  ;;  %v2924_v35 = vunpack.c.l.bf16 %v2860_v58 }
 0x330   : > { %v1989_v26 = vunpack.c.l.bf16 %v1925_v44  ;;  %v3758_v2 = vunpack.c.l.bf16 %v3694_v62  ;;  %v2925_v52 = vunpack.c.l.bf16 %v2861_v6  ;;  %v2179_v61 = vmul.f32 0.5, %v9348_v15 }
 0x331   : > { %v1990_v18 = vunpack.c.l.bf16 %v1926_v37  ;;  %v3759_v11 = vunpack.c.l.bf16 %v3695_v49  ;;  %v2180_v45 = vmul.f32 0.5, %v9349_v56  ;;  %v2988_v62 = vmul.f32 0.796875, %v2924_v35 }
 0x332   : > { %v2053_v5 = vadd.f32 1.0, %v1989_v26  ;;  %v3244_v33 = vmul.f32 %v1989_v26, %v1989_v26  ;;  %v7771_v36 = vmul.f32 %v3822_v3, %v3758_v2  ;;  %v2243_v56 = vpack.c.bf16 %v2179_v61, %v2179_v61 }
 0x333   : > { %v5466_v0 = vpop.eup %5465  ;;  %v2054_v27 = vadd.f32 1.0, %v1990_v18  ;;  %v3245_v12 = vmul.f32 %v1990_v18, %v1990_v18  ;;  %v7773_v29 = vmul.f32 %v3823_v59, %v3759_v11  ;;  %v2989_v3 = vmul.f32 0.796875, %v2925_v52 }
 0x334   : > { %v5468_v60 = vpop.eup %5467  ;;  %9350 = vst [vmem:[#allocation104_spill] sm:$0xff] %v7771_v36  ;;  %v1923_v1 = vpack.c.bf16 %v5466_v0, %v5466_v0  ;;  %v2117_v10 = vpack.c.bf16 %v2053_v5, %v2053_v5  ;;  %v3308_v58 = vpack.c.bf16 %v3244_v33, %v3244_v33  ;;  %v2244_v11 = vpack.c.bf16 %v2180_v45, %v2180_v45 }
 0x335   : > { %9351 = vst [vmem:[#allocation58_spill] sm:$0xff] %v7773_v29  ;;  %v1924_v44 = vpack.c.bf16 %v5468_v60, %v5468_v60  ;;  %v2118_v6 = vpack.c.bf16 %v2054_v27, %v2054_v27  ;;  %v3309_v37 = vpack.c.bf16 %v3245_v12, %v3245_v12  ;;  %v3052_v12 = vpack.c.bf16 %v2988_v62, %v2988_v62  ;;  %v9352_v62 = vld [vmem:[#allocation96_spill] sm:$0xff] }
 0x336   : > { %v1987_v15 = vunpack.c.l.bf16 %v1923_v1  ;;  %v7775_v49 = vunpack.c.l.bf16 %v2117_v10  ;;  %v3372_v26 = vunpack.c.l.bf16 %v3308_v58 }
 0x337   : > { %v1988_v55 = vunpack.c.l.bf16 %v1924_v44  ;;  %v7777_v57 = vunpack.c.l.bf16 %v2118_v6  ;;  %v3373_v2 = vunpack.c.l.bf16 %v3309_v37  ;;  %v2307_v6 = vunpack.c.l.bf16 %v2243_v56 }
 0x338   : > { %v2051_v18 = vadd.f32 1.0, %v1987_v15  ;;  %v3436_v0 = vsub.f32 1.0, %v3372_v26  ;;  %v3242_v5 = vmul.f32 %v1987_v15, %v1987_v15  ;;  %v2437_v33 = vmul.f32 %v7775_v49, %v2309_v23 }
 0x339   : > { %v2052_v59 = vadd.f32 1.0, %v1988_v55  ;;  %v2438_v35 = vmul.f32 %v7777_v57, %v2310_v40  ;;  %v3437_v60 = vsub.f32 1.0, %v3373_v2  ;;  %v3243_v58 = vmul.f32 %v1988_v55, %v1988_v55 }
 0x33a   : > { %v2115_v27 = vpack.c.bf16 %v2051_v18, %v2051_v18  ;;  %v3500_v1 = vpack.c.bf16 %v3436_v0, %v3436_v0  ;;  %v2308_v26 = vunpack.c.l.bf16 %v2244_v11  ;;  %v3306_v45 = vpack.c.bf16 %v3242_v5, %v3242_v5 }
 0x33b   : > { %v2116_v10 = vpack.c.bf16 %v2052_v59, %v2052_v59  ;;  %v2490_v61 = vpack.c.bf16 %v2438_v35, %v2437_v33  ;;  %v3501_v44 = vpack.c.bf16 %v3437_v60, %v3437_v60  ;;  %v1966_v15 = vpack.c.bf16 %v7767_v63, %v7767_v63 }
 0x33c   : > { %v7781_v52 = vunpack.c.l.bf16 %v2115_v27  ;;  %v3564_v37 = vunpack.c.l.bf16 %v3500_v1  ;;  %v3053_v2 = vpack.c.bf16 %v2989_v3, %v2989_v3  ;;  %v9353_v0 = vpack.c.bf16 %v9352_v62, %v9352_v62  ;;  %v9354_v27 = vld [vmem:[#allocation32_spill] sm:$0xff] }
 0x33d   : > { %v7783_v28 = vunpack.c.l.bf16 %v2116_v10  ;;  %2545 = vmatpush.bf16.msra.mxu2 %v2490_v61  ;;  %v3565_v18 = vunpack.c.l.bf16 %v3501_v44  ;;  %v3307_v35 = vpack.c.bf16 %v3243_v58, %v3243_v58  ;;  %v1554_v11 = vpack.c.bf16 %v7764_v22, %v7764_v22 }
 0x33e   : > { %v1793_v55 = vunpack.c.l.bf16 %v9353_v0  ;;  %v3628_v59 = vmul.f32 %v3564_v37, %v2309_v23  ;;  %v2435_v56 = vmul.f32 %v7781_v52, %v2307_v6  ;;  %v3370_v60 = vunpack.c.l.bf16 %v3306_v45 }
 0x33f   : > { %v2436_v33 = vmul.f32 %v7783_v28, %v2308_v26  ;;  %v3629_v5 = vmul.f32 %v3565_v18, %v2310_v40  ;;  %v9355_v63 = vpack.c.bf16 %v9354_v27, %v9354_v27  ;;  %v3820_v10 = vunpack.c.l.bf16 %v3052_v12  ;;  %v9357_v18 = vld [vmem:[#allocation79_spill] sm:$0xff]  ;;  %v9358_v27 = vld [vmem:[#allocation89_spill] sm:$0xff] }
 0x340   : > { %v3692_v1 = vpack.c.bf16 %v3628_v59, %v3628_v59  ;;  %v3371_v44 = vunpack.c.l.bf16 %v3307_v35  ;;  %v3821_v23 = vunpack.c.l.bf16 %v3053_v2  ;;  %v3434_v37 = vsub.f32 1.0, %v3370_v60  ;;  %v9362_v35 = vld [vmem:[#allocation49_spill] sm:$0xff] }
 0x341   : > { %v1794_v3 = vunpack.c.l.bf16 %v9355_v63  ;;  %v2489_v61 = vpack.c.bf16 %v2436_v33, %v2435_v56  ;;  %v3693_v62 = vpack.c.bf16 %v3629_v5, %v3629_v5  ;;  %5469 = vtanh.f32 %v1793_v55 }
 0x342   : > { %v3756_v0 = vunpack.c.l.bf16 %v3692_v1  ;;  %v3435_v58 = vsub.f32 1.0, %v3371_v44  ;;  %v2177_v22 = vmul.f32 0.5, %v9356_v30  ;;  %v3498_v45 = vpack.c.bf16 %v3434_v37, %v3434_v37 }
 0x343   : > { %2546 = vmatpush.bf16.msra.mxu2 %v2489_v61  ;;  %5471 = vtanh.f32 %v1794_v3  ;;  %v3757_v40 = vunpack.c.l.bf16 %v3693_v62  ;;  %v2178_v25 = vmul.f32 0.5, %v9357_v18  ;;  %v9359_v59 = vpack.c.bf16 %v9358_v27, %v9358_v27 }
 0x344   : > { %v9360_v56 = vpack.c.bf16 %v7694_v14, %v7694_v14  ;;  %v7807_v55 = vmul.f32 %v3820_v10, %v3756_v0  ;;  %v3499_v33 = vpack.c.bf16 %v3435_v58, %v3435_v58  ;;  %v9363_v5 = vpack.c.bf16 %v9362_v35, %v9362_v35 }
 0x345   : > { %v1791_v12 = vunpack.c.l.bf16 %v9359_v59  ;;  %v2286_v60 = vpack.c.bf16 %v7748_v54, %v7748_v54  ;;  %v7814_v63 = vmul.f32 %v3821_v23, %v3757_v40  ;;  %v3562_v3 = vunpack.c.l.bf16 %v3498_v45  ;;  %v9366_v45 = vld [vmem:[#allocation66_spill] sm:$0xff] }
 0x346   : > { %v7805_v2 = vunpack.c.l.bf16 %v9360_v56  ;;  %v1792_v30 = vunpack.c.l.bf16 %v9363_v5  ;;  %v7817_v1 = vmul.f32 0.796875, %v7758_v46  ;;  %v1618_v14 = vunpack.c.l.bf16 %v1554_v11 }
 0x347   : > { %9364 = vst [vmem:[#allocation119_spill] sm:$0xff] %v7814_v63  ;;  %5473 = vtanh.f32 %v1791_v12  ;;  %v3563_v61 = vunpack.c.l.bf16 %v3499_v33  ;;  %v5470_v10 = vpop.eup %5469  ;;  %v7819_v44 = vunpack.c.l.bf16 %v1966_v15  ;;  %v7821_v62 = vmul.f32 %v3562_v3, %v2307_v6  ;;  %v9368_v15 = vld [vmem:[#allocation69_spill] sm:$0xff]  ;;  %v9430_v63 = vld [vmem:[#allocation39_spill] sm:$0xff] }
 0x348   : > { %9361 = vst [vmem:[#allocation110_spill] sm:$0xff] %v7805_v2  ;;  %5475 = vtanh.f32 %v1792_v30  ;;  %v2241_v37 = vpack.c.bf16 %v2177_v22, %v2177_v22  ;;  %v2242_v0 = vpack.c.bf16 %v2178_v25, %v2178_v25  ;;  %v1921_v40 = vpack.c.bf16 %v5470_v10, %v5470_v10 }
 0x349   : > { %9365 = vst [vmem:[#allocation130_spill] sm:$0xff] %v7819_v44  ;;  %v5472_v58 = vpop.eup %5471  ;;  %v7825_v23 = vmul.f32 %v3563_v61, %v2308_v26  ;;  %v2175_v46 = vmul.f32 0.5, %v9366_v45  ;;  %5477 = vtanh.f32 %v7676_v19  ;;  %v7829_v11 = vunpack.c.l.bf16 %v2286_v60 }
 0x34a   : > { %v1922_v18 = vpack.c.bf16 %v5472_v58, %v5472_v58  ;;  %v2176_v27 = vmul.f32 0.5, %v9368_v15  ;;  %v7834_v25 = vmul.f32 0.796875, %v1618_v14  ;;  %v1985_v22 = vunpack.c.l.bf16 %v1921_v40 }
 0x34b   : > { %9367 = vst [vmem:[#allocation83_spill] sm:$0xff] %v7829_v11  ;;  %v2093_v59 = vadd.f32 1.0, %v7805_v2  ;;  %v2305_v56 = vunpack.c.l.bf16 %v2241_v37  ;;  %v2306_v33 = vunpack.c.l.bf16 %v2242_v0  ;;  %v2094_v35 = vadd.f32 1.0, %v7819_v44 }
 0x34c   : > { %v1986_v12 = vunpack.c.l.bf16 %v1922_v18  ;;  %v2049_v5 = vadd.f32 1.0, %v1985_v22  ;;  %v3240_v30 = vmul.f32 %v1985_v22, %v1985_v22  ;;  %v2239_v3 = vpack.c.bf16 %v2175_v46, %v2175_v46 }
 0x34d   : > { %v5474_v26 = vpop.eup %5473  ;;  %v2240_v45 = vpack.c.bf16 %v2176_v27, %v2176_v27  ;;  %v2157_v6 = vpack.c.bf16 %v2093_v59, %v2093_v59  ;;  %v2158_v7 = vpack.c.bf16 %v2094_v35, %v2094_v35  ;;  %5479 = vtanh.f32 %v7603_v42 }
 0x34e   : > { %v5476_v19 = vpop.eup %5475  ;;  %v1919_v60 = vpack.c.bf16 %v5474_v26, %v5474_v26  ;;  %v2050_v61 = vadd.f32 1.0, %v1986_v12  ;;  %v3241_v10 = vmul.f32 %v1986_v12, %v1986_v12  ;;  %v2113_v14 = vpack.c.bf16 %v2049_v5, %v2049_v5 }
 0x34f   : > { %v1920_v58 = vpack.c.bf16 %v5476_v19, %v5476_v19  ;;  %v3304_v15 = vpack.c.bf16 %v3240_v30, %v3240_v30  ;;  %v7838_v54 = vpop.eup %5477  ;;  %v2303_v27 = vunpack.c.l.bf16 %v2239_v3  ;;  %v7844_v59 = vunpack.c.l.bf16 %v2157_v6 }
 0x350   : > { %v1983_v40 = vunpack.c.l.bf16 %v1919_v60  ;;  %v2114_v18 = vpack.c.bf16 %v2050_v61, %v2050_v61  ;;  %v3305_v37 = vpack.c.bf16 %v3241_v10, %v3241_v10  ;;  %v7840_v20 = vunpack.c.l.bf16 %v2113_v14 }
 0x351   : > { %v1984_v0 = vunpack.c.l.bf16 %v1920_v58  ;;  %v3368_v44 = vunpack.c.l.bf16 %v3304_v15  ;;  %9369 = vst [vmem:[#allocation92_spill] sm:$0xff] %v7844_v59  ;;  %v2304_v3 = vunpack.c.l.bf16 %v2240_v45  ;;  %v1746_v6 = vpack.c.bf16 %v7834_v25, %v7834_v25 }
 0x352   : > { %v2047_v22 = vadd.f32 1.0, %v1983_v40  ;;  %v3238_v26 = vmul.f32 %v1983_v40, %v1983_v40  ;;  %v7842_v46 = vunpack.c.l.bf16 %v2114_v18  ;;  %v3369_v12 = vunpack.c.l.bf16 %v3305_v37 }
 0x353   : > { %v2048_v19 = vadd.f32 1.0, %v1984_v0  ;;  %v3432_v5 = vsub.f32 1.0, %v3368_v44  ;;  %v3239_v60 = vmul.f32 %v1984_v0, %v1984_v0  ;;  %v2433_v61 = vmul.f32 %v7840_v20, %v2305_v56 }
 0x354   : > { %v2111_v30 = vpack.c.bf16 %v2047_v22, %v2047_v22  ;;  %v2434_v10 = vmul.f32 %v7842_v46, %v2306_v33  ;;  %v3433_v35 = vsub.f32 1.0, %v3369_v12  ;;  %v3302_v40 = vpack.c.bf16 %v3238_v26, %v3238_v26 }
 0x355   : > { %v2112_v58 = vpack.c.bf16 %v2048_v19, %v2048_v19  ;;  %v3496_v14 = vpack.c.bf16 %v3432_v5, %v3432_v5  ;;  %v7850_v18 = vunpack.c.l.bf16 %v2158_v7  ;;  %v3303_v22 = vpack.c.bf16 %v3239_v60, %v3239_v60  ;;  %v7867_v60 = vld [vmem:[#allocation7 + $0x38] sm:$0xff] }
 0x356   : > { %v7848_v15 = vunpack.c.l.bf16 %v2111_v30  ;;  %v2488_v37 = vpack.c.bf16 %v2434_v10, %v2433_v61  ;;  %v3497_v21 = vpack.c.bf16 %v3433_v35, %v3433_v35  ;;  %v2477_v12 = vmul.f32 %v7844_v59, %v7615_v48 }
 0x357   : > { %9370 = vst [vmem:[#allocation96_spill] sm:$0xff] %v7850_v18  ;;  %v7852_v44 = vunpack.c.l.bf16 %v2112_v58  ;;  %v3560_v0 = vunpack.c.l.bf16 %v3496_v14  ;;  %v3366_v26 = vunpack.c.l.bf16 %v3302_v40  ;;  %v9371_v45 = vpack.c.bf16 %v7599_v43, %v7599_v43 }
 0x358   : > { %2547 = vmatpush.bf16.msra.mxu2 %v2488_v37  ;;  %v3561_v19 = vunpack.c.l.bf16 %v3497_v21  ;;  %v2431_v5 = vmul.f32 %v7848_v15, %v2303_v27  ;;  %v3367_v10 = vunpack.c.l.bf16 %v3303_v22  ;;  %v2478_v25 = vmul.f32 %v7850_v18, %v7829_v11 }
 0x359   : > { %v2432_v7 = vmul.f32 %v7852_v44, %v2304_v3  ;;  %v1642_v30 = vunpack.c.l.bf16 %v9371_v45  ;;  %v7863_v61 = vmul.f32 %v3560_v0, %v2305_v56  ;;  %v1679_v35 = vmul.f32 0.796875, %v7609_v53 }
 0x35a   : > { %v7870_v21 = vmul.f32 %v3561_v19, %v2306_v33  ;;  %v3430_v14 = vsub.f32 1.0, %v3366_v26  ;;  %v9372_v40 = vpack.c.bf16 %v7621_v31, %v7621_v31  ;;  %v3431_v43 = vsub.f32 1.0, %v3367_v10  ;;  %v9375_v31 = vld [vmem:[#allocation160_spill] sm:$0xff] }
 0x35b   : > { %v2487_v58 = vpack.c.bf16 %v2432_v7, %v2431_v5  ;;  %v2510_v45 = vpack.c.bf16 %v2478_v25, %v2477_v12  ;;  %v9373_v56 = vpack.c.bf16 %v7817_v1, %v7817_v1  ;;  %v9374_v22 = vpack.c.bf16 %v7579_v41, %v7579_v41  ;;  %v7891_v1 = vld [vmem:[#allocation7 + $0x30] sm:$0xff] }
 0x35c   : > { %v1616_v37 = vunpack.c.l.bf16 %v9372_v40  ;;  %v3494_v53 = vpack.c.bf16 %v3430_v14, %v3430_v14  ;;  %v1810_v33 = vunpack.c.l.bf16 %v1746_v6  ;;  %v7885_v19 = vadd.f32 1.0, %v7587_v34  ;;  %v9376_v40 = vld [vmem:[#allocation159_spill] sm:$0xff] }
 0x35d   : > { %v1809_v0 = vunpack.c.l.bf16 %v9373_v56  ;;  %v7881_v18 = vunpack.c.l.bf16 %v9374_v22  ;;  %2548 = vmatpush.bf16.msra.mxu2 %v2487_v58  ;;  %v7888_v5 = vmul.f32 0.13378906, %v9375_v31  ;;  %v3495_v12 = vpack.c.bf16 %v3431_v43, %v3431_v43  ;;  %2567 = vmatpush.bf16.msra.mxu1 %v2510_v45 }
 0x35e   : > { %v7893_v41 = vmul.f32 0.796875, %v1642_v30  ;;  %v1743_v7 = vpack.c.bf16 %v1679_v35, %v1679_v35  ;;  %v3558_v42 = vunpack.c.l.bf16 %v3494_v53  ;;  %v1680_v26 = vmul.f32 0.796875, %v1616_v37 }
 0x35f   : > { %5481 = vtanh.f32 %v1809_v0  ;;  %v3559_v6 = vunpack.c.l.bf16 %v3495_v12  ;;  %v1963_v34 = vpack.c.bf16 %v7628_v17, %v7628_v17  ;;  %v1964_v10 = vpack.c.bf16 %v7838_v54, %v7838_v54  ;;  %v7910_v17 = vpop.eup %5479 }
 0x360   : > { %5483 = vtanh.f32 %v1810_v33  ;;  %v7899_v25 = vmul.f32 %v3558_v42, %v2303_v27  ;;  %v2193_v58 = vmul.f32 0.5, %v7590_v4  ;;  %v2219_v14 = vmul.f32 0.5, %v7447_v47 }
 0x361   : > { %4476 = vmatpush.bf16.msrb.mxu2 %v7867_v60  ;;  %v2220_v30 = vmul.f32 0.5, %v7489_v9  ;;  %v7905_v35 = vmul.f32 0.13378906, %v9376_v40  ;;  %v7907_v43 = vmul.f32 %v3559_v6, %v2304_v3  ;;  %v2027_v37 = vunpack.c.l.bf16 %v1963_v34 }
 0x362   : > { %v2028_v45 = vunpack.c.l.bf16 %v1964_v10  ;;  %v1770_v54 = vpack.c.bf16 %v7893_v41, %v7893_v41  ;;  %v2194_v4 = vmul.f32 0.5, %v7636_v24  ;;  %v2283_v27 = vpack.c.bf16 %v2219_v14, %v2219_v14 }
 0x363   : > { %v2284_v47 = vpack.c.bf16 %v2220_v30, %v2220_v30  ;;  %v2091_v9 = vadd.f32 1.0, %v2027_v37  ;;  %v3282_v22 = vmul.f32 %v2027_v37, %v2027_v37  ;;  %v1807_v53 = vunpack.c.l.bf16 %v1743_v7 }
 0x364   : > { %v2092_v0 = vadd.f32 1.0, %v2028_v45  ;;  %v1744_v33 = vpack.c.bf16 %v1680_v26, %v1680_v26  ;;  %v2257_v12 = vpack.c.bf16 %v2193_v58, %v2193_v58  ;;  %v7915_v42 = vunpack.c.l.bf16 %v2283_v27 }
 0x365   : > { %4477 = vmatpush.bf16.msrb.mxu2 %v7891_v1  ;;  %v5482_v56 = vpop.eup %5481  ;;  %v2155_v34 = vpack.c.bf16 %v2091_v9, %v2091_v9  ;;  %v7917_v40 = vunpack.c.l.bf16 %v2284_v47  ;;  %v2258_v24 = vpack.c.bf16 %v2194_v4, %v2194_v4  ;;  %v3283_v14 = vmul.f32 %v2028_v45, %v2028_v45 }
 0x366   : > { %v5484_v3 = vpop.eup %5483  ;;  %v1937_v31 = vpack.c.bf16 %v5482_v56, %v5482_v56  ;;  %v2156_v10 = vpack.c.bf16 %v2092_v0, %v2092_v0  ;;  %v3346_v30 = vpack.c.bf16 %v3282_v22, %v3282_v22  ;;  %5485 = vtanh.f32 %v1807_v53 }
 0x367   : > { %v1938_v6 = vpack.c.bf16 %v5484_v3, %v5484_v3  ;;  %v7919_v11 = vunpack.c.l.bf16 %v2155_v34  ;;  %v3347_v58 = vpack.c.bf16 %v3283_v14, %v3283_v14  ;;  %v2615_v45 = vmul.f32 0.13378906, %v7557_v13 }
 0x368   : > { %v2001_v41 = vunpack.c.l.bf16 %v1937_v31  ;;  %v7921_v37 = vunpack.c.l.bf16 %v2156_v10  ;;  %v3410_v27 = vunpack.c.l.bf16 %v3346_v30  ;;  %v1808_v22 = vunpack.c.l.bf16 %v1744_v33 }
 0x369   : > { %v2002_v59 = vunpack.c.l.bf16 %v1938_v6  ;;  %9377 = vst [vmem:[#allocation32_spill] sm:$0xff] %v7919_v11  ;;  %v2475_v47 = vmul.f32 %v7919_v11, %v7915_v42  ;;  %v3411_v34 = vunpack.c.l.bf16 %v3347_v58  ;;  %v2321_v10 = vunpack.c.l.bf16 %v2257_v12 }
 0x36a   : > { %9378 = vst [vmem:[#allocation70_spill] sm:$0xff] %v7921_v37  ;;  %v2065_v7 = vadd.f32 1.0, %v2001_v41  ;;  %v3256_v26 = vmul.f32 %v2001_v41, %v2001_v41  ;;  %v2476_v4 = vmul.f32 %v7921_v37, %v7917_v40  ;;  %v2322_v41 = vunpack.c.l.bf16 %v2258_v24 }
 0x36b   : > { %v2066_v56 = vadd.f32 1.0, %v2002_v59  ;;  %v3257_v3 = vmul.f32 %v2002_v59, %v2002_v59  ;;  %v3474_v37 = vsub.f32 1.0, %v3410_v27  ;;  %v3475_v50 = vsub.f32 1.0, %v3411_v34 }
 0x36c   : > { %v2129_v9 = vpack.c.bf16 %v2065_v7, %v2065_v7  ;;  %v3320_v0 = vpack.c.bf16 %v3256_v26, %v3256_v26  ;;  %v2509_v53 = vpack.c.bf16 %v2476_v4, %v2475_v47  ;;  %v5486_v30 = vpop.eup %5485  ;;  %v1834_v13 = vunpack.c.l.bf16 %v1770_v54 }
 0x36d   : > { %v2130_v31 = vpack.c.bf16 %v2066_v56, %v2066_v56  ;;  %v3321_v6 = vpack.c.bf16 %v3257_v3, %v3257_v3  ;;  %v2678_v33 = vpack.c.bf16 %v7905_v35, %v7905_v35  ;;  %5487 = vtanh.f32 %v1808_v22 }
 0x36e   : > { %v7928_v14 = vunpack.c.l.bf16 %v2129_v9  ;;  %v3384_v59 = vunpack.c.l.bf16 %v3320_v0  ;;  %2568 = vmatpush.bf16.msra.mxu1 %v2509_v53  ;;  %v3538_v58 = vpack.c.bf16 %v3474_v37, %v3474_v37  ;;  %v2679_v56 = vpack.c.bf16 %v2615_v45, %v2615_v45 }
 0x36f   : > { %v7930_v48 = vunpack.c.l.bf16 %v2130_v31  ;;  %v3385_v11 = vunpack.c.l.bf16 %v3321_v6  ;;  %v3539_v47 = vpack.c.bf16 %v3475_v50, %v3475_v50  ;;  %v1935_v4 = vpack.c.bf16 %v5486_v30, %v5486_v30 }
 0x370   : > { %v3448_v7 = vsub.f32 1.0, %v3384_v59  ;;  %v2449_v26 = vmul.f32 %v7928_v14, %v2321_v10  ;;  %v2616_v9 = vmul.f32 0.13378906, %v7607_v39  ;;  %v3602_v54 = vunpack.c.l.bf16 %v3538_v58  ;;  %v9384_v58 = vld [vmem:[#allocation162_spill] sm:$0xff] }
 0x371   : > { %v2450_v12 = vmul.f32 %v7930_v48, %v2322_v41  ;;  %v3449_v24 = vsub.f32 1.0, %v3385_v11  ;;  %v2617_v31 = vmul.f32 0.13378906, %v7670_v32  ;;  %v3603_v6 = vunpack.c.l.bf16 %v3539_v47 }
 0x372   : > { %v3512_v3 = vpack.c.bf16 %v3448_v7, %v3448_v7  ;;  %v7938_v22 = vunpack.c.l.bf16 %v1935_v4  ;;  %v2896_v53 = vpack.c.bf16 %v7885_v19, %v7885_v19  ;;  %5489 = vtanh.f32 %v1834_v13  ;;  %v9381_v7 = vld [vmem:[#allocation153_spill] sm:$0xff] }
 0x373   : > { %v2496_v27 = vpack.c.bf16 %v2450_v12, %v2449_v26  ;;  %v3513_v0 = vpack.c.bf16 %v3449_v24, %v3449_v24  ;;  %v7943_v50 = vmul.f32 %v3602_v54, %v7915_v42  ;;  %v5488_v37 = vpop.eup %5487  ;;  %v2742_v39 = vunpack.c.l.bf16 %v2678_v33  ;;  %v9382_v13 = vld [vmem:[#allocation157_spill] sm:$0xff]  ;;  %v7955_v12 = vld [vmem:[#allocation7 + $0x28] sm:$0xff] }
 0x374   : > { %v3576_v35 = vunpack.c.l.bf16 %v3512_v3  ;;  %v7948_v34 = vmul.f32 %v3603_v6, %v7917_v40  ;;  %v2063_v32 = vadd.f32 1.0, %v7938_v22  ;;  %v1936_v30 = vpack.c.bf16 %v5488_v37, %v5488_v37  ;;  %v9383_v42 = vld [vmem:[#allocation155_spill] sm:$0xff]  ;;  %v9385_v40 = vld [vmem:[#allocation161_spill] sm:$0xff]  ;;  %4478 = vmatpush.bf16.msrb.mxu2 %v7955_v12 }
 0x375   : > { %2560 = vmatpush.bf16.msra.mxu3 %v2496_v27  ;;  %v3577_v11 = vunpack.c.l.bf16 %v3513_v0  ;;  %9379 = vst [vmem:[#allocation79_spill] sm:$0xff] %v7943_v50  ;;  %v2191_v19 = vmul.f32 0.5, %v9381_v7  ;;  %v2192_v26 = vmul.f32 0.5, %v9382_v13  ;;  %5491 = vtanh.f32 %v9383_v42 }
 0x376   : > { %v7945_v45 = vmul.f32 %v3576_v35, %v2321_v10  ;;  %9380 = vst [vmem:[#allocation89_spill] sm:$0xff] %v7948_v34  ;;  %v2743_v24 = vunpack.c.l.bf16 %v2679_v56  ;;  %v2680_v33 = vpack.c.bf16 %v2616_v9, %v2616_v9  ;;  %v2681_v10 = vpack.c.bf16 %v2617_v31, %v2617_v31  ;;  %v9389_v9 = vld [vmem:[#allocation151_spill] sm:$0xff]  ;;  %v9392_v56 = vld [vmem:[#allocation148_spill] sm:$0xff] }
 0x377   : > { %v7951_v59 = vmul.f32 %v3577_v11, %v2322_v41  ;;  %5493 = vtanh.f32 %v9384_v58  ;;  %v9386_v3 = vpack.c.bf16 %v9385_v40, %v9385_v40  ;;  %v2000_v41 = vunpack.c.l.bf16 %v1936_v30 }
 0x378   : > { %v2127_v4 = vpack.c.bf16 %v2063_v32, %v2063_v32  ;;  %5495 = vtanh.f32 %v7881_v18  ;;  %v7966_v27 = vunpack.c.l.bf16 %v2896_v53  ;;  %v7971_v0 = vmul.f32 0.13378906, %v9389_v9  ;;  %v5490_v54 = vpop.eup %5489  ;;  %v9390_v18 = vld [vmem:[#allocation109_spill] sm:$0xff] }
 0x379   : > { %v7962_v47 = vunpack.c.l.bf16 %v9386_v3  ;;  %v7973_v31 = vadd.f32 1.0, %v2742_v39  ;;  %v2064_v35 = vadd.f32 1.0, %v2000_v41  ;;  %v2255_v6 = vpack.c.bf16 %v2191_v19, %v2191_v19 }
 0x37a   : > { %9388 = vst [vmem:[#allocation66_spill] sm:$0xff] %v7966_v27  ;;  %v2256_v11 = vpack.c.bf16 %v2192_v26, %v2192_v26  ;;  %v7975_v37 = vadd.f32 1.0, %v2743_v24  ;;  %v7977_v32 = vunpack.c.l.bf16 %v2680_v33  ;;  %v7979_v30 = vunpack.c.l.bf16 %v2681_v10  ;;  %v9393_v27 = vld [vmem:[#allocation154_spill] sm:$0xff] }
 0x37b   : > { %9387 = vst [vmem:[#allocation49_spill] sm:$0xff] %v7962_v47  ;;  %v9391_v53 = vpack.c.bf16 %v9390_v18, %v9390_v18  ;;  %v7987_v13 = vmul.f32 0.5, %v7840_v20  ;;  %v2128_v42 = vpack.c.bf16 %v2064_v35, %v2064_v35  ;;  %v7989_v39 = vunpack.c.l.bf16 %v2127_v4  ;;  %v7993_v26 = vpop.eup %5491 }
 0x37c   : > { %v1961_v19 = vpack.c.bf16 %v7910_v17, %v7910_v17  ;;  %v7996_v24 = vmul.f32 0.5, %v7842_v46  ;;  %v7999_v33 = vmul.f32 0.5, %v7848_v15  ;;  %v8002_v10 = vmul.f32 0.5, %v7852_v44 }
 0x37d   : > { %v7984_v7 = vunpack.c.l.bf16 %v9391_v53  ;;  %v1962_v58 = vpack.c.bf16 %v5490_v54, %v5490_v54  ;;  %v8004_v20 = vpop.eup %5493  ;;  %v8006_v40 = vunpack.c.l.bf16 %v2255_v6  ;;  %v8008_v3 = vunpack.c.l.bf16 %v2256_v11 }
 0x37e   : > { %v8010_v4 = vunpack.c.l.bf16 %v2128_v42  ;;  %v2025_v17 = vunpack.c.l.bf16 %v1961_v19  ;;  %v8012_v9 = vpop.eup %5495  ;;  %v8015_v46 = vmul.f32 0.5, %v7775_v49  ;;  %v8018_v15 = vmul.f32 0.5, %v7781_v52  ;;  %v8034_v19 = vld [vmem:[#allocation7 + $0x20] sm:$0xff] }
 0x37f   : > { %v2026_v54 = vunpack.c.l.bf16 %v1962_v58  ;;  %v3688_v35 = vpack.c.bf16 %v7863_v61, %v7863_v61  ;;  %v3689_v6 = vpack.c.bf16 %v7870_v21, %v7870_v21  ;;  %v2447_v11 = vmul.f32 %v7989_v39, %v8006_v40  ;;  %4479 = vmatpush.bf16.msrb.mxu2 %v8034_v19 }
 0x380   : > { %v2448_v49 = vmul.f32 %v8010_v4, %v8008_v3  ;;  %v2089_v53 = vadd.f32 1.0, %v2025_v17  ;;  %v2217_v44 = vmul.f32 0.5, %v9392_v56  ;;  %v3254_v34 = vmul.f32 %v7938_v22, %v7938_v22 }
 0x381   : > { %v2090_v42 = vadd.f32 1.0, %v2026_v54  ;;  %v2218_v18 = vmul.f32 0.5, %v9393_v27  ;;  %v8045_v47 = vunpack.c.l.bf16 %v3688_v35  ;;  %v8047_v16 = vunpack.c.l.bf16 %v3689_v6 }
 0x382   : > { %v2495_v58 = vpack.c.bf16 %v2448_v49, %v2447_v11  ;;  %v2153_v52 = vpack.c.bf16 %v2089_v53, %v2089_v53  ;;  %v2281_v61 = vpack.c.bf16 %v2217_v44, %v2217_v44  ;;  %v3280_v38 = vmul.f32 %v2025_v17, %v2025_v17 }
 0x383   : > { %v2154_v50 = vpack.c.bf16 %v2090_v42, %v2090_v42  ;;  %v2870_v11 = vpack.c.bf16 %v7973_v31, %v7973_v31  ;;  %v2282_v56 = vpack.c.bf16 %v2218_v18, %v2218_v18  ;;  %v3255_v27 = vmul.f32 %v2000_v41, %v2000_v41 }
 0x384   : > { %2561 = vmatpush.bf16.msra.mxu3 %v2495_v58  ;;  %v8051_v49 = vunpack.c.l.bf16 %v2153_v52  ;;  %v2345_v53 = vunpack.c.l.bf16 %v2281_v61  ;;  %v3281_v42 = vmul.f32 %v2026_v54, %v2026_v54  ;;  %v3344_v35 = vpack.c.bf16 %v3280_v38, %v3280_v38 }
 0x385   : > { %v8053_v22 = vunpack.c.l.bf16 %v2154_v50  ;;  %v3318_v44 = vpack.c.bf16 %v3254_v34, %v3254_v34  ;;  %v2346_v58 = vunpack.c.l.bf16 %v2282_v56  ;;  %v2871_v31 = vpack.c.bf16 %v7975_v37, %v7975_v37 }
 0x386   : > { %9394 = vst [vmem:[#allocation69_spill] sm:$0xff] %v8051_v49  ;;  %v2473_v50 = vmul.f32 %v8051_v49, %v2345_v53  ;;  %v3345_v52 = vpack.c.bf16 %v3281_v42, %v3281_v42  ;;  %v3408_v18 = vunpack.c.l.bf16 %v3344_v35  ;;  %v8067_v38 = vmul.f32 0.5, %v7930_v48  ;;  %v9396_v35 = vld [vmem:[#allocation141_spill] sm:$0xff]  ;;  %v2512_v49 = vld [vmem:[%s5927_s13] sm:$0xff] }
 0x387   : > { %9395 = vst [vmem:[#allocation160_spill] sm:$0xff] %v8053_v22  ;;  %v2934_v41 = vunpack.c.l.bf16 %v2870_v11  ;;  %v2474_v54 = vmul.f32 %v8053_v22, %v2346_v58  ;;  %v3319_v34 = vpack.c.bf16 %v3255_v27, %v3255_v27  ;;  %v1959_v37 = vpack.c.bf16 %v8004_v20, %v8004_v20 }
 0x388   : > { %5258 = vmatpush.bf16.msrb.mxu3 %v7867_v60  ;;  %v8064_v60 = vmul.f32 0.5, %v7928_v14  ;;  %v3409_v61 = vunpack.c.l.bf16 %v3345_v52  ;;  %v3472_v56 = vsub.f32 1.0, %v3408_v18  ;;  %v3382_v21 = vunpack.c.l.bf16 %v3318_v44  ;;  %v9397_v52 = vld [vmem:[#allocation147_spill] sm:$0xff]  ;;  %v5053_v44 = vld [vmem:[#allocation7 + $0x18] sm:$0xff] }
 0x389   : > { %v2508_v42 = vpack.c.bf16 %v2474_v54, %v2473_v50  ;;  %v1960_v14 = vpack.c.bf16 %v8012_v9, %v8012_v9  ;;  %v2215_v17 = vmul.f32 0.5, %v9396_v35  ;;  %v2935_v48 = vunpack.c.l.bf16 %v2871_v31  ;;  %4480 = vmatpush.bf16.msrb.mxu2 %v5053_v44 }
 0x38a   : > { %v3473_v11 = vsub.f32 1.0, %v3409_v61  ;;  %v3536_v6 = vpack.c.bf16 %v3472_v56, %v3472_v56  ;;  %v2023_v22 = vunpack.c.l.bf16 %v1959_v37  ;;  %v2216_v18 = vmul.f32 0.5, %v9397_v52 }
 0x38b   : > { %2569 = vmatpush.bf16.msra.mxu1 %v2508_v42  ;;  %v2024_v27 = vunpack.c.l.bf16 %v1960_v14  ;;  %v2279_v20 = vpack.c.bf16 %v2215_v17, %v2215_v17  ;;  %v3383_v50 = vunpack.c.l.bf16 %v3319_v34  ;;  %v3446_v31 = vsub.f32 1.0, %v3382_v21 }
 0x38c   : > { %5259 = vmatpush.bf16.msrb.mxu3 %v7891_v1  ;;  %v8077_v1 = vmul.f32 0.5, %v7989_v39  ;;  %v3537_v9 = vpack.c.bf16 %v3473_v11, %v3473_v11  ;;  %v3600_v54 = vunpack.c.l.bf16 %v3536_v6  ;;  %v2087_v35 = vadd.f32 1.0, %v2023_v22 }
 0x38d   : > { %v2088_v61 = vadd.f32 1.0, %v2024_v27  ;;  %v2280_v56 = vpack.c.bf16 %v2216_v18, %v2216_v18  ;;  %v8082_v37 = vunpack.c.l.bf16 %v2279_v20  ;;  %v3278_v17 = vmul.f32 %v2023_v22, %v2023_v22 }
 0x38e   : > { %v3601_v39 = vunpack.c.l.bf16 %v3537_v9  ;;  %v8084_v42 = vmul.f32 %v3600_v54, %v2345_v53  ;;  %v2151_v14 = vpack.c.bf16 %v2087_v35, %v2087_v35  ;;  %v3279_v2 = vmul.f32 %v2024_v27, %v2024_v27 }
 0x38f   : > { %v2152_v52 = vpack.c.bf16 %v2088_v61, %v2088_v61  ;;  %v2516_v34 = vunpack.c.l.b16 %v2512_v49  ;;  %v3447_v6 = vsub.f32 1.0, %v3383_v50  ;;  %v3342_v18 = vpack.c.bf16 %v3278_v17, %v3278_v17  ;;  %v5052_v17 = vld [vmem:[#allocation7 + $0x10] sm:$0xff] }
 0x390   : > { %5260 = vmatpush.bf16.msrb.mxu3 %v7955_v12  ;;  %9398 = vst [vmem:[#allocation159_spill] sm:$0xff] %v8084_v42  ;;  %v2344_v12 = vunpack.c.l.bf16 %v2280_v56  ;;  %v8087_v11 = vmul.f32 %v3601_v39, %v2346_v58  ;;  %v8089_v21 = vunpack.c.l.bf16 %v2151_v14  ;;  %v3343_v9 = vpack.c.bf16 %v3279_v2, %v3279_v2  ;;  %v8094_v42 = vld [vmem:[%s5927_s13 + $0x8] sm:$0xff]  ;;  %4481 = vmatpush.bf16.msrb.mxu2 %v5052_v17  ;;  %s4786_s13 = sshll.u32 %s5752_s16, 4  ;;  %s4787_s13 = int_to_ptr.vmem [resolvable:$true] %s4786_s13 }
 0x391   : > { %v8091_v20 = vunpack.c.l.bf16 %v2152_v52  ;;  %v2520_v53 = vpack.c.b16 %v2516_v34, %v2516_v34  ;;  %v2517_v54 = vunpack.c.h.b16 %v2512_v49  ;;  %v8102_v50 = vmul.f32 0.796875, %v2934_v41 }
 0x392   : > { %9399 = vst [vmem:[#allocation153_spill] sm:$0xff] %v8087_v11  ;;  %v2471_v58 = vmul.f32 %v8089_v21, %v8082_v37  ;;  %v3406_v61 = vunpack.c.l.bf16 %v3342_v18  ;;  %v3407_v2 = vunpack.c.l.bf16 %v3343_v9  ;;  %v8105_v49 = vmul.f32 0.796875, %v2935_v48  ;;  %v9402_v18 = vld [vmem:[#allocation150_spill] sm:$0xff]  ;;  %v9404_v11 = vld [vmem:[#allocation133_spill] sm:$0xff] }
 0x393   : > { %9400 = vst [vmem:[#allocation157_spill] sm:$0xff] %v8089_v21  ;;  %v2472_v35 = vmul.f32 %v8091_v20, %v2344_v12  ;;  %2536 = vmatmul.bf16.vlgmr.msrb.gmra.mxu1 %v2520_v53  ;;  %v3511_v56 = vpack.c.bf16 %v3447_v6, %v3447_v6  ;;  %v2521_v39 = vpack.c.b16 %v2517_v54, %v2517_v54  ;;  %v2518_v14 = vunpack.c.l.b16 %v8094_v42  ;;  %v9403_v53 = vld [vmem:[#allocation118_spill] sm:$0xff] }
 0x394   : > { %5261 = vmatpush.bf16.msrb.mxu3 %v8034_v19  ;;  %9401 = vst [vmem:[#allocation155_spill] sm:$0xff] %v8091_v20  ;;  %v3510_v19 = vpack.c.bf16 %v3446_v31, %v3446_v31  ;;  %v3190_v31 = vpack.c.bf16 %v8077_v1, %v8077_v1  ;;  %v3470_v34 = vsub.f32 1.0, %v3406_v61  ;;  %v3471_v41 = vsub.f32 1.0, %v3407_v2 }
 0x395   : > { %v2507_v52 = vpack.c.bf16 %v2472_v35, %v2471_v58  ;;  %2549 = vmatmul.bf16.vlgmr.msra.gmra.mxu2 %v2521_v39  ;;  %v2522_v22 = vpack.c.b16 %v2518_v14, %v2518_v14  ;;  %v1957_v9 = vpack.c.bf16 %v9402_v18, %v9402_v18  ;;  %v1958_v48 = vpack.c.bf16 %v7993_v26, %v7993_v26  ;;  %v9405_v35 = vld [vmem:[#allocation29_spill] sm:$0xff] }
 0x396   : > { %v3574_v27 = vunpack.c.l.bf16 %v3510_v19  ;;  %v3535_v6 = vpack.c.bf16 %v3471_v41, %v3471_v41  ;;  %v2213_v54 = vmul.f32 0.5, %v9403_v53  ;;  %v2214_v20 = vmul.f32 0.5, %v9404_v11 }
 0x397   : > { %2570 = vmatpush.bf16.msra.mxu1 %v2507_v52  ;;  %v3575_v1 = vunpack.c.l.bf16 %v3511_v56  ;;  %2562 = vmatmul.bf16.vlgmr.msra.gmra.mxu3 %v2522_v22  ;;  %v2021_v58 = vunpack.c.l.bf16 %v1957_v9  ;;  %v2022_v19 = vunpack.c.l.bf16 %v1958_v48  ;;  %v1955_v61 = vpack.c.bf16 %v9405_v35, %v9405_v35 }
 0x398   : > { %5262 = vmatpush.bf16.msrb.mxu3 %v5053_v44  ;;  %v3534_v44 = vpack.c.bf16 %v3470_v34, %v3470_v34  ;;  %v3599_v39 = vunpack.c.l.bf16 %v3535_v6  ;;  %v2277_v14 = vpack.c.bf16 %v2213_v54, %v2213_v54  ;;  %v2278_v18 = vpack.c.bf16 %v2214_v20, %v2214_v20 }
 0x399   : > { %v2085_v26 = vadd.f32 1.0, %v2021_v58  ;;  %v2086_v52 = vadd.f32 1.0, %v2022_v19  ;;  %v3276_v34 = vmul.f32 %v2021_v58, %v2021_v58  ;;  %v3277_v41 = vmul.f32 %v2022_v19, %v2022_v19 }
 0x39a   : > { %v3598_v2 = vunpack.c.l.bf16 %v3534_v44  ;;  %v8121_v11 = vmul.f32 %v3599_v39, %v2344_v12  ;;  %v2341_v22 = vunpack.c.l.bf16 %v2277_v14  ;;  %v2342_v56 = vunpack.c.l.bf16 %v2278_v18 }
 0x39b   : > { %v2149_v9 = vpack.c.bf16 %v2085_v26, %v2085_v26  ;;  %v2150_v48 = vpack.c.bf16 %v2086_v52, %v2086_v52  ;;  %v3340_v21 = vpack.c.bf16 %v3276_v34, %v3276_v34  ;;  %v3341_v35 = vpack.c.bf16 %v3277_v41, %v3277_v41 }
 0x39c   : > { %5263 = vmatpush.bf16.msrb.mxu3 %v5052_v17  ;;  %v8119_v53 = vmul.f32 %v3598_v2, %v8082_v37  ;;  %9407 = vst [vmem:[#allocation161_spill] sm:$0xff] %v8121_v11  ;;  %v8124_v44 = vmul.f32 %v3574_v27, %v8006_v40  ;;  %v8127_v20 = vmul.f32 %v3575_v1, %v8008_v3  ;;  %v9408_v17 = vld [vmem:[#allocation30_spill] sm:$0xff]  ;;  %v2019_v54 = vunpack.c.l.bf16 %v1955_v61  ;;  %v5051_v37 = vld [vmem:[#allocation7 + $0x8] sm:$0xff] }
 0x39d   : > { %v1956_v6 = vpack.c.bf16 %v9408_v17, %v9408_v17  ;;  %v8131_v58 = vunpack.c.l.bf16 %v2149_v9  ;;  %v8133_v12 = vunpack.c.l.bf16 %v2150_v48  ;;  %v3404_v19 = vunpack.c.l.bf16 %v3340_v21  ;;  %4482 = vmatpush.bf16.msrb.mxu2 %v5051_v37  ;;  %v9411_v9 = vld [vmem:[#allocation25_spill] sm:$0xff]  ;;  %v9412_v17 = vld [vmem:[#allocation106_spill] sm:$0xff] }
 0x39e   : > { %9406 = vst [vmem:[#allocation162_spill] sm:$0xff] %v8119_v53  ;;  %v3405_v2 = vunpack.c.l.bf16 %v3341_v35  ;;  %v3062_v39 = vpack.c.bf16 %v8102_v50, %v8102_v50  ;;  %v3063_v40 = vpack.c.bf16 %v8105_v49, %v8105_v49  ;;  %v2083_v3 = vadd.f32 1.0, %v2019_v54 }
 0x39f   : > { %9409 = vst [vmem:[#allocation151_spill] sm:$0xff] %v8131_v58  ;;  %v2020_v27 = vunpack.c.l.bf16 %v1956_v6  ;;  %v8140_v1 = vmul.f32 0.5, %v8010_v4  ;;  %v8142_v61 = vunpack.c.l.bf16 %v3190_v31  ;;  %v2469_v14 = vmul.f32 %v8131_v58, %v2341_v22 }
 0x3a0   : > { %9410 = vst [vmem:[#allocation109_spill] sm:$0xff] %v8133_v12  ;;  %5264 = vmatpush.bf16.msrb.mxu3 %v5051_v37  ;;  %v2470_v21 = vmul.f32 %v8133_v12, %v2342_v56  ;;  %v3468_v18 = vsub.f32 1.0, %v3404_v19  ;;  %v3469_v26 = vsub.f32 1.0, %v3405_v2  ;;  %v2147_v50 = vpack.c.bf16 %v2083_v3, %v2083_v3 }
 0x3a1   : > { %v2084_v52 = vadd.f32 1.0, %v2020_v27  ;;  %v3702_v49 = vpack.c.bf16 %v8124_v44, %v8124_v44  ;;  %v3703_v34 = vpack.c.bf16 %v8127_v20, %v8127_v20  ;;  %v2211_v4 = vmul.f32 0.5, %v9411_v9  ;;  %v9415_v9 = vld [vmem:[#allocation120_spill] sm:$0xff] }
 0x3a2   : > { %v2506_v41 = vpack.c.bf16 %v2470_v21, %v2469_v14  ;;  %v3532_v48 = vpack.c.bf16 %v3468_v18, %v3468_v18  ;;  %v3533_v31 = vpack.c.bf16 %v3469_v26, %v3469_v26  ;;  %v2212_v6 = vmul.f32 0.5, %v9412_v17  ;;  %v5050_v26 = vld [vmem:[#allocation7] sm:$0xff] }
 0x3a3   : > { %v2148_v35 = vpack.c.bf16 %v2084_v52, %v2084_v52  ;;  %v2275_v37 = vpack.c.bf16 %v2211_v4, %v2211_v4  ;;  %v8152_v19 = vunpack.c.l.bf16 %v2147_v50  ;;  %v3274_v2 = vmul.f32 %v2019_v54, %v2019_v54  ;;  %v9418_v4 = vld [vmem:[#allocation27_spill] sm:$0xff]  ;;  %4483 = vmatpush.bf16.msrb.mxu2 %v5050_v26 }
 0x3a4   : > { %2571 = vmatpush.bf16.msra.mxu1 %v2506_v41  ;;  %v3275_v3 = vmul.f32 %v2020_v27, %v2020_v27  ;;  %v3596_v11 = vunpack.c.l.bf16 %v3532_v48  ;;  %v3597_v53 = vunpack.c.l.bf16 %v3533_v31  ;;  %v2276_v44 = vpack.c.bf16 %v2212_v6, %v2212_v6  ;;  %5265 = vmatpush.bf16.msrb.mxu3 %v5050_v26 }
 0x3a5   : > { %9413 = vst [vmem:[#allocation148_spill] sm:$0xff] %v8152_v19  ;;  %v8154_v29 = vunpack.c.l.bf16 %v2148_v35  ;;  %v2339_v20 = vunpack.c.l.bf16 %v2275_v37  ;;  %v3338_v14 = vpack.c.bf16 %v3274_v2, %v3274_v2  ;;  %v1953_v18 = vpack.c.bf16 %v9415_v9, %v9415_v9 }
 0x3a6   : > { %v3339_v21 = vpack.c.bf16 %v3275_v3, %v3275_v3  ;;  %v8158_v52 = vmul.f32 %v3596_v11, %v2341_v22  ;;  %v8160_v41 = vmul.f32 %v3597_v53, %v2342_v56  ;;  %v2340_v50 = vunpack.c.l.bf16 %v2276_v44  ;;  %v9419_v56 = vld [vmem:[#allocation47_spill] sm:$0xff] }
 0x3a7   : > { %9414 = vst [vmem:[#allocation154_spill] sm:$0xff] %v8154_v29  ;;  %v1954_v54 = vpack.c.bf16 %v9418_v4, %v9418_v4  ;;  %v2467_v27 = vmul.f32 %v8152_v19, %v2339_v20  ;;  %v3402_v48 = vunpack.c.l.bf16 %v3338_v14  ;;  %v2017_v35 = vunpack.c.l.bf16 %v1953_v18  ;;  %v9420_v18 = vld [vmem:[#allocation28_spill] sm:$0xff] }
 0x3a8   : > { %9416 = vst [vmem:[#allocation141_spill] sm:$0xff] %v8158_v52  ;;  %v3403_v31 = vunpack.c.l.bf16 %v3339_v21  ;;  %v3830_v17 = vunpack.c.l.bf16 %v3062_v39  ;;  %v3831_v6 = vunpack.c.l.bf16 %v3063_v40  ;;  %v2468_v37 = vmul.f32 %v8154_v29, %v2340_v50 }
 0x3a9   : > { %9417 = vst [vmem:[#allocation147_spill] sm:$0xff] %v8160_v41  ;;  %v2018_v2 = vunpack.c.l.bf16 %v1954_v54  ;;  %v3466_v11 = vsub.f32 1.0, %v3402_v48  ;;  %v2081_v53 = vadd.f32 1.0, %v2017_v35  ;;  %v2209_v3 = vmul.f32 0.5, %v9419_v56 }
 0x3aa   : > { %v3467_v22 = vsub.f32 1.0, %v3403_v31  ;;  %v3766_v44 = vunpack.c.l.bf16 %v3702_v49  ;;  %v3767_v9 = vunpack.c.l.bf16 %v3703_v34  ;;  %v2505_v4 = vpack.c.bf16 %v2468_v37, %v2467_v27 }
 0x3ab   : > { %v2082_v36 = vadd.f32 1.0, %v2018_v2  ;;  %v3530_v12 = vpack.c.bf16 %v3466_v11, %v3466_v11  ;;  %v2145_v21 = vpack.c.bf16 %v2081_v53, %v2081_v53  ;;  %v2210_v41 = vmul.f32 0.5, %v9420_v18  ;;  %v9422_v53 = vld [vmem:[#allocation23_spill] sm:$0xff] }
 0x3ac   : > { %v3531_v14 = vpack.c.bf16 %v3467_v22, %v3467_v22  ;;  %2572 = vmatpush.bf16.msra.mxu1 %v2505_v4  ;;  %v2273_v40 = vpack.c.bf16 %v2209_v3, %v2209_v3  ;;  %v3272_v26 = vmul.f32 %v2017_v35, %v2017_v35  ;;  %v3273_v58 = vmul.f32 %v2018_v2, %v2018_v2 }
 0x3ad   : > { %v2146_v39 = vpack.c.bf16 %v2082_v36, %v2082_v36  ;;  %v3594_v54 = vunpack.c.l.bf16 %v3530_v12  ;;  %v2274_v31 = vpack.c.bf16 %v2210_v41, %v2210_v41  ;;  %v8168_v52 = vunpack.c.l.bf16 %v2145_v21  ;;  %v9423_v41 = vld [vmem:[#allocation33_spill] sm:$0xff] }
 0x3ae   : > { %v3595_v48 = vunpack.c.l.bf16 %v3531_v14  ;;  %v2337_v56 = vunpack.c.l.bf16 %v2273_v40  ;;  %v3336_v34 = vpack.c.bf16 %v3272_v26, %v3272_v26  ;;  %v3337_v27 = vpack.c.bf16 %v3273_v58, %v3273_v58 }
 0x3af   : > { %v8170_v49 = vunpack.c.l.bf16 %v2146_v39  ;;  %v8172_v37 = vmul.f32 %v3594_v54, %v2339_v20  ;;  %v2338_v22 = vunpack.c.l.bf16 %v2274_v31  ;;  %v1951_v36 = vpack.c.bf16 %v9422_v53, %v9422_v53  ;;  %v9424_v39 = vld [vmem:[#allocation80_spill] sm:$0xff] }
 0x3b0   : > { %v8174_v11 = vmul.f32 %v3595_v48, %v2340_v50  ;;  %v2465_v35 = vmul.f32 %v8168_v52, %v2337_v56  ;;  %v3400_v12 = vunpack.c.l.bf16 %v3336_v34  ;;  %v3401_v2 = vunpack.c.l.bf16 %v3337_v27 }
 0x3b1   : > { %v1952_v3 = vpack.c.bf16 %v9423_v41, %v9423_v41  ;;  %v3191_v4 = vpack.c.bf16 %v8140_v1, %v8140_v1  ;;  %v3894_v14 = vmul.f32 %v3830_v17, %v3766_v44  ;;  %v2466_v58 = vmul.f32 %v8170_v49, %v2338_v22  ;;  %v9425_v41 = vld [vmem:[#allocation53_spill] sm:$0xff] }
 0x3b2   : > { %9421 = vst [vmem:[#allocation150_spill] sm:$0xff] %v8174_v11  ;;  %v2015_v20 = vunpack.c.l.bf16 %v1951_v36  ;;  %v3464_v50 = vsub.f32 1.0, %v3400_v12  ;;  %v3465_v21 = vsub.f32 1.0, %v3401_v2  ;;  %v2207_v40 = vmul.f32 0.5, %v9424_v39 }
 0x3b3   : > { %v2016_v18 = vunpack.c.l.bf16 %v1952_v3  ;;  %v3895_v26 = vmul.f32 %v3831_v6, %v3767_v9  ;;  %v2519_v54 = vunpack.c.h.b16 %v8094_v42  ;;  %v2504_v48 = vpack.c.bf16 %v2466_v58, %v2465_v35 }
 0x3b4   : > { %v2079_v31 = vadd.f32 1.0, %v2015_v20  ;;  %v3528_v34 = vpack.c.bf16 %v3464_v50, %v3464_v50  ;;  %v3529_v27 = vpack.c.bf16 %v3465_v21, %v3465_v21  ;;  %v2208_v51 = vmul.f32 0.5, %v9425_v41 }
 0x3b5   : > { %v2080_v53 = vadd.f32 1.0, %v2016_v18  ;;  %2573 = vmatpush.bf16.msra.mxu1 %v2504_v48  ;;  %v2271_v17 = vpack.c.bf16 %v2207_v40, %v2207_v40  ;;  %v3270_v44 = vmul.f32 %v2015_v20, %v2015_v20  ;;  %v3271_v36 = vmul.f32 %v2016_v18, %v2016_v18  ;;  %v4246_v20 = vld [vmem:[%s8847_s3] sm:$0x1]  ;;  %v9426_v48 = vld [vmem:[#allocation111_spill] sm:$0xff] }
 0x3b6   : > { %v2143_v1 = vpack.c.bf16 %v2079_v31, %v2079_v31  ;;  %v3592_v12 = vunpack.c.l.bf16 %v3528_v34  ;;  %v3593_v2 = vunpack.c.l.bf16 %v3529_v27  ;;  %v2272_v8 = vpack.c.bf16 %v2208_v51, %v2208_v51 }
 0x3b7   : > { %v2144_v3 = vpack.c.bf16 %v2080_v53, %v2080_v53  ;;  %v2335_v39 = vunpack.c.l.bf16 %v2271_v17  ;;  %v3334_v42 = vpack.c.bf16 %v3270_v44, %v3270_v44  ;;  %v3335_v9 = vpack.c.bf16 %v3271_v36, %v3271_v36  ;;  %v9428_v53 = vld [vmem:[#allocation145_spill] sm:$0xff]  ;;  %v9429_v17 = vld [vmem:[#allocation146_spill] sm:$0xff] }
 0x3b8   : > { %v8187_v6 = vunpack.c.l.bf16 %v2143_v1  ;;  %v8189_v35 = vmul.f32 %v3592_v12, %v2337_v56  ;;  %v8191_v58 = vmul.f32 %v3593_v2, %v2338_v22  ;;  %v2336_v50 = vunpack.c.l.bf16 %v2272_v8 }
 0x3b9   : > { %v8193_v21 = vunpack.c.l.bf16 %v2144_v3  ;;  %v3398_v40 = vunpack.c.l.bf16 %v3334_v42  ;;  %v3399_v51 = vunpack.c.l.bf16 %v3335_v9  ;;  %v9427_v31 = vpack.c.bf16 %v9426_v48, %v9426_v48 }
 0x3ba   : > { %v2463_v18 = vmul.f32 %v8187_v6, %v2335_v39  ;;  %v3958_v27 = vpack.c.bf16 %v3894_v14, %v3894_v14  ;;  %v3959_v56 = vpack.c.bf16 %v3895_v26, %v3895_v26  ;;  %v4118_v8 = vadd.f32 %v7984_v7, %v9428_v53 }
 0x3bb   : > { %v4055_v34 = vunpack.c.l.bf16 %v9427_v31  ;;  %v2464_v22 = vmul.f32 %v8193_v21, %v2336_v50  ;;  %v3462_v41 = vsub.f32 1.0, %v3398_v40  ;;  %v3463_v1 = vsub.f32 1.0, %v3399_v51 }
 0x3bc   : > { %v4248_v36 = vpack.i.b16 %v4246_v20, %v4246_v20  ;;  %v4023_v12 = vunpack.c.l.bf16 %v3191_v4  ;;  %v2523_v2 = vpack.c.b16 %v2519_v54, %v2519_v54  ;;  %v4182_v42 = vpack.c.bf16 %v4118_v8, %v4118_v8 }
 0x3bd   : > { %v4119_v44 = vadd.f32 %v4055_v34, %v9429_v17  ;;  %v2503_v3 = vpack.c.bf16 %v2464_v22, %v2463_v18  ;;  %v3526_v9 = vpack.c.bf16 %v3462_v41, %v3462_v41  ;;  %v3527_v29 = vpack.c.bf16 %v3463_v1, %v3463_v1  ;;  %v9432_v18 = vld [vmem:[#allocation35_spill] sm:$0xff] }
 0x3be   : > { %v4250_v31 = vperm.slane %v4248_v36, 0  ;;  %v4252_v14 = vunpack.c.l.bf16 %v4182_v42  ;;  %v4086_v26 = vunpack.c.l.bf16 %v3958_v27  ;;  %v4087_v19 = vunpack.c.l.bf16 %v3959_v56 }
 0x3bf   : > { %v4183_v48 = vpack.c.bf16 %v4119_v44, %v4119_v44  ;;  %2574 = vmatpush.bf16.msra.mxu1 %v2503_v3  ;;  %v9431_v7 = vpack.c.bf16 %v9430_v63, %v9430_v63  ;;  %v3590_v51 = vunpack.c.l.bf16 %v3526_v9  ;;  %v3591_v53 = vunpack.c.l.bf16 %v3527_v29 }
 0x3c0   : > { %v8209_v34 = vunpack.c.l.bf16 %v4250_v31  ;;  %v4150_v54 = vadd.f32 %v4086_v26, %v8142_v61  ;;  %v4151_v20 = vadd.f32 %v4087_v19, %v4023_v12  ;;  %v2776_v22 = vadd.f32 1.0, %v9432_v18  ;;  %v9435_v31 = vld [vmem:[#allocation98_spill] sm:$0xff]  ;;  %v9437_v26 = vld [vmem:[#allocation37_spill] sm:$0xff] }
 0x3c1   : > { %v2713_v40 = vunpack.c.l.bf16 %v9431_v7  ;;  %v4253_v4 = vunpack.c.l.bf16 %v4183_v48  ;;  %v8213_v41 = vmul.f32 %v3590_v51, %v2335_v39  ;;  %v8215_v1 = vmul.f32 %v3591_v53, %v2336_v50 }
 0x3c2   : > { %2575 = vmatmul.bf16.vlgmr.msra.gmra.mxu1 %v2523_v2  ;;  %v4316_v27 = vmul.f32 %v4252_v14, %v8209_v34  ;;  %v4214_v56 = vpack.c.bf16 %v4150_v54, %v4150_v54  ;;  %v4215_v29 = vpack.c.bf16 %v4151_v20, %v4151_v20  ;;  %v2840_v17 = vpack.c.bf16 %v2776_v22, %v2776_v22 }
 0x3c3   : > { %v2777_v8 = vadd.f32 1.0, %v2713_v40  ;;  %v4317_v63 = vmul.f32 %v4253_v4, %v8209_v34  ;;  %v3192_v61 = vpack.c.bf16 %v8064_v60, %v8064_v60  ;;  %v3193_v19 = vpack.c.bf16 %v8067_v38, %v8067_v38 }
 0x3c4   : > { %v9433_v39 = vpack.c.bf16 %v7945_v45, %v7945_v45  ;;  %v4284_v12 = vunpack.c.l.bf16 %v4214_v56  ;;  %v4285_v2 = vunpack.c.l.bf16 %v4215_v29  ;;  %v2904_v3 = vunpack.c.l.bf16 %v2840_v17 }
 0x3c5   : > { %v2841_v44 = vpack.c.bf16 %v2777_v8, %v2777_v8  ;;  %v4380_v36 = vpack.c.bf16 %v4317_v63, %v4316_v27  ;;  %v9434_v9 = vpack.c.bf16 %v7951_v59, %v7951_v59  ;;  %v9436_v60 = vpack.c.bf16 %v9435_v31, %v9435_v31  ;;  %v9439_v63 = vld [vmem:[#allocation44_spill] sm:$0xff] }
 0x3c6   : > { %v3768_v50 = vunpack.c.l.bf16 %v9433_v39  ;;  %v9438_v38 = vpack.c.bf16 %v9437_v26, %v9437_v26  ;;  %v2808_v45 = vadd.f32 1.0, %v7977_v32  ;;  %v4348_v40 = vmul.f32 %v4284_v12, %v8209_v34 }
 0x3c7   : > { %v2905_v42 = vunpack.c.l.bf16 %v2841_v44  ;;  %v3769_v48 = vunpack.c.l.bf16 %v9434_v9  ;;  %4484 = vmatmul.bf16.vlgmr.msrb.gmra.mxu2 %v4380_v36  ;;  %v3992_v14 = vunpack.c.l.bf16 %v9436_v60  ;;  %v4349_v51 = vmul.f32 %v4285_v2, %v8209_v34  ;;  %v9441_v44 = vld [vmem:[#allocation42_spill] sm:$0xff]  ;;  %v9442_v36 = vld [vmem:[#allocation97_spill] sm:$0xff] }
 0x3c8   : > { %v3993_v7 = vunpack.c.l.bf16 %v9438_v38  ;;  %v2968_v53 = vmul.f32 0.796875, %v2904_v3  ;;  %v2809_v59 = vadd.f32 1.0, %v7979_v30  ;;  %v2872_v54 = vpack.c.bf16 %v2808_v45, %v2808_v45  ;;  %v9444_v3 = vld [vmem:[#allocation43_spill] sm:$0xff] }
 0x3c9   : > { %v2969_v4 = vmul.f32 0.796875, %v2905_v42  ;;  %v8239_v20 = vunpack.c.l.bf16 %v3192_v61  ;;  %v8241_v18 = vunpack.c.l.bf16 %v3193_v19  ;;  %v4396_v22 = vpack.c.bf16 %v4349_v51, %v4348_v40  ;;  %v9446_v38 = vld [vmem:[#allocation51_spill] sm:$0xff] }
 0x3ca   : > { %v3032_v8 = vpack.c.bf16 %v2968_v53, %v2968_v53  ;;  %v9440_v56 = vpack.c.bf16 %v9439_v63, %v9439_v63  ;;  %v2873_v29 = vpack.c.bf16 %v2809_v59, %v2809_v59  ;;  %v2936_v17 = vunpack.c.l.bf16 %v2872_v54  ;;  %v9448_v51 = vld [vmem:[#allocation99_spill] sm:$0xff] }
 0x3cb   : > { %v3033_v27 = vpack.c.bf16 %v2969_v4, %v2969_v4  ;;  %v2778_v39 = vadd.f32 1.0, %v9441_v44  ;;  %v9443_v12 = vpack.c.bf16 %v9442_v36, %v9442_v36  ;;  %4564 = vmatmul.bf16.vlgmr.msrb.gmra.mxu3 %v4396_v22  ;;  %v9445_v42 = vpack.c.bf16 %v9444_v3, %v9444_v3  ;;  %v9449_v4 = vld [vmem:[#allocation31_spill] sm:$0xff]  ;;  %v9450_v22 = vld [vmem:[#allocation38_spill] sm:$0xff] }
 0x3cc   : > { %v2715_v32 = vunpack.c.l.bf16 %v9440_v56  ;;  %v3800_v61 = vunpack.c.l.bf16 %v3032_v8  ;;  %v2937_v31 = vunpack.c.l.bf16 %v2873_v29  ;;  %v3000_v60 = vmul.f32 0.796875, %v2936_v17  ;;  %v9452_v29 = vld [vmem:[#allocation36_spill] sm:$0xff] }
 0x3cd   : > { %v8250_v30 = vunpack.c.l.bf16 %v9443_v12  ;;  %v3801_v19 = vunpack.c.l.bf16 %v3033_v27  ;;  %v8255_v9 = vunpack.c.l.bf16 %v9445_v42  ;;  %v2842_v26 = vpack.c.bf16 %v2778_v39, %v2778_v39 }
 0x3ce   : > { %v2779_v2 = vadd.f32 1.0, %v2715_v32  ;;  %v9447_v45 = vpack.c.bf16 %v9446_v38, %v9446_v38  ;;  %v3864_v53 = vmul.f32 %v3800_v61, %v9448_v51  ;;  %v9451_v8 = vpack.c.bf16 %v9450_v22, %v9450_v22 }
 0x3cf   : > { %v3865_v59 = vmul.f32 %v3801_v19, %v9449_v4  ;;  %v3001_v63 = vmul.f32 0.796875, %v2937_v31  ;;  %v3064_v56 = vpack.c.bf16 %v3000_v60, %v3000_v60  ;;  %v2906_v32 = vunpack.c.l.bf16 %v2842_v26 }
 0x3d0   : > { %v8260_v40 = vunpack.c.l.bf16 %v9447_v45  ;;  %v2843_v54 = vpack.c.bf16 %v2779_v2, %v2779_v2  ;;  %v2747_v27 = vunpack.c.l.bf16 %v9451_v8  ;;  %v2810_v17 = vadd.f32 1.0, %v9452_v29 }
 0x3d1   : > { %v3928_v44 = vpack.c.bf16 %v3864_v53, %v3864_v53  ;;  %v3929_v39 = vpack.c.bf16 %v3865_v59, %v3865_v59  ;;  %v3065_v3 = vpack.c.bf16 %v3001_v63, %v3001_v63  ;;  %v3832_v42 = vunpack.c.l.bf16 %v3064_v56 }
 0x3d2   : > { %v2907_v36 = vunpack.c.l.bf16 %v2843_v54  ;;  %v2811_v12 = vadd.f32 1.0, %v2747_v27  ;;  %v2970_v38 = vmul.f32 0.796875, %v2906_v32  ;;  %v2874_v61 = vpack.c.bf16 %v2810_v17, %v2810_v17 }
 0x3d3   : > { %v4056_v45 = vunpack.c.l.bf16 %v3928_v44  ;;  %v4057_v19 = vunpack.c.l.bf16 %v3929_v39  ;;  %v3833_v4 = vunpack.c.l.bf16 %v3065_v3  ;;  %v3896_v22 = vmul.f32 %v3832_v42, %v3768_v50 }
 0x3d4   : > { %v2971_v2 = vmul.f32 0.796875, %v2907_v36  ;;  %v2875_v51 = vpack.c.bf16 %v2811_v12, %v2811_v12  ;;  %v3034_v8 = vpack.c.bf16 %v2970_v38, %v2970_v38  ;;  %v2938_v31 = vunpack.c.l.bf16 %v2874_v61  ;;  %v9453_v36 = vld [vmem:[#allocation142_spill] sm:$0xff]  ;;  %v9454_v38 = vld [vmem:[#allocation143_spill] sm:$0xff] }
 0x3d5   : > { %v4120_v60 = vadd.f32 %v4056_v45, %v3992_v14  ;;  %v4121_v26 = vadd.f32 %v4057_v19, %v3993_v7  ;;  %v3897_v53 = vmul.f32 %v3833_v4, %v3769_v48  ;;  %v3960_v59 = vpack.c.bf16 %v3896_v22, %v3896_v22 }
 0x3d6   : > { %v3035_v11 = vpack.c.bf16 %v2971_v2, %v2971_v2  ;;  %v2939_v29 = vunpack.c.l.bf16 %v2875_v51  ;;  %v3802_v54 = vunpack.c.l.bf16 %v3034_v8  ;;  %v3002_v27 = vmul.f32 0.796875, %v2938_v31 }
 0x3d7   : > { %v4184_v63 = vpack.c.bf16 %v4120_v60, %v4120_v60  ;;  %v4185_v56 = vpack.c.bf16 %v4121_v26, %v4121_v26  ;;  %v3961_v44 = vpack.c.bf16 %v3897_v53, %v3897_v53  ;;  %v4088_v39 = vunpack.c.l.bf16 %v3960_v59  ;;  %v9455_v60 = vld [vmem:[#allocation134_spill] sm:$0xff]  ;;  %v9456_v59 = vld [vmem:[#allocation135_spill] sm:$0xff] }
 0x3d8   : > { %v3803_v32 = vunpack.c.l.bf16 %v3035_v11  ;;  %v3003_v17 = vmul.f32 0.796875, %v2939_v29  ;;  %v3866_v12 = vmul.f32 %v3802_v54, %v9453_v36  ;;  %v3066_v3 = vpack.c.bf16 %v3002_v27, %v3002_v27  ;;  %v9457_v27 = vld [vmem:[#allocation26_spill] sm:$0xff] }
 0x3d9   : > { %v4254_v50 = vunpack.c.l.bf16 %v4184_v63  ;;  %v4255_v42 = vunpack.c.l.bf16 %v4185_v56  ;;  %v4089_v61 = vunpack.c.l.bf16 %v3961_v44  ;;  %v4152_v48 = vadd.f32 %v4088_v39, %v8239_v20  ;;  %v9459_v36 = vld [vmem:[#allocation82_spill] sm:$0xff] }
 0x3da   : > { %v3867_v14 = vmul.f32 %v3803_v32, %v9454_v38  ;;  %v3067_v7 = vpack.c.bf16 %v3003_v17, %v3003_v17  ;;  %v3930_v45 = vpack.c.bf16 %v3866_v12, %v3866_v12  ;;  %v3834_v19 = vunpack.c.l.bf16 %v3066_v3 }
 0x3db   : > { %v4318_v2 = vmul.f32 %v4254_v50, %v8209_v34  ;;  %v4319_v11 = vmul.f32 %v4255_v42, %v8209_v34  ;;  %v4153_v22 = vadd.f32 %v4089_v61, %v8241_v18  ;;  %v4216_v8 = vpack.c.bf16 %v4152_v48, %v4152_v48  ;;  %v9461_v50 = vld [vmem:[#allocation48_spill] sm:$0xff] }
 0x3dc   : > { %v3931_v51 = vpack.c.bf16 %v3867_v14, %v3867_v14  ;;  %v3835_v4 = vunpack.c.l.bf16 %v3067_v7  ;;  %v4058_v31 = vunpack.c.l.bf16 %v3930_v45  ;;  %v3898_v26 = vmul.f32 %v3834_v19, %v9455_v60 }
 0x3dd   : > { %v4381_v29 = vpack.c.bf16 %v4319_v11, %v4318_v2  ;;  %v9458_v20 = vpack.c.bf16 %v9457_v27, %v9457_v27  ;;  %v4217_v56 = vpack.c.bf16 %v4153_v22, %v4153_v22  ;;  %v4286_v32 = vunpack.c.l.bf16 %v4216_v8 }
 0x3de   : > { %v4059_v53 = vunpack.c.l.bf16 %v3931_v51  ;;  %v3899_v54 = vmul.f32 %v3835_v4, %v9456_v59  ;;  %v4122_v17 = vadd.f32 %v4058_v31, %v8250_v30  ;;  %v3962_v44 = vpack.c.bf16 %v3898_v26, %v3898_v26  ;;  %v9462_v51 = vld [vmem:[#allocation34_spill] sm:$0xff] }
 0x3df   : > { %v4026_v63 = vunpack.c.l.bf16 %v9458_v20  ;;  %4489 = vmatmul.bf16.gmra.mxu2 %v4381_v29  ;;  %v9460_v12 = vpack.c.bf16 %v9459_v36, %v9459_v36  ;;  %v2780_v42 = vadd.f32 1.0, %v9461_v50  ;;  %v4287_v38 = vunpack.c.l.bf16 %v4217_v56  ;;  %v9468_v36 = vld [vmem:[#allocation45_spill] sm:$0xff] }
 0x3e0   : > { %v4123_v18 = vadd.f32 %v4059_v53, %v8255_v9  ;;  %v3963_v39 = vpack.c.bf16 %v3899_v54, %v3899_v54  ;;  %v4350_v14 = vmul.f32 %v4286_v32, %v8209_v34  ;;  %v4186_v7 = vpack.c.bf16 %v4122_v17, %v4122_v17  ;;  %v9464_v54 = vld [vmem:[#allocation41_spill] sm:$0xff] }
 0x3e1   : > { %v4027_v3 = vunpack.c.l.bf16 %v9460_v12  ;;  %v4090_v61 = vunpack.c.l.bf16 %v3962_v44  ;;  %v2781_v30 = vadd.f32 1.0, %v8260_v40  ;;  %v2844_v19 = vpack.c.bf16 %v2780_v42, %v2780_v42  ;;  %v9466_v44 = vld [vmem:[#allocation46_spill] sm:$0xff] }
 0x3e2   : > { %v4187_v48 = vpack.c.bf16 %v4123_v18, %v4123_v18  ;;  %v4091_v45 = vunpack.c.l.bf16 %v3963_v39  ;;  %v4351_v2 = vmul.f32 %v4287_v38, %v8209_v34  ;;  %v4256_v9 = vunpack.c.l.bf16 %v4186_v7 }
 0x3e3   : > { %v4154_v11 = vadd.f32 %v4090_v61, %v4026_v63  ;;  %v9463_v4 = vpack.c.bf16 %v9462_v51, %v9462_v51  ;;  %v2845_v60 = vpack.c.bf16 %v2781_v30, %v2781_v30  ;;  %v2908_v26 = vunpack.c.l.bf16 %v2844_v19  ;;  %v9471_v19 = vld [vmem:[#allocation126_spill] sm:$0xff] }
 0x3e4   : > { %v4257_v8 = vunpack.c.l.bf16 %v4187_v48  ;;  %v4155_v31 = vadd.f32 %v4091_v45, %v4027_v3  ;;  %v4397_v29 = vpack.c.bf16 %v4351_v2, %v4350_v14  ;;  %v4320_v53 = vmul.f32 %v4256_v9, %v8209_v34  ;;  %v9469_v3 = vld [vmem:[#allocation125_spill] sm:$0xff] }
 0x3e5   : > { %v3996_v22 = vunpack.c.l.bf16 %v9463_v4  ;;  %v4218_v59 = vpack.c.bf16 %v4154_v11, %v4154_v11  ;;  %v9465_v40 = vpack.c.bf16 %v9464_v54, %v9464_v54  ;;  %v2909_v63 = vunpack.c.l.bf16 %v2845_v60  ;;  %v9476_v54 = vld [vmem:[#allocation90_spill] sm:$0xff] }
 0x3e6   : > { %v4321_v20 = vmul.f32 %v4257_v8, %v8209_v34  ;;  %v4219_v56 = vpack.c.bf16 %v4155_v31, %v4155_v31  ;;  %v2972_v32 = vmul.f32 0.796875, %v2908_v26  ;;  %4569 = vmatmul.bf16.gmra.mxu3 %v4397_v29  ;;  %v9467_v18 = vpack.c.bf16 %v9466_v44, %v9466_v44  ;;  %v9473_v8 = vld [vmem:[#allocation63_spill] sm:$0xff] }
 0x3e7   : > { %v3997_v27 = vunpack.c.l.bf16 %v9465_v40  ;;  %v4288_v17 = vunpack.c.l.bf16 %v4218_v59  ;;  %v2812_v12 = vadd.f32 1.0, %v9468_v36  ;;  %v9470_v50 = vpack.c.bf16 %v9469_v3, %v9469_v3 }
 0x3e8   : > { %v2749_v39 = vunpack.c.l.bf16 %v9467_v18  ;;  %v4382_v38 = vpack.c.bf16 %v4321_v20, %v4320_v53  ;;  %v4289_v14 = vunpack.c.l.bf16 %v4219_v56  ;;  %v2973_v7 = vmul.f32 0.796875, %v2909_v63  ;;  %v9475_v53 = vld [vmem:[#allocation54_spill] sm:$0xff] }
 0x3e9   : > { %v8303_v42 = vunpack.c.l.bf16 %v9470_v50  ;;  %v3036_v61 = vpack.c.bf16 %v2972_v32, %v2972_v32  ;;  %v4352_v48 = vmul.f32 %v4288_v17, %v8209_v34  ;;  %v2876_v30 = vpack.c.bf16 %v2812_v12, %v2812_v12  ;;  %v9478_v32 = vld [vmem:[#allocation40_spill] sm:$0xff]  ;;  %v9479_v12 = vld [vmem:[#allocation91_spill] sm:$0xff] }
 0x3ea   : > { %v2813_v45 = vadd.f32 1.0, %v2749_v39  ;;  %v9472_v2 = vpack.c.bf16 %v9471_v19, %v9471_v19  ;;  %v4353_v11 = vmul.f32 %v4289_v14, %v8209_v34  ;;  %v3037_v51 = vpack.c.bf16 %v2973_v7, %v2973_v7  ;;  %v9481_v14 = vld [vmem:[#allocation24_spill] sm:$0xff] }
 0x3eb   : > { %v3804_v4 = vunpack.c.l.bf16 %v3036_v61  ;;  %v9474_v31 = vpack.c.bf16 %v9473_v8, %v9473_v8  ;;  %v2940_v29 = vunpack.c.l.bf16 %v2876_v30  ;;  %v2782_v59 = vadd.f32 1.0, %v9475_v53  ;;  %v9482_v30 = vld [vmem:[#allocation71_spill] sm:$0xff] }
 0x3ec   : > { %v8309_v9 = vunpack.c.l.bf16 %v9472_v2  ;;  %v2877_v26 = vpack.c.bf16 %v2813_v45, %v2813_v45  ;;  %v9477_v40 = vpack.c.bf16 %v9476_v54, %v9476_v54  ;;  %v4398_v56 = vpack.c.bf16 %v4353_v11, %v4352_v48 }
 0x3ed   : > { %v2719_v60 = vunpack.c.l.bf16 %v9474_v31  ;;  %v3805_v63 = vunpack.c.l.bf16 %v3037_v51  ;;  %v3868_v17 = vmul.f32 %v3804_v4, %v9478_v32  ;;  %v3004_v39 = vmul.f32 0.796875, %v2940_v29  ;;  %v9484_v4 = vld [vmem:[#allocation72_spill] sm:$0xff]  ;;  %v9487_v32 = vld [vmem:[#allocation50_spill] sm:$0xff] }
 0x3ee   : > { %v8319_v20 = vunpack.c.l.bf16 %v9477_v40  ;;  %v2941_v18 = vunpack.c.l.bf16 %v2877_v26  ;;  %v2846_v36 = vpack.c.bf16 %v2782_v59, %v2782_v59  ;;  %v9480_v3 = vpack.c.bf16 %v9479_v12, %v9479_v12  ;;  %v9485_v29 = vld [vmem:[#allocation52_spill] sm:$0xff] }
 0x3ef   : > { %v2783_v44 = vadd.f32 1.0, %v2719_v60  ;;  %v3869_v7 = vmul.f32 %v3805_v63, %v9481_v14  ;;  %v3932_v61 = vpack.c.bf16 %v3868_v17, %v3868_v17  ;;  %v9483_v19 = vpack.c.bf16 %v9482_v30, %v9482_v30  ;;  %4494 = vmatmul.bf16.gmra.mxu2 %v4382_v38 }
 0x3f0   : > { %v8325_v50 = vunpack.c.l.bf16 %v9480_v3  ;;  %v3005_v2 = vmul.f32 0.796875, %v2941_v18  ;;  %v3068_v11 = vpack.c.bf16 %v3004_v39, %v3004_v39  ;;  %v2910_v51 = vunpack.c.l.bf16 %v2846_v36  ;;  %v9488_v3 = vld [vmem:[#allocation75_spill] sm:$0xff] }
 0x3f1   : > { %v2847_v45 = vpack.c.bf16 %v2783_v44, %v2783_v44  ;;  %v8331_v48 = vunpack.c.l.bf16 %v9483_v19  ;;  %v8334_v8 = vadd.f32 1.0, %v9484_v4  ;;  %v3933_v31 = vpack.c.bf16 %v3869_v7, %v3869_v7  ;;  %v9489_v4 = vld [vmem:[#allocation57_spill] sm:$0xff] }
 0x3f2   : > { %v4060_v60 = vunpack.c.l.bf16 %v3932_v61  ;;  %v9486_v53 = vpack.c.bf16 %v9485_v29, %v9485_v29  ;;  %v3069_v54 = vpack.c.bf16 %v3005_v2, %v3005_v2  ;;  %v3836_v40 = vunpack.c.l.bf16 %v3068_v11 }
 0x3f3   : > { %v2911_v26 = vunpack.c.l.bf16 %v2847_v45  ;;  %v2974_v63 = vmul.f32 0.796875, %v2910_v51  ;;  %v2814_v17 = vadd.f32 1.0, %v9487_v32  ;;  %v4061_v44 = vunpack.c.l.bf16 %v3933_v31 }
 0x3f4   : > { %v2751_v59 = vunpack.c.l.bf16 %v9486_v53  ;;  %v4124_v18 = vadd.f32 %v4060_v60, %v3996_v22  ;;  %v3837_v12 = vunpack.c.l.bf16 %v3069_v54  ;;  %v3900_v14 = vmul.f32 %v3836_v40, %v9488_v3 }
 0x3f5   : > { %v2975_v39 = vmul.f32 0.796875, %v2911_v26  ;;  %v3038_v38 = vpack.c.bf16 %v2974_v63, %v2974_v63  ;;  %v2878_v7 = vpack.c.bf16 %v2814_v17, %v2814_v17  ;;  %v4125_v61 = vadd.f32 %v4061_v44, %v3997_v27  ;;  %v9491_v17 = vld [vmem:[#allocation140_spill] sm:$0xff] }
 0x3f6   : > { %v2815_v36 = vadd.f32 1.0, %v2751_v59  ;;  %v4188_v45 = vpack.c.bf16 %v4124_v18, %v4124_v18  ;;  %v3901_v29 = vmul.f32 %v3837_v12, %v9489_v4  ;;  %v3964_v2 = vpack.c.bf16 %v3900_v14, %v3900_v14  ;;  %4574 = vmatmul.bf16.gmra.mxu3 %v4398_v56  ;;  %v9490_v59 = vld [vmem:[#allocation139_spill] sm:$0xff] }
 0x3f7   : > { %v3039_v30 = vpack.c.bf16 %v2975_v39, %v2975_v39  ;;  %v3806_v11 = vunpack.c.l.bf16 %v3038_v38  ;;  %v2942_v51 = vunpack.c.l.bf16 %v2878_v7  ;;  %v4189_v53 = vpack.c.bf16 %v4125_v61, %v4125_v61  ;;  %v9492_v7 = vld [vmem:[#allocation67_spill] sm:$0xff] }
 0x3f8   : > { %v2879_v19 = vpack.c.bf16 %v2815_v36, %v2815_v36  ;;  %v4258_v32 = vunpack.c.l.bf16 %v4188_v45  ;;  %v3965_v60 = vpack.c.bf16 %v3901_v29, %v3901_v29  ;;  %v4092_v26 = vunpack.c.l.bf16 %v3964_v2 }
 0x3f9   : > { %v3807_v31 = vunpack.c.l.bf16 %v3039_v30  ;;  %v3870_v54 = vmul.f32 %v3806_v11, %v9490_v59  ;;  %v3006_v40 = vmul.f32 0.796875, %v2942_v51  ;;  %v4259_v63 = vunpack.c.l.bf16 %v4189_v53  ;;  %v9494_v53 = vld [vmem:[#allocation68_spill] sm:$0xff] }
 0x3fa   : > { %v2943_v22 = vunpack.c.l.bf16 %v2879_v19  ;;  %v4322_v27 = vmul.f32 %v4258_v32, %v8209_v34  ;;  %v4093_v39 = vunpack.c.l.bf16 %v3965_v60  ;;  %v4156_v36 = vadd.f32 %v4092_v26, %v8303_v42  ;;  %v9496_v26 = vld [vmem:[#allocation122_spill] sm:$0xff] }
 0x3fb   : > { %v3871_v44 = vmul.f32 %v3807_v31, %v9491_v17  ;;  %v3934_v12 = vpack.c.bf16 %v3870_v54, %v3870_v54  ;;  %v3070_v3 = vpack.c.bf16 %v3006_v40, %v3006_v40  ;;  %v4323_v14 = vmul.f32 %v4259_v63, %v8209_v34  ;;  %v9497_v40 = vld [vmem:[#allocation123_spill] sm:$0xff] }
 0x3fc   : > { %v3007_v18 = vmul.f32 0.796875, %v2943_v22  ;;  %v9493_v61 = vpack.c.bf16 %v9492_v7, %v9492_v7  ;;  %v4157_v30 = vadd.f32 %v4093_v39, %v8309_v9  ;;  %v4220_v19 = vpack.c.bf16 %v4156_v36, %v4156_v36 }
 0x3fd   : > { %v3935_v38 = vpack.c.bf16 %v3871_v44, %v3871_v44  ;;  %v4062_v4 = vunpack.c.l.bf16 %v3934_v12  ;;  %v3838_v29 = vunpack.c.l.bf16 %v3070_v3  ;;  %v4383_v2 = vpack.c.bf16 %v4323_v14, %v4322_v27 }
 0x3fe   : > { %v3071_v56 = vpack.c.bf16 %v3007_v18, %v3007_v18  ;;  %v4030_v45 = vunpack.c.l.bf16 %v9493_v61  ;;  %v9495_v42 = vpack.c.bf16 %v9494_v53, %v9494_v53  ;;  %v4221_v31 = vpack.c.bf16 %v4157_v30, %v4157_v30 }
 0x3ff   : > { %v4063_v11 = vunpack.c.l.bf16 %v3935_v38  ;;  %v4290_v22 = vunpack.c.l.bf16 %v4220_v19  ;;  %v4126_v60 = vadd.f32 %v4062_v4, %v8319_v20  ;;  %v3902_v59 = vmul.f32 %v3838_v29, %v9496_v26  ;;  %4499 = vmatmul.bf16.gmra.mxu2 %v4383_v2  ;;  %v9499_v2 = vld [vmem:[#allocation56_spill] sm:$0xff] }
 0x400   : > { %v3839_v51 = vunpack.c.l.bf16 %v3071_v56  ;;  %v4031_v32 = vunpack.c.l.bf16 %v9495_v42  ;;  %v2785_v63 = vadd.f32 1.0, %v8331_v48  ;;  %v2848_v27 = vpack.c.bf16 %v8334_v8, %v8334_v8 }
 0x401   : > { %v4127_v54 = vadd.f32 %v4063_v11, %v8325_v50  ;;  %v4291_v17 = vunpack.c.l.bf16 %v4221_v31  ;;  %v4354_v44 = vmul.f32 %v4290_v22, %v8209_v34  ;;  %v4190_v18 = vpack.c.bf16 %v4126_v60, %v4126_v60  ;;  %v9501_v60 = vld [vmem:[#allocation81_spill] sm:$0xff] }
 0x402   : > { %v3903_v9 = vmul.f32 %v3839_v51, %v9497_v40  ;;  %v3966_v39 = vpack.c.bf16 %v3902_v59, %v3902_v59  ;;  %v2849_v20 = vpack.c.bf16 %v2785_v63, %v2785_v63  ;;  %v2912_v3 = vunpack.c.l.bf16 %v2848_v27  ;;  %v9505_v63 = vld [vmem:[#allocation64_spill] sm:$0xff] }
 0x403   : > { %v4191_v36 = vpack.c.bf16 %v4127_v54, %v4127_v54  ;;  %v9498_v50 = vpack.c.bf16 %v7899_v25, %v7899_v25  ;;  %v4355_v48 = vmul.f32 %v4291_v17, %v8209_v34  ;;  %v4260_v38 = vunpack.c.l.bf16 %v4190_v18  ;;  %v9503_v54 = vld [vmem:[#allocation65_spill] sm:$0xff] }
 0x404   : > { %v3967_v12 = vpack.c.bf16 %v3903_v9, %v3903_v9  ;;  %v4094_v56 = vunpack.c.l.bf16 %v3966_v39  ;;  %v2913_v61 = vunpack.c.l.bf16 %v2849_v20  ;;  %v2976_v30 = vmul.f32 0.796875, %v2912_v3 }
 0x405   : > { %v8365_v14 = vunpack.c.l.bf16 %v9498_v50  ;;  %v4261_v8 = vunpack.c.l.bf16 %v4191_v36  ;;  %v4399_v19 = vpack.c.bf16 %v4355_v48, %v4354_v44  ;;  %v4324_v4 = vmul.f32 %v4260_v38, %v8209_v34  ;;  %v9508_v38 = vld [vmem:[#allocation136_spill] sm:$0xff] }
 0x406   : > { %v4095_v7 = vunpack.c.l.bf16 %v3967_v12  ;;  %v4158_v29 = vadd.f32 %v4094_v56, %v4030_v45  ;;  %v9500_v11 = vpack.c.bf16 %v9499_v2, %v9499_v2  ;;  %v2977_v42 = vmul.f32 0.796875, %v2913_v61  ;;  %v9506_v12 = vld [vmem:[#allocation61_spill] sm:$0xff] }
 0x407   : > { %v4325_v25 = vmul.f32 %v4261_v8, %v8209_v34  ;;  %v3040_v31 = vpack.c.bf16 %v2976_v30, %v2976_v30  ;;  %v9502_v26 = vpack.c.bf16 %v9501_v60, %v9501_v60  ;;  %v9504_v40 = vpack.c.bf16 %v9503_v54, %v9503_v54  ;;  %4579 = vmatmul.bf16.gmra.mxu3 %v4399_v19  ;;  %v9509_v8 = vld [vmem:[#allocation77_spill] sm:$0xff]  ;;  %v9512_v60 = vld [vmem:[#allocation62_spill] sm:$0xff] }
 0x408   : > { %v4000_v51 = vunpack.c.l.bf16 %v9500_v11  ;;  %v4159_v53 = vadd.f32 %v4095_v7, %v4031_v32  ;;  %v4222_v22 = vpack.c.bf16 %v4158_v29, %v4158_v29  ;;  %v2816_v45 = vadd.f32 1.0, %v9505_v63  ;;  %v9510_v29 = vld [vmem:[#allocation84_spill] sm:$0xff]  ;;  %v9511_v11 = vld [vmem:[#allocation137_spill] sm:$0xff] }
 0x409   : > { %v4001_v59 = vunpack.c.l.bf16 %v9502_v26  ;;  %v2753_v9 = vunpack.c.l.bf16 %v9504_v40  ;;  %v4384_v27 = vpack.c.bf16 %v4325_v25, %v4324_v4  ;;  %v3041_v44 = vpack.c.bf16 %v2977_v42, %v2977_v42 }
 0x40a   : > { %v4223_v17 = vpack.c.bf16 %v4159_v53, %v4159_v53  ;;  %v3808_v18 = vunpack.c.l.bf16 %v3040_v31  ;;  %v4292_v39 = vunpack.c.l.bf16 %v4222_v22  ;;  %v2880_v36 = vpack.c.bf16 %v2816_v45, %v2816_v45 }
 0x40b   : > { %v2817_v32 = vadd.f32 1.0, %v2753_v9  ;;  %v9507_v20 = vpack.c.bf16 %v9506_v12, %v9506_v12  ;;  %v3809_v48 = vunpack.c.l.bf16 %v3041_v44  ;;  %v2786_v7 = vadd.f32 1.0, %v9509_v8 }
 0x40c   : > { %v4293_v50 = vunpack.c.l.bf16 %v4223_v17  ;;  %v3872_v56 = vmul.f32 %v3808_v18, %v9508_v38  ;;  %v4356_v61 = vmul.f32 %v4292_v39, %v8209_v34  ;;  %v2944_v4 = vunpack.c.l.bf16 %v2880_v36  ;;  %v9516_v38 = vld [vmem:[#allocation76_spill] sm:$0xff] }
 0x40d   : > { %v8383_v3 = vunpack.c.l.bf16 %v9507_v20  ;;  %v2881_v30 = vpack.c.bf16 %v2817_v32, %v2817_v32  ;;  %v2787_v19 = vadd.f32 1.0, %v9510_v29  ;;  %v3873_v25 = vmul.f32 %v3809_v48, %v9511_v11  ;;  %v9514_v32 = vld [vmem:[#allocation129_spill] sm:$0xff] }
 0x40e   : > { %v4357_v2 = vmul.f32 %v4293_v50, %v8209_v34  ;;  %v3936_v53 = vpack.c.bf16 %v3872_v56, %v3872_v56  ;;  %v2850_v42 = vpack.c.bf16 %v2786_v7, %v2786_v7  ;;  %v3008_v22 = vmul.f32 0.796875, %v2944_v4  ;;  %v9518_v4 = vld [vmem:[#allocation85_spill] sm:$0xff] }
 0x40f   : > { %v2945_v31 = vunpack.c.l.bf16 %v2881_v30  ;;  %v9513_v26 = vpack.c.bf16 %v9512_v60, %v9512_v60  ;;  %v2851_v40 = vpack.c.bf16 %v2787_v19, %v2787_v19  ;;  %v3937_v63 = vpack.c.bf16 %v3873_v25, %v3873_v25  ;;  %4504 = vmatmul.bf16.gmra.mxu2 %v4384_v27  ;;  %v9519_v25 = vld [vmem:[#allocation73_spill] sm:$0xff]  ;;  %v9521_v60 = vld [vmem:[#allocation74_spill] sm:$0xff] }
 0x410   : > { %v4400_v9 = vpack.c.bf16 %v4357_v2, %v4356_v61  ;;  %v4064_v45 = vunpack.c.l.bf16 %v3936_v53  ;;  %v2914_v17 = vunpack.c.l.bf16 %v2850_v42  ;;  %v3072_v18 = vpack.c.bf16 %v3008_v22, %v3008_v22 }
 0x411   : > { %v4033_v54 = vunpack.c.l.bf16 %v9513_v26  ;;  %v3009_v44 = vmul.f32 0.796875, %v2945_v31  ;;  %v2915_v39 = vunpack.c.l.bf16 %v2851_v40  ;;  %v9515_v36 = vpack.c.bf16 %v9514_v32, %v9514_v32  ;;  %v9520_v31 = vld [vmem:[#allocation115_spill] sm:$0xff] }
 0x412   : > { %v4065_v20 = vunpack.c.l.bf16 %v3937_v63  ;;  %v4128_v50 = vadd.f32 %v4064_v45, %v4000_v51  ;;  %v2978_v48 = vmul.f32 0.796875, %v2914_v17  ;;  %v9517_v56 = vpack.c.bf16 %v9516_v38, %v9516_v38 }
 0x413   : > { %v4002_v12 = vunpack.c.l.bf16 %v9515_v36  ;;  %v3073_v7 = vpack.c.bf16 %v3009_v44, %v3009_v44  ;;  %v3840_v30 = vunpack.c.l.bf16 %v3072_v18  ;;  %v2979_v61 = vmul.f32 0.796875, %v2915_v39  ;;  %v9522_v44 = vld [vmem:[#allocation116_spill] sm:$0xff]  ;;  %v9523_v36 = vld [vmem:[#allocation131_spill] sm:$0xff] }
 0x414   : > { %v4003_v8 = vunpack.c.l.bf16 %v9517_v56  ;;  %v2788_v29 = vadd.f32 1.0, %v9518_v4  ;;  %v4129_v19 = vadd.f32 %v4065_v20, %v4001_v59  ;;  %v4192_v2 = vpack.c.bf16 %v4128_v50, %v4128_v50 }
 0x415   : > { %v3042_v11 = vpack.c.bf16 %v2978_v48, %v2978_v48  ;;  %v2818_v53 = vadd.f32 1.0, %v9519_v25  ;;  %v3841_v42 = vunpack.c.l.bf16 %v3073_v7  ;;  %v3904_v22 = vmul.f32 %v3840_v30, %v9520_v31  ;;  %v9524_v48 = vld [vmem:[#allocation86_spill] sm:$0xff]  ;;  %v9525_v30 = vld [vmem:[#allocation132_spill] sm:$0xff] }
 0x416   : > { %v3043_v51 = vpack.c.bf16 %v2979_v61, %v2979_v61  ;;  %v2819_v26 = vadd.f32 1.0, %v9521_v60  ;;  %v4193_v40 = vpack.c.bf16 %v4129_v19, %v4129_v19  ;;  %v4262_v63 = vunpack.c.l.bf16 %v4192_v2 }
 0x417   : > { %v3810_v45 = vunpack.c.l.bf16 %v3042_v11  ;;  %v2882_v17 = vpack.c.bf16 %v2818_v53, %v2818_v53  ;;  %v3905_v18 = vmul.f32 %v3841_v42, %v9522_v44  ;;  %v3968_v39 = vpack.c.bf16 %v3904_v22, %v3904_v22  ;;  %4584 = vmatmul.bf16.gmra.mxu3 %v4400_v9 }
 0x418   : > { %v3811_v32 = vunpack.c.l.bf16 %v3043_v51  ;;  %v2883_v27 = vpack.c.bf16 %v2819_v26, %v2819_v26  ;;  %v4263_v59 = vunpack.c.l.bf16 %v4193_v40  ;;  %v2789_v38 = vadd.f32 1.0, %v9524_v48  ;;  %v8411_v51 = vpop.f32.mrf.mxu1 }
 0x419   : > { %v3874_v20 = vmul.f32 %v3810_v45, %v9523_v36  ;;  %v2946_v50 = vunpack.c.l.bf16 %v2882_v17  ;;  %v3969_v56 = vpack.c.bf16 %v3905_v18, %v3905_v18  ;;  %v4096_v7 = vunpack.c.l.bf16 %v3968_v39  ;;  %v9526_v45 = vld [vmem:[#allocation105_spill] sm:$0xff] }
 0x41a   : > { %v3875_v61 = vmul.f32 %v3811_v32, %v9525_v30  ;;  %v2947_v4 = vunpack.c.l.bf16 %v2883_v27  ;;  %v4326_v19 = vmul.f32 %v4262_v63, %v8209_v34  ;;  %v4327_v2 = vmul.f32 %v4263_v59, %v8209_v34 }
 0x41b   : > { %v3938_v11 = vpack.c.bf16 %v3874_v20, %v3874_v20  ;;  %v3010_v25 = vmul.f32 0.796875, %v2946_v50  ;;  %v4097_v53 = vunpack.c.l.bf16 %v3969_v56  ;;  %v4160_v42 = vadd.f32 %v4096_v7, %v8383_v3  ;;  %v9528_v7 = vld [vmem:[#allocation113_spill] sm:$0xff] }
 0x41c   : > { %v3939_v31 = vpack.c.bf16 %v3875_v61, %v3875_v61  ;;  %v3011_v22 = vmul.f32 0.796875, %v2947_v4  ;;  %v4385_v60 = vpack.c.bf16 %v4327_v2, %v4326_v19  ;;  %v9527_v17 = vpack.c.bf16 %v9526_v45, %v9526_v45 }
 0x41d   : > { %v4066_v26 = vunpack.c.l.bf16 %v3938_v11  ;;  %v3074_v40 = vpack.c.bf16 %v3010_v25, %v3010_v25  ;;  %v4161_v63 = vadd.f32 %v4097_v53, %v4033_v54  ;;  %v4224_v18 = vpack.c.bf16 %v4160_v42, %v4160_v42  ;;  %v9529_v11 = vld [vmem:[#allocation114_spill] sm:$0xff] }
 0x41e   : > { %v4034_v44 = vunpack.c.l.bf16 %v9527_v17  ;;  %v4067_v39 = vunpack.c.l.bf16 %v3939_v31  ;;  %v3075_v32 = vpack.c.bf16 %v3011_v22, %v3011_v22  ;;  %v2852_v59 = vpack.c.bf16 %v2788_v29, %v2788_v29  ;;  %v9530_v22 = vld [vmem:[#allocation107_spill] sm:$0xff] }
 0x41f   : > { %v4130_v27 = vadd.f32 %v4066_v26, %v4002_v12  ;;  %v3842_v9 = vunpack.c.l.bf16 %v3074_v40  ;;  %v2853_v36 = vpack.c.bf16 %v2789_v38, %v2789_v38  ;;  %v4225_v3 = vpack.c.bf16 %v4161_v63, %v4161_v63  ;;  %4509 = vmatmul.bf16.gmra.mxu2 %v4385_v60 }
 0x420   : > { %v4294_v20 = vunpack.c.l.bf16 %v4224_v18  ;;  %v4131_v50 = vadd.f32 %v4067_v39, %v4003_v8  ;;  %v3843_v48 = vunpack.c.l.bf16 %v3075_v32  ;;  %v2916_v61 = vunpack.c.l.bf16 %v2852_v59  ;;  %v2539_v45 = vpop.f32.mrf.mxu1 }
 0x421   : > { %v4194_v56 = vpack.c.bf16 %v4130_v27, %v4130_v27  ;;  %v3906_v30 = vmul.f32 %v3842_v9, %v9528_v7  ;;  %v2917_v4 = vunpack.c.l.bf16 %v2853_v36  ;;  %v4295_v19 = vunpack.c.l.bf16 %v4225_v3  ;;  %v8428_v27 = vpop.f32.mrf.mxu2  ;;  %v8430_v9 = vpop.f32.mrf.mxu3 }
 0x422   : > { %v4358_v2 = vmul.f32 %v4294_v20, %v8209_v34  ;;  %v4195_v54 = vpack.c.bf16 %v4131_v50, %v4131_v50  ;;  %v3907_v25 = vmul.f32 %v3843_v48, %v9529_v11  ;;  %v2980_v42 = vmul.f32 0.796875, %v2916_v61 }
 0x423   : > { %v4264_v53 = vunpack.c.l.bf16 %v4194_v56  ;;  %v3970_v12 = vpack.c.bf16 %v3906_v30, %v3906_v30  ;;  %v2981_v29 = vmul.f32 0.796875, %v2917_v4  ;;  %v4359_v38 = vmul.f32 %v4295_v19, %v8209_v34  ;;  %v9535_v4 = vld [vmem:[#allocation59_spill] sm:$0xff] }
 0x424   : > { %v4265_v31 = vunpack.c.l.bf16 %v4195_v54  ;;  %v3971_v8 = vpack.c.bf16 %v3907_v25, %v3907_v25  ;;  %v9531_v26 = vpack.c.bf16 %v9530_v22, %v9530_v22  ;;  %v9532_v17 = vpack.c.bf16 %v7907_v43, %v7907_v43  ;;  %v9533_v43 = vld [vmem:[#allocation117_spill] sm:$0xff]  ;;  %v9536_v54 = vld [vmem:[#allocation60_spill] sm:$0xff]  ;;  %v9537_v25 = vld [vmem:[#allocation127_spill] sm:$0xff] }
 0x425   : > { %v4098_v18 = vunpack.c.l.bf16 %v3970_v12  ;;  %v3044_v39 = vpack.c.bf16 %v2980_v42, %v2980_v42  ;;  %v3045_v32 = vpack.c.bf16 %v2981_v29, %v2981_v29  ;;  %v4401_v59 = vpack.c.bf16 %v4359_v38, %v4358_v2  ;;  %v9538_v12 = vld [vmem:[#allocation128_spill] sm:$0xff] }
 0x426   : > { %v4035_v40 = vunpack.c.l.bf16 %v9531_v26  ;;  %v8426_v63 = vunpack.c.l.bf16 %v9532_v17  ;;  %v4328_v36 = vmul.f32 %v4264_v53, %v8209_v34  ;;  %v4329_v3 = vmul.f32 %v4265_v31, %v8209_v34  ;;  %v9541_v26 = vld [vmem:[#allocation87_spill] sm:$0xff] }
 0x427   : > { %v4099_v20 = vunpack.c.l.bf16 %v3971_v8  ;;  %v4162_v50 = vadd.f32 %v4098_v18, %v4034_v44  ;;  %v3812_v48 = vunpack.c.l.bf16 %v3044_v39  ;;  %v3813_v56 = vunpack.c.l.bf16 %v3045_v32  ;;  %v9539_v44 = vld [vmem:[#allocation121_spill] sm:$0xff]  ;;  %v9542_v39 = vld [vmem:[#allocation55_spill] sm:$0xff]  ;;  %4589 = vmatmul.bf16.gmra.mxu3 %v4401_v59 }
 0x428   : > { %v9534_v7 = vpack.c.bf16 %v9533_v43, %v9533_v43  ;;  %v4386_v30 = vpack.c.bf16 %v4329_v3, %v4328_v36  ;;  %v3972_v19 = vpack.c.bf16 %v9535_v4, %v9535_v4  ;;  %v3973_v2 = vpack.c.bf16 %v9536_v54, %v9536_v54  ;;  %v9543_v3 = vld [vmem:[#allocation102_spill] sm:$0xff] }
 0x429   : > { %v4163_v61 = vadd.f32 %v4099_v20, %v4035_v40  ;;  %v4226_v11 = vpack.c.bf16 %v4162_v50, %v4162_v50  ;;  %v3876_v53 = vmul.f32 %v3812_v48, %v9537_v25  ;;  %v3877_v42 = vmul.f32 %v3813_v56, %v9538_v12  ;;  %v9544_v50 = vld [vmem:[#allocation103_spill] sm:$0xff]  ;;  %v2552_v4 = vpop.f32.mrf.mxu2 }
 0x42a   : > { %v4004_v60 = vunpack.c.l.bf16 %v9534_v7  ;;  %v9540_v29 = vpack.c.bf16 %v9539_v44, %v9539_v44  ;;  %v4100_v8 = vunpack.c.l.bf16 %v3972_v19  ;;  %v4101_v22 = vunpack.c.l.bf16 %v3973_v2  ;;  %v2565_v19 = vpop.f32.mrf.mxu3 }
 0x42b   : > { %v4227_v31 = vpack.c.bf16 %v4163_v61, %v4163_v61  ;;  %v2790_v40 = vadd.f32 1.0, %v9541_v26  ;;  %v4296_v45 = vunpack.c.l.bf16 %v4226_v11  ;;  %v3940_v17 = vpack.c.bf16 %v3876_v53, %v3876_v53  ;;  %v9547_v19 = vld [vmem:[#allocation94_spill] sm:$0xff] }
 0x42c   : > { %v4005_v38 = vunpack.c.l.bf16 %v9540_v29  ;;  %v3941_v18 = vpack.c.bf16 %v3877_v42, %v3877_v42  ;;  %v2791_v32 = vadd.f32 1.0, %v9542_v39  ;;  %v4164_v20 = vadd.f32 %v4100_v8, %v9543_v3 }
 0x42d   : > { %v4297_v36 = vunpack.c.l.bf16 %v4227_v31  ;;  %v4165_v48 = vadd.f32 %v4101_v22, %v9544_v50  ;;  %v2854_v56 = vpack.c.bf16 %v2790_v40, %v2790_v40  ;;  %v8451_v43 = vmul.f32 %v4296_v45, %v8209_v34 }
 0x42e   : > { %v4068_v7 = vunpack.c.l.bf16 %v3940_v17  ;;  %v4069_v61 = vunpack.c.l.bf16 %v3941_v18  ;;  %v2855_v54 = vpack.c.bf16 %v2791_v32, %v2791_v32  ;;  %v4228_v11 = vpack.c.bf16 %v4164_v20, %v4164_v20  ;;  %v9546_v20 = vld [vmem:[#allocation93_spill] sm:$0xff] }
 0x42f   : > { %v4361_v2 = vmul.f32 %v4297_v36, %v8209_v34  ;;  %v4229_v25 = vpack.c.bf16 %v4165_v48, %v4165_v48  ;;  %v2918_v53 = vunpack.c.l.bf16 %v2854_v56  ;;  %v3718_v59 = vpack.c.bf16 %v8213_v41, %v8213_v41  ;;  %4514 = vmatmul.bf16.gmra.mxu2 %v4386_v30 }
 0x430   : > { %v4132_v12 = vadd.f32 %v4068_v7, %v4004_v60  ;;  %v4133_v42 = vadd.f32 %v4069_v61, %v4005_v38  ;;  %v2919_v44 = vunpack.c.l.bf16 %v2855_v54  ;;  %v4298_v31 = vunpack.c.l.bf16 %v4228_v11  ;;  %v9545_v60 = vld [vmem:[#allocation88_spill] sm:$0xff] }
 0x431   : > { %v4402_v29 = vpack.c.bf16 %v4361_v2, %v8451_v43  ;;  %v4299_v8 = vunpack.c.l.bf16 %v4229_v25  ;;  %v2982_v22 = vmul.f32 0.796875, %v2918_v53  ;;  %v3719_v26 = vpack.c.bf16 %v8215_v1, %v8215_v1  ;;  %v9548_v53 = vld [vmem:[#allocation101_spill] sm:$0xff] }
 0x432   : > { %v4196_v40 = vpack.c.bf16 %v4132_v12, %v4132_v12  ;;  %v4197_v45 = vpack.c.bf16 %v4133_v42, %v4133_v42  ;;  %v2983_v17 = vmul.f32 0.796875, %v2919_v44  ;;  %v8460_v18 = vmul.f32 %v4298_v31, %v8209_v34 }
 0x433   : > { %v8463_v39 = vmul.f32 %v4299_v8, %v8209_v34  ;;  %v3046_v41 = vpack.c.bf16 %v2982_v22, %v2982_v22  ;;  %v2792_v38 = vadd.f32 1.0, %v9545_v60  ;;  %v2793_v50 = vadd.f32 1.0, %v9546_v20 }
 0x434   : > { %v4266_v32 = vunpack.c.l.bf16 %v4196_v40  ;;  %v4267_v36 = vunpack.c.l.bf16 %v4197_v45  ;;  %v3047_v3 = vpack.c.bf16 %v2983_v17, %v2983_v17  ;;  %v3782_v48 = vunpack.c.l.bf16 %v3718_v59 }
 0x435   : > { %v4403_v1 = vpack.c.bf16 %v8463_v39, %v8460_v18  ;;  %v3814_v56 = vunpack.c.l.bf16 %v3046_v41  ;;  %v2856_v43 = vpack.c.bf16 %v2792_v38, %v2792_v38  ;;  %v2822_v54 = vadd.f32 1.0, %v9547_v19 }
 0x436   : > { %v8470_v7 = vmul.f32 %v4266_v32, %v8209_v34  ;;  %v8473_v61 = vmul.f32 %v4267_v36, %v8209_v34  ;;  %v3815_v4 = vunpack.c.l.bf16 %v3047_v3  ;;  %v3783_v2 = vunpack.c.l.bf16 %v3719_v26 }
 0x437   : > { %v2551_v11 = vadd.f32 %v8428_v27, %v8411_v51  ;;  %v3878_v25 = vmul.f32 %v3814_v56, %v8365_v14  ;;  %v2823_v59 = vadd.f32 1.0, %v9548_v53  ;;  %v2886_v42 = vpack.c.bf16 %v2822_v54, %v2822_v54  ;;  %4594 = vmatmul.bf16.gmra.mxu3 %v4402_v29 }
 0x438   : > { %v4387_v30 = vpack.c.bf16 %v8473_v61, %v8470_v7  ;;  %v3879_v12 = vmul.f32 %v3815_v4, %v8426_v63  ;;  %v2857_v44 = vpack.c.bf16 %v2793_v50, %v2793_v50  ;;  %v9549_v8 = vpack.c.bf16 %v7999_v33, %v7999_v33 }
 0x439   : > { %v3942_v31 = vpack.c.bf16 %v3878_v25, %v3878_v25  ;;  %v2887_v26 = vpack.c.bf16 %v2823_v59, %v2823_v59  ;;  %v3142_v40 = vmul.f32 0.5, %v8187_v6  ;;  %v2950_v27 = vunpack.c.l.bf16 %v2886_v42  ;;  %v9551_v25 = vld [vmem:[#allocation100_spill] sm:$0xff] }
 0x43a   : > { %v4006_v22 = vunpack.c.l.bf16 %v9549_v8  ;;  %v3943_v51 = vpack.c.bf16 %v3879_v12, %v3879_v12  ;;  %v2920_v14 = vunpack.c.l.bf16 %v2856_v43  ;;  %v2921_v45 = vunpack.c.l.bf16 %v2857_v44 }
 0x43b   : > { %v9550_v17 = vpack.c.bf16 %v8002_v10, %v8002_v10  ;;  %v4070_v60 = vunpack.c.l.bf16 %v3942_v31  ;;  %v2951_v63 = vunpack.c.l.bf16 %v2887_v26  ;;  %v3143_v38 = vmul.f32 0.5, %v8193_v21 }
 0x43c   : > { %v4071_v32 = vunpack.c.l.bf16 %v3943_v51  ;;  %v3014_v36 = vmul.f32 0.796875, %v2950_v27  ;;  %v2984_v3 = vmul.f32 0.796875, %v2920_v14  ;;  %v2985_v33 = vmul.f32 0.796875, %v2921_v45  ;;  %v9552_v27 = vld [vmem:[#allocation108_spill] sm:$0xff] }
 0x43d   : > { %v4007_v41 = vunpack.c.l.bf16 %v9550_v17  ;;  %v2564_v20 = vadd.f32 %v8430_v9, %v2551_v11  ;;  %v4134_v6 = vadd.f32 %v4070_v60, %v4006_v22  ;;  %v3015_v50 = vmul.f32 0.796875, %v2951_v63 }
 0x43e   : > { %v3206_v56 = vpack.c.bf16 %v3142_v40, %v3142_v40  ;;  %v3078_v7 = vpack.c.bf16 %v3014_v36, %v3014_v36  ;;  %v3048_v61 = vpack.c.bf16 %v2984_v3, %v2984_v3  ;;  %v3049_v4 = vpack.c.bf16 %v2985_v33, %v2985_v33 }
 0x43f   : > { %v4135_v43 = vadd.f32 %v4071_v32, %v4007_v41  ;;  %v4198_v10 = vpack.c.bf16 %v4134_v6, %v4134_v6  ;;  %v3079_v19 = vpack.c.bf16 %v3015_v50, %v3015_v50  ;;  %v3207_v54 = vpack.c.bf16 %v3143_v38, %v3143_v38  ;;  %4519 = vmatmul.bf16.gmra.mxu2 %v4387_v30 }
 0x440   : > { %v2794_v53 = vadd.f32 1.0, %v9551_v25  ;;  %v3846_v59 = vunpack.c.l.bf16 %v3078_v7  ;;  %v3816_v12 = vunpack.c.l.bf16 %v3048_v61  ;;  %v3817_v42 = vunpack.c.l.bf16 %v3049_v4  ;;  %v2511_v7 = vld [vmem:[#allocation10] sm:$0xff]  ;;  %v2576_v61 = vpop.f32.mrf.mxu1  ;;  %v9555_v25 = vld [vmem:[#allocation112_spill] sm:$0xff] }
 0x441   : > { %v4199_v21 = vpack.c.bf16 %v4135_v43, %v4135_v43  ;;  %v4268_v44 = vunpack.c.l.bf16 %v4198_v10  ;;  %v3847_v29 = vunpack.c.l.bf16 %v3079_v19  ;;  %v4038_v31 = vunpack.c.l.bf16 %v3206_v56 }
 0x442   : > { %v2858_v9 = vpack.c.bf16 %v2794_v53, %v2794_v53  ;;  %v3910_v8 = vmul.f32 %v3846_v59, %v3782_v48  ;;  %v3880_v22 = vmul.f32 %v3816_v12, %v8045_v47  ;;  %v3881_v26 = vmul.f32 %v3817_v42, %v8047_v16 }
 0x443   : > { %v4269_v11 = vunpack.c.l.bf16 %v4199_v21  ;;  %v8496_v40 = vmul.f32 %v4268_v44, %v8209_v34  ;;  %v3911_v51 = vmul.f32 %v3847_v29, %v3783_v2  ;;  %v2795_v14 = vadd.f32 1.0, %v9552_v27  ;;  %v9556_v21 = vld [vmem:[#allocation124_spill] sm:$0xff] }
 0x444   : > { %v2922_v45 = vunpack.c.l.bf16 %v2858_v9  ;;  %v3974_v41 = vpack.c.bf16 %v3910_v8, %v3910_v8  ;;  %v3944_v60 = vpack.c.bf16 %v3880_v22, %v3880_v22  ;;  %v3945_v63 = vpack.c.bf16 %v3881_v26, %v3881_v26 }
 0x445   : > { %v8500_v17 = vmul.f32 %v4269_v11, %v8209_v34  ;;  %v3975_v38 = vpack.c.bf16 %v3911_v51, %v3911_v51  ;;  %v4039_v32 = vunpack.c.l.bf16 %v3207_v54  ;;  %v9553_v47 = vpack.c.bf16 %v7987_v13, %v7987_v13 }
 0x446   : > { %v9554_v16 = vpack.c.bf16 %v7996_v24, %v7996_v24  ;;  %v4102_v3 = vunpack.c.l.bf16 %v3974_v41  ;;  %v4072_v33 = vunpack.c.l.bf16 %v3944_v60  ;;  %v4073_v6 = vunpack.c.l.bf16 %v3945_v63 }
 0x447   : > { %v4008_v48 = vunpack.c.l.bf16 %v9553_v47  ;;  %v4388_v2 = vpack.c.bf16 %v8500_v17, %v8496_v40  ;;  %v3691_v50 = vpack.c.bf16 %v7825_v23, %v7825_v23  ;;  %v3720_v56 = vpack.c.bf16 %v8189_v35, %v8189_v35  ;;  %4599 = vmatmul.bf16.gmra.mxu3 %v4403_v1 }
 0x448   : > { %v4009_v36 = vunpack.c.l.bf16 %v9554_v16  ;;  %v4103_v43 = vunpack.c.l.bf16 %v3975_v38  ;;  %v2859_v13 = vpack.c.bf16 %v2795_v14, %v2795_v14  ;;  %v4166_v4 = vadd.f32 %v4102_v3, %v4038_v31 }
 0x449   : > { %v4136_v24 = vadd.f32 %v4072_v33, %v4008_v48  ;;  %v2986_v30 = vmul.f32 0.796875, %v2922_v45  ;;  %v2577_v19 = vadd.f32 %v2576_v61, %v2564_v20  ;;  %v2824_v53 = vadd.f32 1.0, %v9555_v25 }
 0x44a   : > { %v4137_v10 = vadd.f32 %v4073_v6, %v4009_v36  ;;  %v4167_v54 = vadd.f32 %v4103_v43, %v4039_v32  ;;  %v2825_v59 = vadd.f32 1.0, %v9556_v21  ;;  %v3721_v23 = vpack.c.bf16 %v8191_v58, %v8191_v58  ;;  %v2578_v36 = vpop.f32.mrf.mxu1 }
 0x44b   : > { %v4230_v12 = vpack.c.bf16 %v4166_v4, %v4166_v4  ;;  %v4200_v42 = vpack.c.bf16 %v4136_v24, %v4136_v24  ;;  %v2580_v44 = vadd.f32 %v2577_v19, %v2511_v7  ;;  %v2888_v9 = vpack.c.bf16 %v2824_v53, %v2824_v53  ;;  %v4485_v7 = vpop.f32.mrf.mxu2 }
 0x44c   : > { %v4201_v35 = vpack.c.bf16 %v4137_v10, %v4137_v10  ;;  %v4231_v29 = vpack.c.bf16 %v4167_v54, %v4167_v54  ;;  %v2889_v11 = vpack.c.bf16 %v2825_v59, %v2825_v59  ;;  %v2923_v26 = vunpack.c.l.bf16 %v2859_v13 }
 0x44d   : > { %v4300_v31 = vunpack.c.l.bf16 %v4230_v12  ;;  %v4270_v8 = vunpack.c.l.bf16 %v4200_v42  ;;  %2581 = vst [vmem:[#allocation10] sm:$0xff] %v2580_v44  ;;  %v2952_v51 = vunpack.c.l.bf16 %v2888_v9  ;;  %v3050_v58 = vpack.c.bf16 %v2986_v30, %v2986_v30 }
 0x44e   : > { %v4271_v22 = vunpack.c.l.bf16 %v4201_v35  ;;  %v4301_v20 = vunpack.c.l.bf16 %v4231_v29  ;;  %v2953_v27 = vunpack.c.l.bf16 %v2889_v11  ;;  %v3144_v60 = vmul.f32 0.5, %v8168_v52  ;;  %5279 = dma.vmem_to_hbm [thread:$0]  (%p5833_p2), %s4787_s13, 128, %s4789_s0, [#allocation4]  }
 0x44f   : > { %v8522_v14 = vmul.f32 %v4300_v31, %v8209_v34  ;;  %v8525_v45 = vmul.f32 %v4270_v8, %v8209_v34  ;;  %v3016_v18 = vmul.f32 0.796875, %v2952_v51  ;;  %v3145_v1 = vmul.f32 0.5, %v8170_v49  ;;  %4524 = vmatmul.bf16.gmra.mxu2 %v4388_v2 }
 0x450   : > { %v8528_v41 = vmul.f32 %v4271_v22, %v8209_v34  ;;  %v4365_v63 = vmul.f32 %v4301_v20, %v8209_v34  ;;  %v3017_v39 = vmul.f32 0.796875, %v2953_v27  ;;  %v9557_v38 = vpack.c.bf16 %v7821_v62, %v7821_v62 }
 0x451   : > { %v3784_v47 = vunpack.c.l.bf16 %v3720_v56  ;;  %v2987_v16 = vmul.f32 0.796875, %v2923_v26  ;;  %v3785_v3 = vunpack.c.l.bf16 %v3721_v23  ;;  %v3080_v52 = vpack.c.bf16 %v3016_v18, %v3016_v18 }
 0x452   : > { %v3754_v32 = vunpack.c.l.bf16 %v9557_v38  ;;  %v4389_v48 = vpack.c.bf16 %v8528_v41, %v8525_v45  ;;  %v4404_v33 = vpack.c.bf16 %v4365_v63, %v8522_v14  ;;  %v3081_v6 = vpack.c.bf16 %v3017_v39, %v3017_v39  ;;  %v9559_v14 = vld [vmem:[#allocation138_spill] sm:$0xff]  ;;  %v9569_v45 = vld [vmem:[#allocation151_spill] sm:$0xff] }
 0x453   : > { %v3115_v43 = vmul.f32 0.5, %v7783_v28  ;;  %v3755_v13 = vunpack.c.l.bf16 %v3691_v50  ;;  %v3051_v49 = vpack.c.bf16 %v2987_v16, %v2987_v16  ;;  %v3818_v61 = vunpack.c.l.bf16 %v3050_v58  ;;  %v4487_v40 = vpop.f32.mrf.mxu2 }
 0x454   : > { %v3208_v4 = vpack.c.bf16 %v3144_v60, %v3144_v60  ;;  %v3209_v62 = vpack.c.bf16 %v3145_v1, %v3145_v1  ;;  %v3848_v24 = vunpack.c.l.bf16 %v3080_v52  ;;  %v3849_v56 = vunpack.c.l.bf16 %v3081_v6  ;;  %v9560_v1 = vld [vmem:[#allocation95_spill] sm:$0xff] }
 0x455   : > { %v9558_v10 = vpack.c.bf16 %v7888_v5, %v7888_v5  ;;  %v3178_v19 = vpack.c.bf16 %v8018_v15, %v8018_v15  ;;  %v3819_v54 = vunpack.c.l.bf16 %v3051_v49  ;;  %v3882_v25 = vmul.f32 %v3818_v61, %v3754_v32  ;;  %v4565_v15 = vpop.f32.mrf.mxu3 }
 0x456   : > { %v2706_v28 = vpack.c.bf16 %v7971_v0, %v7971_v0  ;;  %v3117_v50 = vmul.f32 0.5, %v7777_v57  ;;  %v3912_v53 = vmul.f32 %v3848_v24, %v3784_v47  ;;  %v3913_v21 = vmul.f32 %v3849_v56, %v3785_v3 }
 0x457   : > { %v2769_v30 = vunpack.c.l.bf16 %v9558_v10  ;;  %v3180_v59 = vpack.c.bf16 %v8015_v46, %v8015_v46  ;;  %v3179_v23 = vpack.c.bf16 %v3115_v43, %v3115_v43  ;;  %v3883_v5 = vmul.f32 %v3819_v54, %v3755_v13  ;;  %4604 = vmatmul.bf16.gmra.mxu3 %v4404_v33  ;;  %v9561_v13 = vld [vmem:[#allocation150_spill] sm:$0xff]  ;;  %v9563_v54 = vld [vmem:[#allocation148_spill] sm:$0xff] }
 0x458   : > { %v3946_v12 = vpack.c.bf16 %v3882_v25, %v3882_v25  ;;  %v3976_v42 = vpack.c.bf16 %v3912_v53, %v3912_v53  ;;  %v3977_v35 = vpack.c.bf16 %v3913_v21, %v3913_v21  ;;  %v4040_v44 = vunpack.c.l.bf16 %v3208_v4  ;;  %v9564_v21 = vld [vmem:[#allocation154_spill] sm:$0xff] }
 0x459   : > { %v4041_v29 = vunpack.c.l.bf16 %v3209_v62  ;;  %v8553_v0 = vadd.f32 1.0, %v2769_v30  ;;  %v3947_v57 = vpack.c.bf16 %v3883_v5, %v3883_v5  ;;  %v4010_v9 = vunpack.c.l.bf16 %v3178_v19  ;;  %v9562_v62 = vld [vmem:[#allocation119_spill] sm:$0xff] }
 0x45a   : > { %v4074_v11 = vunpack.c.l.bf16 %v3946_v12  ;;  %v2770_v31 = vunpack.c.l.bf16 %v2706_v28  ;;  %v3181_v8 = vpack.c.bf16 %v3117_v50, %v3117_v50  ;;  %v4104_v46 = vunpack.c.l.bf16 %v3976_v42 }
 0x45b   : > { %v4105_v22 = vunpack.c.l.bf16 %v3977_v35  ;;  %v4012_v26 = vunpack.c.l.bf16 %v3180_v59  ;;  %v4011_v17 = vunpack.c.l.bf16 %v3179_v23  ;;  %v4075_v2 = vunpack.c.l.bf16 %v3947_v57 }
 0x45c   : > { %v4138_v20 = vadd.f32 %v4074_v11, %v4010_v9  ;;  %v5062_v51 = vpack.c.bf16 %v4487_v40, %v4485_v7  ;;  %v4168_v27 = vadd.f32 %v4104_v46, %v4040_v44  ;;  %v2826_v60 = vadd.f32 1.0, %v9559_v14 }
 0x45d   : > { %v4169_v58 = vadd.f32 %v4105_v22, %v4041_v29  ;;  %v3948_v63 = vpack.c.bf16 %v7807_v55, %v7807_v55  ;;  %v4139_v18 = vadd.f32 %v4075_v2, %v4011_v17  ;;  %v2827_v38 = vadd.f32 1.0, %v9560_v1  ;;  %v4567_v7 = vpop.f32.mrf.mxu3  ;;  %v9565_v2 = vld [vmem:[#allocation156_spill] sm:$0xff] }
 0x45e   : > { %v4202_v39 = vpack.c.bf16 %v4138_v20, %v4138_v20  ;;  %v4013_v32 = vunpack.c.l.bf16 %v3181_v8  ;;  %5063 = vst [vmem:[%s5934_s22] sm:$0xff] %v5062_v51   ;;  %v4232_v47 = vpack.c.bf16 %v4168_v27, %v4168_v27  ;;  %v2890_v36 = vpack.c.bf16 %v2826_v60, %v2826_v60  ;;  %v9566_v51 = vld [vmem:[#allocation175_spill] sm:$0xff] }
 0x45f   : > { %v4233_v16 = vpack.c.bf16 %v4169_v58, %v4169_v58  ;;  %v3722_v3 = vpack.c.bf16 %v8172_v37, %v8172_v37  ;;  %v4203_v52 = vpack.c.bf16 %v4139_v18, %v4139_v18  ;;  %v2891_v43 = vpack.c.bf16 %v2827_v38, %v2827_v38  ;;  %4529 = vmatmul.bf16.gmra.mxu2 %v4389_v48  ;;  %v9567_v58 = vld [vmem:[#allocation176_spill] sm:$0xff]  ;;  %v9570_v48 = vld [vmem:[#allocation147_spill] sm:$0xff] }
 0x460   : > { %v4272_v6 = vunpack.c.l.bf16 %v4202_v39  ;;  %v3723_v55 = vpack.c.bf16 %v9561_v13, %v9561_v13  ;;  %v4302_v49 = vunpack.c.l.bf16 %v4232_v47  ;;  %v2954_v4 = vunpack.c.l.bf16 %v2890_v36 }
 0x461   : > { %v4303_v61 = vunpack.c.l.bf16 %v4233_v16  ;;  %v3949_v33 = vpack.c.bf16 %v9562_v62, %v9562_v62  ;;  %v5142_v24 = vpack.c.bf16 %v4567_v7, %v4565_v15  ;;  %v4273_v56 = vunpack.c.l.bf16 %v4203_v52 }
 0x462   : > { %v2955_v10 = vunpack.c.l.bf16 %v2891_v43  ;;  %v4366_v30 = vmul.f32 %v4302_v49, %v8209_v34  ;;  %v3018_v19 = vmul.f32 0.796875, %v2954_v4  ;;  %v3146_v25 = vmul.f32 0.5, %v9563_v54  ;;  %v4490_v38 = vpop.f32.mrf.mxu2  ;;  %v9573_v49 = vld [vmem:[#allocation149_spill] sm:$0xff] }
 0x463   : > { %v4367_v37 = vmul.f32 %v4303_v61, %v8209_v34  ;;  %5234 = vst [vmem:[%s5934_s22 + $0x80] sm:$0xff] %v5142_v24   ;;  %v8571_v28 = vmul.f32 %v4272_v6, %v8209_v34  ;;  %v8574_v50 = vmul.f32 %v4273_v56, %v8209_v34  ;;  %v3147_v59 = vmul.f32 0.5, %v9564_v21  ;;  %v9571_v6 = vld [vmem:[#allocation109_spill] sm:$0xff] }
 0x464   : > { %v3019_v53 = vmul.f32 0.796875, %v2955_v10  ;;  %v3786_v23 = vunpack.c.l.bf16 %v3722_v3  ;;  %v3787_v5 = vunpack.c.l.bf16 %v3723_v55  ;;  %v3082_v15 = vpack.c.bf16 %v3018_v19, %v3018_v19  ;;  %v9572_v55 = vld [vmem:[#allocation144_spill] sm:$0xff] }
 0x465   : > { %v4405_v12 = vpack.c.bf16 %v4367_v37, %v4366_v30  ;;  %v4390_v42 = vpack.c.bf16 %v8574_v50, %v8571_v28  ;;  %v4076_v44 = vunpack.c.l.bf16 %v3948_v63  ;;  %v4077_v29 = vunpack.c.l.bf16 %v3949_v33 }
 0x466   : > { %v3083_v35 = vpack.c.bf16 %v3019_v53, %v3019_v53  ;;  %v2897_v57 = vpack.c.bf16 %v8553_v0, %v8553_v0  ;;  %v8581_v9 = vadd.f32 1.0, %v2770_v31  ;;  %v3210_v11 = vpack.c.bf16 %v3146_v25, %v3146_v25  ;;  %v9568_v31 = vld [vmem:[#allocation141_spill] sm:$0xff] }
 0x467   : > { %v3850_v8 = vunpack.c.l.bf16 %v3082_v15  ;;  %v3211_v46 = vpack.c.bf16 %v3147_v59, %v3147_v59  ;;  %v4140_v40 = vadd.f32 %v4076_v44, %v4012_v26  ;;  %v4141_v17 = vadd.f32 %v4077_v29, %v4013_v32  ;;  %4609 = vmatmul.bf16.gmra.mxu3 %v4405_v12  ;;  %v9575_v29 = vld [vmem:[#allocation58_spill] sm:$0xff] }
 0x468   : > { %v3851_v22 = vunpack.c.l.bf16 %v3083_v35  ;;  %v8587_v20 = vmul.f32 0.13378906, %v9565_v2  ;;  %v3118_v27 = vmul.f32 0.5, %v9566_v51  ;;  %v3119_v14 = vmul.f32 0.5, %v9567_v58  ;;  %v9574_v35 = vld [vmem:[#allocation104_spill] sm:$0xff] }
 0x469   : > { %v3914_v60 = vmul.f32 %v3850_v8, %v3786_v23  ;;  %v3724_v63 = vpack.c.bf16 %v9568_v31, %v9568_v31  ;;  %v4204_v39 = vpack.c.bf16 %v4140_v40, %v4140_v40  ;;  %v4205_v1 = vpack.c.bf16 %v4141_v17, %v4141_v17 }
 0x46a   : > { %v3915_v18 = vmul.f32 %v3851_v22, %v3787_v5  ;;  %v3148_v41 = vmul.f32 0.5, %v9569_v45  ;;  %v3725_v26 = vpack.c.bf16 %v9570_v48, %v9570_v48  ;;  %v4042_v47 = vunpack.c.l.bf16 %v3210_v11  ;;  %v4570_v11 = vpop.f32.mrf.mxu3  ;;  %v4492_v22 = vpop.f32.mrf.mxu2 }
 0x46b   : > { %v3978_v32 = vpack.c.bf16 %v3914_v60, %v3914_v60  ;;  %v4043_v36 = vunpack.c.l.bf16 %v3211_v46  ;;  %v4274_v3 = vunpack.c.l.bf16 %v4204_v39  ;;  %v4275_v52 = vunpack.c.l.bf16 %v4205_v1 }
 0x46c   : > { %v3979_v16 = vpack.c.bf16 %v3915_v18, %v3915_v18  ;;  %v3149_v43 = vmul.f32 0.5, %v9571_v6  ;;  %v3020_v7 = vmul.f32 0.796875, %v9572_v55  ;;  %v3021_v61 = vmul.f32 0.796875, %v9573_v49  ;;  %v9577_v6 = vld [vmem:[#allocation173_spill] sm:$0xff] }
 0x46d   : > { %v4106_v13 = vunpack.c.l.bf16 %v3978_v32  ;;  %v3788_v4 = vunpack.c.l.bf16 %v3724_v63  ;;  %v8600_v33 = vmul.f32 %v4274_v3, %v8209_v34  ;;  %v8603_v24 = vmul.f32 %v4275_v52, %v8209_v34  ;;  %v9576_v3 = vld [vmem:[#allocation110_spill] sm:$0xff]  ;;  %v9579_v55 = vld [vmem:[#allocation161_spill] sm:$0xff] }
 0x46e   : > { %v4107_v62 = vunpack.c.l.bf16 %v3979_v16  ;;  %v3789_v56 = vunpack.c.l.bf16 %v3725_v26  ;;  %v3084_v30 = vpack.c.bf16 %v3020_v7, %v3020_v7  ;;  %v3085_v37 = vpack.c.bf16 %v3021_v61, %v3021_v61 }
 0x46f   : > { %v4170_v10 = vadd.f32 %v4106_v13, %v4042_v47  ;;  %v3182_v19 = vpack.c.bf16 %v3118_v27, %v3118_v27  ;;  %v3212_v54 = vpack.c.bf16 %v3148_v41, %v3148_v41  ;;  %v4391_v53 = vpack.c.bf16 %v8603_v24, %v8600_v33  ;;  %4534 = vmatmul.bf16.gmra.mxu2 %v4390_v42  ;;  %v9578_v13 = vld [vmem:[#allocation162_spill] sm:$0xff] }
 0x470   : > { %v4171_v25 = vadd.f32 %v4107_v62, %v4043_v36  ;;  %v3213_v21 = vpack.c.bf16 %v3149_v43, %v3149_v43  ;;  %v3852_v23 = vunpack.c.l.bf16 %v3084_v30  ;;  %v3853_v5 = vunpack.c.l.bf16 %v3085_v37  ;;  %v9580_v42 = vld [vmem:[#allocation174_spill] sm:$0xff]  ;;  %v9581_v30 = vld [vmem:[#allocation157_spill] sm:$0xff] }
 0x471   : > { %v4234_v59 = vpack.c.bf16 %v4170_v10, %v4170_v10  ;;  %v3183_v15 = vpack.c.bf16 %v3119_v14, %v3119_v14  ;;  %v3950_v44 = vpack.c.bf16 %v9574_v35, %v9574_v35  ;;  %v3951_v12 = vpack.c.bf16 %v9575_v29, %v9575_v29  ;;  %v9584_v35 = vld [vmem:[#allocation49_spill] sm:$0xff] }
 0x472   : > { %v4235_v8 = vpack.c.bf16 %v4171_v25, %v4171_v25  ;;  %v2707_v46 = vpack.c.bf16 %v8587_v20, %v8587_v20  ;;  %v3916_v17 = vmul.f32 %v3852_v23, %v3788_v4  ;;  %v3917_v2 = vmul.f32 %v3853_v5, %v3789_v56  ;;  %v4572_v49 = vpop.f32.mrf.mxu3  ;;  %v4495_v4 = vpop.f32.mrf.mxu2  ;;  %v9583_v5 = vld [vmem:[#allocation152_spill] sm:$0xff] }
 0x473   : > { %v4304_v40 = vunpack.c.l.bf16 %v4234_v59  ;;  %v4014_v51 = vunpack.c.l.bf16 %v3182_v19  ;;  %v5067_v27 = vpack.c.bf16 %v4492_v22, %v4490_v38  ;;  %v4044_v14 = vunpack.c.l.bf16 %v3212_v54  ;;  %v9582_v19 = vld [vmem:[#allocation155_spill] sm:$0xff] }
 0x474   : > { %v4305_v58 = vunpack.c.l.bf16 %v4235_v8  ;;  %v3980_v31 = vpack.c.bf16 %v3916_v17, %v3916_v17  ;;  %v3981_v63 = vpack.c.bf16 %v3917_v2, %v3917_v2  ;;  %v4045_v18 = vunpack.c.l.bf16 %v3213_v21 }
 0x475   : > { %v4368_v60 = vmul.f32 %v4304_v40, %v8209_v34  ;;  %v4015_v39 = vunpack.c.l.bf16 %v3183_v15  ;;  %5219 = vst [vmem:[%s5934_s22 + $0x8] sm:$0xff] %v5067_v27   ;;  %v4078_v45 = vunpack.c.l.bf16 %v3950_v44  ;;  %v4079_v41 = vunpack.c.l.bf16 %v3951_v12 }
 0x476   : > { %v4369_v1 = vmul.f32 %v4305_v58, %v8209_v34  ;;  %v8619_v20 = vunpack.c.l.bf16 %v2897_v57  ;;  %v2898_v48 = vpack.c.bf16 %v8581_v9, %v8581_v9  ;;  %v4108_v26 = vunpack.c.l.bf16 %v3980_v31 }
 0x477   : > { %v4109_v38 = vunpack.c.l.bf16 %v3981_v63  ;;  %v2771_v32 = vunpack.c.l.bf16 %v2707_v46  ;;  %v4142_v16 = vadd.f32 %v4078_v45, %v4014_v51  ;;  %v4143_v36 = vadd.f32 %v4079_v41, %v4015_v39  ;;  %v9586_v41 = vld [vmem:[#allocation78_spill] sm:$0xff] }
 0x478   : > { %v4406_v47 = vpack.c.bf16 %v4369_v1, %v4368_v60  ;;  %v3284_v52 = vmul.f32 %v9576_v3, %v9576_v3  ;;  %v3120_v0 = vmul.f32 0.5, %v9577_v6  ;;  %v4172_v57 = vadd.f32 %v4108_v26, %v4044_v14  ;;  %v9585_v1 = vld [vmem:[#allocation177_spill] sm:$0xff] }
 0x479   : > { %v4173_v43 = vadd.f32 %v4109_v38, %v4045_v18  ;;  %v3726_v9 = vpack.c.bf16 %v9578_v13, %v9578_v13  ;;  %v3727_v7 = vpack.c.bf16 %v9579_v55, %v9579_v55  ;;  %v4206_v28 = vpack.c.bf16 %v4142_v16, %v4142_v16 }
 0x47a   : > { %v4207_v50 = vpack.c.bf16 %v4143_v36, %v4143_v36  ;;  %v3121_v61 = vmul.f32 0.5, %v9580_v42  ;;  %v5147_v62 = vpack.c.bf16 %v4572_v49, %v4570_v11  ;;  %v4236_v56 = vpack.c.bf16 %v4172_v57, %v4172_v57  ;;  %4614 = vmatmul.bf16.gmra.mxu3 %v4406_v47  ;;  %v4575_v26 = vpop.f32.mrf.mxu3  ;;  %v9587_v47 = vld [vmem:[#allocation158_spill] sm:$0xff]  ;;  %v4497_v36 = vpop.f32.mrf.mxu2  ;;  %v9588_v57 = vld [vmem:[#allocation163_spill] sm:$0xff] }
 0x47b   : > { %v4237_v10 = vpack.c.bf16 %v4173_v43, %v4173_v43  ;;  %v3150_v37 = vmul.f32 0.5, %v9581_v30  ;;  %v3151_v54 = vmul.f32 0.5, %v9582_v19  ;;  %v4276_v25 = vunpack.c.l.bf16 %v4206_v28  ;;  %v9589_v43 = vld [vmem:[#allocation130_spill] sm:$0xff] }
 0x47c   : > { %v4277_v21 = vunpack.c.l.bf16 %v4207_v50  ;;  %5235 = vst [vmem:[%s5934_s22 + $0x88] sm:$0xff] %v5147_v62   ;;  %v4306_v59 = vunpack.c.l.bf16 %v4236_v56  ;;  %v3022_v15 = vmul.f32 0.796875, %v9583_v5  ;;  %v3023_v44 = vmul.f32 0.796875, %v9584_v35 }
 0x47d   : > { %v4307_v23 = vunpack.c.l.bf16 %v4237_v10  ;;  %v3790_v29 = vunpack.c.l.bf16 %v3726_v9  ;;  %v3791_v12 = vunpack.c.l.bf16 %v3727_v7  ;;  %v8640_v8 = vmul.f32 %v4276_v25, %v8209_v34 }
 0x47e   : > { %v8643_v11 = vmul.f32 %v4277_v21, %v8209_v34  ;;  %v8646_v46 = vmul.f32 %v4306_v59, %v8209_v34  ;;  %v3086_v40 = vpack.c.bf16 %v3022_v15, %v3022_v15  ;;  %v3087_v17 = vpack.c.bf16 %v3023_v44, %v3023_v44  ;;  %v9590_v21 = vld [vmem:[#allocation167_spill] sm:$0xff]  ;;  %v9592_v44 = vld [vmem:[#allocation153_spill] sm:$0xff] }
 0x47f   : > { %v8649_v22 = vmul.f32 %v4307_v23, %v8209_v34  ;;  %v8651_v2 = vunpack.c.l.bf16 %v2898_v48  ;;  %v3348_v51 = vpack.c.bf16 %v3284_v52, %v3284_v52  ;;  %v3214_v27 = vpack.c.bf16 %v3150_v37, %v3150_v37  ;;  %4539 = vmatmul.bf16.gmra.mxu2 %v4391_v53  ;;  %v9591_v15 = vld [vmem:[#allocation159_spill] sm:$0xff] }
 0x480   : > { %v4392_v58 = vpack.c.bf16 %v8643_v11, %v8640_v8  ;;  %v3215_v14 = vpack.c.bf16 %v3151_v54, %v3151_v54  ;;  %v3854_v31 = vunpack.c.l.bf16 %v3086_v40  ;;  %v3855_v63 = vunpack.c.l.bf16 %v3087_v17  ;;  %v9593_v40 = vld [vmem:[#allocation168_spill] sm:$0xff]  ;;  %v9604_v11 = vld [vmem:[#allocation170_spill] sm:$0xff] }
 0x481   : > { %v4407_v60 = vpack.c.bf16 %v8649_v22, %v8646_v46  ;;  %v3184_v18 = vpack.c.bf16 %v3120_v0, %v3120_v0  ;;  %v3185_v39 = vpack.c.bf16 %v3121_v61, %v3121_v61  ;;  %v3952_v45 = vpack.c.bf16 %v9585_v1, %v9585_v1 }
 0x482   : > { %v3953_v48 = vpack.c.bf16 %v9586_v41, %v9586_v41  ;;  %v8661_v38 = vadd.f32 1.0, %v2771_v32  ;;  %v2644_v16 = vmul.f32 0.13378906, %v9587_v47  ;;  %v3918_v3 = vmul.f32 %v3854_v31, %v3790_v29  ;;  %v4500_v24 = vpop.f32.mrf.mxu2  ;;  %v9595_v31 = vld [vmem:[#allocation160_spill] sm:$0xff]  ;;  %v9596_v41 = vld [vmem:[#allocation66_spill] sm:$0xff] }
 0x483   : > { %v3919_v52 = vmul.f32 %v3855_v63, %v3791_v12  ;;  %v8664_v6 = vunpack.c.l.bf16 %v3348_v51  ;;  %v8667_v0 = vmul.f32 0.13378906, %v9588_v57  ;;  %v3285_v13 = vmul.f32 %v9589_v43, %v9589_v43  ;;  %v4577_v12 = vpop.f32.mrf.mxu3 }
 0x484   : > { %v5072_v9 = vpack.c.bf16 %v4497_v36, %v4495_v4  ;;  %v3982_v55 = vpack.c.bf16 %v3918_v3, %v3918_v3  ;;  %v4046_v49 = vunpack.c.l.bf16 %v3214_v27  ;;  %v4047_v28 = vunpack.c.l.bf16 %v3215_v14  ;;  %v9594_v27 = vld [vmem:[#allocation69_spill] sm:$0xff] }
 0x485   : > { %v3983_v7 = vpack.c.bf16 %v3919_v52, %v3919_v52  ;;  %v4016_v32 = vunpack.c.l.bf16 %v3184_v18  ;;  %v4017_v50 = vunpack.c.l.bf16 %v3185_v39  ;;  %v4080_v42 = vunpack.c.l.bf16 %v3952_v45 }
 0x486   : > { %5220 = vst [vmem:[%s5934_s22 + $0x10] sm:$0xff] %v5072_v9   ;;  %v4081_v61 = vunpack.c.l.bf16 %v3953_v48  ;;  %v2899_v62 = vpack.c.bf16 %v8661_v38, %v8661_v38  ;;  %v2708_v56 = vpack.c.bf16 %v2644_v16, %v2644_v16  ;;  %v4110_v10 = vunpack.c.l.bf16 %v3982_v55 }
 0x487   : > { %v4111_v30 = vunpack.c.l.bf16 %v3983_v7  ;;  %v3476_v37 = vsub.f32 1.0, %v8664_v6  ;;  %v2709_v4 = vpack.c.bf16 %v8667_v0, %v8667_v0  ;;  %v4144_v19 = vadd.f32 %v4080_v42, %v4016_v32  ;;  %v9597_v32 = vld [vmem:[#allocation171_spill] sm:$0xff]  ;;  %v9598_v42 = vld [vmem:[#allocation172_spill] sm:$0xff] }
 0x488   : > { %v4145_v54 = vadd.f32 %v4081_v61, %v4017_v50  ;;  %v3349_v25 = vpack.c.bf16 %v3285_v13, %v3285_v13  ;;  %v3122_v59 = vmul.f32 0.5, %v9590_v21  ;;  %v4174_v23 = vadd.f32 %v4110_v10, %v4046_v49 }
 0x489   : > { %v4175_v5 = vadd.f32 %v4111_v30, %v4047_v28  ;;  %v3728_v35 = vpack.c.bf16 %v9591_v15, %v9591_v15  ;;  %v3729_v29 = vpack.c.bf16 %v9592_v44, %v9592_v44  ;;  %v4208_v46 = vpack.c.bf16 %v4144_v19, %v4144_v19 }
 0x48a   : > { %v4209_v22 = vpack.c.bf16 %v4145_v54, %v4145_v54  ;;  %v3123_v33 = vmul.f32 0.5, %v9593_v40  ;;  %v5152_v53 = vpack.c.bf16 %v4577_v12, %v4575_v26  ;;  %v4238_v17 = vpack.c.bf16 %v4174_v23, %v4174_v23  ;;  %4619 = vmatmul.bf16.gmra.mxu3 %v4407_v60  ;;  %v4502_v19 = vpop.f32.mrf.mxu2 }
 0x48b   : > { %v4239_v51 = vpack.c.bf16 %v4175_v5, %v4175_v5  ;;  %v3152_v14 = vmul.f32 0.5, %v9594_v27  ;;  %v3153_v63 = vmul.f32 0.5, %v9595_v31  ;;  %v4278_v18 = vunpack.c.l.bf16 %v4208_v46 }
 0x48c   : > { %v4279_v39 = vunpack.c.l.bf16 %v4209_v22  ;;  %5236 = vst [vmem:[%s5934_s22 + $0x90] sm:$0xff] %v5152_v53   ;;  %v4308_v1 = vunpack.c.l.bf16 %v4238_v17  ;;  %v3024_v48 = vmul.f32 0.796875, %v9596_v41  ;;  %v3025_v38 = vmul.f32 0.796875, %v8619_v20  ;;  %v9599_v17 = vld [vmem:[#allocation165_spill] sm:$0xff] }
 0x48d   : > { %v4309_v45 = vunpack.c.l.bf16 %v4239_v51  ;;  %v3792_v47 = vunpack.c.l.bf16 %v3728_v35  ;;  %v3793_v16 = vunpack.c.l.bf16 %v3729_v29  ;;  %v8692_v36 = vmul.f32 %v4278_v18, %v8209_v34 }
 0x48e   : > { %v8695_v26 = vmul.f32 %v4279_v39, %v8209_v34  ;;  %v8698_v3 = vmul.f32 %v4308_v1, %v8209_v34  ;;  %v3088_v6 = vpack.c.bf16 %v3024_v48, %v3024_v48  ;;  %v3089_v57 = vpack.c.bf16 %v3025_v38, %v3025_v38  ;;  %v9603_v48 = vld [vmem:[#allocation89_spill] sm:$0xff] }
 0x48f   : > { %v8701_v52 = vmul.f32 %v4309_v45, %v8209_v34  ;;  %v2772_v0 = vunpack.c.l.bf16 %v2708_v56  ;;  %v3413_v43 = vunpack.c.l.bf16 %v3349_v25  ;;  %v3216_v20 = vpack.c.bf16 %v3152_v14, %v3152_v14  ;;  %v4580_v56 = vpop.f32.mrf.mxu3  ;;  %4544 = vmatmul.bf16.gmra.mxu2 %v4392_v58  ;;  %v9600_v14 = vld [vmem:[#allocation166_spill] sm:$0xff]  ;;  %v9602_v45 = vld [vmem:[#allocation79_spill] sm:$0xff] }
 0x490   : > { %v4393_v13 = vpack.c.bf16 %v8695_v26, %v8692_v36  ;;  %v3217_v9 = vpack.c.bf16 %v3153_v63, %v3153_v63  ;;  %v3856_v7 = vunpack.c.l.bf16 %v3088_v6  ;;  %v3857_v60 = vunpack.c.l.bf16 %v3089_v57  ;;  %v9601_v63 = vld [vmem:[#allocation169_spill] sm:$0xff] }
 0x491   : > { %v4408_v55 = vpack.c.bf16 %v8701_v52, %v8698_v3  ;;  %v3186_v49 = vpack.c.bf16 %v3122_v59, %v3122_v59  ;;  %v3187_v28 = vpack.c.bf16 %v3123_v33, %v3123_v33  ;;  %v3954_v50 = vpack.c.bf16 %v9597_v32, %v9597_v32 }
 0x492   : > { %v3955_v61 = vpack.c.bf16 %v9598_v42, %v9598_v42  ;;  %v8711_v10 = vpack.c.bf16 %v3476_v37, %v3476_v37  ;;  %v2773_v30 = vunpack.c.l.bf16 %v2709_v4  ;;  %v3920_v54 = vmul.f32 %v3856_v7, %v3792_v47  ;;  %v4505_v3 = vpop.f32.mrf.mxu2 }
 0x493   : > { %v3921_v25 = vmul.f32 %v3857_v60, %v3793_v16  ;;  %v2963_v21 = vunpack.c.l.bf16 %v2899_v62  ;;  %v8713_v23 = vadd.f32 1.0, %v2772_v0  ;;  %v3477_v5 = vsub.f32 1.0, %v3413_v43  ;;  %v9605_v0 = vld [vmem:[#allocation32_spill] sm:$0xff] }
 0x494   : > { %v5077_v59 = vpack.c.bf16 %v4502_v19, %v4500_v24  ;;  %v3984_v15 = vpack.c.bf16 %v3920_v54, %v3920_v54  ;;  %v4048_v44 = vunpack.c.l.bf16 %v3216_v20  ;;  %v4049_v29 = vunpack.c.l.bf16 %v3217_v9  ;;  %v9606_v20 = vld [vmem:[#allocation70_spill] sm:$0xff] }
 0x495   : > { %v3985_v35 = vpack.c.bf16 %v3921_v25, %v3921_v25  ;;  %v4018_v12 = vunpack.c.l.bf16 %v3186_v49  ;;  %v4019_v46 = vunpack.c.l.bf16 %v3187_v28  ;;  %v4082_v22 = vunpack.c.l.bf16 %v3954_v50 }
 0x496   : > { %5221 = vst [vmem:[%s5934_s22 + $0x18] sm:$0xff] %v5077_v59   ;;  %v4083_v40 = vunpack.c.l.bf16 %v3955_v61  ;;  %v3604_v37 = vunpack.c.l.bf16 %v8711_v10  ;;  %v8717_v4 = vadd.f32 1.0, %v2773_v30  ;;  %v4112_v33 = vunpack.c.l.bf16 %v3984_v15 }
 0x497   : > { %v4113_v53 = vunpack.c.l.bf16 %v3985_v35  ;;  %v8719_v62 = vpack.c.bf16 %v3477_v5, %v3477_v5  ;;  %v3124_v51 = vmul.f32 0.5, %v9599_v17  ;;  %v4146_v24 = vadd.f32 %v4082_v22, %v4018_v12  ;;  %v4582_v47 = vpop.f32.mrf.mxu3 }
 0x498   : > { %v4147_v27 = vadd.f32 %v4083_v40, %v4019_v46  ;;  %v3125_v31 = vmul.f32 0.5, %v9600_v14  ;;  %v3956_v18 = vpack.c.bf16 %v9601_v63, %v9601_v63  ;;  %v4176_v39 = vadd.f32 %v4112_v33, %v4048_v44 }
 0x499   : > { %v4177_v1 = vadd.f32 %v4113_v53, %v4049_v29  ;;  %v3730_v41 = vpack.c.bf16 %v9602_v45, %v9602_v45  ;;  %v3731_v38 = vpack.c.bf16 %v9603_v48, %v9603_v48  ;;  %v4210_v16 = vpack.c.bf16 %v4146_v24, %v4146_v24  ;;  %v9607_v24 = vld [vmem:[#allocation164_spill] sm:$0xff]  ;;  %v9608_v45 = vld [vmem:[#allocation83_spill] sm:$0xff] }
 0x49a   : > { %v4211_v8 = vpack.c.bf16 %v4147_v27, %v4147_v27  ;;  %v3957_v58 = vpack.c.bf16 %v9604_v11, %v9604_v11  ;;  %v5157_v52 = vpack.c.bf16 %v4582_v47, %v4580_v56  ;;  %v4240_v6 = vpack.c.bf16 %v4176_v39, %v4176_v39  ;;  %4624 = vmatmul.bf16.gmra.mxu3 %v4408_v55  ;;  %v4507_v53 = vpop.f32.mrf.mxu2 }
 0x49b   : > { %v4241_v57 = vpack.c.bf16 %v4177_v1, %v4177_v1  ;;  %v3154_v43 = vmul.f32 0.5, %v9605_v0  ;;  %v3155_v9 = vmul.f32 0.5, %v9606_v20  ;;  %v4280_v7 = vunpack.c.l.bf16 %v4210_v16 }
 0x49c   : > { %v4281_v60 = vunpack.c.l.bf16 %v4211_v8  ;;  %5237 = vst [vmem:[%s5934_s22 + $0x98] sm:$0xff] %v5157_v52   ;;  %v4310_v49 = vunpack.c.l.bf16 %v4240_v6  ;;  %v3026_v32 = vmul.f32 0.796875, %v8651_v2  ;;  %v3027_v50 = vmul.f32 0.796875, %v2963_v21 }
 0x49d   : > { %v4311_v28 = vunpack.c.l.bf16 %v4241_v57  ;;  %v3794_v42 = vunpack.c.l.bf16 %v3730_v41  ;;  %v3795_v61 = vunpack.c.l.bf16 %v3731_v38  ;;  %v8739_v10 = vmul.f32 %v4280_v7, %v8209_v34 }
 0x49e   : > { %v8742_v56 = vmul.f32 %v4281_v60, %v8209_v34  ;;  %v8745_v30 = vmul.f32 %v4310_v49, %v8209_v34  ;;  %v3090_v54 = vpack.c.bf16 %v3026_v32, %v3026_v32  ;;  %v3091_v25 = vpack.c.bf16 %v3027_v50, %v3027_v50 }
 0x49f   : > { %v4375_v19 = vmul.f32 %v4311_v28, %v8209_v34  ;;  %v3188_v5 = vpack.c.bf16 %v3124_v51, %v3124_v51  ;;  %v3189_v59 = vpack.c.bf16 %v3125_v31, %v3125_v31  ;;  %v3218_v2 = vpack.c.bf16 %v3154_v43, %v3154_v43  ;;  %v4585_v22 = vpop.f32.mrf.mxu3  ;;  %4549 = vmatmul.bf16.gmra.mxu2 %v4393_v13 }
 0x4a0   : > { %v4394_v21 = vpack.c.bf16 %v8742_v56, %v8739_v10  ;;  %v3219_v15 = vpack.c.bf16 %v3155_v9, %v3155_v9  ;;  %v3858_v44 = vunpack.c.l.bf16 %v3090_v54  ;;  %v3859_v29 = vunpack.c.l.bf16 %v3091_v25 }
 0x4a1   : > { %v4409_v35 = vpack.c.bf16 %v4375_v19, %v8745_v30  ;;  %v3605_v55 = vunpack.c.l.bf16 %v8719_v62  ;;  %v4084_v12 = vunpack.c.l.bf16 %v3956_v18  ;;  %v4085_v46 = vunpack.c.l.bf16 %v3957_v58  ;;  %v9610_v19 = vld [vmem:[#allocation96_spill] sm:$0xff] }
 0x4a2   : > { %v2900_v40 = vpack.c.bf16 %v8713_v23, %v8713_v23  ;;  %v2901_v33 = vpack.c.bf16 %v8717_v4, %v8717_v4  ;;  %v3922_v17 = vmul.f32 %v3858_v44, %v3794_v42  ;;  %v3923_v51 = vmul.f32 %v3859_v29, %v3795_v61  ;;  %v4510_v43 = vpop.f32.mrf.mxu2  ;;  %v9609_v61 = vld [vmem:[#allocation92_spill] sm:$0xff] }
 0x4a3   : > { %v3668_v27 = vmul.f32 %v3604_v37, %v9607_v24  ;;  %v4020_v14 = vunpack.c.l.bf16 %v3188_v5  ;;  %v4021_v31 = vunpack.c.l.bf16 %v3189_v59  ;;  %v5082_v63 = vpack.c.bf16 %v4507_v53, %v4505_v3 }
 0x4a4   : > { %v3986_v39 = vpack.c.bf16 %v3922_v17, %v3922_v17  ;;  %v3987_v62 = vpack.c.bf16 %v3923_v51, %v3923_v51  ;;  %v4050_v18 = vunpack.c.l.bf16 %v3218_v2  ;;  %v4051_v1 = vunpack.c.l.bf16 %v3219_v15 }
 0x4a5   : > { %v3669_v41 = vmul.f32 %v3605_v55, %v9608_v45  ;;  %5222 = vst [vmem:[%s5934_s22 + $0x20] sm:$0xff] %v5082_v63   ;;  %v4148_v48 = vadd.f32 %v4084_v12, %v4020_v14  ;;  %v4149_v23 = vadd.f32 %v4085_v46, %v4021_v31  ;;  %v3732_v4 = vpack.c.bf16 %v3668_v27, %v3668_v27 }
 0x4a6   : > { %v4114_v38 = vunpack.c.l.bf16 %v3986_v39  ;;  %v4115_v47 = vunpack.c.l.bf16 %v3987_v62  ;;  %v2964_v8 = vunpack.c.l.bf16 %v2900_v40  ;;  %v2965_v11 = vunpack.c.l.bf16 %v2901_v33 }
 0x4a7   : > { %v4212_v37 = vpack.c.bf16 %v4148_v48, %v4148_v48  ;;  %v4213_v16 = vpack.c.bf16 %v4149_v23, %v4149_v23  ;;  %v3733_v52 = vpack.c.bf16 %v3669_v41, %v3669_v41  ;;  %v4587_v6 = vpop.f32.mrf.mxu3  ;;  %v3796_v60 = vunpack.c.l.bf16 %v3732_v4 }
 0x4a8   : > { %v4178_v58 = vadd.f32 %v4114_v38, %v4050_v18  ;;  %v4179_v3 = vadd.f32 %v4115_v47, %v4051_v1  ;;  %v5162_v20 = vpack.c.bf16 %v4587_v6, %v4585_v22  ;;  %v3028_v28 = vmul.f32 0.796875, %v2964_v8 }
 0x4a9   : > { %v4282_v57 = vunpack.c.l.bf16 %v4212_v37  ;;  %v4283_v0 = vunpack.c.l.bf16 %v4213_v16  ;;  %v3029_v32 = vmul.f32 0.796875, %v2965_v11  ;;  %v3797_v50 = vunpack.c.l.bf16 %v3733_v52 }
 0x4aa   : > { %v4242_v9 = vpack.c.bf16 %v4178_v58, %v4178_v58  ;;  %v4243_v7 = vpack.c.bf16 %v4179_v3, %v4179_v3  ;;  %5238 = vst [vmem:[%s5934_s22 + $0xa0] sm:$0xff] %v5162_v20   ;;  %v3156_v30 = vmul.f32 0.5, %v9609_v61  ;;  %v3157_v54 = vmul.f32 0.5, %v9610_v19  ;;  %4629 = vmatmul.bf16.gmra.mxu3 %v4409_v35  ;;  %v4512_v22 = vpop.f32.mrf.mxu2 }
 0x4ab   : > { %v4346_v49 = vmul.f32 %v4282_v57, %v8209_v34  ;;  %v4347_v36 = vmul.f32 %v4283_v0, %v8209_v34  ;;  %v3092_v59 = vpack.c.bf16 %v3028_v28, %v3028_v28  ;;  %v3093_v2 = vpack.c.bf16 %v3029_v32, %v3029_v32 }
 0x4ac   : > { %v4312_v26 = vunpack.c.l.bf16 %v4242_v9  ;;  %v4313_v13 = vunpack.c.l.bf16 %v4243_v7  ;;  %v3220_v15 = vpack.c.bf16 %v3156_v30, %v3156_v30  ;;  %v3221_v29 = vpack.c.bf16 %v3157_v54, %v3157_v54 }
 0x4ad   : > { %v4395_v42 = vpack.c.bf16 %v4347_v36, %v4346_v49  ;;  %v3860_v55 = vunpack.c.l.bf16 %v3092_v59  ;;  %v3861_v12 = vunpack.c.l.bf16 %v3093_v2  ;;  %v5087_v53 = vpack.c.bf16 %v4512_v22, %v4510_v43 }
 0x4ae   : > { %v4376_v25 = vmul.f32 %v4312_v26, %v8209_v34  ;;  %v4377_v5 = vmul.f32 %v4313_v13, %v8209_v34  ;;  %v4052_v51 = vunpack.c.l.bf16 %v3220_v15  ;;  %v4053_v24 = vunpack.c.l.bf16 %v3221_v29 }
 0x4af   : > { %v4590_v46 = vpop.f32.mrf.mxu3  ;;  %v3924_v40 = vmul.f32 %v3860_v55, %v3796_v60  ;;  %v3925_v33 = vmul.f32 %v3861_v12, %v3797_v50  ;;  %5223 = vst [vmem:[%s5934_s22 + $0x28] sm:$0xff] %v5087_v53   ;;  %4554 = vmatmul.bf16.gmra.mxu2 %v4394_v21 }
 0x4b0   : > { %v4410_v44 = vpack.c.bf16 %v4377_v5, %v4376_v25 }
 0x4b1   : > { %v3988_v17 = vpack.c.bf16 %v3924_v40, %v3924_v40  ;;  %v3989_v35 = vpack.c.bf16 %v3925_v33, %v3925_v33 }
 0x4b2   : > { %v4515_v62 = vpop.f32.mrf.mxu2 }
 0x4b3   : > { %v4116_v27 = vunpack.c.l.bf16 %v3988_v17  ;;  %v4117_v14 = vunpack.c.l.bf16 %v3989_v35 }
 0x4b5   : > { %v4180_v31 = vadd.f32 %v4116_v27, %v4052_v51  ;;  %v4181_v63 = vadd.f32 %v4117_v14, %v4053_v24 }
 0x4b7   : > { %v4592_v39 = vpop.f32.mrf.mxu3  ;;  %v4244_v1 = vpack.c.bf16 %v4180_v31, %v4180_v31  ;;  %v4245_v45 = vpack.c.bf16 %v4181_v63, %v4181_v63 }
 0x4b8   : > { %v5167_v18 = vpack.c.bf16 %v4592_v39, %v4590_v46 }
 0x4b9   : > { %v4314_v41 = vunpack.c.l.bf16 %v4244_v1  ;;  %v4315_v48 = vunpack.c.l.bf16 %v4245_v45 }
 0x4ba   : > { %5239 = vst [vmem:[%s5934_s22 + $0xa8] sm:$0xff] %v5167_v18   ;;  %4634 = vmatmul.bf16.gmra.mxu3 %v4410_v44  ;;  %v4517_v21 = vpop.f32.mrf.mxu2 }
 0x4bb   : > { %v4378_v23 = vmul.f32 %v4314_v41, %v8209_v34  ;;  %v4379_v38 = vmul.f32 %v4315_v48, %v8209_v34  ;;  %v5092_v47 = vpack.c.bf16 %v4517_v21, %v4515_v62 }
 0x4bd   : > { %v4411_v10 = vpack.c.bf16 %v4379_v38, %v4378_v23  ;;  %5224 = vst [vmem:[%s5934_s22 + $0x30] sm:$0xff] %v5092_v47  }
 0x4bf   : > { %v4595_v56 = vpop.f32.mrf.mxu3  ;;  %4559 = vmatmul.bf16.gmra.mxu2 %v4395_v42 }
 0x4c2   : > { %v4520_v37 = vpop.f32.mrf.mxu2 }
 0x4c7   : > { %v4597_v4 = vpop.f32.mrf.mxu3 }
 0x4c8   : > { %v5172_v16 = vpack.c.bf16 %v4597_v4, %v4595_v56 }
 0x4ca   : > { %5240 = vst [vmem:[%s5934_s22 + $0xb0] sm:$0xff] %v5172_v16   ;;  %4639 = vmatmul.bf16.gmra.mxu3 %v4411_v10  ;;  %v4522_v11 = vpop.f32.mrf.mxu2 }
 0x4cb   : > { %v5097_v58 = vpack.c.bf16 %v4522_v11, %v4520_v37 }
 0x4cd   : > { %5225 = vst [vmem:[%s5934_s22 + $0x38] sm:$0xff] %v5097_v58  }
 0x4cf   : > { %v4600_v8 = vpop.f32.mrf.mxu3 }
 0x4d2   : > { %v4525_v34 = vpop.f32.mrf.mxu2 }
 0x4d7   : > { %v4602_v3 = vpop.f32.mrf.mxu3 }
 0x4d8   : > { %v5177_v52 = vpack.c.bf16 %v4602_v3, %v4600_v8 }
 0x4da   : > { %5241 = vst [vmem:[%s5934_s22 + $0xb8] sm:$0xff] %v5177_v52   ;;  %v4527_v57 = vpop.f32.mrf.mxu2 }
 0x4db   : > { %v5102_v0 = vpack.c.bf16 %v4527_v57, %v4525_v34 }
 0x4dd   : > { %5226 = vst [vmem:[%s5934_s22 + $0x40] sm:$0xff] %v5102_v0  }
 0x4df   : > { %v4605_v6 = vpop.f32.mrf.mxu3 }
 0x4e2   : > { %v4530_v20 = vpop.f32.mrf.mxu2 }
 0x4e7   : > { %v4607_v43 = vpop.f32.mrf.mxu3 }
 0x4e8   : > { %v5182_v9 = vpack.c.bf16 %v4607_v43, %v4605_v6 }
 0x4ea   : > { %5242 = vst [vmem:[%s5934_s22 + $0xc0] sm:$0xff] %v5182_v9   ;;  %v4532_v60 = vpop.f32.mrf.mxu2 }
 0x4eb   : > { %v5107_v49 = vpack.c.bf16 %v4532_v60, %v4530_v20 }
 0x4ed   : > { %5227 = vst [vmem:[%s5934_s22 + $0x48] sm:$0xff] %v5107_v49  }
 0x4ef   : > { %v4610_v7 = vpop.f32.mrf.mxu3 }
 0x4f2   : > { %v4535_v26 = vpop.f32.mrf.mxu2 }
 0x4f7   : > { %v4612_v36 = vpop.f32.mrf.mxu3 }
 0x4f8   : > { %v5187_v13 = vpack.c.bf16 %v4612_v36, %v4610_v7 }
 0x4fa   : > { %5243 = vst [vmem:[%s5934_s22 + $0xc8] sm:$0xff] %v5187_v13   ;;  %v4537_v32 = vpop.f32.mrf.mxu2 }
 0x4fb   : > { %v5112_v50 = vpack.c.bf16 %v4537_v32, %v4535_v26 }
 0x4fd   : > { %5228 = vst [vmem:[%s5934_s22 + $0x50] sm:$0xff] %v5112_v50  }
 0x4ff   : > { %v4615_v28 = vpop.f32.mrf.mxu3 }
 0x502   : > { %v4540_v61 = vpop.f32.mrf.mxu2 }
 0x507   : > { %v4617_v42 = vpop.f32.mrf.mxu3 }
 0x508   : > { %v5192_v30 = vpack.c.bf16 %v4617_v42, %v4615_v28 }
 0x50a   : > { %5244 = vst [vmem:[%s5934_s22 + $0xd0] sm:$0xff] %v5192_v30   ;;  %v4542_v54 = vpop.f32.mrf.mxu2 }
 0x50b   : > { %v5117_v25 = vpack.c.bf16 %v4542_v54, %v4540_v61 }
 0x50d   : > { %5229 = vst [vmem:[%s5934_s22 + $0x58] sm:$0xff] %v5117_v25  }
 0x50f   : > { %v4620_v19 = vpop.f32.mrf.mxu3 }
 0x512   : > { %v4545_v59 = vpop.f32.mrf.mxu2 }
 0x517   : > { %v4622_v5 = vpop.f32.mrf.mxu3 }
 0x518   : > { %v5197_v2 = vpack.c.bf16 %v4622_v5, %v4620_v19 }
 0x51a   : > { %5245 = vst [vmem:[%s5934_s22 + $0xd8] sm:$0xff] %v5197_v2   ;;  %v4547_v44 = vpop.f32.mrf.mxu2 }
 0x51b   : > { %v5122_v29 = vpack.c.bf16 %v4547_v44, %v4545_v59 }
 0x51d   : > { %5230 = vst [vmem:[%s5934_s22 + $0x60] sm:$0xff] %v5122_v29  }
 0x51f   : > { %v4625_v15 = vpop.f32.mrf.mxu3 }
 0x522   : > { %v4550_v12 = vpop.f32.mrf.mxu2 }
 0x527   : > { %v4627_v55 = vpop.f32.mrf.mxu3 }
 0x528   : > { %v5202_v46 = vpack.c.bf16 %v4627_v55, %v4625_v15 }
 0x52a   : > { %5246 = vst [vmem:[%s5934_s22 + $0xe0] sm:$0xff] %v5202_v46   ;;  %v4552_v40 = vpop.f32.mrf.mxu2 }
 0x52b   : > { %v5127_v33 = vpack.c.bf16 %v4552_v40, %v4550_v12 }
 0x52d   : > { %5231 = vst [vmem:[%s5934_s22 + $0x68] sm:$0xff] %v5127_v33  }
 0x52f   : > { %v4630_v22 = vpop.f32.mrf.mxu3 }
 0x532   : > { %v4555_v17 = vpop.f32.mrf.mxu2 }
 0x537   : > { %v4632_v53 = vpop.f32.mrf.mxu3 }
 0x538   : > { %v5207_v35 = vpack.c.bf16 %v4632_v53, %v4630_v22 }
 0x53a   : > { %5247 = vst [vmem:[%s5934_s22 + $0xe8] sm:$0xff] %v5207_v35   ;;  %v4557_v24 = vpop.f32.mrf.mxu2 }
 0x53b   : > { %v5132_v27 = vpack.c.bf16 %v4557_v24, %v4555_v17 }
 0x53d   : > { %5232 = vst [vmem:[%s5934_s22 + $0x70] sm:$0xff] %v5132_v27  }
 0x53f   : > { %v4635_v51 = vpop.f32.mrf.mxu3 }
 0x542   : > { %v4560_v31 = vpop.f32.mrf.mxu2 }
 0x547   : > { %v4637_v14 = vpop.f32.mrf.mxu3 }
 0x548   : > { %v5212_v63 = vpack.c.bf16 %v4637_v14, %v4635_v51 }
 0x54a   : > { %5248 = vst [vmem:[%s5934_s22 + $0xf0] sm:$0xff] %v5212_v63   ;;  %v4562_v62 = vpop.f32.mrf.mxu2 }
 0x54b   : > { %v5137_v18 = vpack.c.bf16 %v4562_v62, %v4560_v31 }
 0x54d   : > { %5233 = vst [vmem:[%s5934_s22 + $0x78] sm:$0xff] %v5137_v18  }
 0x54f   : > { %v4640_v39 = vpop.f32.mrf.mxu3 }
 0x557   : > { %v4642_v1 = vpop.f32.mrf.mxu3 }
 0x558   : > { %v5217_v45 = vpack.c.bf16 %v4642_v1, %v4640_v39 }
 0x55a   : > { %5249 = vst [vmem:[%s5934_s22 + $0xf8] sm:$0xff] %v5217_v45  }
 0x55b   : > { %5676 = shalt.err (!%p5673_p5)
}
 0x55c   : > { %s5753_s29 = smov 64   ;;  %s5754_s22 = smov 4  }
 0x55d   : > { %5280 = dma.vmem_to_hbm [thread:$0]  (%p5878_p7), %s4803_s14, 4096, %s4805_s21, %s4774_s23, %s5753_s29, %s5753_s29, %s5754_s22  }
 0x55e   : > { %5714 = dma.done.wait (%p5833_p2), [#allocation4], 128  }
 0x55f   : > { %5716 = vsyncadd (%p5833_p2), [#allocation4], 4294967168 }
 0x560 PF: > { %s9612_s12 = sld [smem:[#allocation19_spill]]  ;;  %s4824_s0 = sand.u32 1, %s5723_s24  }
 0x561   : > { %p5299_p9 = pnand %p4955_p11, %p5844_p6  ;;  %s4825_s16 = scalar_lea.sflag [#allocation12], %s4824_s0 }
 0x563   : > { %p5300_p10 = pneg %p5299_p9 }
 0x565   : > { %5718 = dma.done.wait (%p5300_p10), %s4825_s16, 4096  }
 0x566   : > { %5720 = vsyncadd (%p5300_p10), %s4825_s16, 4294963200  ;;  %s29_s29 = sadd.s32 1, %s9612_s12   ;;  %s9613_s15 = sld [smem:[#allocation18_spill]] }
 0x567   : > { %p26_p7 = scmp.ge.s32.totalorder %s29_s29, 4   ;;  %s9614_s26 = sld [smem:[#allocation22_spill]] }
 0x568   : > { %s9615_s10 = sld [smem:[#allocation21_spill]]  ;;  %s9616_s24 = smov %s5727_s25 }
 0x569   : > { %s9618_s27 = smov %s5739_s28 }
 0x56a   :  { %28 = sbr.rel (!%p26_p7) target bundleno = 14 (0xe), region = 124 }
 0x56c   : > { %s9617_s25 = smov %s9613_s15 }
 0x56e   : > { %s9619_s28 = smov %s9615_s10 }
 0x56f   :  { %4831 = vsyncpa [#allocation3], 1 }
 0x570   :  { %4833 = vsyncpa [#allocation3 + $0x1], 1 }
 0x571   :  { %4834 = vsyncpa [#allocation6], 1 }
 0x572   :  { %4835 = vsyncpa [#allocation9], 1 }
 0x573   :  { %4837 = vsyncpa [#allocation9 + $0x1], 1 }
 0x574   :  { %4838 = vsyncpa [#allocation4], 1 }
 0x575   :  { %4840 = vsyncpa [#allocation4 + $0x1], 1 }
 0x576   :  { %4841 = vsyncpa [#allocation12], 1 }
 0x577   :  { %4843 = vsyncpa [#allocation12 + $0x1], 1 }

</bundles_post_ra>
